<compile_context>
chip_gen: v6e
topology: v6e:2x2x1
jax: 0.10.0
libtpu: 0.0.40
codegen_flags: <defaults>
</compile_context>

<pallas_src>
import functools
import math

import jax
import jax.numpy as jnp
from jax.experimental import pallas as pl
from jax.experimental.pallas import tpu as pltpu


# ----------------------------------------------------------------------------
# helpers
# ----------------------------------------------------------------------------
def _round_up(x, m):
    return (x + m - 1) // m * m


def _cpad(c):
    """Stored channel width: multiple of 128, minimum 128 (lane-dense)."""
    return max(128, _round_up(c, 128))


# ----------------------------------------------------------------------------
# Pallas kernels
# ----------------------------------------------------------------------------
def _conv_in_kernel(a_ref, b_ref, bias_ref, o_ref, *, norm, relu, eps):
    """One sample: im2col-patches @ weights (bf16 -> f32) + bias, IN, ReLU."""
    acc = jnp.dot(a_ref[...], b_ref[...], preferred_element_type=jnp.float32)
    acc = acc + bias_ref[...]
    if norm:
        inv_n = 1.0 / acc.shape[0]
        mean = jnp.sum(acc, axis=0, keepdims=True) * inv_n
        ex2 = jnp.sum(acc * acc, axis=0, keepdims=True) * inv_n
        var = jnp.maximum(ex2 - mean * mean, 0.0)
        acc = (acc - mean) * jax.lax.rsqrt(var + eps)
    if relu:
        acc = jnp.maximum(acc, 0.0)
    o_ref[...] = acc


def _conv_in_res_kernel(a_ref, b_ref, bias_ref, r_ref, o_ref, *, eps):
    """One sample: conv + IN, then residual add, then ReLU (BasicBlock tail)."""
    acc = jnp.dot(a_ref[...], b_ref[...], preferred_element_type=jnp.float32)
    acc = acc + bias_ref[...]
    inv_n = 1.0 / acc.shape[0]
    mean = jnp.sum(acc, axis=0, keepdims=True) * inv_n
    ex2 = jnp.sum(acc * acc, axis=0, keepdims=True) * inv_n
    var = jnp.maximum(ex2 - mean * mean, 0.0)
    acc = (acc - mean) * jax.lax.rsqrt(var + eps)
    o_ref[...] = jnp.maximum(acc + r_ref[...], 0.0)


def _upconv_in_relu_kernel(a_ref, b_ref, o_ref, *, cp, eps):
    """One sample: ConvTranspose(2,2) as matmul + grouped InstanceNorm + ReLU.

    Columns of the matmul output are ordered (a, b, co) with pos = a*2+b, so
    per-channel IN stats = mean over all rows and the 4 position groups.
    """
    acc = jnp.dot(a_ref[...], b_ref[...], preferred_element_type=jnp.float32)
    hw = acc.shape[0]
    gs = [acc[:, p * cp:(p + 1) * cp] for p in range(4)]
    s1 = gs[0] + gs[1] + gs[2] + gs[3]
    s2 = gs[0] * gs[0] + gs[1] * gs[1] + gs[2] * gs[2] + gs[3] * gs[3]
    inv_n = 1.0 / (4.0 * hw)
    mean = jnp.sum(s1, axis=0, keepdims=True) * inv_n
    ex2 = jnp.sum(s2, axis=0, keepdims=True) * inv_n
    inv_std = jax.lax.rsqrt(jnp.maximum(ex2 - mean * mean, 0.0) + eps)
    for p in range(4):
        o_ref[:, p * cp:(p + 1) * cp] = jnp.maximum((gs[p] - mean) * inv_std, 0.0)


def _last_conv_final_kernel(a_ref, b_ref, bias_ref, m_ref, o_ref):
    """One sample: 1x1 conv (Cout=1) + relu(out)/max(out) * (1 - mask)."""
    out = jnp.dot(a_ref[...], b_ref[...], preferred_element_type=jnp.float32)
    out = out + bias_ref[...]                       # [HW, 1]
    mx = jnp.max(out, axis=0, keepdims=True)        # per-sample max of pre-ReLU out
    # No epsilon guard: matches the PyTorch reference (plain division by max).
    inv = pl.reciprocal(mx, approx=True)
    o_ref[...] = jnp.maximum(out, 0.0) * inv * (1.0 - m_ref[...])


# ----------------------------------------------------------------------------
# JAX glue: NHWC im2col (no transposes) + fused-kernel wrappers
# ----------------------------------------------------------------------------
def _patches_nhwc(x, kh, kw, stride, padding):
    """x: [N,H,W,Cp] -> patches [N*Ho*Wo, kh*kw*Cp] (channel-minor, no transpose)."""
    N, H, W, C = x.shape
    xp = jnp.pad(x, ((0, 0), (padding, padding), (padding, padding), (0, 0)))
    Ho = (H + 2 * padding - kh) // stride + 1
    Wo = (W + 2 * padding - kw) // stride + 1
    cols = []
    for i in range(kh):
        for j in range(kw):
            cols.append(xp[:, i:i + stride * Ho:stride, j:j + stride * Wo:stride, :])
    patches = jnp.concatenate(cols, axis=-1) if len(cols) > 1 else cols[0]
    return patches.reshape(N * Ho * Wo, kh * kw * C), Ho, Wo


def conv_in(x, w2, bias=None, *, kh, kw, stride, padding,
            norm=True, relu=True, residual=None, eps=1e-5):
    """Fused Conv2d(+bias) + InstanceNorm [+ residual] [+ ReLU], NHWC.

    x:   [N, H, W, Cin_p] f32 (channel-padded)
    w2:  [kh*kw*Cin_p, Cout_p] bf16 (kernel-ready layout)
    returns [N, Ho, Wo, Cout_p] f32
    """
    N = x.shape[0]
    K, Cout_p = w2.shape
    a, Ho, Wo = _patches_nhwc(x, kh, kw, stride, padding)
    a = a.astype(jnp.bfloat16)
    HW = Ho * Wo
    M = N * HW
    if bias is None:
        bias = jnp.zeros((Cout_p,), jnp.float32)
    bias2 = bias.reshape(1, Cout_p).astype(jnp.float32)

    in_specs = [
        pl.BlockSpec((HW, K), lambda n: (n, 0)),
        pl.BlockSpec((K, Cout_p), lambda n: (0, 0)),
        pl.BlockSpec((1, Cout_p), lambda n: (0, 0)),
    ]
    args = [a, w2, bias2]
    if residual is None:
        kernel = functools.partial(_conv_in_kernel, norm=norm, relu=relu, eps=eps)
    else:
        in_specs.append(pl.BlockSpec((HW, Cout_p), lambda n: (n, 0)))
        args.append(residual.reshape(M, Cout_p).astype(jnp.float32))
        kernel = functools.partial(_conv_in_res_kernel, eps=eps)

    out = pl.pallas_call(
        kernel,
        out_shape=jax.ShapeDtypeStruct((M, Cout_p), jnp.float32),
        grid=(N,),
        in_specs=in_specs,
        out_specs=pl.BlockSpec((HW, Cout_p), lambda n: (n, 0)),
        compiler_params=pltpu.CompilerParams(dimension_semantics=("parallel",)),
    )(*args)
    return out.reshape(N, Ho, Wo, Cout_p)


def upconv_in_relu(x, w2, *, eps=1e-5):
    """Fused ConvTranspose2d(k=2, s=2, no bias) + InstanceNorm + ReLU, NHWC."""
    N, H, W, Cin_p = x.shape
    Cout_p = w2.shape[1] // 4
    HW = H * W
    a = x.reshape(N * HW, Cin_p).astype(jnp.bfloat16)
    out = pl.pallas_call(
        functools.partial(_upconv_in_relu_kernel, cp=Cout_p, eps=eps),
        out_shape=jax.ShapeDtypeStruct((N * HW, 4 * Cout_p), jnp.float32),
        grid=(N,),
        in_specs=[pl.BlockSpec((HW, Cin_p), lambda n: (n, 0)),
                  pl.BlockSpec((Cin_p, 4 * Cout_p), lambda n: (0, 0))],
        out_specs=pl.BlockSpec((HW, 4 * Cout_p), lambda n: (n, 0)),
        compiler_params=pltpu.CompilerParams(dimension_semantics=("parallel",)),
    )(a, w2)
    # pixel shuffle: column order is (a, b, co) with pos = a*2 + b
    out = out.reshape(N, H, W, 2, 2, Cout_p)
    out = out.transpose(0, 1, 3, 2, 4, 5).reshape(N, 2 * H, 2 * W, Cout_p)
    return out


def last_conv_final(x, w2, bias, mask):
    """Fused 1x1 Conv (Cout=1) + per-sample max-normalisation + (1 - mask)."""
    N, H, W, Cin_p = x.shape
    HW = H * W
    K, Cout = w2.shape                    # Cout == 1 (unpadded on purpose)
    a = x.reshape(N * HW, Cin_p).astype(jnp.bfloat16)
    m = mask.astype(jnp.float32).reshape(N * HW, 1)
    bias2 = bias.reshape(1, Cout).astype(jnp.float32)
    out = pl.pallas_call(
        _last_conv_final_kernel,
        out_shape=jax.ShapeDtypeStruct((N * HW, 1), jnp.float32),
        grid=(N,),
        in_specs=[pl.BlockSpec((HW, Cin_p), lambda n: (n, 0)),
                  pl.BlockSpec((K, Cout), lambda n: (0, 0)),
                  pl.BlockSpec((1, Cout), lambda n: (0, 0)),
                  pl.BlockSpec((HW, 1), lambda n: (n, 0))],
        out_specs=pl.BlockSpec((HW, 1), lambda n: (n, 0)),
        compiler_params=pltpu.CompilerParams(dimension_semantics=("parallel",)),
    )(a, w2, bias2, m)
    return out.reshape(N, 1, H, W)


# ----------------------------------------------------------------------------
# ResNet forward
# ----------------------------------------------------------------------------
def basic_block(x, p, stride):
    h = conv_in(x, p["w1"], kh=3, kw=3, stride=stride, padding=1, norm=True, relu=True)
    if "wsc" in p:
        sc = conv_in(x, p["wsc"], kh=1, kw=1, stride=stride, padding=0,
                     norm=True, relu=False)
    else:
        sc = x
    # conv2 + IN + residual-add + ReLU, fused
    return conv_in(h, p["w2"], kh=3, kw=3, stride=1, padding=1, residual=sc)


def _run_layer(out, layer, layer_stride):
    for bi, blk in enumerate(layer):
        s = layer_stride if bi == 0 else 1
        out = basic_block(out, blk, s)
    return out


def forward(params, x_nhwc, mask):
    """x_nhwc: [N,H,W,4] observed k-space, mask: [N,1,H,W].  Returns [N,1,H,W]."""
    N, H, W, _ = x_nhwc.shape
    mask_c = jnp.transpose(mask, (0, 2, 3, 1)).astype(jnp.float32)      # [N,H,W,1]
    x = jnp.concatenate([x_nhwc.astype(jnp.float32), mask_c], axis=-1)  # 5 channels
    x = jnp.pad(x, ((0, 0), (0, 0), (0, 0), (0, _cpad(x.shape[-1]) - x.shape[-1])))

    out = conv_in(x, params["conv1_w2"], kh=3, kw=3, stride=1, padding=1,
                  norm=True, relu=True)
    out = _run_layer(out, params["layer1"], 1)
    out = _run_layer(out, params["layer2"], 2)
    out = _run_layer(out, params["layer3"], 2)
    out = upconv_in_relu(out, params["up1_w2"])
    out = upconv_in_relu(out, params["up2_w2"])
    out = conv_in(out, params["last1_w2"], params["last1_b"],
                  kh=3, kw=3, stride=1, padding=1, norm=True, relu=True)
    return last_conv_final(out, params["last2_w2"], params["last2_b"], mask)


# ----------------------------------------------------------------------------
# Deterministic parameter init (kernel-ready, channel-padded, bf16 weights)
# ----------------------------------------------------------------------------
def init_params(key, num_blocks=(1, 1, 1)):
    keys = iter(jax.random.split(key, 64))

    def conv_w2(cout, cin, kh, kw, pad_out=True):
        fan_in = cin * kh * kw
        w = jax.random.normal(next(keys), (cout, cin, kh, kw), jnp.float32) / math.sqrt(fan_in)
        cinp = _cpad(cin)
        coutp = _cpad(cout) if pad_out else cout
        wt = jnp.transpose(w, (2, 3, 1, 0))                     # [kh, kw, cin, cout]
        wp = jnp.zeros((kh, kw, cinp, coutp), jnp.float32)
        wp = wp.at[:, :, :cin, :cout].set(wt)
        return wp.reshape(kh * kw * cinp, coutp).astype(jnp.bfloat16)

    def upconv_w2(cin, cout):
        w = jax.random.normal(next(keys), (cin, cout, 2, 2), jnp.float32) / math.sqrt(cin * 4)
        cinp, coutp = _cpad(cin), _cpad(cout)
        wt = jnp.transpose(w, (0, 2, 3, 1))                     # [cin, 2, 2, cout]
        wp = jnp.zeros((cinp, 2, 2, coutp), jnp.float32)
        wp = wp.at[:cin, :, :, :cout].set(wt)
        return wp.reshape(cinp, 4 * coutp).astype(jnp.bfloat16)  # cols = (a,b,co)

    params = {"conv1_w2": conv_w2(64, 5, 3, 3)}
    in_planes = 64

    def make_layer(planes, nblocks, stride):
        nonlocal in_planes
        layer = []
        for s in [stride] + [1] * (nblocks - 1):
            blk = {"w1": conv_w2(planes, in_planes, 3, 3),
                   "w2": conv_w2(planes, planes, 3, 3)}
            if s != 1 or in_planes != planes:
                blk["wsc"] = conv_w2(planes, in_planes, 1, 1)
            layer.append(blk)
            in_planes = planes
        return layer

    params["layer1"] = make_layer(64, num_blocks[0], 1)
    params["layer2"] = make_layer(128, num_blocks[1], 2)
    params["layer3"] = make_layer(256, num_blocks[2], 2)
    params["up1_w2"] = upconv_w2(256, 128)
    params["up2_w2"] = upconv_w2(128, 64)
    params["last1_w2"] = conv_w2(16, 64, 3, 3)
    params["last1_b"] = jnp.zeros((_cpad(16),), jnp.float32)
    params["last2_w2"] = conv_w2(1, 16, 1, 1, pad_out=False)     # [128, 1]
    params["last2_b"] = jnp.zeros((1,), jnp.float32)
    return params


# ----------------------------------------------------------------------------
if __name__ == "__main__":
    key = jax.random.PRNGKey(0)
    kp, kx, km = jax.random.split(key, 3)

    # small shapes: batch=2, spatial=16x16, 4 input channels (+1 mask channel)
    N, H, W, C = 2, 16, 16, 4
    params = init_params(kp, num_blocks=(1, 1, 1))
    x = jax.random.normal(kx, (N, H, W, C), jnp.float32)                       # NHWC
    mask = (jax.random.uniform(km, (N, 1, H, W)) < 0.25).astype(jnp.float32)   # N1HW

    fwd = jax.jit(forward)
    out = fwd(params, x, mask)
    jax.block_until_ready(out)
    assert out.shape == (N, 1, H, W) and out.dtype == jnp.float32
    print("KERNEL_OK")
</pallas_src>

<mosaic_0001>
module attributes {stable_mosaic.version = 11 : i64} {
  func.func @_conv_in_kernel(%arg0: i32, %arg1: memref<256x1152xbf16, #tpu.memory_space<vmem>>, %arg2: memref<1152x128xbf16, #tpu.memory_space<vmem>>, %arg3: memref<1x128xf32, #tpu.memory_space<vmem>>, %arg4: memref<256x128xf32, #tpu.memory_space<vmem>>) attributes {dimension_semantics = [#tpu.dimension_semantics<parallel>], iteration_bounds = array<i64: 2>, scalar_prefetch = 0 : i64, scratch_operands = 0 : i64, tpu.core_type = #tpu.core_type<tc>, window_params = [{transform_indices = @transform_0, window_bounds = array<i64: 256, 1152>}, {pipeline_mode = #tpu.pipeline_mode<synchronous>, transform_indices = @transform_1, window_bounds = array<i64: 1152, 128>}, {pipeline_mode = #tpu.pipeline_mode<synchronous>, transform_indices = @transform_2, window_bounds = array<i64: 1, 128>}, {transform_indices = @transform_3, window_bounds = array<i64: 256, 128>}]} {
    %c0 = arith.constant 0 : index
    %c0_0 = arith.constant 0 : index
    %0 = vector.load %arg1[%c0, %c0_0] : memref<256x1152xbf16, #tpu.memory_space<vmem>>, vector<256x1152xbf16>
    %c0_1 = arith.constant 0 : index
    %c0_2 = arith.constant 0 : index
    %1 = vector.load %arg2[%c0_1, %c0_2] : memref<1152x128xbf16, #tpu.memory_space<vmem>>, vector<1152x128xbf16>
    %cst = arith.constant dense<0.000000e+00> : vector<256x128xf32>
    %2 = tpu.matmul %0, %1, %cst {dimension_numbers = #tpu.dot_dimension_numbers<[1], [0], [0], [1], [0, 0, 1, 1], [], []>} : vector<256x1152xbf16>, vector<1152x128xbf16>, vector<256x128xf32> -> vector<256x128xf32>
    %c0_3 = arith.constant 0 : index
    %c0_4 = arith.constant 0 : index
    %3 = vector.load %arg3[%c0_3, %c0_4] : memref<1x128xf32, #tpu.memory_space<vmem>>, vector<1x128xf32>
    %4 = vector.broadcast %3 : vector<1x128xf32> to vector<256x128xf32>
    %5 = arith.addf %2, %4 : vector<256x128xf32>
    %cst_5 = arith.constant dense<0.000000e+00> : vector<128xf32>
    %6 = vector.multi_reduction <add>, %5, %cst_5 [0] : vector<256x128xf32> to vector<128xf32>
    %7 = vector.shape_cast %6 : vector<128xf32> to vector<1x128xf32>
    %cst_6 = arith.constant 3.906250e-03 : f32
    %8 = vector.broadcast %cst_6 : f32 to vector<1x128xf32>
    %9 = arith.mulf %7, %8 : vector<1x128xf32>
    %10 = arith.mulf %5, %5 : vector<256x128xf32>
    %cst_7 = arith.constant dense<0.000000e+00> : vector<128xf32>
    %11 = vector.multi_reduction <add>, %10, %cst_7 [0] : vector<256x128xf32> to vector<128xf32>
    %12 = vector.shape_cast %11 : vector<128xf32> to vector<1x128xf32>
    %cst_8 = arith.constant 3.906250e-03 : f32
    %13 = vector.broadcast %cst_8 : f32 to vector<1x128xf32>
    %14 = arith.mulf %12, %13 : vector<1x128xf32>
    %15 = arith.mulf %9, %9 : vector<1x128xf32>
    %16 = arith.subf %14, %15 : vector<1x128xf32>
    %cst_9 = arith.constant 0.000000e+00 : f32
    %17 = vector.broadcast %cst_9 : f32 to vector<1x128xf32>
    %18 = arith.maximumf %16, %17 : vector<1x128xf32>
    %19 = vector.broadcast %9 : vector<1x128xf32> to vector<256x128xf32>
    %20 = arith.subf %5, %19 : vector<256x128xf32>
    %cst_10 = arith.constant 9.99999974E-6 : f32
    %21 = vector.broadcast %cst_10 : f32 to vector<1x128xf32>
    %22 = arith.addf %18, %21 : vector<1x128xf32>
    %23 = math.rsqrt %22 : vector<1x128xf32>
    %24 = vector.broadcast %23 : vector<1x128xf32> to vector<256x128xf32>
    %25 = arith.mulf %20, %24 : vector<256x128xf32>
    %cst_11 = arith.constant 0.000000e+00 : f32
    %26 = vector.broadcast %cst_11 : f32 to vector<256x128xf32>
    %27 = arith.maximumf %25, %26 : vector<256x128xf32>
    %c0_12 = arith.constant 0 : index
    %c0_13 = arith.constant 0 : index
    %28 = vector.load %arg4[%c0_12, %c0_13] : memref<256x128xf32, #tpu.memory_space<vmem>>, vector<256x128xf32>
    tpu.vector_store %arg4[%c0_12, %c0_13], %27 {strides = array<i32>} : memref<256x128xf32, #tpu.memory_space<vmem>>, vector<256x128xf32>,
    return
  }
  func.func @transform_0(%arg0: i32) -> (i32, i32) {
    %c0_i32 = arith.constant 0 : i32
    %c0_i32_0 = arith.constant 0 : i32
    return %arg0, %c0_i32 : i32, i32
  }
  func.func @transform_1(%arg0: i32) -> (i32, i32) {
    %c0_i32 = arith.constant 0 : i32
    %c0_i32_0 = arith.constant 0 : i32
    %c0_i32_1 = arith.constant 0 : i32
    return %c0_i32, %c0_i32_0 : i32, i32
  }
  func.func @transform_2(%arg0: i32) -> (i32, i32) {
    %c0_i32 = arith.constant 0 : i32
    %c0_i32_0 = arith.constant 0 : i32
    %c0_i32_1 = arith.constant 0 : i32
    return %c0_i32, %c0_i32_0 : i32, i32
  }
  func.func @transform_3(%arg0: i32) -> (i32, i32) {
    %c0_i32 = arith.constant 0 : i32
    %c0_i32_0 = arith.constant 0 : i32
    return %arg0, %c0_i32 : i32, i32
  }
}

module attributes {stable_mosaic.version = 11 : i64} {
  func.func @_conv_in_res_kernel(%arg0: i32, %arg1: memref<256x1152xbf16, #tpu.memory_space<vmem>>, %arg2: memref<1152x128xbf16, #tpu.memory_space<vmem>>, %arg3: memref<1x128xf32, #tpu.memory_space<vmem>>, %arg4: memref<256x128xf32, #tpu.memory_space<vmem>>, %arg5: memref<256x128xf32, #tpu.memory_space<vmem>>) attributes {dimension_semantics = [#tpu.dimension_semantics<parallel>], iteration_bounds = array<i64: 2>, scalar_prefetch = 0 : i64, scratch_operands = 0 : i64, tpu.core_type = #tpu.core_type<tc>, window_params = [{transform_indices = @transform_0, window_bounds = array<i64: 256, 1152>}, {pipeline_mode = #tpu.pipeline_mode<synchronous>, transform_indices = @transform_1, window_bounds = array<i64: 1152, 128>}, {pipeline_mode = #tpu.pipeline_mode<synchronous>, transform_indices = @transform_2, window_bounds = array<i64: 1, 128>}, {transform_indices = @transform_3, window_bounds = array<i64: 256, 128>}, {transform_indices = @transform_4, window_bounds = array<i64: 256, 128>}]} {
    %c0 = arith.constant 0 : index
    %c0_0 = arith.constant 0 : index
    %0 = vector.load %arg1[%c0, %c0_0] : memref<256x1152xbf16, #tpu.memory_space<vmem>>, vector<256x1152xbf16>
    %c0_1 = arith.constant 0 : index
    %c0_2 = arith.constant 0 : index
    %1 = vector.load %arg2[%c0_1, %c0_2] : memref<1152x128xbf16, #tpu.memory_space<vmem>>, vector<1152x128xbf16>
    %cst = arith.constant dense<0.000000e+00> : vector<256x128xf32>
    %2 = tpu.matmul %0, %1, %cst {dimension_numbers = #tpu.dot_dimension_numbers<[1], [0], [0], [1], [0, 0, 1, 1], [], []>} : vector<256x1152xbf16>, vector<1152x128xbf16>, vector<256x128xf32> -> vector<256x128xf32>
    %c0_3 = arith.constant 0 : index
    %c0_4 = arith.constant 0 : index
    %3 = vector.load %arg3[%c0_3, %c0_4] : memref<1x128xf32, #tpu.memory_space<vmem>>, vector<1x128xf32>
    %4 = vector.broadcast %3 : vector<1x128xf32> to vector<256x128xf32>
    %5 = arith.addf %2, %4 : vector<256x128xf32>
    %cst_5 = arith.constant dense<0.000000e+00> : vector<128xf32>
    %6 = vector.multi_reduction <add>, %5, %cst_5 [0] : vector<256x128xf32> to vector<128xf32>
    %7 = vector.shape_cast %6 : vector<128xf32> to vector<1x128xf32>
    %cst_6 = arith.constant 3.906250e-03 : f32
    %8 = vector.broadcast %cst_6 : f32 to vector<1x128xf32>
    %9 = arith.mulf %7, %8 : vector<1x128xf32>
    %10 = arith.mulf %5, %5 : vector<256x128xf32>
    %cst_7 = arith.constant dense<0.000000e+00> : vector<128xf32>
    %11 = vector.multi_reduction <add>, %10, %cst_7 [0] : vector<256x128xf32> to vector<128xf32>
    %12 = vector.shape_cast %11 : vector<128xf32> to vector<1x128xf32>
    %cst_8 = arith.constant 3.906250e-03 : f32
    %13 = vector.broadcast %cst_8 : f32 to vector<1x128xf32>
    %14 = arith.mulf %12, %13 : vector<1x128xf32>
    %15 = arith.mulf %9, %9 : vector<1x128xf32>
    %16 = arith.subf %14, %15 : vector<1x128xf32>
    %cst_9 = arith.constant 0.000000e+00 : f32
    %17 = vector.broadcast %cst_9 : f32 to vector<1x128xf32>
    %18 = arith.maximumf %16, %17 : vector<1x128xf32>
    %19 = vector.broadcast %9 : vector<1x128xf32> to vector<256x128xf32>
    %20 = arith.subf %5, %19 : vector<256x128xf32>
    %cst_10 = arith.constant 9.99999974E-6 : f32
    %21 = vector.broadcast %cst_10 : f32 to vector<1x128xf32>
    %22 = arith.addf %18, %21 : vector<1x128xf32>
    %23 = math.rsqrt %22 : vector<1x128xf32>
    %24 = vector.broadcast %23 : vector<1x128xf32> to vector<256x128xf32>
    %25 = arith.mulf %20, %24 : vector<256x128xf32>
    %c0_11 = arith.constant 0 : index
    %c0_12 = arith.constant 0 : index
    %26 = vector.load %arg4[%c0_11, %c0_12] : memref<256x128xf32, #tpu.memory_space<vmem>>, vector<256x128xf32>
    %27 = arith.addf %25, %26 : vector<256x128xf32>
    %cst_13 = arith.constant 0.000000e+00 : f32
    %28 = vector.broadcast %cst_13 : f32 to vector<256x128xf32>
    %29 = arith.maximumf %27, %28 : vector<256x128xf32>
    %c0_14 = arith.constant 0 : index
    %c0_15 = arith.constant 0 : index
    %30 = vector.load %arg5[%c0_14, %c0_15] : memref<256x128xf32, #tpu.memory_space<vmem>>, vector<256x128xf32>
    tpu.vector_store %arg5[%c0_14, %c0_15], %29 {strides = array<i32>} : memref<256x128xf32, #tpu.memory_space<vmem>>, vector<256x128xf32>,
    return
  }
  func.func @transform_0(%arg0: i32) -> (i32, i32) {
    %c0_i32 = arith.constant 0 : i32
    %c0_i32_0 = arith.constant 0 : i32
    return %arg0, %c0_i32 : i32, i32
  }
  func.func @transform_1(%arg0: i32) -> (i32, i32) {
    %c0_i32 = arith.constant 0 : i32
    %c0_i32_0 = arith.constant 0 : i32
    %c0_i32_1 = arith.constant 0 : i32
    return %c0_i32, %c0_i32_0 : i32, i32
  }
  func.func @transform_2(%arg0: i32) -> (i32, i32) {
    %c0_i32 = arith.constant 0 : i32
    %c0_i32_0 = arith.constant 0 : i32
    %c0_i32_1 = arith.constant 0 : i32
    return %c0_i32, %c0_i32_0 : i32, i32
  }
  func.func @transform_3(%arg0: i32) -> (i32, i32) {
    %c0_i32 = arith.constant 0 : i32
    %c0_i32_0 = arith.constant 0 : i32
    return %arg0, %c0_i32 : i32, i32
  }
  func.func @transform_4(%arg0: i32) -> (i32, i32) {
    %c0_i32 = arith.constant 0 : i32
    %c0_i32_0 = arith.constant 0 : i32
    return %arg0, %c0_i32 : i32, i32
  }
}

module attributes {stable_mosaic.version = 11 : i64} {
  func.func @_conv_in_kernel(%arg0: i32, %arg1: memref<64x1152xbf16, #tpu.memory_space<vmem>>, %arg2: memref<1152x128xbf16, #tpu.memory_space<vmem>>, %arg3: memref<1x128xf32, #tpu.memory_space<vmem>>, %arg4: memref<64x128xf32, #tpu.memory_space<vmem>>) attributes {dimension_semantics = [#tpu.dimension_semantics<parallel>], iteration_bounds = array<i64: 2>, scalar_prefetch = 0 : i64, scratch_operands = 0 : i64, tpu.core_type = #tpu.core_type<tc>, window_params = [{transform_indices = @transform_0, window_bounds = array<i64: 64, 1152>}, {pipeline_mode = #tpu.pipeline_mode<synchronous>, transform_indices = @transform_1, window_bounds = array<i64: 1152, 128>}, {pipeline_mode = #tpu.pipeline_mode<synchronous>, transform_indices = @transform_2, window_bounds = array<i64: 1, 128>}, {transform_indices = @transform_3, window_bounds = array<i64: 64, 128>}]} {
    %c0 = arith.constant 0 : index
    %c0_0 = arith.constant 0 : index
    %0 = vector.load %arg1[%c0, %c0_0] : memref<64x1152xbf16, #tpu.memory_space<vmem>>, vector<64x1152xbf16>
    %c0_1 = arith.constant 0 : index
    %c0_2 = arith.constant 0 : index
    %1 = vector.load %arg2[%c0_1, %c0_2] : memref<1152x128xbf16, #tpu.memory_space<vmem>>, vector<1152x128xbf16>
    %cst = arith.constant dense<0.000000e+00> : vector<64x128xf32>
    %2 = tpu.matmul %0, %1, %cst {dimension_numbers = #tpu.dot_dimension_numbers<[1], [0], [0], [1], [0, 0, 1, 1], [], []>} : vector<64x1152xbf16>, vector<1152x128xbf16>, vector<64x128xf32> -> vector<64x128xf32>
    %c0_3 = arith.constant 0 : index
    %c0_4 = arith.constant 0 : index
    %3 = vector.load %arg3[%c0_3, %c0_4] : memref<1x128xf32, #tpu.memory_space<vmem>>, vector<1x128xf32>
    %4 = vector.broadcast %3 : vector<1x128xf32> to vector<64x128xf32>
    %5 = arith.addf %2, %4 : vector<64x128xf32>
    %cst_5 = arith.constant dense<0.000000e+00> : vector<128xf32>
    %6 = vector.multi_reduction <add>, %5, %cst_5 [0] : vector<64x128xf32> to vector<128xf32>
    %7 = vector.shape_cast %6 : vector<128xf32> to vector<1x128xf32>
    %cst_6 = arith.constant 1.562500e-02 : f32
    %8 = vector.broadcast %cst_6 : f32 to vector<1x128xf32>
    %9 = arith.mulf %7, %8 : vector<1x128xf32>
    %10 = arith.mulf %5, %5 : vector<64x128xf32>
    %cst_7 = arith.constant dense<0.000000e+00> : vector<128xf32>
    %11 = vector.multi_reduction <add>, %10, %cst_7 [0] : vector<64x128xf32> to vector<128xf32>
    %12 = vector.shape_cast %11 : vector<128xf32> to vector<1x128xf32>
    %cst_8 = arith.constant 1.562500e-02 : f32
    %13 = vector.broadcast %cst_8 : f32 to vector<1x128xf32>
    %14 = arith.mulf %12, %13 : vector<1x128xf32>
    %15 = arith.mulf %9, %9 : vector<1x128xf32>
    %16 = arith.subf %14, %15 : vector<1x128xf32>
    %cst_9 = arith.constant 0.000000e+00 : f32
    %17 = vector.broadcast %cst_9 : f32 to vector<1x128xf32>
    %18 = arith.maximumf %16, %17 : vector<1x128xf32>
    %19 = vector.broadcast %9 : vector<1x128xf32> to vector<64x128xf32>
    %20 = arith.subf %5, %19 : vector<64x128xf32>
    %cst_10 = arith.constant 9.99999974E-6 : f32
    %21 = vector.broadcast %cst_10 : f32 to vector<1x128xf32>
    %22 = arith.addf %18, %21 : vector<1x128xf32>
    %23 = math.rsqrt %22 : vector<1x128xf32>
    %24 = vector.broadcast %23 : vector<1x128xf32> to vector<64x128xf32>
    %25 = arith.mulf %20, %24 : vector<64x128xf32>
    %cst_11 = arith.constant 0.000000e+00 : f32
    %26 = vector.broadcast %cst_11 : f32 to vector<64x128xf32>
    %27 = arith.maximumf %25, %26 : vector<64x128xf32>
    %c0_12 = arith.constant 0 : index
    %c0_13 = arith.constant 0 : index
    %28 = vector.load %arg4[%c0_12, %c0_13] : memref<64x128xf32, #tpu.memory_space<vmem>>, vector<64x128xf32>
    tpu.vector_store %arg4[%c0_12, %c0_13], %27 {strides = array<i32>} : memref<64x128xf32, #tpu.memory_space<vmem>>, vector<64x128xf32>,
    return
  }
  func.func @transform_0(%arg0: i32) -> (i32, i32) {
    %c0_i32 = arith.constant 0 : i32
    %c0_i32_0 = arith.constant 0 : i32
    return %arg0, %c0_i32 : i32, i32
  }
  func.func @transform_1(%arg0: i32) -> (i32, i32) {
    %c0_i32 = arith.constant 0 : i32
    %c0_i32_0 = arith.constant 0 : i32
    %c0_i32_1 = arith.constant 0 : i32
    return %c0_i32, %c0_i32_0 : i32, i32
  }
  func.func @transform_2(%arg0: i32) -> (i32, i32) {
    %c0_i32 = arith.constant 0 : i32
    %c0_i32_0 = arith.constant 0 : i32
    %c0_i32_1 = arith.constant 0 : i32
    return %c0_i32, %c0_i32_0 : i32, i32
  }
  func.func @transform_3(%arg0: i32) -> (i32, i32) {
    %c0_i32 = arith.constant 0 : i32
    %c0_i32_0 = arith.constant 0 : i32
    return %arg0, %c0_i32 : i32, i32
  }
}

module attributes {stable_mosaic.version = 11 : i64} {
  func.func @_conv_in_kernel(%arg0: i32, %arg1: memref<64x128xbf16, #tpu.memory_space<vmem>>, %arg2: memref<128x128xbf16, #tpu.memory_space<vmem>>, %arg3: memref<1x128xf32, #tpu.memory_space<vmem>>, %arg4: memref<64x128xf32, #tpu.memory_space<vmem>>) attributes {dimension_semantics = [#tpu.dimension_semantics<parallel>], iteration_bounds = array<i64: 2>, scalar_prefetch = 0 : i64, scratch_operands = 0 : i64, tpu.core_type = #tpu.core_type<tc>, window_params = [{transform_indices = @transform_0, window_bounds = array<i64: 64, 128>}, {pipeline_mode = #tpu.pipeline_mode<synchronous>, transform_indices = @transform_1, window_bounds = array<i64: 128, 128>}, {pipeline_mode = #tpu.pipeline_mode<synchronous>, transform_indices = @transform_2, window_bounds = array<i64: 1, 128>}, {transform_indices = @transform_3, window_bounds = array<i64: 64, 128>}]} {
    %c0 = arith.constant 0 : index
    %c0_0 = arith.constant 0 : index
    %0 = vector.load %arg1[%c0, %c0_0] : memref<64x128xbf16, #tpu.memory_space<vmem>>, vector<64x128xbf16>
    %c0_1 = arith.constant 0 : index
    %c0_2 = arith.constant 0 : index
    %1 = vector.load %arg2[%c0_1, %c0_2] : memref<128x128xbf16, #tpu.memory_space<vmem>>, vector<128x128xbf16>
    %cst = arith.constant dense<0.000000e+00> : vector<64x128xf32>
    %2 = tpu.matmul %0, %1, %cst {dimension_numbers = #tpu.dot_dimension_numbers<[1], [0], [0], [1], [0, 0, 1, 1], [], []>} : vector<64x128xbf16>, vector<128x128xbf16>, vector<64x128xf32> -> vector<64x128xf32>
    %c0_3 = arith.constant 0 : index
    %c0_4 = arith.constant 0 : index
    %3 = vector.load %arg3[%c0_3, %c0_4] : memref<1x128xf32, #tpu.memory_space<vmem>>, vector<1x128xf32>
    %4 = vector.broadcast %3 : vector<1x128xf32> to vector<64x128xf32>
    %5 = arith.addf %2, %4 : vector<64x128xf32>
    %cst_5 = arith.constant dense<0.000000e+00> : vector<128xf32>
    %6 = vector.multi_reduction <add>, %5, %cst_5 [0] : vector<64x128xf32> to vector<128xf32>
    %7 = vector.shape_cast %6 : vector<128xf32> to vector<1x128xf32>
    %cst_6 = arith.constant 1.562500e-02 : f32
    %8 = vector.broadcast %cst_6 : f32 to vector<1x128xf32>
    %9 = arith.mulf %7, %8 : vector<1x128xf32>
    %10 = arith.mulf %5, %5 : vector<64x128xf32>
    %cst_7 = arith.constant dense<0.000000e+00> : vector<128xf32>
    %11 = vector.multi_reduction <add>, %10, %cst_7 [0] : vector<64x128xf32> to vector<128xf32>
    %12 = vector.shape_cast %11 : vector<128xf32> to vector<1x128xf32>
    %cst_8 = arith.constant 1.562500e-02 : f32
    %13 = vector.broadcast %cst_8 : f32 to vector<1x128xf32>
    %14 = arith.mulf %12, %13 : vector<1x128xf32>
    %15 = arith.mulf %9, %9 : vector<1x128xf32>
    %16 = arith.subf %14, %15 : vector<1x128xf32>
    %cst_9 = arith.constant 0.000000e+00 : f32
    %17 = vector.broadcast %cst_9 : f32 to vector<1x128xf32>
    %18 = arith.maximumf %16, %17 : vector<1x128xf32>
    %19 = vector.broadcast %9 : vector<1x128xf32> to vector<64x128xf32>
    %20 = arith.subf %5, %19 : vector<64x128xf32>
    %cst_10 = arith.constant 9.99999974E-6 : f32
    %21 = vector.broadcast %cst_10 : f32 to vector<1x128xf32>
    %22 = arith.addf %18, %21 : vector<1x128xf32>
    %23 = math.rsqrt %22 : vector<1x128xf32>
    %24 = vector.broadcast %23 : vector<1x128xf32> to vector<64x128xf32>
    %25 = arith.mulf %20, %24 : vector<64x128xf32>
    %c0_11 = arith.constant 0 : index
    %c0_12 = arith.constant 0 : index
    %26 = vector.load %arg4[%c0_11, %c0_12] : memref<64x128xf32, #tpu.memory_space<vmem>>, vector<64x128xf32>
    tpu.vector_store %arg4[%c0_11, %c0_12], %25 {strides = array<i32>} : memref<64x128xf32, #tpu.memory_space<vmem>>, vector<64x128xf32>,
    return
  }
  func.func @transform_0(%arg0: i32) -> (i32, i32) {
    %c0_i32 = arith.constant 0 : i32
    %c0_i32_0 = arith.constant 0 : i32
    return %arg0, %c0_i32 : i32, i32
  }
  func.func @transform_1(%arg0: i32) -> (i32, i32) {
    %c0_i32 = arith.constant 0 : i32
    %c0_i32_0 = arith.constant 0 : i32
    %c0_i32_1 = arith.constant 0 : i32
    return %c0_i32, %c0_i32_0 : i32, i32
  }
  func.func @transform_2(%arg0: i32) -> (i32, i32) {
    %c0_i32 = arith.constant 0 : i32
    %c0_i32_0 = arith.constant 0 : i32
    %c0_i32_1 = arith.constant 0 : i32
    return %c0_i32, %c0_i32_0 : i32, i32
  }
  func.func @transform_3(%arg0: i32) -> (i32, i32) {
    %c0_i32 = arith.constant 0 : i32
    %c0_i32_0 = arith.constant 0 : i32
    return %arg0, %c0_i32 : i32, i32
  }
}

module attributes {stable_mosaic.version = 11 : i64} {
  func.func @_conv_in_res_kernel(%arg0: i32, %arg1: memref<64x1152xbf16, #tpu.memory_space<vmem>>, %arg2: memref<1152x128xbf16, #tpu.memory_space<vmem>>, %arg3: memref<1x128xf32, #tpu.memory_space<vmem>>, %arg4: memref<64x128xf32, #tpu.memory_space<vmem>>, %arg5: memref<64x128xf32, #tpu.memory_space<vmem>>) attributes {dimension_semantics = [#tpu.dimension_semantics<parallel>], iteration_bounds = array<i64: 2>, scalar_prefetch = 0 : i64, scratch_operands = 0 : i64, tpu.core_type = #tpu.core_type<tc>, window_params = [{transform_indices = @transform_0, window_bounds = array<i64: 64, 1152>}, {pipeline_mode = #tpu.pipeline_mode<synchronous>, transform_indices = @transform_1, window_bounds = array<i64: 1152, 128>}, {pipeline_mode = #tpu.pipeline_mode<synchronous>, transform_indices = @transform_2, window_bounds = array<i64: 1, 128>}, {transform_indices = @transform_3, window_bounds = array<i64: 64, 128>}, {transform_indices = @transform_4, window_bounds = array<i64: 64, 128>}]} {
    %c0 = arith.constant 0 : index
    %c0_0 = arith.constant 0 : index
    %0 = vector.load %arg1[%c0, %c0_0] : memref<64x1152xbf16, #tpu.memory_space<vmem>>, vector<64x1152xbf16>
    %c0_1 = arith.constant 0 : index
    %c0_2 = arith.constant 0 : index
    %1 = vector.load %arg2[%c0_1, %c0_2] : memref<1152x128xbf16, #tpu.memory_space<vmem>>, vector<1152x128xbf16>
    %cst = arith.constant dense<0.000000e+00> : vector<64x128xf32>
    %2 = tpu.matmul %0, %1, %cst {dimension_numbers = #tpu.dot_dimension_numbers<[1], [0], [0], [1], [0, 0, 1, 1], [], []>} : vector<64x1152xbf16>, vector<1152x128xbf16>, vector<64x128xf32> -> vector<64x128xf32>
    %c0_3 = arith.constant 0 : index
    %c0_4 = arith.constant 0 : index
    %3 = vector.load %arg3[%c0_3, %c0_4] : memref<1x128xf32, #tpu.memory_space<vmem>>, vector<1x128xf32>
    %4 = vector.broadcast %3 : vector<1x128xf32> to vector<64x128xf32>
    %5 = arith.addf %2, %4 : vector<64x128xf32>
    %cst_5 = arith.constant dense<0.000000e+00> : vector<128xf32>
    %6 = vector.multi_reduction <add>, %5, %cst_5 [0] : vector<64x128xf32> to vector<128xf32>
    %7 = vector.shape_cast %6 : vector<128xf32> to vector<1x128xf32>
    %cst_6 = arith.constant 1.562500e-02 : f32
    %8 = vector.broadcast %cst_6 : f32 to vector<1x128xf32>
    %9 = arith.mulf %7, %8 : vector<1x128xf32>
    %10 = arith.mulf %5, %5 : vector<64x128xf32>
    %cst_7 = arith.constant dense<0.000000e+00> : vector<128xf32>
    %11 = vector.multi_reduction <add>, %10, %cst_7 [0] : vector<64x128xf32> to vector<128xf32>
    %12 = vector.shape_cast %11 : vector<128xf32> to vector<1x128xf32>
    %cst_8 = arith.constant 1.562500e-02 : f32
    %13 = vector.broadcast %cst_8 : f32 to vector<1x128xf32>
    %14 = arith.mulf %12, %13 : vector<1x128xf32>
    %15 = arith.mulf %9, %9 : vector<1x128xf32>
    %16 = arith.subf %14, %15 : vector<1x128xf32>
    %cst_9 = arith.constant 0.000000e+00 : f32
    %17 = vector.broadcast %cst_9 : f32 to vector<1x128xf32>
    %18 = arith.maximumf %16, %17 : vector<1x128xf32>
    %19 = vector.broadcast %9 : vector<1x128xf32> to vector<64x128xf32>
    %20 = arith.subf %5, %19 : vector<64x128xf32>
    %cst_10 = arith.constant 9.99999974E-6 : f32
    %21 = vector.broadcast %cst_10 : f32 to vector<1x128xf32>
    %22 = arith.addf %18, %21 : vector<1x128xf32>
    %23 = math.rsqrt %22 : vector<1x128xf32>
    %24 = vector.broadcast %23 : vector<1x128xf32> to vector<64x128xf32>
    %25 = arith.mulf %20, %24 : vector<64x128xf32>
    %c0_11 = arith.constant 0 : index
    %c0_12 = arith.constant 0 : index
    %26 = vector.load %arg4[%c0_11, %c0_12] : memref<64x128xf32, #tpu.memory_space<vmem>>, vector<64x128xf32>
    %27 = arith.addf %25, %26 : vector<64x128xf32>
    %cst_13 = arith.constant 0.000000e+00 : f32
    %28 = vector.broadcast %cst_13 : f32 to vector<64x128xf32>
    %29 = arith.maximumf %27, %28 : vector<64x128xf32>
    %c0_14 = arith.constant 0 : index
    %c0_15 = arith.constant 0 : index
    %30 = vector.load %arg5[%c0_14, %c0_15] : memref<64x128xf32, #tpu.memory_space<vmem>>, vector<64x128xf32>
    tpu.vector_store %arg5[%c0_14, %c0_15], %29 {strides = array<i32>} : memref<64x128xf32, #tpu.memory_space<vmem>>, vector<64x128xf32>,
    return
  }
  func.func @transform_0(%arg0: i32) -> (i32, i32) {
    %c0_i32 = arith.constant 0 : i32
    %c0_i32_0 = arith.constant 0 : i32
    return %arg0, %c0_i32 : i32, i32
  }
  func.func @transform_1(%arg0: i32) -> (i32, i32) {
    %c0_i32 = arith.constant 0 : i32
    %c0_i32_0 = arith.constant 0 : i32
    %c0_i32_1 = arith.constant 0 : i32
    return %c0_i32, %c0_i32_0 : i32, i32
  }
  func.func @transform_2(%arg0: i32) -> (i32, i32) {
    %c0_i32 = arith.constant 0 : i32
    %c0_i32_0 = arith.constant 0 : i32
    %c0_i32_1 = arith.constant 0 : i32
    return %c0_i32, %c0_i32_0 : i32, i32
  }
  func.func @transform_3(%arg0: i32) -> (i32, i32) {
    %c0_i32 = arith.constant 0 : i32
    %c0_i32_0 = arith.constant 0 : i32
    return %arg0, %c0_i32 : i32, i32
  }
  func.func @transform_4(%arg0: i32) -> (i32, i32) {
    %c0_i32 = arith.constant 0 : i32
    %c0_i32_0 = arith.constant 0 : i32
    return %arg0, %c0_i32 : i32, i32
  }
}

module attributes {stable_mosaic.version = 11 : i64} {
  func.func @_conv_in_kernel(%arg0: i32, %arg1: memref<16x1152xbf16, #tpu.memory_space<vmem>>, %arg2: memref<1152x256xbf16, #tpu.memory_space<vmem>>, %arg3: memref<1x256xf32, #tpu.memory_space<vmem>>, %arg4: memref<16x256xf32, #tpu.memory_space<vmem>>) attributes {dimension_semantics = [#tpu.dimension_semantics<parallel>], iteration_bounds = array<i64: 2>, scalar_prefetch = 0 : i64, scratch_operands = 0 : i64, tpu.core_type = #tpu.core_type<tc>, window_params = [{transform_indices = @transform_0, window_bounds = array<i64: 16, 1152>}, {pipeline_mode = #tpu.pipeline_mode<synchronous>, transform_indices = @transform_1, window_bounds = array<i64: 1152, 256>}, {pipeline_mode = #tpu.pipeline_mode<synchronous>, transform_indices = @transform_2, window_bounds = array<i64: 1, 256>}, {transform_indices = @transform_3, window_bounds = array<i64: 16, 256>}]} {
    %c0 = arith.constant 0 : index
    %c0_0 = arith.constant 0 : index
    %0 = vector.load %arg1[%c0, %c0_0] : memref<16x1152xbf16, #tpu.memory_space<vmem>>, vector<16x1152xbf16>
    %c0_1 = arith.constant 0 : index
    %c0_2 = arith.constant 0 : index
    %1 = vector.load %arg2[%c0_1, %c0_2] : memref<1152x256xbf16, #tpu.memory_space<vmem>>, vector<1152x256xbf16>
    %cst = arith.constant dense<0.000000e+00> : vector<16x256xf32>
    %2 = tpu.matmul %0, %1, %cst {dimension_numbers = #tpu.dot_dimension_numbers<[1], [0], [0], [1], [0, 0, 1, 1], [], []>} : vector<16x1152xbf16>, vector<1152x256xbf16>, vector<16x256xf32> -> vector<16x256xf32>
    %c0_3 = arith.constant 0 : index
    %c0_4 = arith.constant 0 : index
    %3 = vector.load %arg3[%c0_3, %c0_4] : memref<1x256xf32, #tpu.memory_space<vmem>>, vector<1x256xf32>
    %4 = vector.broadcast %3 : vector<1x256xf32> to vector<16x256xf32>
    %5 = arith.addf %2, %4 : vector<16x256xf32>
    %cst_5 = arith.constant dense<0.000000e+00> : vector<256xf32>
    %6 = vector.multi_reduction <add>, %5, %cst_5 [0] : vector<16x256xf32> to vector<256xf32>
    %7 = vector.shape_cast %6 : vector<256xf32> to vector<1x256xf32>
    %cst_6 = arith.constant 6.250000e-02 : f32
    %8 = vector.broadcast %cst_6 : f32 to vector<1x256xf32>
    %9 = arith.mulf %7, %8 : vector<1x256xf32>
    %10 = arith.mulf %5, %5 : vector<16x256xf32>
    %cst_7 = arith.constant dense<0.000000e+00> : vector<256xf32>
    %11 = vector.multi_reduction <add>, %10, %cst_7 [0] : vector<16x256xf32> to vector<256xf32>
    %12 = vector.shape_cast %11 : vector<256xf32> to vector<1x256xf32>
    %cst_8 = arith.constant 6.250000e-02 : f32
    %13 = vector.broadcast %cst_8 : f32 to vector<1x256xf32>
    %14 = arith.mulf %12, %13 : vector<1x256xf32>
    %15 = arith.mulf %9, %9 : vector<1x256xf32>
    %16 = arith.subf %14, %15 : vector<1x256xf32>
    %cst_9 = arith.constant 0.000000e+00 : f32
    %17 = vector.broadcast %cst_9 : f32 to vector<1x256xf32>
    %18 = arith.maximumf %16, %17 : vector<1x256xf32>
    %19 = vector.broadcast %9 : vector<1x256xf32> to vector<16x256xf32>
    %20 = arith.subf %5, %19 : vector<16x256xf32>
    %cst_10 = arith.constant 9.99999974E-6 : f32
    %21 = vector.broadcast %cst_10 : f32 to vector<1x256xf32>
    %22 = arith.addf %18, %21 : vector<1x256xf32>
    %23 = math.rsqrt %22 : vector<1x256xf32>
    %24 = vector.broadcast %23 : vector<1x256xf32> to vector<16x256xf32>
    %25 = arith.mulf %20, %24 : vector<16x256xf32>
    %cst_11 = arith.constant 0.000000e+00 : f32
    %26 = vector.broadcast %cst_11 : f32 to vector<16x256xf32>
    %27 = arith.maximumf %25, %26 : vector<16x256xf32>
    %c0_12 = arith.constant 0 : index
    %c0_13 = arith.constant 0 : index
    %28 = vector.load %arg4[%c0_12, %c0_13] : memref<16x256xf32, #tpu.memory_space<vmem>>, vector<16x256xf32>
    tpu.vector_store %arg4[%c0_12, %c0_13], %27 {strides = array<i32>} : memref<16x256xf32, #tpu.memory_space<vmem>>, vector<16x256xf32>,
    return
  }
  func.func @transform_0(%arg0: i32) -> (i32, i32) {
    %c0_i32 = arith.constant 0 : i32
    %c0_i32_0 = arith.constant 0 : i32
    return %arg0, %c0_i32 : i32, i32
  }
  func.func @transform_1(%arg0: i32) -> (i32, i32) {
    %c0_i32 = arith.constant 0 : i32
    %c0_i32_0 = arith.constant 0 : i32
    %c0_i32_1 = arith.constant 0 : i32
    return %c0_i32, %c0_i32_0 : i32, i32
  }
  func.func @transform_2(%arg0: i32) -> (i32, i32) {
    %c0_i32 = arith.constant 0 : i32
    %c0_i32_0 = arith.constant 0 : i32
    %c0_i32_1 = arith.constant 0 : i32
    return %c0_i32, %c0_i32_0 : i32, i32
  }
  func.func @transform_3(%arg0: i32) -> (i32, i32) {
    %c0_i32 = arith.constant 0 : i32
    %c0_i32_0 = arith.constant 0 : i32
    return %arg0, %c0_i32 : i32, i32
  }
}

module attributes {stable_mosaic.version = 11 : i64} {
  func.func @_conv_in_res_kernel(%arg0: i32, %arg1: memref<16x2304xbf16, #tpu.memory_space<vmem>>, %arg2: memref<2304x256xbf16, #tpu.memory_space<vmem>>, %arg3: memref<1x256xf32, #tpu.memory_space<vmem>>, %arg4: memref<16x256xf32, #tpu.memory_space<vmem>>, %arg5: memref<16x256xf32, #tpu.memory_space<vmem>>) attributes {dimension_semantics = [#tpu.dimension_semantics<parallel>], iteration_bounds = array<i64: 2>, scalar_prefetch = 0 : i64, scratch_operands = 0 : i64, tpu.core_type = #tpu.core_type<tc>, window_params = [{transform_indices = @transform_0, window_bounds = array<i64: 16, 2304>}, {pipeline_mode = #tpu.pipeline_mode<synchronous>, transform_indices = @transform_1, window_bounds = array<i64: 2304, 256>}, {pipeline_mode = #tpu.pipeline_mode<synchronous>, transform_indices = @transform_2, window_bounds = array<i64: 1, 256>}, {transform_indices = @transform_3, window_bounds = array<i64: 16, 256>}, {transform_indices = @transform_4, window_bounds = array<i64: 16, 256>}]} {
    %c0 = arith.constant 0 : index
    %c0_0 = arith.constant 0 : index
    %0 = vector.load %arg1[%c0, %c0_0] : memref<16x2304xbf16, #tpu.memory_space<vmem>>, vector<16x2304xbf16>
    %c0_1 = arith.constant 0 : index
    %c0_2 = arith.constant 0 : index
    %1 = vector.load %arg2[%c0_1, %c0_2] : memref<2304x256xbf16, #tpu.memory_space<vmem>>, vector<2304x256xbf16>
    %cst = arith.constant dense<0.000000e+00> : vector<16x256xf32>
    %2 = tpu.matmul %0, %1, %cst {dimension_numbers = #tpu.dot_dimension_numbers<[1], [0], [0], [1], [0, 0, 1, 1], [], []>} : vector<16x2304xbf16>, vector<2304x256xbf16>, vector<16x256xf32> -> vector<16x256xf32>
    %c0_3 = arith.constant 0 : index
    %c0_4 = arith.constant 0 : index
    %3 = vector.load %arg3[%c0_3, %c0_4] : memref<1x256xf32, #tpu.memory_space<vmem>>, vector<1x256xf32>
    %4 = vector.broadcast %3 : vector<1x256xf32> to vector<16x256xf32>
    %5 = arith.addf %2, %4 : vector<16x256xf32>
    %cst_5 = arith.constant dense<0.000000e+00> : vector<256xf32>
    %6 = vector.multi_reduction <add>, %5, %cst_5 [0] : vector<16x256xf32> to vector<256xf32>
    %7 = vector.shape_cast %6 : vector<256xf32> to vector<1x256xf32>
    %cst_6 = arith.constant 6.250000e-02 : f32
    %8 = vector.broadcast %cst_6 : f32 to vector<1x256xf32>
    %9 = arith.mulf %7, %8 : vector<1x256xf32>
    %10 = arith.mulf %5, %5 : vector<16x256xf32>
    %cst_7 = arith.constant dense<0.000000e+00> : vector<256xf32>
    %11 = vector.multi_reduction <add>, %10, %cst_7 [0] : vector<16x256xf32> to vector<256xf32>
    %12 = vector.shape_cast %11 : vector<256xf32> to vector<1x256xf32>
    %cst_8 = arith.constant 6.250000e-02 : f32
    %13 = vector.broadcast %cst_8 : f32 to vector<1x256xf32>
    %14 = arith.mulf %12, %13 : vector<1x256xf32>
    %15 = arith.mulf %9, %9 : vector<1x256xf32>
    %16 = arith.subf %14, %15 : vector<1x256xf32>
    %cst_9 = arith.constant 0.000000e+00 : f32
    %17 = vector.broadcast %cst_9 : f32 to vector<1x256xf32>
    %18 = arith.maximumf %16, %17 : vector<1x256xf32>
    %19 = vector.broadcast %9 : vector<1x256xf32> to vector<16x256xf32>
    %20 = arith.subf %5, %19 : vector<16x256xf32>
    %cst_10 = arith.constant 9.99999974E-6 : f32
    %21 = vector.broadcast %cst_10 : f32 to vector<1x256xf32>
    %22 = arith.addf %18, %21 : vector<1x256xf32>
    %23 = math.rsqrt %22 : vector<1x256xf32>
    %24 = vector.broadcast %23 : vector<1x256xf32> to vector<16x256xf32>
    %25 = arith.mulf %20, %24 : vector<16x256xf32>
    %c0_11 = arith.constant 0 : index
    %c0_12 = arith.constant 0 : index
    %26 = vector.load %arg4[%c0_11, %c0_12] : memref<16x256xf32, #tpu.memory_space<vmem>>, vector<16x256xf32>
    %27 = arith.addf %25, %26 : vector<16x256xf32>
    %cst_13 = arith.constant 0.000000e+00 : f32
    %28 = vector.broadcast %cst_13 : f32 to vector<16x256xf32>
    %29 = arith.maximumf %27, %28 : vector<16x256xf32>
    %c0_14 = arith.constant 0 : index
    %c0_15 = arith.constant 0 : index
    %30 = vector.load %arg5[%c0_14, %c0_15] : memref<16x256xf32, #tpu.memory_space<vmem>>, vector<16x256xf32>
    tpu.vector_store %arg5[%c0_14, %c0_15], %29 {strides = array<i32>} : memref<16x256xf32, #tpu.memory_space<vmem>>, vector<16x256xf32>,
    return
  }
  func.func @transform_0(%arg0: i32) -> (i32, i32) {
    %c0_i32 = arith.constant 0 : i32
    %c0_i32_0 = arith.constant 0 : i32
    return %arg0, %c0_i32 : i32, i32
  }
  func.func @transform_1(%arg0: i32) -> (i32, i32) {
    %c0_i32 = arith.constant 0 : i32
    %c0_i32_0 = arith.constant 0 : i32
    %c0_i32_1 = arith.constant 0 : i32
    return %c0_i32, %c0_i32_0 : i32, i32
  }
  func.func @transform_2(%arg0: i32) -> (i32, i32) {
    %c0_i32 = arith.constant 0 : i32
    %c0_i32_0 = arith.constant 0 : i32
    %c0_i32_1 = arith.constant 0 : i32
    return %c0_i32, %c0_i32_0 : i32, i32
  }
  func.func @transform_3(%arg0: i32) -> (i32, i32) {
    %c0_i32 = arith.constant 0 : i32
    %c0_i32_0 = arith.constant 0 : i32
    return %arg0, %c0_i32 : i32, i32
  }
  func.func @transform_4(%arg0: i32) -> (i32, i32) {
    %c0_i32 = arith.constant 0 : i32
    %c0_i32_0 = arith.constant 0 : i32
    return %arg0, %c0_i32 : i32, i32
  }
}

module attributes {stable_mosaic.version = 11 : i64} {
  func.func @_conv_in_kernel(%arg0: i32, %arg1: memref<16x128xbf16, #tpu.memory_space<vmem>>, %arg2: memref<128x256xbf16, #tpu.memory_space<vmem>>, %arg3: memref<1x256xf32, #tpu.memory_space<vmem>>, %arg4: memref<16x256xf32, #tpu.memory_space<vmem>>) attributes {dimension_semantics = [#tpu.dimension_semantics<parallel>], iteration_bounds = array<i64: 2>, scalar_prefetch = 0 : i64, scratch_operands = 0 : i64, tpu.core_type = #tpu.core_type<tc>, window_params = [{transform_indices = @transform_0, window_bounds = array<i64: 16, 128>}, {pipeline_mode = #tpu.pipeline_mode<synchronous>, transform_indices = @transform_1, window_bounds = array<i64: 128, 256>}, {pipeline_mode = #tpu.pipeline_mode<synchronous>, transform_indices = @transform_2, window_bounds = array<i64: 1, 256>}, {transform_indices = @transform_3, window_bounds = array<i64: 16, 256>}]} {
    %c0 = arith.constant 0 : index
    %c0_0 = arith.constant 0 : index
    %0 = vector.load %arg1[%c0, %c0_0] : memref<16x128xbf16, #tpu.memory_space<vmem>>, vector<16x128xbf16>
    %c0_1 = arith.constant 0 : index
    %c0_2 = arith.constant 0 : index
    %1 = vector.load %arg2[%c0_1, %c0_2] : memref<128x256xbf16, #tpu.memory_space<vmem>>, vector<128x256xbf16>
    %cst = arith.constant dense<0.000000e+00> : vector<16x256xf32>
    %2 = tpu.matmul %0, %1, %cst {dimension_numbers = #tpu.dot_dimension_numbers<[1], [0], [0], [1], [0, 0, 1, 1], [], []>} : vector<16x128xbf16>, vector<128x256xbf16>, vector<16x256xf32> -> vector<16x256xf32>
    %c0_3 = arith.constant 0 : index
    %c0_4 = arith.constant 0 : index
    %3 = vector.load %arg3[%c0_3, %c0_4] : memref<1x256xf32, #tpu.memory_space<vmem>>, vector<1x256xf32>
    %4 = vector.broadcast %3 : vector<1x256xf32> to vector<16x256xf32>
    %5 = arith.addf %2, %4 : vector<16x256xf32>
    %cst_5 = arith.constant dense<0.000000e+00> : vector<256xf32>
    %6 = vector.multi_reduction <add>, %5, %cst_5 [0] : vector<16x256xf32> to vector<256xf32>
    %7 = vector.shape_cast %6 : vector<256xf32> to vector<1x256xf32>
    %cst_6 = arith.constant 6.250000e-02 : f32
    %8 = vector.broadcast %cst_6 : f32 to vector<1x256xf32>
    %9 = arith.mulf %7, %8 : vector<1x256xf32>
    %10 = arith.mulf %5, %5 : vector<16x256xf32>
    %cst_7 = arith.constant dense<0.000000e+00> : vector<256xf32>
    %11 = vector.multi_reduction <add>, %10, %cst_7 [0] : vector<16x256xf32> to vector<256xf32>
    %12 = vector.shape_cast %11 : vector<256xf32> to vector<1x256xf32>
    %cst_8 = arith.constant 6.250000e-02 : f32
    %13 = vector.broadcast %cst_8 : f32 to vector<1x256xf32>
    %14 = arith.mulf %12, %13 : vector<1x256xf32>
    %15 = arith.mulf %9, %9 : vector<1x256xf32>
    %16 = arith.subf %14, %15 : vector<1x256xf32>
    %cst_9 = arith.constant 0.000000e+00 : f32
    %17 = vector.broadcast %cst_9 : f32 to vector<1x256xf32>
    %18 = arith.maximumf %16, %17 : vector<1x256xf32>
    %19 = vector.broadcast %9 : vector<1x256xf32> to vector<16x256xf32>
    %20 = arith.subf %5, %19 : vector<16x256xf32>
    %cst_10 = arith.constant 9.99999974E-6 : f32
    %21 = vector.broadcast %cst_10 : f32 to vector<1x256xf32>
    %22 = arith.addf %18, %21 : vector<1x256xf32>
    %23 = math.rsqrt %22 : vector<1x256xf32>
    %24 = vector.broadcast %23 : vector<1x256xf32> to vector<16x256xf32>
    %25 = arith.mulf %20, %24 : vector<16x256xf32>
    %c0_11 = arith.constant 0 : index
    %c0_12 = arith.constant 0 : index
    %26 = vector.load %arg4[%c0_11, %c0_12] : memref<16x256xf32, #tpu.memory_space<vmem>>, vector<16x256xf32>
    tpu.vector_store %arg4[%c0_11, %c0_12], %25 {strides = array<i32>} : memref<16x256xf32, #tpu.memory_space<vmem>>, vector<16x256xf32>,
    return
  }
  func.func @transform_0(%arg0: i32) -> (i32, i32) {
    %c0_i32 = arith.constant 0 : i32
    %c0_i32_0 = arith.constant 0 : i32
    return %arg0, %c0_i32 : i32, i32
  }
  func.func @transform_1(%arg0: i32) -> (i32, i32) {
    %c0_i32 = arith.constant 0 : i32
    %c0_i32_0 = arith.constant 0 : i32
    %c0_i32_1 = arith.constant 0 : i32
    return %c0_i32, %c0_i32_0 : i32, i32
  }
  func.func @transform_2(%arg0: i32) -> (i32, i32) {
    %c0_i32 = arith.constant 0 : i32
    %c0_i32_0 = arith.constant 0 : i32
    %c0_i32_1 = arith.constant 0 : i32
    return %c0_i32, %c0_i32_0 : i32, i32
  }
  func.func @transform_3(%arg0: i32) -> (i32, i32) {
    %c0_i32 = arith.constant 0 : i32
    %c0_i32_0 = arith.constant 0 : i32
    return %arg0, %c0_i32 : i32, i32
  }
}

module attributes {stable_mosaic.version = 11 : i64} {
  func.func @_upconv_in_relu_kernel(%arg0: i32, %arg1: memref<16x256xbf16, #tpu.memory_space<vmem>>, %arg2: memref<256x512xbf16, #tpu.memory_space<vmem>>, %arg3: memref<16x512xf32, #tpu.memory_space<vmem>>) attributes {dimension_semantics = [#tpu.dimension_semantics<parallel>], iteration_bounds = array<i64: 2>, scalar_prefetch = 0 : i64, scratch_operands = 0 : i64, tpu.core_type = #tpu.core_type<tc>, window_params = [{transform_indices = @transform_0, window_bounds = array<i64: 16, 256>}, {pipeline_mode = #tpu.pipeline_mode<synchronous>, transform_indices = @transform_1, window_bounds = array<i64: 256, 512>}, {transform_indices = @transform_2, window_bounds = array<i64: 16, 512>}]} {
    %c0 = arith.constant 0 : index
    %c0_0 = arith.constant 0 : index
    %0 = vector.load %arg1[%c0, %c0_0] : memref<16x256xbf16, #tpu.memory_space<vmem>>, vector<16x256xbf16>
    %c0_1 = arith.constant 0 : index
    %c0_2 = arith.constant 0 : index
    %1 = vector.load %arg2[%c0_1, %c0_2] : memref<256x512xbf16, #tpu.memory_space<vmem>>, vector<256x512xbf16>
    %cst = arith.constant dense<0.000000e+00> : vector<16x512xf32>
    %2 = tpu.matmul %0, %1, %cst {dimension_numbers = #tpu.dot_dimension_numbers<[1], [0], [0], [1], [0, 0, 1, 1], [], []>} : vector<16x256xbf16>, vector<256x512xbf16>, vector<16x512xf32> -> vector<16x512xf32>
    %3 = vector.extract_strided_slice %2 {offsets = [0, 0], sizes = [16, 128], strides = [1, 1]} : vector<16x512xf32> to vector<16x128xf32>
    %4 = vector.extract_strided_slice %2 {offsets = [0, 128], sizes = [16, 128], strides = [1, 1]} : vector<16x512xf32> to vector<16x128xf32>
    %5 = vector.extract_strided_slice %2 {offsets = [0, 256], sizes = [16, 128], strides = [1, 1]} : vector<16x512xf32> to vector<16x128xf32>
    %6 = vector.extract_strided_slice %2 {offsets = [0, 384], sizes = [16, 128], strides = [1, 1]} : vector<16x512xf32> to vector<16x128xf32>
    %7 = arith.addf %3, %4 : vector<16x128xf32>
    %8 = arith.addf %7, %5 : vector<16x128xf32>
    %9 = arith.addf %8, %6 : vector<16x128xf32>
    %10 = arith.mulf %3, %3 : vector<16x128xf32>
    %11 = arith.mulf %4, %4 : vector<16x128xf32>
    %12 = arith.addf %10, %11 : vector<16x128xf32>
    %13 = arith.mulf %5, %5 : vector<16x128xf32>
    %14 = arith.addf %12, %13 : vector<16x128xf32>
    %15 = arith.mulf %6, %6 : vector<16x128xf32>
    %16 = arith.addf %14, %15 : vector<16x128xf32>
    %cst_3 = arith.constant dense<0.000000e+00> : vector<128xf32>
    %17 = vector.multi_reduction <add>, %9, %cst_3 [0] : vector<16x128xf32> to vector<128xf32>
    %18 = vector.shape_cast %17 : vector<128xf32> to vector<1x128xf32>
    %cst_4 = arith.constant 1.562500e-02 : f32
    %19 = vector.broadcast %cst_4 : f32 to vector<1x128xf32>
    %20 = arith.mulf %18, %19 : vector<1x128xf32>
    %cst_5 = arith.constant dense<0.000000e+00> : vector<128xf32>
    %21 = vector.multi_reduction <add>, %16, %cst_5 [0] : vector<16x128xf32> to vector<128xf32>
    %22 = vector.shape_cast %21 : vector<128xf32> to vector<1x128xf32>
    %cst_6 = arith.constant 1.562500e-02 : f32
    %23 = vector.broadcast %cst_6 : f32 to vector<1x128xf32>
    %24 = arith.mulf %22, %23 : vector<1x128xf32>
    %25 = arith.mulf %20, %20 : vector<1x128xf32>
    %26 = arith.subf %24, %25 : vector<1x128xf32>
    %cst_7 = arith.constant 0.000000e+00 : f32
    %27 = vector.broadcast %cst_7 : f32 to vector<1x128xf32>
    %28 = arith.maximumf %26, %27 : vector<1x128xf32>
    %cst_8 = arith.constant 9.99999974E-6 : f32
    %29 = vector.broadcast %cst_8 : f32 to vector<1x128xf32>
    %30 = arith.addf %28, %29 : vector<1x128xf32>
    %31 = math.rsqrt %30 : vector<1x128xf32>
    %32 = vector.broadcast %20 : vector<1x128xf32> to vector<16x128xf32>
    %33 = arith.subf %3, %32 : vector<16x128xf32>
    %34 = vector.broadcast %31 : vector<1x128xf32> to vector<16x128xf32>
    %35 = arith.mulf %33, %34 : vector<16x128xf32>
    %cst_9 = arith.constant 0.000000e+00 : f32
    %36 = vector.broadcast %cst_9 : f32 to vector<16x128xf32>
    %37 = arith.maximumf %35, %36 : vector<16x128xf32>
    %c0_10 = arith.constant 0 : index
    %c0_11 = arith.constant 0 : index
    %38 = vector.load %arg3[%c0_10, %c0_11] : memref<16x512xf32, #tpu.memory_space<vmem>>, vector<16x128xf32>
    tpu.vector_store %arg3[%c0_10, %c0_11], %37 {strides = array<i32>} : memref<16x512xf32, #tpu.memory_space<vmem>>, vector<16x128xf32>,
    %39 = vector.broadcast %20 : vector<1x128xf32> to vector<16x128xf32>
    %40 = arith.subf %4, %39 : vector<16x128xf32>
    %41 = vector.broadcast %31 : vector<1x128xf32> to vector<16x128xf32>
    %42 = arith.mulf %40, %41 : vector<16x128xf32>
    %cst_12 = arith.constant 0.000000e+00 : f32
    %43 = vector.broadcast %cst_12 : f32 to vector<16x128xf32>
    %44 = arith.maximumf %42, %43 : vector<16x128xf32>
    %c0_13 = arith.constant 0 : index
    %c128 = arith.constant 128 : index
    %45 = vector.load %arg3[%c0_13, %c128] : memref<16x512xf32, #tpu.memory_space<vmem>>, vector<16x128xf32>
    tpu.vector_store %arg3[%c0_13, %c128], %44 {strides = array<i32>} : memref<16x512xf32, #tpu.memory_space<vmem>>, vector<16x128xf32>,
    %46 = vector.broadcast %20 : vector<1x128xf32> to vector<16x128xf32>
    %47 = arith.subf %5, %46 : vector<16x128xf32>
    %48 = vector.broadcast %31 : vector<1x128xf32> to vector<16x128xf32>
    %49 = arith.mulf %47, %48 : vector<16x128xf32>
    %cst_14 = arith.constant 0.000000e+00 : f32
    %50 = vector.broadcast %cst_14 : f32 to vector<16x128xf32>
    %51 = arith.maximumf %49, %50 : vector<16x128xf32>
    %c0_15 = arith.constant 0 : index
    %c256 = arith.constant 256 : index
    %52 = vector.load %arg3[%c0_15, %c256] : memref<16x512xf32, #tpu.memory_space<vmem>>, vector<16x128xf32>
    tpu.vector_store %arg3[%c0_15, %c256], %51 {strides = array<i32>} : memref<16x512xf32, #tpu.memory_space<vmem>>, vector<16x128xf32>,
    %53 = vector.broadcast %20 : vector<1x128xf32> to vector<16x128xf32>
    %54 = arith.subf %6, %53 : vector<16x128xf32>
    %55 = vector.broadcast %31 : vector<1x128xf32> to vector<16x128xf32>
    %56 = arith.mulf %54, %55 : vector<16x128xf32>
    %cst_16 = arith.constant 0.000000e+00 : f32
    %57 = vector.broadcast %cst_16 : f32 to vector<16x128xf32>
    %58 = arith.maximumf %56, %57 : vector<16x128xf32>
    %c0_17 = arith.constant 0 : index
    %c384 = arith.constant 384 : index
    %59 = vector.load %arg3[%c0_17, %c384] : memref<16x512xf32, #tpu.memory_space<vmem>>, vector<16x128xf32>
    tpu.vector_store %arg3[%c0_17, %c384], %58 {strides = array<i32>} : memref<16x512xf32, #tpu.memory_space<vmem>>, vector<16x128xf32>,
    return
  }
  func.func @transform_0(%arg0: i32) -> (i32, i32) {
    %c0_i32 = arith.constant 0 : i32
    %c0_i32_0 = arith.constant 0 : i32
    return %arg0, %c0_i32 : i32, i32
  }
  func.func @transform_1(%arg0: i32) -> (i32, i32) {
    %c0_i32 = arith.constant 0 : i32
    %c0_i32_0 = arith.constant 0 : i32
    %c0_i32_1 = arith.constant 0 : i32
    return %c0_i32, %c0_i32_0 : i32, i32
  }
  func.func @transform_2(%arg0: i32) -> (i32, i32) {
    %c0_i32 = arith.constant 0 : i32
    %c0_i32_0 = arith.constant 0 : i32
    return %arg0, %c0_i32 : i32, i32
  }
}

module attributes {stable_mosaic.version = 11 : i64} {
  func.func @_upconv_in_relu_kernel(%arg0: i32, %arg1: memref<64x128xbf16, #tpu.memory_space<vmem>>, %arg2: memref<128x512xbf16, #tpu.memory_space<vmem>>, %arg3: memref<64x512xf32, #tpu.memory_space<vmem>>) attributes {dimension_semantics = [#tpu.dimension_semantics<parallel>], iteration_bounds = array<i64: 2>, scalar_prefetch = 0 : i64, scratch_operands = 0 : i64, tpu.core_type = #tpu.core_type<tc>, window_params = [{transform_indices = @transform_0, window_bounds = array<i64: 64, 128>}, {pipeline_mode = #tpu.pipeline_mode<synchronous>, transform_indices = @transform_1, window_bounds = array<i64: 128, 512>}, {transform_indices = @transform_2, window_bounds = array<i64: 64, 512>}]} {
    %c0 = arith.constant 0 : index
    %c0_0 = arith.constant 0 : index
    %0 = vector.load %arg1[%c0, %c0_0] : memref<64x128xbf16, #tpu.memory_space<vmem>>, vector<64x128xbf16>
    %c0_1 = arith.constant 0 : index
    %c0_2 = arith.constant 0 : index
    %1 = vector.load %arg2[%c0_1, %c0_2] : memref<128x512xbf16, #tpu.memory_space<vmem>>, vector<128x512xbf16>
    %cst = arith.constant dense<0.000000e+00> : vector<64x512xf32>
    %2 = tpu.matmul %0, %1, %cst {dimension_numbers = #tpu.dot_dimension_numbers<[1], [0], [0], [1], [0, 0, 1, 1], [], []>} : vector<64x128xbf16>, vector<128x512xbf16>, vector<64x512xf32> -> vector<64x512xf32>
    %3 = vector.extract_strided_slice %2 {offsets = [0, 0], sizes = [64, 128], strides = [1, 1]} : vector<64x512xf32> to vector<64x128xf32>
    %4 = vector.extract_strided_slice %2 {offsets = [0, 128], sizes = [64, 128], strides = [1, 1]} : vector<64x512xf32> to vector<64x128xf32>
    %5 = vector.extract_strided_slice %2 {offsets = [0, 256], sizes = [64, 128], strides = [1, 1]} : vector<64x512xf32> to vector<64x128xf32>
    %6 = vector.extract_strided_slice %2 {offsets = [0, 384], sizes = [64, 128], strides = [1, 1]} : vector<64x512xf32> to vector<64x128xf32>
    %7 = arith.addf %3, %4 : vector<64x128xf32>
    %8 = arith.addf %7, %5 : vector<64x128xf32>
    %9 = arith.addf %8, %6 : vector<64x128xf32>
    %10 = arith.mulf %3, %3 : vector<64x128xf32>
    %11 = arith.mulf %4, %4 : vector<64x128xf32>
    %12 = arith.addf %10, %11 : vector<64x128xf32>
    %13 = arith.mulf %5, %5 : vector<64x128xf32>
    %14 = arith.addf %12, %13 : vector<64x128xf32>
    %15 = arith.mulf %6, %6 : vector<64x128xf32>
    %16 = arith.addf %14, %15 : vector<64x128xf32>
    %cst_3 = arith.constant dense<0.000000e+00> : vector<128xf32>
    %17 = vector.multi_reduction <add>, %9, %cst_3 [0] : vector<64x128xf32> to vector<128xf32>
    %18 = vector.shape_cast %17 : vector<128xf32> to vector<1x128xf32>
    %cst_4 = arith.constant 3.906250e-03 : f32
    %19 = vector.broadcast %cst_4 : f32 to vector<1x128xf32>
    %20 = arith.mulf %18, %19 : vector<1x128xf32>
    %cst_5 = arith.constant dense<0.000000e+00> : vector<128xf32>
    %21 = vector.multi_reduction <add>, %16, %cst_5 [0] : vector<64x128xf32> to vector<128xf32>
    %22 = vector.shape_cast %21 : vector<128xf32> to vector<1x128xf32>
    %cst_6 = arith.constant 3.906250e-03 : f32
    %23 = vector.broadcast %cst_6 : f32 to vector<1x128xf32>
    %24 = arith.mulf %22, %23 : vector<1x128xf32>
    %25 = arith.mulf %20, %20 : vector<1x128xf32>
    %26 = arith.subf %24, %25 : vector<1x128xf32>
    %cst_7 = arith.constant 0.000000e+00 : f32
    %27 = vector.broadcast %cst_7 : f32 to vector<1x128xf32>
    %28 = arith.maximumf %26, %27 : vector<1x128xf32>
    %cst_8 = arith.constant 9.99999974E-6 : f32
    %29 = vector.broadcast %cst_8 : f32 to vector<1x128xf32>
    %30 = arith.addf %28, %29 : vector<1x128xf32>
    %31 = math.rsqrt %30 : vector<1x128xf32>
    %32 = vector.broadcast %20 : vector<1x128xf32> to vector<64x128xf32>
    %33 = arith.subf %3, %32 : vector<64x128xf32>
    %34 = vector.broadcast %31 : vector<1x128xf32> to vector<64x128xf32>
    %35 = arith.mulf %33, %34 : vector<64x128xf32>
    %cst_9 = arith.constant 0.000000e+00 : f32
    %36 = vector.broadcast %cst_9 : f32 to vector<64x128xf32>
    %37 = arith.maximumf %35, %36 : vector<64x128xf32>
    %c0_10 = arith.constant 0 : index
    %c0_11 = arith.constant 0 : index
    %38 = vector.load %arg3[%c0_10, %c0_11] : memref<64x512xf32, #tpu.memory_space<vmem>>, vector<64x128xf32>
    tpu.vector_store %arg3[%c0_10, %c0_11], %37 {strides = array<i32>} : memref<64x512xf32, #tpu.memory_space<vmem>>, vector<64x128xf32>,
    %39 = vector.broadcast %20 : vector<1x128xf32> to vector<64x128xf32>
    %40 = arith.subf %4, %39 : vector<64x128xf32>
    %41 = vector.broadcast %31 : vector<1x128xf32> to vector<64x128xf32>
    %42 = arith.mulf %40, %41 : vector<64x128xf32>
    %cst_12 = arith.constant 0.000000e+00 : f32
    %43 = vector.broadcast %cst_12 : f32 to vector<64x128xf32>
    %44 = arith.maximumf %42, %43 : vector<64x128xf32>
    %c0_13 = arith.constant 0 : index
    %c128 = arith.constant 128 : index
    %45 = vector.load %arg3[%c0_13, %c128] : memref<64x512xf32, #tpu.memory_space<vmem>>, vector<64x128xf32>
    tpu.vector_store %arg3[%c0_13, %c128], %44 {strides = array<i32>} : memref<64x512xf32, #tpu.memory_space<vmem>>, vector<64x128xf32>,
    %46 = vector.broadcast %20 : vector<1x128xf32> to vector<64x128xf32>
    %47 = arith.subf %5, %46 : vector<64x128xf32>
    %48 = vector.broadcast %31 : vector<1x128xf32> to vector<64x128xf32>
    %49 = arith.mulf %47, %48 : vector<64x128xf32>
    %cst_14 = arith.constant 0.000000e+00 : f32
    %50 = vector.broadcast %cst_14 : f32 to vector<64x128xf32>
    %51 = arith.maximumf %49, %50 : vector<64x128xf32>
    %c0_15 = arith.constant 0 : index
    %c256 = arith.constant 256 : index
    %52 = vector.load %arg3[%c0_15, %c256] : memref<64x512xf32, #tpu.memory_space<vmem>>, vector<64x128xf32>
    tpu.vector_store %arg3[%c0_15, %c256], %51 {strides = array<i32>} : memref<64x512xf32, #tpu.memory_space<vmem>>, vector<64x128xf32>,
    %53 = vector.broadcast %20 : vector<1x128xf32> to vector<64x128xf32>
    %54 = arith.subf %6, %53 : vector<64x128xf32>
    %55 = vector.broadcast %31 : vector<1x128xf32> to vector<64x128xf32>
    %56 = arith.mulf %54, %55 : vector<64x128xf32>
    %cst_16 = arith.constant 0.000000e+00 : f32
    %57 = vector.broadcast %cst_16 : f32 to vector<64x128xf32>
    %58 = arith.maximumf %56, %57 : vector<64x128xf32>
    %c0_17 = arith.constant 0 : index
    %c384 = arith.constant 384 : index
    %59 = vector.load %arg3[%c0_17, %c384] : memref<64x512xf32, #tpu.memory_space<vmem>>, vector<64x128xf32>
    tpu.vector_store %arg3[%c0_17, %c384], %58 {strides = array<i32>} : memref<64x512xf32, #tpu.memory_space<vmem>>, vector<64x128xf32>,
    return
  }
  func.func @transform_0(%arg0: i32) -> (i32, i32) {
    %c0_i32 = arith.constant 0 : i32
    %c0_i32_0 = arith.constant 0 : i32
    return %arg0, %c0_i32 : i32, i32
  }
  func.func @transform_1(%arg0: i32) -> (i32, i32) {
    %c0_i32 = arith.constant 0 : i32
    %c0_i32_0 = arith.constant 0 : i32
    %c0_i32_1 = arith.constant 0 : i32
    return %c0_i32, %c0_i32_0 : i32, i32
  }
  func.func @transform_2(%arg0: i32) -> (i32, i32) {
    %c0_i32 = arith.constant 0 : i32
    %c0_i32_0 = arith.constant 0 : i32
    return %arg0, %c0_i32 : i32, i32
  }
}

module attributes {stable_mosaic.version = 11 : i64} {
  func.func @_last_conv_final_kernel(%arg0: i32, %arg1: memref<256x128xbf16, #tpu.memory_space<vmem>>, %arg2: memref<128x1xbf16, #tpu.memory_space<vmem>>, %arg3: memref<1x1xf32, #tpu.memory_space<vmem>>, %arg4: memref<256x1xf32, #tpu.memory_space<vmem>>, %arg5: memref<256x1xf32, #tpu.memory_space<vmem>>) attributes {dimension_semantics = [#tpu.dimension_semantics<parallel>], iteration_bounds = array<i64: 2>, scalar_prefetch = 0 : i64, scratch_operands = 0 : i64, tpu.core_type = #tpu.core_type<tc>, window_params = [{transform_indices = @transform_0, window_bounds = array<i64: 256, 128>}, {pipeline_mode = #tpu.pipeline_mode<synchronous>, transform_indices = @transform_1, window_bounds = array<i64: 128, 1>}, {pipeline_mode = #tpu.pipeline_mode<synchronous>, transform_indices = @transform_2, window_bounds = array<i64: 1, 1>}, {transform_indices = @transform_3, window_bounds = array<i64: 256, 1>}, {transform_indices = @transform_4, window_bounds = array<i64: 256, 1>}]} {
    %c0 = arith.constant 0 : index
    %c0_0 = arith.constant 0 : index
    %0 = vector.load %arg1[%c0, %c0_0] : memref<256x128xbf16, #tpu.memory_space<vmem>>, vector<256x128xbf16>
    %c0_1 = arith.constant 0 : index
    %c0_2 = arith.constant 0 : index
    %1 = vector.load %arg2[%c0_1, %c0_2] : memref<128x1xbf16, #tpu.memory_space<vmem>>, vector<128x1xbf16>
    %cst = arith.constant dense<0.000000e+00> : vector<256x1xf32>
    %2 = tpu.matmul %0, %1, %cst {dimension_numbers = #tpu.dot_dimension_numbers<[1], [0], [0], [1], [0, 0, 1, 1], [], []>} : vector<256x128xbf16>, vector<128x1xbf16>, vector<256x1xf32> -> vector<256x1xf32>
    %c0_3 = arith.constant 0 : index
    %c0_4 = arith.constant 0 : index
    %3 = vector.load %arg3[%c0_3, %c0_4] : memref<1x1xf32, #tpu.memory_space<vmem>>, vector<1x1xf32>
    %4 = vector.broadcast %3 : vector<1x1xf32> to vector<256x1xf32>
    %5 = arith.addf %2, %4 : vector<256x1xf32>
    %cst_5 = arith.constant dense<0xFF800000> : vector<1xf32>
    %6 = vector.multi_reduction <maximumf>, %5, %cst_5 [0] : vector<256x1xf32> to vector<1xf32>
    %7 = vector.shape_cast %6 : vector<1xf32> to vector<1x1xf32>
    %8 = tpu.reciprocal %7 {approx = true} : vector<1x1xf32> -> vector<1x1xf32>
    %cst_6 = arith.constant 0.000000e+00 : f32
    %9 = vector.broadcast %cst_6 : f32 to vector<256x1xf32>
    %10 = arith.maximumf %5, %9 : vector<256x1xf32>
    %11 = vector.broadcast %8 : vector<1x1xf32> to vector<256x1xf32>
    %12 = arith.mulf %10, %11 : vector<256x1xf32>
    %c0_7 = arith.constant 0 : index
    %c0_8 = arith.constant 0 : index
    %13 = vector.load %arg4[%c0_7, %c0_8] : memref<256x1xf32, #tpu.memory_space<vmem>>, vector<256x1xf32>
    %cst_9 = arith.constant 1.000000e+00 : f32
    %14 = vector.broadcast %cst_9 : f32 to vector<256x1xf32>
    %15 = arith.subf %14, %13 : vector<256x1xf32>
    %16 = arith.mulf %12, %15 : vector<256x1xf32>
    %c0_10 = arith.constant 0 : index
    %c0_11 = arith.constant 0 : index
    %17 = vector.load %arg5[%c0_10, %c0_11] : memref<256x1xf32, #tpu.memory_space<vmem>>, vector<256x1xf32>
    tpu.vector_store %arg5[%c0_10, %c0_11], %16 {strides = array<i32>} : memref<256x1xf32, #tpu.memory_space<vmem>>, vector<256x1xf32>,
    return
  }
  func.func @transform_0(%arg0: i32) -> (i32, i32) {
    %c0_i32 = arith.constant 0 : i32
    %c0_i32_0 = arith.constant 0 : i32
    return %arg0, %c0_i32 : i32, i32
  }
  func.func @transform_1(%arg0: i32) -> (i32, i32) {
    %c0_i32 = arith.constant 0 : i32
    %c0_i32_0 = arith.constant 0 : i32
    %c0_i32_1 = arith.constant 0 : i32
    return %c0_i32, %c0_i32_0 : i32, i32
  }
  func.func @transform_2(%arg0: i32) -> (i32, i32) {
    %c0_i32 = arith.constant 0 : i32
    %c0_i32_0 = arith.constant 0 : i32
    %c0_i32_1 = arith.constant 0 : i32
    return %c0_i32, %c0_i32_0 : i32, i32
  }
  func.func @transform_3(%arg0: i32) -> (i32, i32) {
    %c0_i32 = arith.constant 0 : i32
    %c0_i32_0 = arith.constant 0 : i32
    return %arg0, %c0_i32 : i32, i32
  }
  func.func @transform_4(%arg0: i32) -> (i32, i32) {
    %c0_i32 = arith.constant 0 : i32
    %c0_i32_0 = arith.constant 0 : i32
    return %arg0, %c0_i32 : i32, i32
  }
}

</mosaic_0001>

<bundles_post_ra>
// kernel: forward.13
= control target key start
LH: loop header
LB: loop body
LE: loop exit
PB: predicated region body
PF: predicated region fallthrough
CT: control target
= control target key end

     0   :  { %s3842_s12 = smov 0   ;;  %s4980_s0 = inlined_call_operand.vmem [shape: bf16[512,1152], index: 0, kind: input, shape index: {}]   ;;  %s4981_s1 = inlined_call_operand.vmem [shape: bf16[1152,128], index: 1, kind: input, shape index: {}]   ;;  %s4982_s2 = inlined_call_operand.vmem [shape: f32[1,128], index: 2, kind: input, shape index: {}]   ;;  %s4983_s3 = inlined_call_operand.vmem [shape: f32[512,128], index: 3, kind: output, shape index: {}]  }
   0x1 LB: > { %s2759_s13 = sadd.s32 4294967295, %s3820_s12   ;;  %p2763_p0 = scmp.ge.s32.totalorder %s3820_s12, 1  ;;  %s3820_s12 = sphi %s3842_s12, %s13_s12  }
   0x2   : > { %p139_p1 = scmp.lt.s32.totalorder %s3820_s12, 3 }
   0x4   : > { %p140_p2 = pnand %p2763_p0, %p139_p1 }
   0x6   : > { %143 = sbr.rel (%p140_p2) target bundleno = 594 (0x252), region = 32 }
   0xb   : > { %v3532_v0 = vld [vmem:[%s4981_s1 + $0x78] sm:$0xff]   ;;  %s2764_s16 = sshll.u32 %s2759_s13, 5  ;;  %v3534_v2 = vld [vmem:[%s4981_s1 + $0x70] sm:$0xff]   ;;  %v3536_v4 = vld [vmem:[%s4981_s1 + $0x68] sm:$0xff]  }
   0xc   : > { %v3533_v1 = vld [vmem:[%s4981_s1 + $0x38] sm:$0xff]   ;;  %2987 = vmatprep.subr.bf16.mxu0 %v3532_v0  ;;  %3507 = vmatprep.subr.bf16.mxu1 %v3532_v0  ;;  %p165_p3 = scmp.lt.s32.totalorder %s2764_s16, 63  ;;  %v3535_v3 = vld [vmem:[%s4981_s1 + $0x30] sm:$0xff]   ;;  %v3537_v5 = vld [vmem:[%s4981_s1 + $0x28] sm:$0xff]  }
   0xd   : > { %2988 = vmatpush3.bf16.msra.mxu0 %v3533_v1  ;;  %3515 = vmatpush3.bf16.msra.mxu1 %v3533_v1  ;;  %v3538_v6 = vld [vmem:[%s4981_s1 + $0x60] sm:$0xff]   ;;  %v3540_v8 = vld [vmem:[%s4981_s1 + $0x58] sm:$0xff]   ;;  %v3542_v10 = vld [vmem:[%s4981_s1 + $0x50] sm:$0xff]  }
   0xe   : > { %2989 = vmatprep.subr.bf16.mxu0 %v3534_v2  ;;  %3508 = vmatprep.subr.bf16.mxu1 %v3534_v2  ;;  %s5007_s16 = smov (!%p165_p3, %s2764_s16), 63  ;;  %v3539_v7 = vld [vmem:[%s4981_s1 + $0x20] sm:$0xff]   ;;  %v3541_v9 = vld [vmem:[%s4981_s1 + $0x18] sm:$0xff]   ;;  %v3543_v13 = vld [vmem:[%s4981_s1 + $0x10] sm:$0xff]  }
   0xf   : > { %s3523_s29 = smul.u32 36, %s5007_s16  ;;  %v3544_v14 = vld [vmem:[%s4981_s1 + $0x48] sm:$0xff]   ;;  %v3546_v16 = vld [vmem:[%s4981_s1 + $0x40] sm:$0xff]   ;;  %v3554_v18 = vld [vmem:[%s4981_s1 + $0xf8] sm:$0xff]  }
  0x10   : > { %v3545_v15 = vld [vmem:[%s4981_s1 + $0x8] sm:$0xff]   ;;  %v3547_v17 = vld [vmem:[%s4981_s1] sm:$0xff]   ;;  %v3555_v21 = vld [vmem:[%s4981_s1 + $0x178] sm:$0xff]  }
  0x11   : > { %2990 = vmatpush3.bf16.msra.mxu0 %v3535_v3  ;;  %3516 = vmatpush3.bf16.msra.mxu1 %v3535_v3  ;;  %s3883_s9 = scalar_lea.vmem %s4980_s0, %s3523_s29  ;;  %v3556_v22 = vld [vmem:[%s4981_s1 + $0xb8] sm:$0xff]   ;;  %v3558_v24 = vld [vmem:[%s4981_s1 + $0xf0] sm:$0xff]   ;;  %v3566_v32 = vld [vmem:[%s4981_s1 + $0xe8] sm:$0xff]  }
  0x12   : > { %2991 = vmatprep.subr.bf16.mxu0 %v3536_v4  ;;  %3509 = vmatprep.subr.bf16.mxu1 %v3536_v4  ;;  %v3550_v11 = vld [vmem:[%s3883_s9 + $0x4] ss:$36 sps:$4 sm:$0xff]   ;;  %v3557_v23 = vld [vmem:[%s4981_s1 + $0x138] sm:$0xff]   ;;  %v3560_v25 = vld [vmem:[%s3883_s9 + $0x4c] ss:$36 sps:$4 sm:$0xff]  }
  0x13   : > { %v3553_v12 = vld [vmem:[%s3883_s9 + $0x364] ss:$36 sps:$4 sm:$0xff]   ;;  %1689 = vmatprep.mubr.bf16.mxu0 %v3550_v11  ;;  %v3562_v26 = vld [vmem:[%s3883_s9 + $0x3ac] ss:$36 sps:$4 sm:$0xff]   ;;  %v3572_v35 = vld [vmem:[%s3883_s9 + $0x94] ss:$36 sps:$4 sm:$0xff]  }
  0x14   : > { %1785 = vmatprep.mubr.bf16.mxu1 %v3553_v12  ;;  %v3548_v19 = vld [vmem:[%s3883_s9] ss:$36 sps:$4 sm:$0xff]   ;;  %v3569_v27 = vld [vmem:[%s4981_s1 + $0x170] sm:$0xff]   ;;  %v3564_v30 = vld [vmem:[%s3883_s9 + $0x48] ss:$36 sps:$4 sm:$0xff]  }
  0x15   : > { %2992 = vmatpush3.bf16.msra.mxu0 %v3537_v5  ;;  %3517 = vmatpush3.bf16.msra.mxu1 %v3537_v5  ;;  %v3551_v20 = vld [vmem:[%s3883_s9 + $0x360] ss:$36 sps:$4 sm:$0xff]   ;;  %v3559_v28 = vld [vmem:[%s4981_s1 + $0xb0] sm:$0xff]   ;;  %v3565_v31 = vld [vmem:[%s3883_s9 + $0x3a8] ss:$36 sps:$4 sm:$0xff]  }
  0x16   : > { %2993 = vmatprep.subr.bf16.mxu0 %v3538_v6  ;;  %3510 = vmatprep.subr.bf16.mxu1 %v3538_v6  ;;  %v3571_v29 = vld [vmem:[%s4981_s1 + $0x130] sm:$0xff]   ;;  %v3567_v33 = vld [vmem:[%s4981_s1 + $0xa8] sm:$0xff]   ;;  %v3568_v34 = vld [vmem:[%s4981_s1 + $0xe0] sm:$0xff]  }
  0x17   : > { %v3574_v36 = vld [vmem:[%s3883_s9 + $0x3f4] ss:$36 sps:$4 sm:$0xff]   ;;  %v3570_v37 = vld [vmem:[%s4981_s1 + $0xa0] sm:$0xff]   ;;  %v3589_v41 = vld [vmem:[%s4981_s1 + $0x168] sm:$0xff]  }
  0x18   : > { %v3578_v38 = vld [vmem:[%s4981_s1 + $0xd8] sm:$0xff]   ;;  %v3576_v39 = vld [vmem:[%s3883_s9 + $0x90] ss:$36 sps:$4 sm:$0xff]   ;;  %v3591_v44 = vld [vmem:[%s4981_s1 + $0x128] sm:$0xff]  }
  0x19   : > { %2994 = vmatpush3.bf16.msra.mxu0 %v3539_v7  ;;  %3518 = vmatpush3.bf16.msra.mxu1 %v3539_v7  ;;  %v3577_v40 = vld [vmem:[%s3883_s9 + $0x3f0] ss:$36 sps:$4 sm:$0xff]   ;;  %v3579_v42 = vld [vmem:[%s4981_s1 + $0x98] sm:$0xff]   ;;  %v3588_v50 = vld [vmem:[%s4981_s1 + $0xc8] sm:$0xff]  }
  0x1a   : > { %2995 = vmatprep.subr.bf16.mxu0 %v3540_v8  ;;  %3511 = vmatprep.subr.bf16.mxu1 %v3540_v8  ;;  %v3580_v43 = vld [vmem:[%s4981_s1 + $0xd0] sm:$0xff]   ;;  %v3582_v45 = vld [vmem:[%s3883_s9 + $0xdc] ss:$36 sps:$4 sm:$0xff]   ;;  %v3590_v51 = vld [vmem:[%s4981_s1 + $0x88] sm:$0xff]  }
  0x1b   : > { %v3584_v46 = vld [vmem:[%s3883_s9 + $0x43c] ss:$36 sps:$4 sm:$0xff]   ;;  %v3581_v47 = vld [vmem:[%s4981_s1 + $0x90] sm:$0xff]   ;;  %v3594_v52 = vld [vmem:[%s3883_s9 + $0x124] ss:$36 sps:$4 sm:$0xff]  }
  0x1c   : > { %v3586_v48 = vld [vmem:[%s3883_s9 + $0xd8] ss:$36 sps:$4 sm:$0xff]   ;;  %v3592_v53 = vld [vmem:[%s4981_s1 + $0xc0] sm:$0xff]   ;;  %v3598_v56 = vld [vmem:[%s3883_s9 + $0xc] ss:$36 sps:$4 sm:$0xff]  }
  0x1d   : > { %2996 = vmatpush3.bf16.msra.mxu0 %v3541_v9  ;;  %3519 = vmatpush3.bf16.msra.mxu1 %v3541_v9  ;;  %v3587_v49 = vld [vmem:[%s3883_s9 + $0x438] ss:$36 sps:$4 sm:$0xff]   ;;  %v3602_v54 = vld [vmem:[%s4981_s1 + $0x160] sm:$0xff]   ;;  %v3596_v58 = vld [vmem:[%s3883_s9 + $0x8] ss:$36 sps:$4 sm:$0xff]  }
  0x1e   : > { %2997 = vmatprep.subr.bf16.mxu0 %v3542_v10  ;;  %3512 = vmatprep.subr.bf16.mxu1 %v3542_v10  ;;  %v3603_v55 = vld [vmem:[%s4981_s1 + $0x120] sm:$0xff]   ;;  %v3600_v60 = vld [vmem:[%s4981_s1 + $0x1f8] sm:$0xff]   ;;  %v3604_v62 = vld [vmem:[%s3883_s9 + $0x16c] ss:$36 sps:$4 sm:$0xff]  }
  0x1f   : > { %v3593_v57 = vld [vmem:[%s4981_s1 + $0x80] sm:$0xff]   ;;  %v3601_v61 = vld [vmem:[%s4981_s1 + $0x1b8] sm:$0xff]   ;;  %v3617_v2 = vld [vmem:[%s4981_s1 + $0x1f0] sm:$0xff]  }
  0x20   : > { %v3599_v59 = vld [vmem:[%s3883_s9 + $0x120] ss:$36 sps:$4 sm:$0xff]   ;;  %v3616_v63 = vld [vmem:[%s4981_s1 + $0x158] sm:$0xff]   ;;  %v3619_v3 = vld [vmem:[%s4981_s1 + $0x1b0] sm:$0xff]  }
  0x21   : > { %2998 = vmatpush3.bf16.msra.mxu0 %v3543_v13  ;;  %3520 = vmatpush3.bf16.msra.mxu1 %v3543_v13  ;;  %v3606_v0 = vld [vmem:[%s3883_s9 + $0x54] ss:$36 sps:$4 sm:$0xff]   ;;  %v3608_v4 = vld [vmem:[%s3883_s9 + $0x168] ss:$36 sps:$4 sm:$0xff]   ;;  %v3612_v9 = vld [vmem:[%s3883_s9 + $0x9c] ss:$36 sps:$4 sm:$0xff]  }
  0x22   : > { %2999 = vmatprep.subr.bf16.mxu0 %v3544_v14  ;;  %3513 = vmatprep.subr.bf16.mxu1 %v3544_v14  ;;  %v3618_v1 = vld [vmem:[%s4981_s1 + $0x118] sm:$0xff]   ;;  %v3626_v5 = vld [vmem:[%s4981_s1 + $0x150] sm:$0xff]   ;;  %v3634_v10 = vld [vmem:[%s4981_s1 + $0x1e8] sm:$0xff]  }
  0x23   : > { %v3627_v6 = vld [vmem:[%s4981_s1 + $0x110] sm:$0xff]   ;;  %v3635_v11 = vld [vmem:[%s4981_s1 + $0x1a8] sm:$0xff]   ;;  %v3615_v13 = vld [vmem:[%s3883_s9 + $0x98] ss:$36 sps:$4 sm:$0xff]  }
  0x24   : > { %v3609_v7 = vld [vmem:[%s3883_s9 + $0x50] ss:$36 sps:$4 sm:$0xff]   ;;  %v3620_v14 = vld [vmem:[%s3883_s9 + $0x1fc] ss:$36 sps:$4 sm:$0xff]  }
  0x25   : > { %3000 = vmatpush3.bf16.msra.mxu0 %v3545_v15  ;;  %3521 = vmatpush3.bf16.msra.mxu1 %v3545_v15  ;;  %v3610_v8 = vld [vmem:[%s3883_s9 + $0x1b4] ss:$36 sps:$4 sm:$0xff]   ;;  %v3642_v15 = vld [vmem:[%s4981_s1 + $0x148] sm:$0xff]  }
  0x26   : > { %3001 = vmatprep.subr.bf16.mxu0 %v3546_v16  ;;  %3514 = vmatprep.subr.bf16.mxu1 %v3546_v16  ;;  %v3614_v12 = vld [vmem:[%s3883_s9 + $0x1b0] ss:$36 sps:$4 sm:$0xff]   ;;  %v3643_v16 = vld [vmem:[%s4981_s1 + $0x108] sm:$0xff]  }
  0x29   : > { %3002 = vmatpush3.bf16.msra.mxu0 %v3547_v17  ;;  %3522 = vmatpush3.bf16.msra.mxu1 %v3547_v17  ;;  %v3622_v17 = vld [vmem:[%s3883_s9 + $0xe4] ss:$36 sps:$4 sm:$0xff]  }
  0x2a   : > { %3099 = vmatprep.subr.bf16.mxu1 %v3554_v18  ;;  %3211 = vmatprep.subr.bf16.mxu0 %v3555_v21  ;;  %v3650_v18 = vld [vmem:[%s4981_s1 + $0x1e0] sm:$0xff]  }
  0x2b   : > { %v3652_v21 = vld [vmem:[%s4981_s1 + $0x140] sm:$0xff]  }
  0x2c   : > { %1690 = vmatmul.mubr.bf16.vlgmr.msra.gmra.mxu0 %v3548_v19  ;;  %1786 = vmatmul.mubr.bf16.vlgmr.msra.gmra.mxu1 %v3551_v20  ;;  %v3651_v19 = vld [vmem:[%s4981_s1 + $0x1a0] sm:$0xff]   ;;  %v3624_v20 = vld [vmem:[%s3883_s9 + $0x1f8] ss:$36 sps:$4 sm:$0xff]  }
  0x2d   : > { %3100 = vmatpush3.bf16.msra.mxu1 %v3556_v22  ;;  %3212 = vmatpush3.bf16.msra.mxu0 %v3557_v23  ;;  %v3653_v22 = vld [vmem:[%s4981_s1 + $0x100] sm:$0xff]  }
  0x2e   : > { %3101 = vmatprep.subr.bf16.mxu1 %v3558_v24  ;;  %1697 = vmatprep.mubr.bf16.mxu0 %v3560_v25  ;;  %v3625_v23 = vld [vmem:[%s3883_s9 + $0xe0] ss:$36 sps:$4 sm:$0xff]   ;;  %v3630_v25 = vld [vmem:[%s3883_s9 + $0x12c] ss:$36 sps:$4 sm:$0xff]  }
  0x2f   : > { %1793 = vmatprep.mubr.bf16.mxu1 %v3562_v26  ;;  %3213 = vmatprep.subr.bf16.mxu0 %v3569_v27  ;;  %v3628_v24 = vld [vmem:[%s3883_s9 + $0x244] ss:$36 sps:$4 sm:$0xff]   ;;  %v3666_v26 = vld [vmem:[%s4981_s1 + $0x1d8] sm:$0xff]  }
  0x30   : > { %v3632_v27 = vld [vmem:[%s3883_s9 + $0x240] ss:$36 sps:$4 sm:$0xff]  }
  0x31   : > { %3102 = vmatpush3.bf16.msra.mxu1 %v3559_v28  ;;  %3214 = vmatpush3.bf16.msra.mxu0 %v3571_v29  ;;  %v3667_v28 = vld [vmem:[%s4981_s1 + $0x238] sm:$0xff]  }
  0x32   : > { %3103 = vmatprep.subr.bf16.mxu1 %v3566_v32  ;;  %3215 = vmatprep.subr.bf16.mxu0 %v3589_v41  ;;  %v3668_v29 = vld [vmem:[%s4981_s1 + $0x198] sm:$0xff]   ;;  %v3696_v41 = vld [vmem:[%s4981_s1 + $0x1c8] sm:$0xff]  }
  0x33   : > { %v3638_v32 = vld [vmem:[%s3883_s9 + $0x174] ss:$36 sps:$4 sm:$0xff]  }
  0x34   : > { %1698 = vmatmul.mubr.bf16.gmra.mxu0 %v3564_v30  ;;  %1794 = vmatmul.mubr.bf16.gmra.mxu1 %v3565_v31  ;;  %v3633_v30 = vld [vmem:[%s3883_s9 + $0x128] ss:$36 sps:$4 sm:$0xff]  }
  0x35   : > { %3104 = vmatpush3.bf16.msra.mxu1 %v3567_v33  ;;  %1705 = vmatprep.mubr.bf16.mxu0 %v3572_v35  ;;  %v3636_v31 = vld [vmem:[%s3883_s9 + $0x28c] ss:$36 sps:$4 sm:$0xff]  }
  0x36   : > { %3105 = vmatprep.subr.bf16.mxu1 %v3568_v34  ;;  %1801 = vmatprep.mubr.bf16.mxu1 %v3574_v36  ;;  %v3681_v33 = vld [vmem:[%s4981_s1 + $0x1d0] sm:$0xff]   ;;  %v3640_v34 = vld [vmem:[%s3883_s9 + $0x288] ss:$36 sps:$4 sm:$0xff]  }
  0x37   : > { %3216 = vmatpush3.bf16.msra.mxu0 %v3591_v44  ;;  %v3641_v35 = vld [vmem:[%s3883_s9 + $0x170] ss:$36 sps:$4 sm:$0xff]   ;;  %v3656_v44 = vld [vmem:[%s3883_s9 + $0x204] ss:$36 sps:$4 sm:$0xff]  }
  0x38   : > { %3217 = vmatprep.subr.bf16.mxu0 %v3602_v54  ;;  %v3683_v36 = vld [vmem:[%s4981_s1 + $0x190] sm:$0xff]   ;;  %v3671_v54 = vld [vmem:[%s3883_s9 + $0x5c] ss:$36 sps:$4 sm:$0xff]  }
  0x39   : > { %3106 = vmatpush3.bf16.msra.mxu1 %v3570_v37  ;;  %v3644_v37 = vld [vmem:[%s3883_s9 + $0x2d4] ss:$36 sps:$4 sm:$0xff]  }
  0x3a   : > { %3107 = vmatprep.subr.bf16.mxu1 %v3578_v38  ;;  %v3646_v38 = vld [vmem:[%s3883_s9 + $0x1bc] ss:$36 sps:$4 sm:$0xff]  }
  0x3b   : > { %3218 = vmatpush3.bf16.msra.mxu0 %v3603_v55  ;;  %v3682_v55 = vld [vmem:[%s4981_s1 + $0x230] sm:$0xff]  }
  0x3c   : > { %1706 = vmatmul.mubr.bf16.gmra.mxu0 %v3576_v39  ;;  %1802 = vmatmul.mubr.bf16.gmra.mxu1 %v3577_v40  ;;  %v3648_v39 = vld [vmem:[%s3883_s9 + $0x2d0] ss:$36 sps:$4 sm:$0xff]   ;;  %v3649_v40 = vld [vmem:[%s3883_s9 + $0x1b8] ss:$36 sps:$4 sm:$0xff]  }
  0x3d   : > { %3108 = vmatpush3.bf16.msra.mxu1 %v3579_v42  ;;  %1713 = vmatprep.mubr.bf16.mxu0 %v3582_v45  ;;  %v3654_v42 = vld [vmem:[%s3883_s9 + $0x31c] ss:$36 sps:$4 sm:$0xff]  }
  0x3e   : > { %3109 = vmatprep.subr.bf16.mxu1 %v3580_v43  ;;  %1809 = vmatprep.mubr.bf16.mxu1 %v3584_v46  ;;  %v3698_v43 = vld [vmem:[%s4981_s1 + $0x188] sm:$0xff]   ;;  %v3658_v45 = vld [vmem:[%s3883_s9 + $0x318] ss:$36 sps:$4 sm:$0xff]   ;;  %v3659_v46 = vld [vmem:[%s3883_s9 + $0x200] ss:$36 sps:$4 sm:$0xff]  }
  0x3f   : > { %3219 = vmatprep.subr.bf16.mxu0 %v3616_v63  ;;  %v3726_v63 = vld [vmem:[%s4981_s1 + $0x218] sm:$0xff]  }
  0x40   : > { %3220 = vmatpush3.bf16.msra.mxu0 %v3618_v1  ;;  %v3684_v1 = vld [vmem:[%s3883_s9 + $0x324] ss:$36 sps:$4 sm:$0xff]  }
  0x41   : > { %3110 = vmatpush3.bf16.msra.mxu1 %v3581_v47  ;;  %3221 = vmatprep.subr.bf16.mxu0 %v3626_v5  ;;  %v3711_v47 = vld [vmem:[%s4981_s1 + $0x1c0] sm:$0xff]   ;;  %v3752_v5 = vld [vmem:[%s4981_s1 + $0x208] sm:$0xff]  }
  0x42   : > { %3111 = vmatprep.subr.bf16.mxu1 %v3588_v50  ;;  %v3664_v50 = vld [vmem:[%s3883_s9 + $0x14] ss:$36 sps:$4 sm:$0xff]  }
  0x44   : > { %1714 = vmatmul.mubr.bf16.gmra.mxu0 %v3586_v48  ;;  %1810 = vmatmul.mubr.bf16.gmra.mxu1 %v3587_v49  ;;  %v3660_v48 = vld [vmem:[%s3883_s9 + $0x24c] ss:$36 sps:$4 sm:$0xff]   ;;  %v3713_v49 = vld [vmem:[%s4981_s1 + $0x180] sm:$0xff]  }
  0x45   : > { %3112 = vmatpush3.bf16.msra.mxu1 %v3590_v51  ;;  %1721 = vmatprep.mubr.bf16.mxu0 %v3594_v52  ;;  %v3662_v51 = vld [vmem:[%s3883_s9 + $0x10] ss:$36 sps:$4 sm:$0xff]   ;;  %v3665_v52 = vld [vmem:[%s3883_s9 + $0x248] ss:$36 sps:$4 sm:$0xff]  }
  0x46   : > { %3113 = vmatprep.subr.bf16.mxu1 %v3592_v53  ;;  %1850 = vmatprep.mubr.bf16.mxu1 %v3598_v56  ;;  %v3669_v53 = vld [vmem:[%s3883_s9 + $0x294] ss:$36 sps:$4 sm:$0xff]   ;;  %v3697_v56 = vld [vmem:[%s4981_s1 + $0x228] sm:$0xff]  }
  0x47   : > { %3222 = vmatpush3.bf16.msra.mxu0 %v3627_v6  ;;  %v3689_v6 = vld [vmem:[%s3883_s9 + $0xe8] ss:$36 sps:$4 sm:$0xff]  }
  0x48   : > { %3223 = vmatprep.subr.bf16.mxu0 %v3642_v15  ;;  %v3704_v15 = vld [vmem:[%s3883_s9 + $0x178] ss:$36 sps:$4 sm:$0xff]  }
  0x49   : > { %3114 = vmatpush3.bf16.msra.mxu1 %v3593_v57  ;;  %v3673_v57 = vld [vmem:[%s3883_s9 + $0x290] ss:$36 sps:$4 sm:$0xff]  }
  0x4a   : > { %3323 = vmatprep.subr.bf16.mxu1 %v3600_v60  ;;  %v3677_v60 = vld [vmem:[%s3883_s9 + $0xa4] ss:$36 sps:$4 sm:$0xff]  }
  0x4b   : > { %3224 = vmatpush3.bf16.msra.mxu0 %v3643_v16  ;;  %v3705_v16 = vld [vmem:[%s3883_s9 + $0x3fc] ss:$36 sps:$4 sm:$0xff]  }
  0x4c   : > { %1722 = vmatmul.mubr.bf16.gmra.mxu0 %v3599_v59  ;;  %1851 = vmatmul.mubr.bf16.vlgmr.msra.gmra.mxu1 %v3596_v58  ;;  %v3674_v58 = vld [vmem:[%s3883_s9 + $0x58] ss:$36 sps:$4 sm:$0xff]  }
  0x4d   : > { %3324 = vmatpush3.bf16.msra.mxu1 %v3601_v61  ;;  %1729 = vmatprep.mubr.bf16.mxu0 %v3604_v62  ;;  %v3675_v59 = vld [vmem:[%s3883_s9 + $0x2dc] ss:$36 sps:$4 sm:$0xff]  }
  0x4e   : > { %1858 = vmatprep.mubr.bf16.mxu1 %v3606_v0  ;;  %3325 = vmatprep.subr.bf16.mxu1 %v3617_v2  ;;  %v3712_v61 = vld [vmem:[%s4981_s1 + $0x220] sm:$0xff]   ;;  %v3679_v62 = vld [vmem:[%s3883_s9 + $0x2d8] ss:$36 sps:$4 sm:$0xff]   ;;  %v3686_v2 = vld [vmem:[%s3883_s9 + $0xec] ss:$36 sps:$4 sm:$0xff]  }
  0x4f   : > { %3225 = vmatprep.subr.bf16.mxu0 %v3652_v21  ;;  %v3680_v0 = vld [vmem:[%s3883_s9 + $0xa0] ss:$36 sps:$4 sm:$0xff]   ;;  %v3716_v21 = vld [vmem:[%s3883_s9 + $0x20c] ss:$36 sps:$4 sm:$0xff]  }
  0x50   : > { %3226 = vmatpush3.bf16.msra.mxu0 %v3653_v22  ;;  %v3718_v22 = vld [vmem:[%s3883_s9 + $0x440] ss:$36 sps:$4 sm:$0xff]  }
  0x51   : > { %3326 = vmatpush3.bf16.msra.mxu1 %v3619_v3  ;;  %3459 = vmatprep.subr.bf16.mxu0 %v3667_v28  ;;  %v3739_v3 = vld [vmem:[%s4981_s1 + $0x210] sm:$0xff]  }
  0x52   : > { %3327 = vmatprep.subr.bf16.mxu1 %v3634_v10  ;;  %v3694_v10 = vld [vmem:[%s3883_s9 + $0x368] ss:$36 sps:$4 sm:$0xff]  }
  0x54   : > { %1730 = vmatmul.mubr.bf16.gmra.mxu0 %v3608_v4  ;;  %1859 = vmatmul.mubr.bf16.gmra.mxu1 %v3609_v7  ;;  %v3688_v4 = vld [vmem:[%s3883_s9 + $0x320] ss:$36 sps:$4 sm:$0xff]   ;;  %v3690_v7 = vld [vmem:[%s3883_s9 + $0x36c] ss:$36 sps:$4 sm:$0xff]  }
  0x55   : > { %1737 = vmatprep.mubr.bf16.mxu0 %v3610_v8  ;;  %1866 = vmatprep.mubr.bf16.mxu1 %v3612_v9  ;;  %v3692_v8 = vld [vmem:[%s3883_s9 + $0x134] ss:$36 sps:$4 sm:$0xff]   ;;  %v3765_v9 = vld [vmem:[%s4981_s1 + $0x200] sm:$0xff]  }
  0x56   : > { %3328 = vmatpush3.bf16.msra.mxu1 %v3635_v11  ;;  %v3695_v11 = vld [vmem:[%s3883_s9 + $0x130] ss:$36 sps:$4 sm:$0xff]  }
  0x57   : > { %3329 = vmatprep.subr.bf16.mxu1 %v3650_v18  ;;  %v3709_v18 = vld [vmem:[%s3883_s9 + $0x3f8] ss:$36 sps:$4 sm:$0xff]  }
  0x5a   : > { %3330 = vmatpush3.bf16.msra.mxu1 %v3651_v19  ;;  %v3710_v19 = vld [vmem:[%s3883_s9 + $0x1c0] ss:$36 sps:$4 sm:$0xff]  }
  0x5b   : > { %3331 = vmatprep.subr.bf16.mxu1 %v3666_v26  ;;  %v3722_v26 = vld [vmem:[%s3883_s9 + $0x18] ss:$36 sps:$4 sm:$0xff]  }
  0x5c   : > { %1738 = vmatmul.mubr.bf16.gmra.mxu0 %v3614_v12  ;;  %1867 = vmatmul.mubr.bf16.gmra.mxu1 %v3615_v13  ;;  %v3699_v12 = vld [vmem:[%s3883_s9 + $0x3b4] ss:$36 sps:$4 sm:$0xff]   ;;  %v3701_v13 = vld [vmem:[%s3883_s9 + $0x17c] ss:$36 sps:$4 sm:$0xff]  }
  0x5d   : > { %1745 = vmatprep.mubr.bf16.mxu0 %v3620_v14  ;;  %1874 = vmatprep.mubr.bf16.mxu1 %v3622_v17  ;;  %v3703_v14 = vld [vmem:[%s3883_s9 + $0x3b0] ss:$36 sps:$4 sm:$0xff]   ;;  %v3707_v17 = vld [vmem:[%s3883_s9 + $0x1c4] ss:$36 sps:$4 sm:$0xff]  }
  0x5e   : > { %3332 = vmatpush3.bf16.msra.mxu1 %v3668_v29  ;;  %v3729_v29 = vld [vmem:[%s3883_s9 + $0x64] ss:$36 sps:$4 sm:$0xff]  }
  0x5f   : > { %3333 = vmatprep.subr.bf16.mxu1 %v3681_v33  ;;  %v3735_v33 = vld [vmem:[%s3883_s9 + $0xac] ss:$36 sps:$4 sm:$0xff]  }
  0x62   : > { %3334 = vmatpush3.bf16.msra.mxu1 %v3683_v36  ;;  %v3740_v36 = vld [vmem:[%s3883_s9 + $0x32c] ss:$36 sps:$4 sm:$0xff]  }
  0x63   : > { %3335 = vmatprep.subr.bf16.mxu1 %v3696_v41  ;;  %v3748_v41 = vld [vmem:[%s3883_s9 + $0x13c] ss:$36 sps:$4 sm:$0xff]  }
  0x64   : > { %1746 = vmatmul.mubr.bf16.gmra.mxu0 %v3624_v20  ;;  %1875 = vmatmul.mubr.bf16.gmra.mxu1 %v3625_v23  ;;  %v3714_v20 = vld [vmem:[%s3883_s9 + $0x444] ss:$36 sps:$4 sm:$0xff]  }
  0x65   : > { %1753 = vmatprep.mubr.bf16.mxu0 %v3628_v24  ;;  %1882 = vmatprep.mubr.bf16.mxu1 %v3630_v25  ;;  %v3719_v23 = vld [vmem:[%s3883_s9 + $0x208] ss:$36 sps:$4 sm:$0xff]   ;;  %v3720_v24 = vld [vmem:[%s3883_s9 + $0x254] ss:$36 sps:$4 sm:$0xff]   ;;  %v3724_v25 = vld [vmem:[%s3883_s9 + $0x1c] ss:$36 sps:$4 sm:$0xff]  }
  0x66   : > { %3336 = vmatpush3.bf16.msra.mxu1 %v3698_v43  ;;  %v3751_v43 = vld [vmem:[%s3883_s9 + $0x138] ss:$36 sps:$4 sm:$0xff]  }
  0x67   : > { %3337 = vmatprep.subr.bf16.mxu1 %v3711_v47 }
  0x6a   : > { %3338 = vmatpush3.bf16.msra.mxu1 %v3713_v49 }
  0x6c   : > { %1754 = vmatmul.mubr.bf16.gmra.mxu0 %v3632_v27  ;;  %1883 = vmatmul.mubr.bf16.gmra.mxu1 %v3633_v30  ;;  %v3725_v27 = vld [vmem:[%s3883_s9 + $0x250] ss:$36 sps:$4 sm:$0xff]   ;;  %v3731_v30 = vld [vmem:[%s3883_s9 + $0x298] ss:$36 sps:$4 sm:$0xff]  }
  0x6d   : > { %1761 = vmatprep.mubr.bf16.mxu0 %v3636_v31  ;;  %1890 = vmatprep.mubr.bf16.mxu1 %v3638_v32  ;;  %v3732_v31 = vld [vmem:[%s3883_s9 + $0x60] ss:$36 sps:$4 sm:$0xff]  }
  0x6e   : > { %v3733_v32 = vld [vmem:[%s3883_s9 + $0x2e4] ss:$36 sps:$4 sm:$0xff]  }
  0x74   : > { %1762 = vmatmul.mubr.bf16.gmra.mxu0 %v3640_v34  ;;  %1891 = vmatmul.mubr.bf16.gmra.mxu1 %v3641_v35  ;;  %v3737_v34 = vld [vmem:[%s3883_s9 + $0x2e0] ss:$36 sps:$4 sm:$0xff]   ;;  %v3738_v35 = vld [vmem:[%s3883_s9 + $0xa8] ss:$36 sps:$4 sm:$0xff]  }
  0x75   : > { %1769 = vmatprep.mubr.bf16.mxu0 %v3644_v37  ;;  %1898 = vmatprep.mubr.bf16.mxu1 %v3646_v38  ;;  %v3742_v37 = vld [vmem:[%s3883_s9 + $0xf4] ss:$36 sps:$4 sm:$0xff]   ;;  %v3744_v38 = vld [vmem:[%s3883_s9 + $0x328] ss:$36 sps:$4 sm:$0xff]  }
  0x7c   : > { %1770 = vmatmul.mubr.bf16.gmra.mxu0 %v3648_v39  ;;  %1899 = vmatmul.mubr.bf16.gmra.mxu1 %v3649_v40  ;;  %v3745_v39 = vld [vmem:[%s3883_s9 + $0xf0] ss:$36 sps:$4 sm:$0xff]  }
  0x7d   : > { %1777 = vmatprep.mubr.bf16.mxu0 %v3654_v42  ;;  %1906 = vmatprep.mubr.bf16.mxu1 %v3656_v44  ;;  %v3746_v40 = vld [vmem:[%s3883_s9 + $0x374] ss:$36 sps:$4 sm:$0xff]   ;;  %v3753_v44 = vld [vmem:[%s3883_s9 + $0x3bc] ss:$36 sps:$4 sm:$0xff]  }
  0x7e   : > { %v3750_v42 = vld [vmem:[%s3883_s9 + $0x370] ss:$36 sps:$4 sm:$0xff]  }
  0x84   : > { %1778 = vmatmul.mubr.bf16.gmra.mxu0 %v3658_v45  ;;  %1907 = vmatmul.mubr.bf16.gmra.mxu1 %v3659_v46  ;;  %v3755_v45 = vld [vmem:[%s3883_s9 + $0x184] ss:$36 sps:$4 sm:$0xff]  }
  0x85   : > { %1914 = vmatprep.mubr.bf16.mxu1 %v3660_v48  ;;  %2011 = vmatprep.mubr.bf16.mxu0 %v3664_v50 }
  0x8c   : > { %1915 = vmatmul.mubr.bf16.gmra.mxu1 %v3665_v52  ;;  %2012 = vmatmul.mubr.bf16.vlgmr.msra.gmra.mxu0 %v3662_v51 }
  0x8d   : > { %3460 = vmatpush3.bf16.msra.mxu0 %v3667_v28  ;;  %1922 = vmatprep.mubr.bf16.mxu1 %v3669_v53  ;;  %v3727_v28 = vld [vmem:[%s3883_s9 + $0x29c] ss:$36 sps:$4 sm:$0xff]  }
  0x8e   : > { %2019 = vmatprep.mubr.bf16.mxu0 %v3671_v54  ;;  %3461 = vmatprep.subr.bf16.mxu0 %v3682_v55  ;;  %v3757_v54 = vld [vmem:[%s3883_s9 + $0x3b8] ss:$36 sps:$4 sm:$0xff]  }
  0x91   : > { %3462 = vmatpush3.bf16.msra.mxu0 %v3682_v55  ;;  %v3758_v55 = vld [vmem:[%s3883_s9 + $0x180] ss:$36 sps:$4 sm:$0xff]  }
  0x92   : > { %3463 = vmatprep.subr.bf16.mxu0 %v3697_v56 }
  0x94   : > { %1923 = vmatmul.mubr.bf16.gmra.mxu1 %v3673_v57  ;;  %2020 = vmatmul.mubr.bf16.gmra.mxu0 %v3674_v58  ;;  %v3761_v57 = vld [vmem:[%s3883_s9 + $0x1cc] ss:$36 sps:$4 sm:$0xff]  }
  0x95   : > { %1930 = vmatprep.mubr.bf16.mxu1 %v3675_v59  ;;  %2027 = vmatprep.mubr.bf16.mxu0 %v3677_v60 }
  0x96   : > { %3464 = vmatpush3.bf16.msra.mxu0 %v3697_v56  ;;  %v3759_v56 = vld [vmem:[%s3883_s9 + $0x404] ss:$36 sps:$4 sm:$0xff]  }
  0x97   : > { %3465 = vmatprep.subr.bf16.mxu0 %v3712_v61 }
  0x9a   : > { %3466 = vmatpush3.bf16.msra.mxu0 %v3712_v61 }
  0x9b   : > { %3467 = vmatprep.subr.bf16.mxu0 %v3726_v63 }
  0x9c   : > { %1931 = vmatmul.mubr.bf16.gmra.mxu1 %v3679_v62  ;;  %2028 = vmatmul.mubr.bf16.gmra.mxu0 %v3680_v0 }
  0x9d   : > { %1938 = vmatprep.mubr.bf16.mxu1 %v3684_v1  ;;  %2035 = vmatprep.mubr.bf16.mxu0 %v3686_v2 }
  0x9e   : > { %3468 = vmatpush3.bf16.msra.mxu0 %v3726_v63 }
  0x9f   : > { %3469 = vmatprep.subr.bf16.mxu0 %v3739_v3 }
  0xa2   : > { %3470 = vmatpush3.bf16.msra.mxu0 %v3739_v3 }
  0xa3   : > { %3471 = vmatprep.subr.bf16.mxu0 %v3752_v5 }
  0xa4   : > { %1939 = vmatmul.mubr.bf16.gmra.mxu1 %v3688_v4  ;;  %2036 = vmatmul.mubr.bf16.gmra.mxu0 %v3689_v6  ;;  %v3763_v6 = vld [vmem:[%s3883_s9 + $0x400] ss:$36 sps:$4 sm:$0xff]  }
  0xa5   : > { %1946 = vmatprep.mubr.bf16.mxu1 %v3690_v7  ;;  %2043 = vmatprep.mubr.bf16.mxu0 %v3692_v8  ;;  %v3764_v7 = vld [vmem:[%s3883_s9 + $0x1c8] ss:$36 sps:$4 sm:$0xff]  }
  0xa6   : > { %3472 = vmatpush3.bf16.msra.mxu0 %v3752_v5  ;;  %v3766_v8 = vld [vmem:[%s3883_s9 + $0x44c] ss:$36 sps:$4 sm:$0xff]  }
  0xa7   : > { %3473 = vmatprep.subr.bf16.mxu0 %v3765_v9 }
  0xaa   : > { %3474 = vmatpush3.bf16.msra.mxu0 %v3765_v9  ;;  %v3768_v9 = vld [vmem:[%s3883_s9 + $0x214] ss:$36 sps:$4 sm:$0xff]  }
  0xac   : > { %1947 = vmatmul.mubr.bf16.gmra.mxu1 %v3694_v10  ;;  %2044 = vmatmul.mubr.bf16.gmra.mxu0 %v3695_v11 }
  0xad   : > { %1954 = vmatprep.mubr.bf16.mxu1 %v3699_v12  ;;  %2051 = vmatprep.mubr.bf16.mxu0 %v3701_v13 }
  0xb4   : > { %1955 = vmatmul.mubr.bf16.gmra.mxu1 %v3703_v14  ;;  %2052 = vmatmul.mubr.bf16.gmra.mxu0 %v3704_v15 }
  0xb5   : > { %1962 = vmatprep.mubr.bf16.mxu1 %v3705_v16  ;;  %2059 = vmatprep.mubr.bf16.mxu0 %v3707_v17 }
  0xbc   : > { %1963 = vmatmul.mubr.bf16.gmra.mxu1 %v3709_v18  ;;  %2060 = vmatmul.mubr.bf16.gmra.mxu0 %v3710_v19 }
  0xbd   : > { %1970 = vmatprep.mubr.bf16.mxu1 %v3714_v20  ;;  %2067 = vmatprep.mubr.bf16.mxu0 %v3716_v21 }
  0xc4   : > { %1971 = vmatmul.mubr.bf16.gmra.mxu1 %v3718_v22  ;;  %2068 = vmatmul.mubr.bf16.gmra.mxu0 %v3719_v23  ;;  %v3770_v22 = vld [vmem:[%s3883_s9 + $0x448] ss:$36 sps:$4 sm:$0xff]   ;;  %v3771_v23 = vld [vmem:[%s3883_s9 + $0x210] ss:$36 sps:$4 sm:$0xff]  }
  0xc5   : > { %2075 = vmatprep.mubr.bf16.mxu0 %v3720_v24  ;;  %2172 = vmatprep.mubr.bf16.mxu1 %v3724_v25  ;;  %v3774_v24 = vld [vmem:[%s3883_s9 + $0x25c] ss:$36 sps:$4 sm:$0xff]  }
  0xc6   : > { %v3775_v25 = vld [vmem:[%s3883_s9 + $0x20] ss:$36 sps:$4 sm:$0xff]  }
  0xcc   : > { %2076 = vmatmul.mubr.bf16.gmra.mxu0 %v3725_v27  ;;  %2173 = vmatmul.mubr.bf16.vlgmr.msra.gmra.mxu1 %v3722_v26 }
  0xcd   : > { %2083 = vmatprep.mubr.bf16.mxu0 %v3727_v28  ;;  %2180 = vmatprep.mubr.bf16.mxu1 %v3729_v29 }
  0xd4   : > { %2084 = vmatmul.mubr.bf16.gmra.mxu0 %v3731_v30  ;;  %2181 = vmatmul.mubr.bf16.gmra.mxu1 %v3732_v31 }
  0xd5   : > { %2091 = vmatprep.mubr.bf16.mxu0 %v3733_v32  ;;  %2188 = vmatprep.mubr.bf16.mxu1 %v3735_v33 }
  0xdc   : > { %2092 = vmatmul.mubr.bf16.gmra.mxu0 %v3737_v34  ;;  %2189 = vmatmul.mubr.bf16.gmra.mxu1 %v3738_v35 }
  0xdd   : > { %2099 = vmatprep.mubr.bf16.mxu0 %v3740_v36  ;;  %2196 = vmatprep.mubr.bf16.mxu1 %v3742_v37 }
  0xe4   : > { %2100 = vmatmul.mubr.bf16.gmra.mxu0 %v3744_v38  ;;  %2197 = vmatmul.mubr.bf16.gmra.mxu1 %v3745_v39  ;;  %v3772_v38 = vld [vmem:[%s3883_s9 + $0x258] ss:$36 sps:$4 sm:$0xff]   ;;  %v3776_v39 = vld [vmem:[%s3883_s9 + $0x68] ss:$36 sps:$4 sm:$0xff]  }
  0xe5   : > { %2107 = vmatprep.mubr.bf16.mxu0 %v3746_v40  ;;  %2204 = vmatprep.mubr.bf16.mxu1 %v3748_v41  ;;  %v3779_v40 = vld [vmem:[%s3883_s9 + $0x2a4] ss:$36 sps:$4 sm:$0xff]   ;;  %v3780_v41 = vld [vmem:[%s3883_s9 + $0xb0] ss:$36 sps:$4 sm:$0xff]  }
  0xec   : > { %v3003_v46 = vpop.f32.mrf.mxu0  ;;  %v3075_v47 = vpop.f32.mrf.mxu1  ;;  %2108 = vmatmul.mubr.bf16.gmra.mxu0 %v3750_v42  ;;  %2205 = vmatmul.mubr.bf16.gmra.mxu1 %v3751_v43 }
  0xed   : > { %2115 = vmatprep.mubr.bf16.mxu0 %v3753_v44  ;;  %2212 = vmatprep.mubr.bf16.mxu1 %v3755_v45 }
  0xee   : > { %v3004_v48 = vpop.f32.mrf.mxu0  ;;  %v3076_v49 = vpop.f32.mrf.mxu1 }
  0xef   : > { %v4176_v50 = vadd.f32 %v3004_v48, %v3003_v46  ;;  %v4178_v51 = vadd.f32 %v3076_v49, %v3075_v47  ;;  %v4227_v46 = vld [vmem:[%s4982_s2] ss:$0 sm:$0xff] }
  0xf0   : > { %v3006_v52 = vpop.f32.mrf.mxu0  ;;  %v3078_v53 = vpop.f32.mrf.mxu1 }
  0xf2   : > { %v3007_v58 = vpop.f32.mrf.mxu0  ;;  %v3079_v59 = vpop.f32.mrf.mxu1 }
  0xf3   : > { %v4184_v60 = vadd.f32 %v3007_v58, %v3006_v52  ;;  %v4186_v61 = vadd.f32 %v3079_v59, %v3078_v53  ;;  %v1692_v53 = vadd.f32 %v4176_v50, %v4227_v46  ;;  %v3777_v58 = vld [vmem:[%s3883_s9 + $0x2a0] ss:$36 sps:$4 sm:$0xff]   ;;  %v3781_v59 = vld [vmem:[%s3883_s9 + $0xf8] ss:$36 sps:$4 sm:$0xff]  }
  0xf4   : > { %v3009_v62 = vpop.f32.mrf.mxu0  ;;  %v3081_v63 = vpop.f32.mrf.mxu1  ;;  %2116 = vmatmul.mubr.bf16.gmra.mxu0 %v3757_v54  ;;  %2213 = vmatmul.mubr.bf16.gmra.mxu1 %v3758_v55 }
  0xf5   : > { %2123 = vmatprep.mubr.bf16.mxu0 %v3759_v56  ;;  %2220 = vmatprep.mubr.bf16.mxu1 %v3761_v57 }
  0xf6   : > { %v3010_v0 = vpop.f32.mrf.mxu0  ;;  %v3082_v1 = vpop.f32.mrf.mxu1 }
  0xf7   : > { %v4188_v2 = vadd.f32 %v3010_v0, %v3009_v62  ;;  %v4190_v3 = vadd.f32 %v3082_v1, %v3081_v63  ;;  %v3784_v63 = vld [vmem:[%s3883_s9 + $0x2ec] ss:$36 sps:$4 sm:$0xff]   ;;  %v3785_v0 = vld [vmem:[%s3883_s9 + $0x140] ss:$36 sps:$4 sm:$0xff]  }
  0xf8   : > { %v3012_v4 = vpop.f32.mrf.mxu0  ;;  %v3084_v5 = vpop.f32.mrf.mxu1 }
  0xfa   : > { %v3013_v10 = vpop.f32.mrf.mxu0  ;;  %v3085_v11 = vpop.f32.mrf.mxu1 }
  0xfb   : > { %v4196_v12 = vadd.f32 %v3013_v10, %v3012_v4  ;;  %v4198_v13 = vadd.f32 %v3085_v11, %v3084_v5  ;;  %v1695_v5 = vadd.f32 %v4184_v60, %v4227_v46  ;;  %v1700_v60 = vadd.f32 %v4188_v2, %v4227_v46 }
  0xfc   : > { %v3015_v14 = vpop.f32.mrf.mxu0  ;;  %v3087_v15 = vpop.f32.mrf.mxu1  ;;  %2124 = vmatmul.mubr.bf16.gmra.mxu0 %v3763_v6  ;;  %2221 = vmatmul.mubr.bf16.gmra.mxu1 %v3764_v7 }
  0xfd   : > { %2131 = vmatprep.mubr.bf16.mxu0 %v3766_v8  ;;  %2228 = vmatprep.mubr.bf16.mxu1 %v3768_v9 }
  0xfe   : > { %v3016_v16 = vpop.f32.mrf.mxu0  ;;  %v3088_v17 = vpop.f32.mrf.mxu1 }
  0xff   : > { %v4200_v18 = vadd.f32 %v3016_v16, %v3015_v14  ;;  %v4202_v19 = vadd.f32 %v3088_v17, %v3087_v15 }
 0x100   : > { %v3018_v20 = vpop.f32.mrf.mxu0  ;;  %v3090_v21 = vpop.f32.mrf.mxu1 }
 0x102   : > { %v3019_v26 = vpop.f32.mrf.mxu0  ;;  %v3091_v27 = vpop.f32.mrf.mxu1 }
 0x103   : > { %v4208_v28 = vadd.f32 %v3019_v26, %v3018_v20  ;;  %v4210_v29 = vadd.f32 %v3091_v27, %v3090_v21  ;;  %v3782_v20 = vld [vmem:[%s3883_s9 + $0x2e8] ss:$36 sps:$4 sm:$0xff]   ;;  %v1703_v27 = vadd.f32 %v4196_v12, %v4227_v46  ;;  %v1708_v12 = vadd.f32 %v4200_v18, %v4227_v46 }
 0x104   : > { %v3021_v30 = vpop.f32.mrf.mxu0  ;;  %v3093_v31 = vpop.f32.mrf.mxu1  ;;  %2132 = vmatmul.mubr.bf16.gmra.mxu0 %v3770_v22  ;;  %2229 = vmatmul.mubr.bf16.gmra.mxu1 %v3771_v23  ;;  %v3786_v21 = vld [vmem:[%s3883_s9 + $0x188] ss:$36 sps:$4 sm:$0xff]   ;;  %v3789_v23 = vld [vmem:[%s3883_s9 + $0x334] ss:$36 sps:$4 sm:$0xff]  }
 0x105   : > { %2236 = vmatprep.mubr.bf16.mxu1 %v3774_v24  ;;  %3475 = vmatprep.mubr.bf16.mxu0 %v3775_v25  ;;  %v3790_v24 = vld [vmem:[%s3883_s9 + $0x1d0] ss:$36 sps:$4 sm:$0xff]  }
 0x106   : > { %v3022_v32 = vpop.f32.mrf.mxu0  ;;  %v3094_v33 = vpop.f32.mrf.mxu1 }
 0x107   : > { %v4212_v34 = vadd.f32 %v3022_v32, %v3021_v30  ;;  %v4214_v35 = vadd.f32 %v3094_v33, %v3093_v31 }
 0x108   : > { %v3024_v36 = vpop.f32.mrf.mxu0  ;;  %v3096_v37 = vpop.f32.mrf.mxu1 }
 0x10a   : > { %v3025_v42 = vpop.f32.mrf.mxu0  ;;  %v3097_v43 = vpop.f32.mrf.mxu1 }
 0x10b   : > { %v4220_v44 = vadd.f32 %v3025_v42, %v3024_v36  ;;  %v4222_v45 = vadd.f32 %v3097_v43, %v3096_v37  ;;  %v3787_v42 = vld [vmem:[%s3883_s9 + $0x330] ss:$36 sps:$4 sm:$0xff]   ;;  %v3791_v43 = vld [vmem:[%s3883_s9 + $0x218] ss:$36 sps:$4 sm:$0xff]  }
 0x10c   : > { %v3027_v47 = vpop.f32.mrf.mxu0  ;;  %v3115_v48 = vpop.f32.mrf.mxu1  ;;  %2237 = vmatmul.mubr.bf16.gmra.mxu1 %v3772_v38  ;;  %3476 = vmatmul.mubr.bf16.vlgmr.msra.gmra.mxu0 %v3776_v39 }
 0x10d   : > { %2244 = vmatprep.mubr.bf16.mxu1 %v3779_v40  ;;  %3479 = vmatprep.mubr.bf16.mxu0 %v3780_v41 }
 0x10e   : > { %v3028_v49 = vpop.f32.mrf.mxu0  ;;  %v3116_v52 = vpop.f32.mrf.mxu1 }
 0x10f   : > { %v4231_v54 = vadd.f32 %v3028_v49, %v3027_v47  ;;  %v3117_v55 = vadd.f32 %v3116_v52, %v3115_v48  ;;  %v3794_v48 = vld [vmem:[%s3883_s9 + $0x37c] ss:$36 sps:$4 sm:$0xff]  }
 0x110   : > { %v3030_v56 = vpop.f32.mrf.mxu0  ;;  %v3118_v57 = vpop.f32.mrf.mxu1  ;;  %v3795_v49 = vld [vmem:[%s3883_s9 + $0x260] ss:$36 sps:$4 sm:$0xff]  }
 0x111   : > { %v4235_v62 = vadd.f32 %v3117_v55, %v1692_v53  ;;  %v1711_v55 = vadd.f32 %v4208_v28, %v4227_v46  ;;  %v1716_v28 = vadd.f32 %v4212_v34, %v4227_v46 }
 0x112   : > { %v3031_v1 = vpop.f32.mrf.mxu0  ;;  %v3119_v4 = vpop.f32.mrf.mxu1 }
 0x113   : > { %v4241_v6 = vadd.f32 %v3031_v1, %v3030_v56  ;;  %v3120_v50 = vadd.f32 %v3119_v4, %v3118_v57 }
 0x114   : > { %v3033_v7 = vpop.f32.mrf.mxu0  ;;  %v3121_v8 = vpop.f32.mrf.mxu1  ;;  %2245 = vmatmul.mubr.bf16.gmra.mxu1 %v3777_v58  ;;  %3480 = vmatmul.mubr.bf16.gmra.mxu0 %v3781_v59 }
 0x115   : > { %v4243_v9 = vadd.f32 %v3120_v50, %v1695_v5  ;;  %2252 = vmatprep.mubr.bf16.mxu1 %v3784_v63  ;;  %3483 = vmatprep.mubr.bf16.mxu0 %v3785_v0 }
 0x116   : > { %v3034_v10 = vpop.f32.mrf.mxu0  ;;  %v3122_v11 = vpop.f32.mrf.mxu1 }
 0x117   : > { %v4247_v14 = vadd.f32 %v3034_v10, %v3033_v7  ;;  %v3123_v15 = vadd.f32 %v3122_v11, %v3121_v8  ;;  %v3792_v7 = vld [vmem:[%s3883_s9 + $0x378] ss:$36 sps:$4 sm:$0xff]   ;;  %v3796_v8 = vld [vmem:[%s3883_s9 + $0x2a8] ss:$36 sps:$4 sm:$0xff]  }
 0x118   : > { %v3036_v16 = vpop.f32.mrf.mxu0  ;;  %v3124_v17 = vpop.f32.mrf.mxu1  ;;  %v3799_v11 = vld [vmem:[%s3883_s9 + $0x3c4] ss:$36 sps:$4 sm:$0xff]  }
 0x119   : > { %v4251_v22 = vadd.f32 %v3123_v15, %v1700_v60  ;;  %v3800_v60 = vld [vmem:[%s3883_s9 + $0x2f0] ss:$36 sps:$4 sm:$0xff]  }
 0x11a   : > { %v3037_v25 = vpop.f32.mrf.mxu0  ;;  %v3125_v26 = vpop.f32.mrf.mxu1 }
 0x11b   : > { %v4257_v30 = vadd.f32 %v3037_v25, %v3036_v16  ;;  %v3126_v2 = vadd.f32 %v3125_v26, %v3124_v17  ;;  %v1719_v17 = vadd.f32 %v4220_v44, %v4227_v46  ;;  %v1724_v44 = vadd.f32 %v4231_v54, %v4227_v46 }
 0x11c   : > { %v3039_v31 = vpop.f32.mrf.mxu0  ;;  %v3127_v32 = vpop.f32.mrf.mxu1  ;;  %2253 = vmatmul.mubr.bf16.gmra.mxu1 %v3782_v20  ;;  %3484 = vmatmul.mubr.bf16.gmra.mxu0 %v3786_v21 }
 0x11d   : > { %v4259_v33 = vadd.f32 %v3126_v2, %v1703_v27  ;;  %2260 = vmatprep.mubr.bf16.mxu1 %v3789_v23  ;;  %3487 = vmatprep.mubr.bf16.mxu0 %v3790_v24 }
 0x11e   : > { %v3040_v36 = vpop.f32.mrf.mxu0  ;;  %v3128_v37 = vpop.f32.mrf.mxu1 }
 0x11f   : > { %v4263_v38 = vadd.f32 %v3040_v36, %v3039_v31  ;;  %v3129_v39 = vadd.f32 %v3128_v37, %v3127_v32  ;;  %v3797_v36 = vld [vmem:[%s3883_s9 + $0x3c0] ss:$36 sps:$4 sm:$0xff]   ;;  %v3801_v37 = vld [vmem:[%s3883_s9 + $0x338] ss:$36 sps:$4 sm:$0xff]  }
 0x120   : > { %v3042_v40 = vpop.f32.mrf.mxu0  ;;  %v3130_v41 = vpop.f32.mrf.mxu1 }
 0x121   : > { %v4267_v47 = vadd.f32 %v3129_v39, %v1708_v12  ;;  %v3804_v39 = vld [vmem:[%s3883_s9 + $0x40c] ss:$36 sps:$4 sm:$0xff]  }
 0x122   : > { %v3043_v52 = vpop.f32.mrf.mxu0  ;;  %v3131_v53 = vpop.f32.mrf.mxu1 }
 0x123   : > { %v4273_v56 = vadd.f32 %v3043_v52, %v3042_v40  ;;  %v3132_v18 = vadd.f32 %v3131_v53, %v3130_v41  ;;  %v3805_v40 = vld [vmem:[%s3883_s9 + $0x380] ss:$36 sps:$4 sm:$0xff]  }
 0x124   : > { %v3045_v57 = vpop.f32.mrf.mxu0  ;;  %v3133_v58 = vpop.f32.mrf.mxu1  ;;  %2261 = vmatmul.mubr.bf16.gmra.mxu1 %v3787_v42  ;;  %3488 = vmatmul.mubr.bf16.gmra.mxu0 %v3791_v43  ;;  %v1727_v43 = vadd.f32 %v4241_v6, %v4227_v46  ;;  %v1732_v6 = vadd.f32 %v4247_v14, %v4227_v46 }
 0x125   : > { %v4275_v59 = vadd.f32 %v3132_v18, %v1711_v55  ;;  %2268 = vmatprep.mubr.bf16.mxu1 %v3794_v48  ;;  %3491 = vmatprep.mubr.bf16.mxu0 %v3795_v49 }
 0x126   : > { %v3046_v63 = vpop.f32.mrf.mxu0  ;;  %v3134_v0 = vpop.f32.mrf.mxu1 }
 0x127   : > { %v4279_v1 = vadd.f32 %v3046_v63, %v3045_v57  ;;  %v3135_v4 = vadd.f32 %v3134_v0, %v3133_v58 }
 0x128   : > { %v3048_v5 = vpop.f32.mrf.mxu0  ;;  %v3136_v50 = vpop.f32.mrf.mxu1 }
 0x129   : > { %v4283_v10 = vadd.f32 %v3135_v4, %v1716_v28  ;;  %v3802_v28 = vld [vmem:[%s3883_s9 + $0x408] ss:$36 sps:$4 sm:$0xff]  }
 0x12a   : > { %v3049_v15 = vpop.f32.mrf.mxu0  ;;  %v3137_v16 = vpop.f32.mrf.mxu1  ;;  %v3806_v4 = vld [vmem:[%s3883_s9 + $0x3c8] ss:$36 sps:$4 sm:$0xff]  }
 0x12b   : > { %v4289_v20 = vadd.f32 %v3049_v15, %v3048_v5  ;;  %v3138_v34 = vadd.f32 %v3137_v16, %v3136_v50  ;;  %v3809_v50 = vld [vmem:[%s3883_s9 + $0x454] ss:$36 sps:$4 sm:$0xff]  }
 0x12c   : > { %v3051_v21 = vpop.f32.mrf.mxu0  ;;  %v3139_v23 = vpop.f32.mrf.mxu1  ;;  %2269 = vmatmul.mubr.bf16.gmra.mxu1 %v3792_v7  ;;  %3492 = vmatmul.mubr.bf16.gmra.mxu0 %v3796_v8  ;;  %v3810_v7 = vld [vmem:[%s3883_s9 + $0x410] ss:$36 sps:$4 sm:$0xff]  }
 0x12d   : > { %v4291_v24 = vadd.f32 %v3138_v34, %v1719_v17  ;;  %2276 = vmatprep.mubr.bf16.mxu1 %v3799_v11  ;;  %3495 = vmatprep.mubr.bf16.mxu0 %v3800_v60  ;;  %v1735_v60 = vadd.f32 %v4257_v30, %v4227_v46 }
 0x12e   : > { %v3052_v25 = vpop.f32.mrf.mxu0  ;;  %v3140_v26 = vpop.f32.mrf.mxu1 }
 0x12f   : > { %v4295_v27 = vadd.f32 %v3052_v25, %v3051_v21  ;;  %v3141_v2 = vadd.f32 %v3140_v26, %v3139_v23  ;;  %v1740_v25 = vadd.f32 %v4263_v38, %v4227_v46 }
 0x130   : > { %v3054_v31 = vpop.f32.mrf.mxu0  ;;  %v3142_v32 = vpop.f32.mrf.mxu1 }
 0x131   : > { %v4299_v12 = vadd.f32 %v3141_v2, %v1724_v44 }
 0x132   : > { %v3055_v41 = vpop.f32.mrf.mxu0  ;;  %v3143_v42 = vpop.f32.mrf.mxu1 }
 0x133   : > { %v4305_v48 = vadd.f32 %v3055_v41, %v3054_v31  ;;  %v3144_v54 = vadd.f32 %v3143_v42, %v3142_v32  ;;  %v3807_v31 = vld [vmem:[%s3883_s9 + $0x450] ss:$36 sps:$4 sm:$0xff]   ;;  %v3811_v32 = vld [vmem:[%s3883_s9 + $0x458] ss:$36 sps:$4 sm:$0xff]   ;;  %s2767_s9 = sshll.u32 %s5007_s16, 3 }
 0x134   : > { %v3057_v49 = vpop.f32.mrf.mxu0  ;;  %v3145_v52 = vpop.f32.mrf.mxu1  ;;  %2277 = vmatmul.mubr.bf16.gmra.mxu1 %v3797_v36  ;;  %3496 = vmatmul.mubr.bf16.gmra.mxu0 %v3801_v37  ;;  %s4923_s21 = scalar_lea.vmem %s4983_s3, %s2767_s9 }
 0x135   : > { %v4307_v53 = vadd.f32 %v3144_v54, %v1727_v43  ;;  %2284 = vmatprep.mubr.bf16.mxu1 %v3804_v39  ;;  %3499 = vmatprep.mubr.bf16.mxu0 %v3805_v40  ;;  %v1743_v40 = vadd.f32 %v4273_v56, %v4227_v46 }
 0x136   : > { %v3058_v55 = vpop.f32.mrf.mxu0  ;;  %v3146_v18 = vpop.f32.mrf.mxu1 }
 0x137   : > { %v4311_v57 = vadd.f32 %v3058_v55, %v3057_v49  ;;  %v3147_v58 = vadd.f32 %v3146_v18, %v3145_v52  ;;  %v1748_v55 = vadd.f32 %v4279_v1, %v4227_v46 }
 0x138   : > { %v3060_v63 = vpop.f32.mrf.mxu0  ;;  %v3148_v0 = vpop.f32.mrf.mxu1 }
 0x139   : > { %v4315_v5 = vadd.f32 %v3147_v58, %v1732_v6 }
 0x13a   : > { %v3061_v8 = vpop.f32.mrf.mxu0  ;;  %v3149_v11 = vpop.f32.mrf.mxu1 }
 0x13b   : > { %v4321_v15 = vadd.f32 %v3061_v8, %v3060_v63  ;;  %v3150_v14 = vadd.f32 %v3149_v11, %v3148_v0 }
 0x13c   : > { %v3063_v16 = vpop.f32.mrf.mxu0  ;;  %v3151_v17 = vpop.f32.mrf.mxu1  ;;  %2285 = vmatmul.mubr.bf16.gmra.mxu1 %v3802_v28  ;;  %3500 = vmatmul.mubr.bf16.gmra.mxu0 %v3806_v4  ;;  %v1751_v4 = vadd.f32 %v4289_v20, %v4227_v46 }
 0x13d   : > { %v4323_v34 = vadd.f32 %v3150_v14, %v1735_v60  ;;  %2292 = vmatprep.mubr.bf16.mxu1 %v3809_v50  ;;  %3503 = vmatprep.mubr.bf16.mxu0 %v3810_v7 }
 0x13e   : > { %v3064_v21 = vpop.f32.mrf.mxu0  ;;  %v3152_v23 = vpop.f32.mrf.mxu1 }
 0x13f   : > { %v4327_v26 = vadd.f32 %v3064_v21, %v3063_v16  ;;  %v3153_v30 = vadd.f32 %v3152_v23, %v3151_v17  ;;  %v1756_v16 = vadd.f32 %v4295_v27, %v4227_v46 }
 0x140   : > { %v3066_v44 = vpop.f32.mrf.mxu0  ;;  %v3154_v2 = vpop.f32.mrf.mxu1 }
 0x141   : > { %v4331_v36 = vadd.f32 %v3153_v30, %v1740_v25 }
 0x142   : > { %v3067_v37 = vpop.f32.mrf.mxu0  ;;  %v3155_v39 = vpop.f32.mrf.mxu1 }
 0x143   : > { %v4335_v41 = vadd.f32 %v3067_v37, %v3066_v44  ;;  %v3156_v42 = vadd.f32 %v3155_v39, %v3154_v2 }
 0x144   : > { %v3069_v43 = vpop.f32.mrf.mxu0  ;;  %v3157_v54 = vpop.f32.mrf.mxu1  ;;  %2293 = vmatmul.mubr.bf16.gmra.mxu1 %v3807_v31  ;;  %3504 = vmatmul.mubr.bf16.gmra.mxu0 %v3811_v32  ;;  %v1759_v31 = vadd.f32 %v4305_v48, %v4227_v46 }
 0x145   : > { %v4337_v38 = vadd.f32 %v3156_v42, %v1743_v40 }
 0x146   : > { %v3070_v49 = vpop.f32.mrf.mxu0  ;;  %v3158_v52 = vpop.f32.mrf.mxu1 }
 0x147   : > { %v4341_v18 = vadd.f32 %v3070_v49, %v3069_v43  ;;  %v3159_v6 = vadd.f32 %v3158_v52, %v3157_v54 }
 0x148   : > { %v3072_v58 = vpop.f32.mrf.mxu0  ;;  %v3160_v63 = vpop.f32.mrf.mxu1 }
 0x149   : > { %v4343_v56 = vadd.f32 %v3159_v6, %v1748_v55 }
 0x14a   : > { %v3073_v0 = vpop.f32.mrf.mxu0  ;;  %v3161_v28 = vpop.f32.mrf.mxu1 }
 0x14b   : > { %v4347_v50 = vadd.f32 %v3073_v0, %v3072_v58  ;;  %v3162_v7 = vadd.f32 %v3161_v28, %v3160_v63 }
 0x14c   : > { %v3163_v8 = vpop.f32.mrf.mxu1  ;;  %v3227_v11 = vpop.f32.mrf.mxu0 }
 0x14d   : > { %v4349_v60 = vadd.f32 %v3162_v7, %v1751_v4 }
 0x14e   : > { %v3164_v1 = vpop.f32.mrf.mxu1  ;;  %v3228_v14 = vpop.f32.mrf.mxu0 }
 0x14f   : > { %v3165_v17 = vadd.f32 %v3164_v1, %v3163_v8  ;;  %v3229_v21 = vadd.f32 %v3228_v14, %v3227_v11 }
 0x150   : > { %v3166_v23 = vpop.f32.mrf.mxu1  ;;  %v3230_v25 = vpop.f32.mrf.mxu0 }
 0x151   : > { %v4353_v30 = vadd.f32 %v3165_v17, %v1756_v16  ;;  %v4356_v20 = vadd.f32 %v3229_v21, %v4235_v62  ;;  %v1764_v62 = vadd.f32 %v4311_v57, %v4227_v46 }
 0x152   : > { %v3167_v44 = vpop.f32.mrf.mxu1  ;;  %v3231_v2 = vpop.f32.mrf.mxu0 }
 0x153   : > { %v3168_v32 = vadd.f32 %v3167_v44, %v3166_v23  ;;  %v3232_v37 = vadd.f32 %v3231_v2, %v3230_v25 }
 0x154   : > { %v3169_v39 = vpop.f32.mrf.mxu1  ;;  %v3233_v40 = vpop.f32.mrf.mxu0 }
 0x155   : > { %v4360_v42 = vadd.f32 %v3168_v32, %v1759_v31  ;;  %v4363_v27 = vadd.f32 %v3232_v37, %v4243_v9  ;;  %v1767_v9 = vadd.f32 %v4321_v15, %v4227_v46 }
 0x156   : > { %v3170_v43 = vpop.f32.mrf.mxu1  ;;  %v3234_v54 = vpop.f32.mrf.mxu0 }
 0x157   : > { %v3171_v49 = vadd.f32 %v3170_v43, %v3169_v39  ;;  %v3235_v52 = vadd.f32 %v3234_v54, %v3233_v40 }
 0x158   : > { %v3172_v55 = vpop.f32.mrf.mxu1  ;;  %v3236_v6 = vpop.f32.mrf.mxu0 }
 0x159   : > { %v4367_v58 = vadd.f32 %v3171_v49, %v1764_v62  ;;  %v4370_v48 = vadd.f32 %v3235_v52, %v4251_v22  ;;  %v1772_v22 = vadd.f32 %v4327_v26, %v4227_v46 }
 0x15a   : > { %v3173_v63 = vpop.f32.mrf.mxu1  ;;  %v3237_v0 = vpop.f32.mrf.mxu0 }
 0x15b   : > { %v3174_v28 = vadd.f32 %v3173_v63, %v3172_v55  ;;  %v3238_v4 = vadd.f32 %v3237_v0, %v3236_v6 }
 0x15c   : > { %v3175_v7 = vpop.f32.mrf.mxu1  ;;  %v3239_v8 = vpop.f32.mrf.mxu0 }
 0x15d   : > { %v4374_v11 = vadd.f32 %v3174_v28, %v1767_v9  ;;  %v4377_v57 = vadd.f32 %v3238_v4, %v4259_v33  ;;  %v1775_v33 = vadd.f32 %v4335_v41, %v4227_v46 }
 0x15e   : > { %v3176_v1 = vpop.f32.mrf.mxu1  ;;  %v3240_v14 = vpop.f32.mrf.mxu0 }
 0x15f   : > { %v3177_v16 = vadd.f32 %v3176_v1, %v3175_v7  ;;  %v3241_v17 = vadd.f32 %v3240_v14, %v3239_v8 }
 0x160   : > { %v3178_v21 = vpop.f32.mrf.mxu1  ;;  %v3242_v23 = vpop.f32.mrf.mxu0 }
 0x161   : > { %v4381_v25 = vadd.f32 %v3177_v16, %v1772_v22  ;;  %v4384_v15 = vadd.f32 %v3241_v17, %v4267_v47  ;;  %v1780_v47 = vadd.f32 %v4341_v18, %v4227_v46 }
 0x162   : > { %v3179_v44 = vpop.f32.mrf.mxu1  ;;  %v3243_v2 = vpop.f32.mrf.mxu0 }
 0x163   : > { %v3180_v31 = vadd.f32 %v3179_v44, %v3178_v21  ;;  %v3244_v32 = vadd.f32 %v3243_v2, %v3242_v23 }
 0x164   : > { %v3181_v37 = vpop.f32.mrf.mxu1  ;;  %v3245_v39 = vpop.f32.mrf.mxu0 }
 0x165   : > { %v4388_v40 = vadd.f32 %v3180_v31, %v1775_v33  ;;  %v4391_v26 = vadd.f32 %v3244_v32, %v4275_v59  ;;  %v1783_v59 = vadd.f32 %v4347_v50, %v4227_v46 }
 0x166   : > { %v3182_v43 = vpop.f32.mrf.mxu1  ;;  %v3246_v54 = vpop.f32.mrf.mxu0 }
 0x167   : > { %v3183_v62 = vadd.f32 %v3182_v43, %v3181_v37  ;;  %v3247_v49 = vadd.f32 %v3246_v54, %v3245_v39 }
 0x168   : > { %v3184_v52 = vpop.f32.mrf.mxu1  ;;  %v3248_v55 = vpop.f32.mrf.mxu0 }
 0x169   : > { %v4395_v6 = vadd.f32 %v3183_v62, %v1780_v47  ;;  %v4398_v41 = vadd.f32 %v3247_v49, %v4283_v10  ;;  %v1788_v10 = vadd.f32 %v4178_v51, %v4227_v46 }
 0x16a   : > { %v3185_v63 = vpop.f32.mrf.mxu1  ;;  %v3249_v0 = vpop.f32.mrf.mxu0 }
 0x16b   : > { %v3186_v9 = vadd.f32 %v3185_v63, %v3184_v52  ;;  %v3250_v28 = vadd.f32 %v3249_v0, %v3248_v55 }
 0x16c   : > { %v3187_v4 = vpop.f32.mrf.mxu1  ;;  %v3251_v7 = vpop.f32.mrf.mxu0 }
 0x16d   : > { %v4402_v8 = vadd.f32 %v3186_v9, %v1783_v59  ;;  %v4405_v18 = vadd.f32 %v3250_v28, %v4291_v24  ;;  %v1791_v24 = vadd.f32 %v4186_v61, %v4227_v46 }
 0x16e   : > { %v3188_v1 = vpop.f32.mrf.mxu1  ;;  %v3252_v14 = vpop.f32.mrf.mxu0 }
 0x16f   : > { %v3189_v22 = vadd.f32 %v3188_v1, %v3187_v4  ;;  %v3253_v16 = vadd.f32 %v3252_v14, %v3251_v7 }
 0x170   : > { %v3190_v17 = vpop.f32.mrf.mxu1  ;;  %v3254_v21 = vpop.f32.mrf.mxu0 }
 0x171   : > { %v4409_v23 = vadd.f32 %v3189_v22, %v1788_v10  ;;  %v4412_v50 = vadd.f32 %v3253_v16, %v4299_v12  ;;  %v1796_v12 = vadd.f32 %v4190_v3, %v4227_v46 }
 0x172   : > { %v3191_v44 = vpop.f32.mrf.mxu1  ;;  %v3255_v2 = vpop.f32.mrf.mxu0 }
 0x173   : > { %v3192_v33 = vadd.f32 %v3191_v44, %v3190_v17  ;;  %v3256_v31 = vadd.f32 %v3255_v2, %v3254_v21 }
 0x174   : > { %v3193_v32 = vpop.f32.mrf.mxu1  ;;  %v3257_v37 = vpop.f32.mrf.mxu0 }
 0x175   : > { %v4416_v39 = vadd.f32 %v3192_v33, %v1791_v24  ;;  %v4419_v51 = vadd.f32 %v3256_v31, %v4307_v53  ;;  %v1799_v53 = vadd.f32 %v4198_v13, %v4227_v46 }
 0x176   : > { %v3194_v43 = vpop.f32.mrf.mxu1  ;;  %v3258_v54 = vpop.f32.mrf.mxu0 }
 0x177   : > { %v3195_v47 = vadd.f32 %v3194_v43, %v3193_v32  ;;  %v3259_v62 = vadd.f32 %v3258_v54, %v3257_v37 }
 0x178   : > { %v3196_v49 = vpop.f32.mrf.mxu1  ;;  %v3260_v52 = vpop.f32.mrf.mxu0 }
 0x179   : > { %v4423_v55 = vadd.f32 %v3195_v47, %v1796_v12  ;;  %v4426_v61 = vadd.f32 %v3259_v62, %v4315_v5  ;;  %v1804_v5 = vadd.f32 %v4202_v19, %v4227_v46 }
 0x17a   : > { %v3197_v63 = vpop.f32.mrf.mxu1  ;;  %v3261_v0 = vpop.f32.mrf.mxu0 }
 0x17b   : > { %v3198_v59 = vadd.f32 %v3197_v63, %v3196_v49  ;;  %v3262_v9 = vadd.f32 %v3261_v0, %v3260_v52 }
 0x17c   : > { %v3199_v28 = vpop.f32.mrf.mxu1  ;;  %v3263_v4 = vpop.f32.mrf.mxu0 }
 0x17d   : > { %v4430_v7 = vadd.f32 %v3198_v59, %v1799_v53  ;;  %v4433_v3 = vadd.f32 %v3262_v9, %v4323_v34  ;;  %v1807_v34 = vadd.f32 %v4210_v29, %v4227_v46 }
 0x17e   : > { %v3200_v1 = vpop.f32.mrf.mxu1  ;;  %v3264_v14 = vpop.f32.mrf.mxu0 }
 0x17f   : > { %v3201_v10 = vadd.f32 %v3200_v1, %v3199_v28  ;;  %v3265_v22 = vadd.f32 %v3264_v14, %v3263_v4 }
 0x180   : > { %v3202_v16 = vpop.f32.mrf.mxu1  ;;  %v3266_v17 = vpop.f32.mrf.mxu0 }
 0x181   : > { %v4437_v21 = vadd.f32 %v3201_v10, %v1804_v5  ;;  %v4440_v13 = vadd.f32 %v3265_v22, %v4331_v36  ;;  %v1812_v36 = vadd.f32 %v4214_v35, %v4227_v46 }
 0x182   : > { %v3203_v44 = vpop.f32.mrf.mxu1  ;;  %v3267_v2 = vpop.f32.mrf.mxu0 }
 0x183   : > { %v3204_v24 = vadd.f32 %v3203_v44, %v3202_v16  ;;  %v3268_v33 = vadd.f32 %v3267_v2, %v3266_v17 }
 0x184   : > { %v3205_v31 = vpop.f32.mrf.mxu1  ;;  %v3269_v32 = vpop.f32.mrf.mxu0 }
 0x185   : > { %v4444_v37 = vadd.f32 %v3204_v24, %v1807_v34  ;;  %v4447_v19 = vadd.f32 %v3268_v33, %v4337_v38  ;;  %v1815_v38 = vadd.f32 %v4222_v45, %v4227_v46 }
 0x186   : > { %v3206_v43 = vpop.f32.mrf.mxu1  ;;  %v3270_v54 = vpop.f32.mrf.mxu0 }
 0x187   : > { %v3207_v12 = vadd.f32 %v3206_v43, %v3205_v31  ;;  %v3271_v47 = vadd.f32 %v3270_v54, %v3269_v32 }
 0x188   : > { %v3208_v62 = vpop.f32.mrf.mxu1  ;;  %v3272_v49 = vpop.f32.mrf.mxu0 }
 0x189   : > { %v4451_v52 = vadd.f32 %v3207_v12, %v1812_v36  ;;  %v4454_v29 = vadd.f32 %v3271_v47, %v4343_v56 }
 0x18a   : > { %v3209_v63 = vpop.f32.mrf.mxu1  ;;  %v3273_v0 = vpop.f32.mrf.mxu0 }
 0x18b   : > { %v3210_v53 = vadd.f32 %v3209_v63, %v3208_v62  ;;  %v3274_v59 = vadd.f32 %v3273_v0, %v3272_v49 }
 0x18c   : > { %v3275_v9 = vpop.f32.mrf.mxu0  ;;  %v3339_v28 = vpop.f32.mrf.mxu1 }
 0x18d   : > { %v4458_v4 = vadd.f32 %v3210_v53, %v1815_v38  ;;  %v4461_v35 = vadd.f32 %v3274_v59, %v4349_v60 }
 0x18e   : > { %v3276_v1 = vpop.f32.mrf.mxu0  ;;  %v3340_v14 = vpop.f32.mrf.mxu1 }
 0x18f   : > { %v3277_v5 = vadd.f32 %v3276_v1, %v3275_v9  ;;  %v3341_v10 = vadd.f32 %v3340_v14, %v3339_v28 }
 0x190   : > { %v3278_v56 = vpop.f32.mrf.mxu0  ;;  %v4463_v22 = vpop.f32.mrf.mxu1 }
 0x191   : > { %v4466_v16 = vadd.f32 %v3277_v5, %v4353_v30  ;;  %v4469_v45 = vadd.f32 %v3341_v10, %v4356_v20 }
 0x192   : > { %v3279_v46 = vpop.f32.mrf.mxu0  ;;  %v4471_v17 = vpop.f32.mrf.mxu1 }
 0x193   : > { %v3280_v44 = vadd.f32 %v3279_v46, %v3278_v56 }
 0x194   : > { %v3281_v2 = vpop.f32.mrf.mxu0  ;;  %v4473_v60 = vpop.f32.mrf.mxu1 }
 0x195   : > { %v4476_v34 = vadd.f32 %v3280_v44, %v4360_v42 }
 0x196   : > { %v3282_v24 = vpop.f32.mrf.mxu0  ;;  %v4478_v33 = vpop.f32.mrf.mxu1 }
 0x197   : > { %v3283_v31 = vadd.f32 %v3282_v24, %v3281_v2 }
 0x198   : > { %v3284_v32 = vpop.f32.mrf.mxu0  ;;  %v4480_v30 = vpop.f32.mrf.mxu1 }
 0x199   : > { %v4483_v20 = vadd.f32 %v3283_v31, %v4367_v58 }
 0x19a   : > { %v3285_v43 = vpop.f32.mrf.mxu0  ;;  %v4485_v54 = vpop.f32.mrf.mxu1 }
 0x19b   : > { %v3286_v36 = vadd.f32 %v3285_v43, %v3284_v32 }
 0x19c   : > { %v3287_v12 = vpop.f32.mrf.mxu0  ;;  %v4487_v47 = vpop.f32.mrf.mxu1 }
 0x19d   : > { %v4490_v42 = vadd.f32 %v3286_v36, %v4374_v11 }
 0x19e   : > { %v3288_v62 = vpop.f32.mrf.mxu0  ;;  %v4492_v49 = vpop.f32.mrf.mxu1 }
 0x19f   : > { %v3289_v63 = vadd.f32 %v3288_v62, %v3287_v12 }
 0x1a0   : > { %v3290_v0 = vpop.f32.mrf.mxu0  ;;  %v4494_v38 = vpop.f32.mrf.mxu1 }
 0x1a1   : > { %v4497_v58 = vadd.f32 %v3289_v63, %v4381_v25 }
 0x1a2   : > { %v3291_v53 = vpop.f32.mrf.mxu0  ;;  %v4499_v59 = vpop.f32.mrf.mxu1 }
 0x1a3   : > { %4984 = vst [vmem:[#allocation2_spill] sm:$0xff] %v4497_v58  ;;  %v3292_v9 = vadd.f32 %v3291_v53, %v3290_v0 }
 0x1a4   : > { %v3293_v28 = vpop.f32.mrf.mxu0  ;;  %v4501_v1 = vpop.f32.mrf.mxu1 }
 0x1a5   : > { %v4504_v11 = vadd.f32 %v3292_v9, %v4388_v40 }
 0x1a6   : > { %v3294_v14 = vpop.f32.mrf.mxu0  ;;  %v4506_v5 = vpop.f32.mrf.mxu1 }
 0x1a7   : > { %4985 = vst [vmem:[#allocation3_spill] sm:$0xff] %v4504_v11  ;;  %v3295_v10 = vadd.f32 %v3294_v14, %v3293_v28 }
 0x1a8   : > { %v3296_v56 = vpop.f32.mrf.mxu0  ;;  %v4508_v46 = vpop.f32.mrf.mxu1 }
 0x1a9   : > { %v4511_v25 = vadd.f32 %v3295_v10, %v4395_v6 }
 0x1aa   : > { %v3297_v44 = vpop.f32.mrf.mxu0  ;;  %v4513_v2 = vpop.f32.mrf.mxu1 }
 0x1ab   : > { %4986 = vst [vmem:[#allocation4_spill] sm:$0xff] %v4511_v25  ;;  %v3298_v24 = vadd.f32 %v3297_v44, %v3296_v56 }
 0x1ac   : > { %v3299_v31 = vpop.f32.mrf.mxu0  ;;  %v4515_v32 = vpop.f32.mrf.mxu1 }
 0x1ad   : > { %v4518_v40 = vadd.f32 %v3298_v24, %v4402_v8 }
 0x1ae   : > { %v3300_v43 = vpop.f32.mrf.mxu0  ;;  %v4520_v36 = vpop.f32.mrf.mxu1 }
 0x1af   : > { %4987 = vst [vmem:[#allocation5_spill] sm:$0xff] %v4518_v40  ;;  %v3301_v12 = vadd.f32 %v3300_v43, %v3299_v31 }
 0x1b0   : > { %v3302_v62 = vpop.f32.mrf.mxu0  ;;  %v4522_v63 = vpop.f32.mrf.mxu1 }
 0x1b1   : > { %v4525_v6 = vadd.f32 %v3301_v12, %v4409_v23 }
 0x1b2   : > { %v3303_v0 = vpop.f32.mrf.mxu0  ;;  %v4527_v53 = vpop.f32.mrf.mxu1 }
 0x1b3   : > { %4988 = vst [vmem:[#allocation6_spill] sm:$0xff] %v4525_v6  ;;  %v3304_v9 = vadd.f32 %v3303_v0, %v3302_v62 }
 0x1b4   : > { %v3305_v28 = vpop.f32.mrf.mxu0  ;;  %v4529_v14 = vpop.f32.mrf.mxu1 }
 0x1b5   : > { %v4532_v8 = vadd.f32 %v3304_v9, %v4416_v39 }
 0x1b6   : > { %v3306_v10 = vpop.f32.mrf.mxu0  ;;  %v4534_v56 = vpop.f32.mrf.mxu1 }
 0x1b7   : > { %4989 = vst [vmem:[#allocation7_spill] sm:$0xff] %v4532_v8  ;;  %v3307_v44 = vadd.f32 %v3306_v10, %v3305_v28 }
 0x1b8   : > { %v3308_v24 = vpop.f32.mrf.mxu0  ;;  %v4536_v31 = vpop.f32.mrf.mxu1 }
 0x1b9   : > { %v4539_v23 = vadd.f32 %v3307_v44, %v4423_v55 }
 0x1ba   : > { %v3309_v43 = vpop.f32.mrf.mxu0  ;;  %v4541_v12 = vpop.f32.mrf.mxu1 }
 0x1bb   : > { %4990 = vst [vmem:[#allocation8_spill] sm:$0xff] %v4539_v23  ;;  %v3310_v62 = vadd.f32 %v3309_v43, %v3308_v24 }
 0x1bc   : > { %v3311_v0 = vpop.f32.mrf.mxu0  ;;  %v4543_v6 = vpop.f32.mrf.mxu1 }
 0x1bd   : > { %v4546_v39 = vadd.f32 %v3310_v62, %v4430_v7 }
 0x1be   : > { %v3312_v9 = vpop.f32.mrf.mxu0  ;;  %v4548_v8 = vpop.f32.mrf.mxu1 }
 0x1bf   : > { %4991 = vst [vmem:[#allocation9_spill] sm:$0xff] %v4546_v39  ;;  %v3313_v28 = vadd.f32 %v3312_v9, %v3311_v0 }
 0x1c0   : > { %v3314_v10 = vpop.f32.mrf.mxu0  ;;  %v4550_v40 = vpop.f32.mrf.mxu1 }
 0x1c1   : > { %v4553_v55 = vadd.f32 %v3313_v28, %v4437_v21 }
 0x1c2   : > { %v3315_v44 = vpop.f32.mrf.mxu0  ;;  %v4555_v23 = vpop.f32.mrf.mxu1 }
 0x1c3   : > { %4992 = vst [vmem:[#allocation10_spill] sm:$0xff] %v4553_v55  ;;  %v3316_v24 = vadd.f32 %v3315_v44, %v3314_v10 }
 0x1c4   : > { %v3317_v43 = vpop.f32.mrf.mxu0  ;;  %v4557_v11 = vpop.f32.mrf.mxu1 }
 0x1c5   : > { %v4560_v7 = vadd.f32 %v3316_v24, %v4444_v37  ;;  %v3344_v37 = vadd.f32 %v4471_v17, %v4463_v22  ;;  %v3347_v24 = vadd.f32 %v4478_v33, %v4473_v60 }
 0x1c6   : > { %v3318_v62 = vpop.f32.mrf.mxu0  ;;  %v4562_v39 = vpop.f32.mrf.mxu1 }
 0x1c7   : > { %4993 = vst [vmem:[#allocation11_spill] sm:$0xff] %v4560_v7  ;;  %v3319_v0 = vadd.f32 %v3318_v62, %v3317_v43  ;;  %v2178_v22 = vadd.f32 %v3344_v37, %v4363_v27 }
 0x1c8   : > { %v3320_v9 = vpop.f32.mrf.mxu0  ;;  %v4564_v25 = vpop.f32.mrf.mxu1 }
 0x1c9   : > { %v4567_v21 = vadd.f32 %v3319_v0, %v4451_v52  ;;  %v3350_v0 = vadd.f32 %v4485_v54, %v4480_v30 }
 0x1ca   : > { %v3321_v28 = vpop.f32.mrf.mxu0  ;;  %v4569_v55 = vpop.f32.mrf.mxu1 }
 0x1cb   : > { %4994 = vst [vmem:[#allocation12_spill] sm:$0xff] %v4567_v21  ;;  %v3322_v10 = vadd.f32 %v3321_v28, %v3320_v9  ;;  %v2183_v28 = vadd.f32 %v3347_v24, %v4370_v48  ;;  %v2186_v30 = vadd.f32 %v3350_v0, %v4377_v57  ;;  %v3359_v57 = vadd.f32 %v4506_v5, %v4501_v1 }
 0x1cc   : > { %v4571_v44 = vpop.f32.mrf.mxu1  ;;  %v3477_v58 = vpop.f32.mrf.mxu0 }
 0x1cd   : > { %v4578_v43 = vadd.f32 %v3322_v10, %v4458_v4  ;;  %v3353_v4 = vadd.f32 %v4492_v49, %v4487_v47  ;;  %v4595_v33 = vadd.f32 %v3477_v58, %v2183_v28  ;;  %v3356_v49 = vadd.f32 %v4499_v59, %v4494_v38 }
 0x1ce   : > { %v4580_v62 = vpop.f32.mrf.mxu1  ;;  %v2335_v52 = vpop.f32.mrf.mxu0 }
 0x1cf   : > { %v4588_v21 = vadd.f32 %v2335_v52, %v4469_v45  ;;  %v2191_v37 = vadd.f32 %v3353_v4, %v4384_v15  ;;  %v2502_v0 = vmul.f32 %v4595_v33, %v4595_v33  ;;  %v3365_v4 = vadd.f32 %v4520_v36, %v4515_v32 }
 0x1d0   : > { %v4584_v7 = vpop.f32.mrf.mxu1  ;;  %v3478_v9 = vpop.f32.mrf.mxu0  ;;  %v3368_v36 = vadd.f32 %v4527_v53, %v4522_v63 }
 0x1d1   : > { %v2500_v45 = vmul.f32 %v4588_v21, %v4588_v21  ;;  %v4604_v24 = vadd.f32 %v3478_v9, %v2186_v30  ;;  %v2199_v30 = vadd.f32 %v3359_v57, %v4398_v41 }
 0x1d2   : > { %v4593_v17 = vpop.f32.mrf.mxu1  ;;  %v2338_v60 = vpop.f32.mrf.mxu0 }
 0x1d3   : > { %v4598_v54 = vadd.f32 %v2338_v60, %v2178_v22  ;;  %v3362_v22 = vadd.f32 %v4513_v2, %v4508_v46  ;;  %v2503_v1 = vmul.f32 %v4604_v24, %v4604_v24  ;;  %v2194_v46 = vadd.f32 %v3356_v49, %v4391_v26 }
 0x1d4   : > { %v4600_v10 = vpop.f32.mrf.mxu1  ;;  %v3481_v48 = vpop.f32.mrf.mxu0  ;;  %v3371_v26 = vadd.f32 %v4534_v56, %v4529_v14 }
 0x1d5   : > { %v2462_v27 = vadd.f32 %v4598_v54, %v4588_v21  ;;  %v2501_v47 = vmul.f32 %v4598_v54, %v4598_v54 }
 0x1d6   : > { %v4614_v58 = vpop.f32.mrf.mxu1  ;;  %v2351_v52 = vpop.f32.mrf.mxu0 }
 0x1d7   : > { %v2463_v9 = vadd.f32 %v2462_v27, %v4595_v33  ;;  %v2532_v28 = vadd.f32 %v2501_v47, %v2500_v45  ;;  %v4622_v60 = vadd.f32 %v2351_v52, %v2191_v37  ;;  %v4638_v52 = vadd.f32 %v3481_v48, %v2199_v30 }
 0x1d8   : > { %v4624_v38 = vpop.f32.mrf.mxu1  ;;  %v3482_v59 = vpop.f32.mrf.mxu0  ;;  %v2215_v30 = vadd.f32 %v3371_v26, %v4426_v61  ;;  %v3380_v26 = vadd.f32 %v4555_v23, %v4550_v40 }
 0x1d9   : > { %v2533_v5 = vadd.f32 %v2532_v28, %v2502_v0  ;;  %v2464_v15 = vadd.f32 %v2463_v9, %v4604_v24  ;;  %v2504_v47 = vmul.f32 %v4622_v60, %v4622_v60  ;;  %v2202_v0 = vadd.f32 %v3362_v22, %v4405_v18 }
 0x1da   : > { %v4632_v45 = vpop.f32.mrf.mxu1  ;;  %v2354_v2 = vpop.f32.mrf.mxu0  ;;  %v2207_v22 = vadd.f32 %v3365_v4, %v4412_v50  ;;  %v2506_v63 = vmul.f32 %v4638_v52, %v4638_v52  ;;  %v3377_v50 = vadd.f32 %v4548_v8, %v4543_v6 }
 0x1db   : > { %v2465_v27 = vadd.f32 %v2464_v15, %v4622_v60  ;;  %v2534_v37 = vadd.f32 %v2533_v5, %v2503_v1  ;;  %v4641_v9 = vadd.f32 %v2354_v2, %v2194_v46  ;;  %v4649_v57 = vadd.f32 %v3482_v59, %v2202_v0 }
 0x1dc   : > { %v4643_v32 = vpop.f32.mrf.mxu1  ;;  %v3485_v41 = vpop.f32.mrf.mxu0  ;;  %v3374_v5 = vadd.f32 %v4541_v12, %v4536_v31  ;;  %v2210_v46 = vadd.f32 %v3368_v36, %v4419_v51 }
 0x1dd   : > { %v2535_v49 = vadd.f32 %v2534_v37, %v2504_v47  ;;  %v2466_v28 = vadd.f32 %v2465_v27, %v4641_v9  ;;  %v2505_v48 = vmul.f32 %v4641_v9, %v4641_v9  ;;  %v2507_v31 = vmul.f32 %v4649_v57, %v4649_v57 }
 0x1de   : > { %v4654_v18 = vpop.f32.mrf.mxu1  ;;  %v2367_v1 = vpop.f32.mrf.mxu0  ;;  %v2218_v47 = vadd.f32 %v3374_v5, %v4433_v3  ;;  %v4678_v0 = vadd.f32 %v3485_v41, %v2215_v30  ;;  %v2226_v30 = vadd.f32 %v3380_v26, %v4447_v19 }
 0x1df   : > { %v2467_v53 = vadd.f32 %v2466_v28, %v4638_v52  ;;  %v2536_v14 = vadd.f32 %v2535_v49, %v2505_v48  ;;  %v4662_v56 = vadd.f32 %v2367_v1, %v2207_v22  ;;  %v3383_v49 = vadd.f32 %v4562_v39, %v4557_v11 }
 0x1e0   : > { %v4664_v59 = vpop.f32.mrf.mxu1  ;;  %v3486_v15 = vpop.f32.mrf.mxu0  ;;  %v2223_v1 = vadd.f32 %v3377_v50, %v4440_v13  ;;  %v2510_v40 = vmul.f32 %v4678_v0, %v4678_v0  ;;  %v3389_v13 = vadd.f32 %v4580_v62, %v4571_v44 }
 0x1e1   : > { %v2537_v12 = vadd.f32 %v2536_v14, %v2506_v63  ;;  %v2468_v4 = vadd.f32 %v2467_v53, %v4649_v57  ;;  %v2508_v61 = vmul.f32 %v4662_v56, %v4662_v56  ;;  %v4691_v28 = vadd.f32 %v3486_v15, %v2218_v47 }
 0x1e2   : > { %v4673_v2 = vpop.f32.mrf.mxu1  ;;  %v2370_v27 = vpop.f32.mrf.mxu0  ;;  %v3386_v63 = vadd.f32 %v4569_v55, %v4564_v25  ;;  %v2231_v15 = vadd.f32 %v3383_v49, %v4454_v29 }
 0x1e3   : > { %v4676_v37 = vadd.f32 %v2370_v27, %v2210_v46  ;;  %v2469_v51 = vadd.f32 %v2468_v4, %v4662_v56  ;;  %v2538_v6 = vadd.f32 %v2537_v12, %v2507_v31  ;;  %v2511_v25 = vmul.f32 %v4691_v28, %v4691_v28 }
 0x1e4   : > { %v4683_v8 = vpop.f32.mrf.mxu1  ;;  %v3489_v36 = vpop.f32.mrf.mxu0  ;;  %v2234_v12 = vadd.f32 %v3386_v63, %v4461_v35 }
 0x1e5   : > { %v2509_v3 = vmul.f32 %v4676_v37, %v4676_v37  ;;  %v2539_v41 = vadd.f32 %v2538_v6, %v2508_v61  ;;  %v2470_v48 = vadd.f32 %v2469_v51, %v4676_v37  ;;  %v4712_v27 = vadd.f32 %v3489_v36, %v2231_v15 }
 0x1e6   : > { %v3406_v22 = vpop.f32.mrf.mxu1  ;;  %v2383_v5 = vpop.f32.mrf.mxu0  ;;  %v3392_v51 = vadd.f32 %v4593_v17, %v4584_v7  ;;  %v3395_v61 = vadd.f32 %v4614_v58, %v4600_v10 }
 0x1e7   : > { %v2471_v11 = vadd.f32 %v2470_v48, %v4678_v0  ;;  %v2540_v23 = vadd.f32 %v2539_v41, %v2509_v3  ;;  %v4700_v39 = vadd.f32 %v2383_v5, %v2223_v1  ;;  %v2239_v3 = vadd.f32 %v3389_v13, %v4466_v16 }
 0x1e8   : > { %v3408_v53 = vpop.f32.mrf.mxu1  ;;  %v3490_v14 = vpop.f32.mrf.mxu0  ;;  %v3398_v48 = vadd.f32 %v4632_v45, %v4624_v38  ;;  %v2514_v7 = vmul.f32 %v4712_v27, %v4712_v27  ;;  %v2247_v63 = vadd.f32 %v3395_v61, %v4483_v20  ;;  %v3401_v16 = vadd.f32 %v4654_v18, %v4643_v32 }
 0x1e9   : > { %v2541_v55 = vadd.f32 %v2540_v23, %v2510_v40  ;;  %v2472_v46 = vadd.f32 %v2471_v11, %v4691_v28  ;;  %v2512_v19 = vmul.f32 %v4700_v39, %v4700_v39  ;;  %v4723_v36 = vadd.f32 %v3490_v14, %v2234_v12 }
 0x1ea   : > { %v3409_v50 = vpop.f32.mrf.mxu1  ;;  %v2386_v31 = vpop.f32.mrf.mxu0  ;;  %v2242_v40 = vadd.f32 %v3392_v51, %v4476_v34  ;;  %v2250_v15 = vadd.f32 %v3398_v48, %v4490_v42 }
 0x1eb   : > { %v4710_v4 = vadd.f32 %v2386_v31, %v2226_v30  ;;  %v2473_v29 = vadd.f32 %v2472_v46, %v4700_v39  ;;  %v2542_v44 = vadd.f32 %v2541_v55, %v2511_v25  ;;  %v2515_v38 = vmul.f32 %v4723_v36, %v4723_v36 }
 0x1ec   : > { %v3411_v62 = vpop.f32.mrf.mxu1  ;;  %v3493_v47 = vpop.f32.mrf.mxu0  ;;  %v3404_v55 = vadd.f32 %v4673_v2, %v4664_v59  ;;  %v3407_v46 = vadd.f32 %v3406_v22, %v4683_v8  ;;  %v3410_v61 = vadd.f32 %v3409_v50, %v3408_v53 }
 0x1ed   : > { %v2513_v35 = vmul.f32 %v4710_v4, %v4710_v4  ;;  %v2543_v6 = vadd.f32 %v2542_v44, %v2512_v19  ;;  %v2474_v26 = vadd.f32 %v2473_v29, %v4710_v4  ;;  %v4744_v13 = vadd.f32 %v3493_v47, %v2247_v63  ;;  %v4995_v44 = vld [vmem:[#allocation2_spill] sm:$0xff] }
 0x1ee   : > { %v3412_v49 = vpop.f32.mrf.mxu1  ;;  %v2399_v41 = vpop.f32.mrf.mxu0  ;;  %v2255_v47 = vadd.f32 %v3401_v16, %v4995_v44 }
 0x1ef   : > { %v2475_v17 = vadd.f32 %v2474_v26, %v4712_v27  ;;  %v2544_v10 = vadd.f32 %v2543_v6, %v2513_v35  ;;  %v4732_v58 = vadd.f32 %v2399_v41, %v2239_v3  ;;  %v2518_v35 = vmul.f32 %v4744_v13, %v4744_v13  ;;  %v4996_v26 = vld [vmem:[#allocation4_spill] sm:$0xff]  ;;  %v4997_v41 = vld [vmem:[#allocation3_spill] sm:$0xff] }
 0x1f0   : > { %v3414_v1 = vpop.f32.mrf.mxu1  ;;  %v3494_v5 = vpop.f32.mrf.mxu0  ;;  %v2263_v3 = vadd.f32 %v3407_v46, %v4996_v26  ;;  %v2258_v48 = vadd.f32 %v3404_v55, %v4997_v41 }
 0x1f1   : > { %v2545_v45 = vadd.f32 %v2544_v10, %v2514_v7  ;;  %v2476_v11 = vadd.f32 %v2475_v17, %v4723_v36  ;;  %v2516_v34 = vmul.f32 %v4732_v58, %v4732_v58  ;;  %v4754_v12 = vadd.f32 %v3494_v5, %v2250_v15 }
 0x1f2   : > { %v3415_v23 = vpop.f32.mrf.mxu1  ;;  %v2402_v14 = vpop.f32.mrf.mxu0  ;;  %v3413_v7 = vadd.f32 %v3412_v49, %v3411_v62 }
 0x1f3   : > { %v4742_v30 = vadd.f32 %v2402_v14, %v2242_v40  ;;  %v2477_v20 = vadd.f32 %v2476_v11, %v4732_v58  ;;  %v2546_v32 = vadd.f32 %v2545_v45, %v2515_v38  ;;  %v2519_v17 = vmul.f32 %v4754_v12, %v4754_v12  ;;  %v4998_v11 = vld [vmem:[#allocation5_spill] sm:$0xff] }
 0x1f4   : > { %v3417_v18 = vpop.f32.mrf.mxu1  ;;  %v3497_v25 = vpop.f32.mrf.mxu0  ;;  %v2266_v62 = vadd.f32 %v3410_v61, %v4998_v11  ;;  %v3416_v15 = vadd.f32 %v3415_v23, %v3414_v1  ;;  %v5000_v61 = vld [vmem:[#allocation8_spill] sm:$0xff] }
 0x1f5   : > { %v2517_v42 = vmul.f32 %v4742_v30, %v4742_v30  ;;  %v2547_v31 = vadd.f32 %v2546_v32, %v2516_v34  ;;  %v2478_v29 = vadd.f32 %v2477_v20, %v4742_v30  ;;  %v4768_v63 = vadd.f32 %v3497_v25, %v2263_v3 }
 0x1f6   : > { %v3418_v19 = vpop.f32.mrf.mxu1  ;;  %v2415_v51 = vpop.f32.mrf.mxu0 }
 0x1f7   : > { %v2479_v59 = vadd.f32 %v2478_v29, %v4744_v13  ;;  %v2548_v2 = vadd.f32 %v2547_v31, %v2517_v42  ;;  %v4761_v8 = vadd.f32 %v2415_v51, %v2255_v47  ;;  %v3419_v20 = vadd.f32 %v3418_v19, %v3417_v18  ;;  %v4999_v42 = vld [vmem:[#allocation6_spill] sm:$0xff] }
 0x1f8   : > { %v3420_v22 = vpop.f32.mrf.mxu1  ;;  %v3498_v6 = vpop.f32.mrf.mxu0  ;;  %v2271_v31 = vadd.f32 %v3413_v7, %v4999_v42  ;;  %v2522_v44 = vmul.f32 %v4768_v63, %v4768_v63 }
 0x1f9   : > { %v2549_v10 = vadd.f32 %v2548_v2, %v2518_v35  ;;  %v2480_v53 = vadd.f32 %v2479_v59, %v4754_v12  ;;  %v2520_v38 = vmul.f32 %v4761_v8, %v4761_v8  ;;  %v4778_v25 = vadd.f32 %v3498_v6, %v2266_v62  ;;  %v5001_v59 = vld [vmem:[#allocation7_spill] sm:$0xff] }
 0x1fa   : > { %v3421_v50 = vpop.f32.mrf.mxu1  ;;  %v2418_v5 = vpop.f32.mrf.mxu0  ;;  %v2279_v35 = vadd.f32 %v3419_v20, %v5000_v61  ;;  %v2274_v2 = vadd.f32 %v3416_v15, %v5001_v59 }
 0x1fb   : > { %v4770_v40 = vadd.f32 %v2418_v5, %v2258_v48  ;;  %v2481_v16 = vadd.f32 %v2480_v53, %v4761_v8  ;;  %v2550_v45 = vadd.f32 %v2549_v10, %v2519_v17  ;;  %v3422_v47 = vadd.f32 %v3421_v50, %v3420_v22  ;;  %v5002_v5 = vld [vmem:[#allocation9_spill] sm:$0xff] }
 0x1fc   : > { %v3423_v49 = vpop.f32.mrf.mxu1  ;;  %v3501_v14 = vpop.f32.mrf.mxu0  ;;  %v2523_v6 = vmul.f32 %v4778_v25, %v4778_v25 }
 0x1fd   : > { %v2521_v34 = vmul.f32 %v4770_v40, %v4770_v40  ;;  %v2551_v32 = vadd.f32 %v2550_v45, %v2520_v38  ;;  %v2482_v55 = vadd.f32 %v2481_v16, %v4770_v40  ;;  %v4792_v7 = vadd.f32 %v3501_v14, %v2279_v35 }
 0x1fe   : > { %v3424_v46 = vpop.f32.mrf.mxu1  ;;  %v2431_v29 = vpop.f32.mrf.mxu0  ;;  %v2282_v16 = vadd.f32 %v3422_v47, %v5002_v5 }
 0x1ff   : > { %v2483_v51 = vadd.f32 %v2482_v55, %v4768_v63  ;;  %v2552_v1 = vadd.f32 %v2551_v32, %v2521_v34  ;;  %v4785_v23 = vadd.f32 %v2431_v29, %v2271_v31  ;;  %v3425_v3 = vadd.f32 %v3424_v46, %v3423_v49  ;;  %v5003_v34 = vld [vmem:[#allocation10_spill] sm:$0xff] }
 0x200   : > { %v3426_v18 = vpop.f32.mrf.mxu1  ;;  %v3502_v19 = vpop.f32.mrf.mxu0  ;;  %v2526_v42 = vmul.f32 %v4792_v7, %v4792_v7 }
 0x201   : > { %v2553_v26 = vadd.f32 %v2552_v1, %v2522_v44  ;;  %v2484_v41 = vadd.f32 %v2483_v51, %v4778_v25  ;;  %v2524_v53 = vmul.f32 %v4785_v23, %v4785_v23  ;;  %v4802_v15 = vadd.f32 %v3502_v19, %v2282_v16  ;;  %v5004_v1 = vld [vmem:[#allocation12_spill] sm:$0xff]  ;;  %v5005_v19 = vld [vmem:[#allocation11_spill] sm:$0xff] }
 0x202   : > { %v3427_v48 = vpop.f32.mrf.mxu1  ;;  %v2434_v22 = vpop.f32.mrf.mxu0  ;;  %v2287_v32 = vadd.f32 %v3425_v3, %v5003_v34 }
 0x203   : > { %v4794_v17 = vadd.f32 %v2434_v22, %v2274_v2  ;;  %v2485_v10 = vadd.f32 %v2484_v41, %v4785_v23  ;;  %v2554_v50 = vadd.f32 %v2553_v26, %v2523_v6  ;;  %v3428_v11 = vadd.f32 %v3427_v48, %v3426_v18 }
 0x204   : > { %v3429_v38 = vpop.f32.mrf.mxu1  ;;  %v3505_v45 = vpop.f32.mrf.mxu0  ;;  %v2527_v35 = vmul.f32 %v4802_v15, %v4802_v15 }
 0x205   : > { %v2525_v62 = vmul.f32 %v4794_v17, %v4794_v17  ;;  %v2555_v49 = vadd.f32 %v2554_v50, %v2524_v53  ;;  %v2486_v14 = vadd.f32 %v2485_v10, %v4794_v17  ;;  %v2290_v61 = vadd.f32 %v3428_v11, %v5005_v19 }
 0x206   : > { %v3430_v20 = vpop.f32.mrf.mxu1  ;;  %v2447_v55 = vpop.f32.mrf.mxu0 }
 0x207   : > { %v3431_v46 = vadd.f32 %v3430_v20, %v3429_v38  ;;  %v2487_v31 = vadd.f32 %v2486_v14, %v4792_v7  ;;  %v2556_v29 = vadd.f32 %v2555_v49, %v2525_v62  ;;  %v4809_v44 = vadd.f32 %v2447_v55, %v2287_v32 }
 0x208   : > { %v3432_v47 = vpop.f32.mrf.mxu1  ;;  %v3506_v51 = vpop.f32.mrf.mxu0 }
 0x209   : > { %v2295_v18 = vadd.f32 %v3431_v46, %v5004_v1  ;;  %v2557_v59 = vadd.f32 %v2556_v29, %v2526_v42  ;;  %v2488_v2 = vadd.f32 %v2487_v31, %v4802_v15  ;;  %v2528_v10 = vmul.f32 %v4809_v44, %v4809_v44 }
 0x20a   : > { %v3433_v6 = vpop.f32.mrf.mxu1  ;;  %v2450_v26 = vpop.f32.mrf.mxu0 }
 0x20b   : > { %v3434_v3 = vadd.f32 %v3433_v6, %v3432_v47  ;;  %v4816_v41 = vadd.f32 %v2450_v26, %v2290_v61  ;;  %v4818_v48 = vadd.f32 %v3505_v45, %v2295_v18  ;;  %v2489_v22 = vadd.f32 %v2488_v2, %v4809_v44 }
 0x20c   : > { %v2558_v53 = vadd.f32 %v2557_v59, %v2527_v35 }
 0x20d   : > { %v2298_v50 = vadd.f32 %v3434_v3, %v4578_v43  ;;  %v2529_v5 = vmul.f32 %v4816_v41, %v4816_v41  ;;  %v2490_v38 = vadd.f32 %v2489_v22, %v4816_v41  ;;  %v2530_v45 = vmul.f32 %v4818_v48, %v4818_v48 }
 0x20e   : > { %v2559_v16 = vadd.f32 %v2558_v53, %v2528_v10 }
 0x20f   : > { %v4827_v11 = vadd.f32 %v3506_v51, %v2298_v50  ;;  %v2491_v62 = vadd.f32 %v2490_v38, %v4818_v48 }
 0x210   : > { %v2560_v49 = vadd.f32 %v2559_v16, %v2529_v5 }
 0x211   : > { %v2531_v14 = vmul.f32 %v4827_v11, %v4827_v11  ;;  %v2492_v20 = vadd.f32 %v2491_v62, %v4827_v11 }
 0x212   : > { %v2561_v43 = vadd.f32 %v2560_v49, %v2530_v45 }
 0x213   : > { %v2493_v34 = vrot.slane %v2492_v20, 4 }
 0x214   : > { %v2562_v32 = vadd.f32 %v2561_v43, %v2531_v14 }
 0x215   : > { %v2494_v55 = vadd.f32 %v2493_v34, %v2492_v20 }
 0x216   : > { %v2563_v46 = vrot.slane %v2562_v32, 4 }
 0x217   : > { %v2495_v42 = vrot.slane %v2494_v55, 2 }
 0x218   : > { %v2564_v31 = vadd.f32 %v2563_v46, %v2562_v32 }
 0x219   : > { %v2496_v29 = vadd.f32 %v2495_v42, %v2494_v55 }
 0x21a   : > { %v2565_v47 = vrot.slane %v2564_v31, 2 }
 0x21b   : > { %v2497_v51 = vrot.slane %v2496_v29, 1 }
 0x21c   : > { %v2566_v1 = vadd.f32 %v2565_v47, %v2564_v31 }
 0x21d   : > { %v2498_v18 = vadd.f32 %v2497_v51, %v2496_v29 }
 0x21e   : > { %v2567_v19 = vrot.slane %v2566_v1, 1 }
 0x21f   : > { %v4835_v61 = vmul.f32 0.00390625, %v2498_v18 }
 0x220   : > { %v2568_v35 = vadd.f32 %v2567_v19, %v2566_v1 }
 0x221   : > { %v2570_v2 = vmul.f32 %v4835_v61, %v4835_v61  ;;  %v2582_v26 = vsub.f32 %v4676_v37, %v4835_v61  ;;  %v2585_v3 = vsub.f32 %v4700_v39, %v4835_v61  ;;  %v2586_v10 = vsub.f32 %v4710_v4, %v4835_v61 }
 0x222   : > { %v2569_v59 = vmul.f32 0.00390625, %v2568_v35  ;;  %v2587_v53 = vsub.f32 %v4712_v27, %v4835_v61  ;;  %v2588_v50 = vsub.f32 %v4723_v36, %v4835_v61  ;;  %v2589_v5 = vsub.f32 %v4732_v58, %v4835_v61 }
 0x223   : > { %v2590_v16 = vsub.f32 %v4742_v30, %v4835_v61  ;;  %v2591_v37 = vsub.f32 %v4744_v13, %v4835_v61  ;;  %v2592_v39 = vsub.f32 %v4754_v12, %v4835_v61  ;;  %v2593_v4 = vsub.f32 %v4761_v8, %v4835_v61 }
 0x224   : > { %v2571_v6 = vsub.f32 %v2569_v59, %v2570_v2  ;;  %v2594_v27 = vsub.f32 %v4770_v40, %v4835_v61  ;;  %v2595_v36 = vsub.f32 %v4768_v63, %v4835_v61  ;;  %v2596_v58 = vsub.f32 %v4778_v25, %v4835_v61 }
 0x225   : > { %v2597_v30 = vsub.f32 %v4785_v23, %v4835_v61  ;;  %v2598_v13 = vsub.f32 %v4794_v17, %v4835_v61  ;;  %v2599_v12 = vsub.f32 %v4792_v7, %v4835_v61  ;;  %v2600_v8 = vsub.f32 %v4802_v15, %v4835_v61 }
 0x226   : > { %v2572_v22 = vmax.f32 %v2571_v6, 0.0  ;;  %v2601_v40 = vsub.f32 %v4809_v44, %v4835_v61  ;;  %v2602_v63 = vsub.f32 %v4816_v41, %v4835_v61  ;;  %v2603_v25 = vsub.f32 %v4818_v48, %v4835_v61 }
 0x227   : > { %v2604_v23 = vsub.f32 %v4827_v11, %v4835_v61  ;;  %v2573_v7 = vsub.f32 %v4588_v21, %v4835_v61  ;;  %v2574_v17 = vsub.f32 %v4598_v54, %v4835_v61  ;;  %v2575_v15 = vsub.f32 %v4595_v33, %v4835_v61 }
 0x228   : > { %v2605_v38 = vadd.f32 1e-05, %v2572_v22  ;;  %v2576_v44 = vsub.f32 %v4604_v24, %v4835_v61  ;;  %v2577_v41 = vsub.f32 %v4622_v60, %v4835_v61  ;;  %v2578_v48 = vsub.f32 %v4641_v9, %v4835_v61 }
 0x229   : > { %v2579_v11 = vsub.f32 %v4638_v52, %v4835_v61  ;;  %v2580_v21 = vsub.f32 %v4649_v57, %v4835_v61  ;;  %v2581_v54 = vsub.f32 %v4662_v56, %v4835_v61  ;;  %v2583_v33 = vsub.f32 %v4678_v0, %v4835_v61 }
 0x22a   : > { %3812 = vrsqrt.f32 %v2605_v38  ;;  %v2584_v24 = vsub.f32 %v4691_v28, %v4835_v61 }
 0x237   : > { %v3813_v45 = vpop.eup %3812 }
 0x238   : > { %v2607_v60 = vmul.f32 %v3813_v45, %v2573_v7  ;;  %v2608_v62 = vmul.f32 %v3813_v45, %v2574_v17  ;;  %v2609_v9 = vmul.f32 %v3813_v45, %v2575_v15  ;;  %v2610_v49 = vmul.f32 %v3813_v45, %v2576_v44 }
 0x239   : > { %v2611_v14 = vmul.f32 %v3813_v45, %v2577_v41  ;;  %v2612_v52 = vmul.f32 %v3813_v45, %v2578_v48  ;;  %v2613_v20 = vmul.f32 %v3813_v45, %v2579_v11  ;;  %v2614_v43 = vmul.f32 %v3813_v45, %v2580_v21 }
 0x23a   : > { %v2615_v34 = vmul.f32 %v3813_v45, %v2581_v54  ;;  %v2616_v57 = vmul.f32 %v3813_v45, %v2582_v26  ;;  %v2617_v32 = vmul.f32 %v3813_v45, %v2583_v33  ;;  %v2618_v55 = vmul.f32 %v3813_v45, %v2584_v24 }
 0x23b   : > { %v2619_v56 = vmul.f32 %v3813_v45, %v2585_v3  ;;  %v2620_v46 = vmul.f32 %v3813_v45, %v2586_v10  ;;  %v2621_v42 = vmul.f32 %v3813_v45, %v2587_v53  ;;  %v2622_v0 = vmul.f32 %v3813_v45, %v2588_v50 }
 0x23c   : > { %v2623_v31 = vmul.f32 %v3813_v45, %v2589_v5  ;;  %v2624_v28 = vmul.f32 %v3813_v45, %v2590_v16  ;;  %v2625_v29 = vmul.f32 %v3813_v45, %v2591_v37  ;;  %v2626_v47 = vmul.f32 %v3813_v45, %v2592_v39 }
 0x23d   : > { %v4904_v51 = vmul.f32 %v3813_v45, %v2593_v4  ;;  %v4906_v1 = vmul.f32 %v3813_v45, %v2594_v27  ;;  %v4908_v18 = vmul.f32 %v3813_v45, %v2595_v36  ;;  %v4910_v19 = vmul.f32 %v3813_v45, %v2596_v58 }
 0x23e   : > { %v4912_v61 = vmul.f32 %v3813_v45, %v2597_v30  ;;  %v4914_v35 = vmul.f32 %v3813_v45, %v2598_v13  ;;  %v4916_v59 = vmul.f32 %v3813_v45, %v2599_v12  ;;  %v4918_v2 = vmul.f32 %v3813_v45, %v2600_v8 }
 0x23f   : > { %v4925_v6 = vmul.f32 %v3813_v45, %v2601_v40  ;;  %v4927_v26 = vmul.f32 %v3813_v45, %v2602_v63  ;;  %v4929_v3 = vmul.f32 %v3813_v45, %v2603_v25  ;;  %v4931_v22 = vmul.f32 %v3813_v45, %v2604_v23 }
 0x240   : > { %v2639_v10 = vmax.f32 %v2607_v60, 0.0  ;;  %v2640_v53 = vmax.f32 %v2608_v62, 0.0  ;;  %v2641_v50 = vmax.f32 %v2609_v9, 0.0  ;;  %v2642_v5 = vmax.f32 %v2610_v49, 0.0 }
 0x241   : > { %v2643_v16 = vmax.f32 %v2611_v14, 0.0  ;;  %v2644_v37 = vmax.f32 %v2612_v52, 0.0  ;;  %v2645_v39 = vmax.f32 %v2613_v20, 0.0  ;;  %v2646_v4 = vmax.f32 %v2614_v43, 0.0 }
 0x242   : > { %v2647_v27 = vmax.f32 %v2615_v34, 0.0  ;;  %v2648_v36 = vmax.f32 %v2616_v57, 0.0  ;;  %v2649_v58 = vmax.f32 %v2617_v32, 0.0  ;;  %v2650_v30 = vmax.f32 %v2618_v55, 0.0  ;;  %2671 = vst [vmem:[%s4923_s21] sm:$0xff] %v2639_v10  ;;  %2672 = vst [vmem:[%s4923_s21 + $0x8] sm:$0xff] %v2640_v53 }
 0x243   : > { %2673 = vst [vmem:[%s4923_s21 + $0x10] sm:$0xff] %v2641_v50  ;;  %2674 = vst [vmem:[%s4923_s21 + $0x18] sm:$0xff] %v2642_v5  ;;  %v2651_v13 = vmax.f32 %v2619_v56, 0.0  ;;  %v2652_v12 = vmax.f32 %v2620_v46, 0.0  ;;  %v2653_v8 = vmax.f32 %v2621_v42, 0.0  ;;  %v2654_v40 = vmax.f32 %v2622_v0, 0.0 }
 0x244   : > { %2675 = vst [vmem:[%s4923_s21 + $0x20] sm:$0xff] %v2643_v16  ;;  %2676 = vst [vmem:[%s4923_s21 + $0x28] sm:$0xff] %v2644_v37  ;;  %v2655_v63 = vmax.f32 %v2623_v31, 0.0  ;;  %v2656_v25 = vmax.f32 %v2624_v28, 0.0  ;;  %v2657_v23 = vmax.f32 %v2625_v29, 0.0  ;;  %v2658_v38 = vmax.f32 %v2626_v47, 0.0 }
 0x245   : > { %2677 = vst [vmem:[%s4923_s21 + $0x30] sm:$0xff] %v2645_v39  ;;  %2678 = vst [vmem:[%s4923_s21 + $0x38] sm:$0xff] %v2646_v4  ;;  %v2659_v7 = vmax.f32 %v4904_v51, 0.0  ;;  %v2660_v17 = vmax.f32 %v4906_v1, 0.0  ;;  %v2661_v15 = vmax.f32 %v4908_v18, 0.0  ;;  %v2662_v44 = vmax.f32 %v4910_v19, 0.0 }
 0x246   : > { %2679 = vst [vmem:[%s4923_s21 + $0x40] sm:$0xff] %v2647_v27  ;;  %2680 = vst [vmem:[%s4923_s21 + $0x48] sm:$0xff] %v2648_v36  ;;  %v2663_v41 = vmax.f32 %v4912_v61, 0.0  ;;  %v2664_v48 = vmax.f32 %v4914_v35, 0.0  ;;  %v2665_v11 = vmax.f32 %v4916_v59, 0.0  ;;  %v2666_v45 = vmax.f32 %v4918_v2, 0.0 }
 0x247   : > { %2681 = vst [vmem:[%s4923_s21 + $0x50] sm:$0xff] %v2649_v58  ;;  %2682 = vst [vmem:[%s4923_s21 + $0x58] sm:$0xff] %v2650_v30  ;;  %v2667_v21 = vmax.f32 %v4925_v6, 0.0  ;;  %v2668_v54 = vmax.f32 %v4927_v26, 0.0  ;;  %v2669_v33 = vmax.f32 %v4929_v3, 0.0  ;;  %v2670_v24 = vmax.f32 %v4931_v22, 0.0 }
 0x248   : > { %2683 = vst [vmem:[%s4923_s21 + $0x60] sm:$0xff] %v2651_v13  ;;  %2684 = vst [vmem:[%s4923_s21 + $0x68] sm:$0xff] %v2652_v12 }
 0x249   : > { %2685 = vst [vmem:[%s4923_s21 + $0x70] sm:$0xff] %v2653_v8  ;;  %2686 = vst [vmem:[%s4923_s21 + $0x78] sm:$0xff] %v2654_v40 }
 0x24a   : > { %2687 = vst [vmem:[%s4923_s21 + $0x80] sm:$0xff] %v2655_v63  ;;  %2688 = vst [vmem:[%s4923_s21 + $0x88] sm:$0xff] %v2656_v25 }
 0x24b   : > { %2689 = vst [vmem:[%s4923_s21 + $0x90] sm:$0xff] %v2657_v23  ;;  %2690 = vst [vmem:[%s4923_s21 + $0x98] sm:$0xff] %v2658_v38 }
 0x24c   : > { %2691 = vst [vmem:[%s4923_s21 + $0xa0] sm:$0xff] %v2659_v7  ;;  %2692 = vst [vmem:[%s4923_s21 + $0xa8] sm:$0xff] %v2660_v17 }
 0x24d   : > { %2693 = vst [vmem:[%s4923_s21 + $0xb0] sm:$0xff] %v2661_v15  ;;  %2694 = vst [vmem:[%s4923_s21 + $0xb8] sm:$0xff] %v2662_v44 }
 0x24e   : > { %2695 = vst [vmem:[%s4923_s21 + $0xc0] sm:$0xff] %v2663_v41  ;;  %2696 = vst [vmem:[%s4923_s21 + $0xc8] sm:$0xff] %v2664_v48 }
 0x24f   : > { %2697 = vst [vmem:[%s4923_s21 + $0xd0] sm:$0xff] %v2665_v11  ;;  %2698 = vst [vmem:[%s4923_s21 + $0xd8] sm:$0xff] %v2666_v45 }
 0x250   : > { %2699 = vst [vmem:[%s4923_s21 + $0xe0] sm:$0xff] %v2667_v21  ;;  %2700 = vst [vmem:[%s4923_s21 + $0xe8] sm:$0xff] %v2668_v54 }
 0x251   : > { %2701 = vst [vmem:[%s4923_s21 + $0xf0] sm:$0xff] %v2669_v33  ;;  %2702 = vst [vmem:[%s4923_s21 + $0xf8] sm:$0xff] %v2670_v24 }
 0x252 PF: > { %s13_s12 = sadd.s32 1, %s3820_s12  }
 0x253   : > { %p10_p4 = scmp.ge.s32.totalorder %s13_s12, 4  }
 0x255   :  { %12 = sbr.rel (!%p10_p4) target bundleno = 1 (0x1), region = 62 }

// kernel: forward.15
= control target key start
LH: loop header
LB: loop body
LE: loop exit
PB: predicated region body
PF: predicated region fallthrough
CT: control target
= control target key end

     0   :  { %s3974_s15 = smov 0   ;;  %s5153_s0 = inlined_call_operand.vmem [shape: bf16[512,1152], index: 0, kind: input, shape index: {}]   ;;  %s5154_s1 = inlined_call_operand.vmem [shape: bf16[1152,128], index: 1, kind: input, shape index: {}]   ;;  %s5155_s2 = inlined_call_operand.vmem [shape: f32[1,128], index: 2, kind: input, shape index: {}]   ;;  %s5156_s3 = inlined_call_operand.vmem [shape: f32[512,128], index: 3, kind: input, shape index: {}]   ;;  %s5157_s4 = inlined_call_operand.vmem [shape: f32[512,128], index: 4, kind: output, shape index: {}]  }
   0x1 LB: > { %s2884_s16 = sadd.s32 4294967295, %s3947_s15   ;;  %p2888_p0 = scmp.ge.s32.totalorder %s3947_s15, 1  ;;  %s3947_s15 = sphi %s3974_s15, %s14_s15  }
   0x2   : > { %p175_p1 = scmp.lt.s32.totalorder %s3947_s15, 3 }
   0x4   : > { %p176_p2 = pnand %p2888_p0, %p175_p1 }
   0x6   : > { %179 = sbr.rel (%p176_p2) target bundleno = 602 (0x25a), region = 36 }
   0xb   : > { %v3659_v0 = vld [vmem:[%s5154_s1 + $0x78] sm:$0xff]   ;;  %s2889_s19 = sshll.u32 %s2884_s16, 5  ;;  %v3661_v2 = vld [vmem:[%s5154_s1 + $0x70] sm:$0xff]   ;;  %v3663_v4 = vld [vmem:[%s5154_s1 + $0x68] sm:$0xff]  }
   0xc   : > { %v3660_v1 = vld [vmem:[%s5154_s1 + $0x38] sm:$0xff]   ;;  %3114 = vmatprep.subr.bf16.mxu0 %v3659_v0  ;;  %3634 = vmatprep.subr.bf16.mxu1 %v3659_v0  ;;  %p208_p3 = scmp.lt.s32.totalorder %s2889_s19, 63  ;;  %v3662_v3 = vld [vmem:[%s5154_s1 + $0x30] sm:$0xff]   ;;  %v3664_v5 = vld [vmem:[%s5154_s1 + $0x28] sm:$0xff]  }
   0xd   : > { %3115 = vmatpush3.bf16.msra.mxu0 %v3660_v1  ;;  %3642 = vmatpush3.bf16.msra.mxu1 %v3660_v1  ;;  %v3665_v6 = vld [vmem:[%s5154_s1 + $0x60] sm:$0xff]   ;;  %v3667_v8 = vld [vmem:[%s5154_s1 + $0x58] sm:$0xff]   ;;  %v3669_v10 = vld [vmem:[%s5154_s1 + $0x50] sm:$0xff]  }
   0xe   : > { %3116 = vmatprep.subr.bf16.mxu0 %v3661_v2  ;;  %3635 = vmatprep.subr.bf16.mxu1 %v3661_v2  ;;  %s5181_s19 = smov (!%p208_p3, %s2889_s19), 63  ;;  %v3666_v7 = vld [vmem:[%s5154_s1 + $0x20] sm:$0xff]   ;;  %v3668_v9 = vld [vmem:[%s5154_s1 + $0x18] sm:$0xff]   ;;  %v3670_v13 = vld [vmem:[%s5154_s1 + $0x10] sm:$0xff]  }
   0xf   : > { %s3650_s6 = smul.u32 36, %s5181_s19  ;;  %v3671_v14 = vld [vmem:[%s5154_s1 + $0x48] sm:$0xff]   ;;  %v3673_v16 = vld [vmem:[%s5154_s1 + $0x40] sm:$0xff]   ;;  %v3681_v18 = vld [vmem:[%s5154_s1 + $0xf8] sm:$0xff]  }
  0x10   : > { %v3672_v15 = vld [vmem:[%s5154_s1 + $0x8] sm:$0xff]   ;;  %v3674_v17 = vld [vmem:[%s5154_s1] sm:$0xff]   ;;  %v3682_v21 = vld [vmem:[%s5154_s1 + $0x178] sm:$0xff]  }
  0x11   : > { %3117 = vmatpush3.bf16.msra.mxu0 %v3662_v3  ;;  %3643 = vmatpush3.bf16.msra.mxu1 %v3662_v3  ;;  %s4015_s13 = scalar_lea.vmem %s5153_s0, %s3650_s6  ;;  %v3683_v22 = vld [vmem:[%s5154_s1 + $0xb8] sm:$0xff]   ;;  %v3685_v24 = vld [vmem:[%s5154_s1 + $0xf0] sm:$0xff]   ;;  %v3693_v32 = vld [vmem:[%s5154_s1 + $0xe8] sm:$0xff]  }
  0x12   : > { %3118 = vmatprep.subr.bf16.mxu0 %v3663_v4  ;;  %3636 = vmatprep.subr.bf16.mxu1 %v3663_v4  ;;  %v3677_v11 = vld [vmem:[%s4015_s13 + $0x4] ss:$36 sps:$4 sm:$0xff]   ;;  %v3684_v23 = vld [vmem:[%s5154_s1 + $0x138] sm:$0xff]   ;;  %v3687_v25 = vld [vmem:[%s4015_s13 + $0x4c] ss:$36 sps:$4 sm:$0xff]  }
  0x13   : > { %v3680_v12 = vld [vmem:[%s4015_s13 + $0x364] ss:$36 sps:$4 sm:$0xff]   ;;  %1738 = vmatprep.mubr.bf16.mxu0 %v3677_v11  ;;  %v3689_v26 = vld [vmem:[%s4015_s13 + $0x3ac] ss:$36 sps:$4 sm:$0xff]   ;;  %v3699_v35 = vld [vmem:[%s4015_s13 + $0x94] ss:$36 sps:$4 sm:$0xff]  }
  0x14   : > { %1834 = vmatprep.mubr.bf16.mxu1 %v3680_v12  ;;  %v3675_v19 = vld [vmem:[%s4015_s13] ss:$36 sps:$4 sm:$0xff]   ;;  %v3696_v27 = vld [vmem:[%s5154_s1 + $0x170] sm:$0xff]   ;;  %v3691_v30 = vld [vmem:[%s4015_s13 + $0x48] ss:$36 sps:$4 sm:$0xff]  }
  0x15   : > { %3119 = vmatpush3.bf16.msra.mxu0 %v3664_v5  ;;  %3644 = vmatpush3.bf16.msra.mxu1 %v3664_v5  ;;  %v3678_v20 = vld [vmem:[%s4015_s13 + $0x360] ss:$36 sps:$4 sm:$0xff]   ;;  %v3686_v28 = vld [vmem:[%s5154_s1 + $0xb0] sm:$0xff]   ;;  %v3692_v31 = vld [vmem:[%s4015_s13 + $0x3a8] ss:$36 sps:$4 sm:$0xff]  }
  0x16   : > { %3120 = vmatprep.subr.bf16.mxu0 %v3665_v6  ;;  %3637 = vmatprep.subr.bf16.mxu1 %v3665_v6  ;;  %v3698_v29 = vld [vmem:[%s5154_s1 + $0x130] sm:$0xff]   ;;  %v3694_v33 = vld [vmem:[%s5154_s1 + $0xa8] sm:$0xff]   ;;  %v3695_v34 = vld [vmem:[%s5154_s1 + $0xe0] sm:$0xff]  }
  0x17   : > { %v3701_v36 = vld [vmem:[%s4015_s13 + $0x3f4] ss:$36 sps:$4 sm:$0xff]   ;;  %v3697_v37 = vld [vmem:[%s5154_s1 + $0xa0] sm:$0xff]   ;;  %v3716_v41 = vld [vmem:[%s5154_s1 + $0x168] sm:$0xff]  }
  0x18   : > { %v3705_v38 = vld [vmem:[%s5154_s1 + $0xd8] sm:$0xff]   ;;  %v3703_v39 = vld [vmem:[%s4015_s13 + $0x90] ss:$36 sps:$4 sm:$0xff]   ;;  %v3718_v44 = vld [vmem:[%s5154_s1 + $0x128] sm:$0xff]  }
  0x19   : > { %3121 = vmatpush3.bf16.msra.mxu0 %v3666_v7  ;;  %3645 = vmatpush3.bf16.msra.mxu1 %v3666_v7  ;;  %v3704_v40 = vld [vmem:[%s4015_s13 + $0x3f0] ss:$36 sps:$4 sm:$0xff]   ;;  %v3706_v42 = vld [vmem:[%s5154_s1 + $0x98] sm:$0xff]   ;;  %v3715_v50 = vld [vmem:[%s5154_s1 + $0xc8] sm:$0xff]  }
  0x1a   : > { %3122 = vmatprep.subr.bf16.mxu0 %v3667_v8  ;;  %3638 = vmatprep.subr.bf16.mxu1 %v3667_v8  ;;  %v3707_v43 = vld [vmem:[%s5154_s1 + $0xd0] sm:$0xff]   ;;  %v3709_v45 = vld [vmem:[%s4015_s13 + $0xdc] ss:$36 sps:$4 sm:$0xff]   ;;  %v3717_v51 = vld [vmem:[%s5154_s1 + $0x88] sm:$0xff]  }
  0x1b   : > { %v3711_v46 = vld [vmem:[%s4015_s13 + $0x43c] ss:$36 sps:$4 sm:$0xff]   ;;  %v3708_v47 = vld [vmem:[%s5154_s1 + $0x90] sm:$0xff]   ;;  %v3721_v52 = vld [vmem:[%s4015_s13 + $0x124] ss:$36 sps:$4 sm:$0xff]  }
  0x1c   : > { %v3713_v48 = vld [vmem:[%s4015_s13 + $0xd8] ss:$36 sps:$4 sm:$0xff]   ;;  %v3719_v53 = vld [vmem:[%s5154_s1 + $0xc0] sm:$0xff]   ;;  %v3725_v56 = vld [vmem:[%s4015_s13 + $0xc] ss:$36 sps:$4 sm:$0xff]  }
  0x1d   : > { %3123 = vmatpush3.bf16.msra.mxu0 %v3668_v9  ;;  %3646 = vmatpush3.bf16.msra.mxu1 %v3668_v9  ;;  %v3714_v49 = vld [vmem:[%s4015_s13 + $0x438] ss:$36 sps:$4 sm:$0xff]   ;;  %v3729_v54 = vld [vmem:[%s5154_s1 + $0x160] sm:$0xff]   ;;  %v3723_v58 = vld [vmem:[%s4015_s13 + $0x8] ss:$36 sps:$4 sm:$0xff]  }
  0x1e   : > { %3124 = vmatprep.subr.bf16.mxu0 %v3669_v10  ;;  %3639 = vmatprep.subr.bf16.mxu1 %v3669_v10  ;;  %v3730_v55 = vld [vmem:[%s5154_s1 + $0x120] sm:$0xff]   ;;  %v3727_v60 = vld [vmem:[%s5154_s1 + $0x1f8] sm:$0xff]   ;;  %v3731_v62 = vld [vmem:[%s4015_s13 + $0x16c] ss:$36 sps:$4 sm:$0xff]  }
  0x1f   : > { %v3720_v57 = vld [vmem:[%s5154_s1 + $0x80] sm:$0xff]   ;;  %v3728_v61 = vld [vmem:[%s5154_s1 + $0x1b8] sm:$0xff]   ;;  %v3744_v2 = vld [vmem:[%s5154_s1 + $0x1f0] sm:$0xff]  }
  0x20   : > { %v3726_v59 = vld [vmem:[%s4015_s13 + $0x120] ss:$36 sps:$4 sm:$0xff]   ;;  %v3743_v63 = vld [vmem:[%s5154_s1 + $0x158] sm:$0xff]   ;;  %v3746_v3 = vld [vmem:[%s5154_s1 + $0x1b0] sm:$0xff]  }
  0x21   : > { %3125 = vmatpush3.bf16.msra.mxu0 %v3670_v13  ;;  %3647 = vmatpush3.bf16.msra.mxu1 %v3670_v13  ;;  %v3733_v0 = vld [vmem:[%s4015_s13 + $0x54] ss:$36 sps:$4 sm:$0xff]   ;;  %v3735_v4 = vld [vmem:[%s4015_s13 + $0x168] ss:$36 sps:$4 sm:$0xff]   ;;  %v3739_v9 = vld [vmem:[%s4015_s13 + $0x9c] ss:$36 sps:$4 sm:$0xff]  }
  0x22   : > { %3126 = vmatprep.subr.bf16.mxu0 %v3671_v14  ;;  %3640 = vmatprep.subr.bf16.mxu1 %v3671_v14  ;;  %v3745_v1 = vld [vmem:[%s5154_s1 + $0x118] sm:$0xff]   ;;  %v3753_v5 = vld [vmem:[%s5154_s1 + $0x150] sm:$0xff]   ;;  %v3761_v10 = vld [vmem:[%s5154_s1 + $0x1e8] sm:$0xff]  }
  0x23   : > { %v3754_v6 = vld [vmem:[%s5154_s1 + $0x110] sm:$0xff]   ;;  %v3762_v11 = vld [vmem:[%s5154_s1 + $0x1a8] sm:$0xff]   ;;  %v3742_v13 = vld [vmem:[%s4015_s13 + $0x98] ss:$36 sps:$4 sm:$0xff]  }
  0x24   : > { %v3736_v7 = vld [vmem:[%s4015_s13 + $0x50] ss:$36 sps:$4 sm:$0xff]   ;;  %v3747_v14 = vld [vmem:[%s4015_s13 + $0x1fc] ss:$36 sps:$4 sm:$0xff]  }
  0x25   : > { %3127 = vmatpush3.bf16.msra.mxu0 %v3672_v15  ;;  %3648 = vmatpush3.bf16.msra.mxu1 %v3672_v15  ;;  %v3737_v8 = vld [vmem:[%s4015_s13 + $0x1b4] ss:$36 sps:$4 sm:$0xff]   ;;  %v3769_v15 = vld [vmem:[%s5154_s1 + $0x148] sm:$0xff]  }
  0x26   : > { %3128 = vmatprep.subr.bf16.mxu0 %v3673_v16  ;;  %3641 = vmatprep.subr.bf16.mxu1 %v3673_v16  ;;  %v3741_v12 = vld [vmem:[%s4015_s13 + $0x1b0] ss:$36 sps:$4 sm:$0xff]   ;;  %v3770_v16 = vld [vmem:[%s5154_s1 + $0x108] sm:$0xff]  }
  0x29   : > { %3129 = vmatpush3.bf16.msra.mxu0 %v3674_v17  ;;  %3649 = vmatpush3.bf16.msra.mxu1 %v3674_v17  ;;  %v3749_v17 = vld [vmem:[%s4015_s13 + $0xe4] ss:$36 sps:$4 sm:$0xff]  }
  0x2a   : > { %3226 = vmatprep.subr.bf16.mxu1 %v3681_v18  ;;  %3338 = vmatprep.subr.bf16.mxu0 %v3682_v21  ;;  %v3777_v18 = vld [vmem:[%s5154_s1 + $0x1e0] sm:$0xff]  }
  0x2b   : > { %v3779_v21 = vld [vmem:[%s5154_s1 + $0x140] sm:$0xff]  }
  0x2c   : > { %1739 = vmatmul.mubr.bf16.vlgmr.msra.gmra.mxu0 %v3675_v19  ;;  %1835 = vmatmul.mubr.bf16.vlgmr.msra.gmra.mxu1 %v3678_v20  ;;  %v3778_v19 = vld [vmem:[%s5154_s1 + $0x1a0] sm:$0xff]   ;;  %v3751_v20 = vld [vmem:[%s4015_s13 + $0x1f8] ss:$36 sps:$4 sm:$0xff]  }
  0x2d   : > { %3227 = vmatpush3.bf16.msra.mxu1 %v3683_v22  ;;  %3339 = vmatpush3.bf16.msra.mxu0 %v3684_v23  ;;  %v3780_v22 = vld [vmem:[%s5154_s1 + $0x100] sm:$0xff]  }
  0x2e   : > { %3228 = vmatprep.subr.bf16.mxu1 %v3685_v24  ;;  %1746 = vmatprep.mubr.bf16.mxu0 %v3687_v25  ;;  %v3752_v23 = vld [vmem:[%s4015_s13 + $0xe0] ss:$36 sps:$4 sm:$0xff]   ;;  %v3757_v25 = vld [vmem:[%s4015_s13 + $0x12c] ss:$36 sps:$4 sm:$0xff]  }
  0x2f   : > { %1842 = vmatprep.mubr.bf16.mxu1 %v3689_v26  ;;  %3340 = vmatprep.subr.bf16.mxu0 %v3696_v27  ;;  %v3755_v24 = vld [vmem:[%s4015_s13 + $0x244] ss:$36 sps:$4 sm:$0xff]   ;;  %v3793_v26 = vld [vmem:[%s5154_s1 + $0x1d8] sm:$0xff]  }
  0x30   : > { %v3759_v27 = vld [vmem:[%s4015_s13 + $0x240] ss:$36 sps:$4 sm:$0xff]  }
  0x31   : > { %3229 = vmatpush3.bf16.msra.mxu1 %v3686_v28  ;;  %3341 = vmatpush3.bf16.msra.mxu0 %v3698_v29  ;;  %v3794_v28 = vld [vmem:[%s5154_s1 + $0x238] sm:$0xff]  }
  0x32   : > { %3230 = vmatprep.subr.bf16.mxu1 %v3693_v32  ;;  %3342 = vmatprep.subr.bf16.mxu0 %v3716_v41  ;;  %v3795_v29 = vld [vmem:[%s5154_s1 + $0x198] sm:$0xff]   ;;  %v3823_v41 = vld [vmem:[%s5154_s1 + $0x1c8] sm:$0xff]  }
  0x33   : > { %v3765_v32 = vld [vmem:[%s4015_s13 + $0x174] ss:$36 sps:$4 sm:$0xff]  }
  0x34   : > { %1747 = vmatmul.mubr.bf16.gmra.mxu0 %v3691_v30  ;;  %1843 = vmatmul.mubr.bf16.gmra.mxu1 %v3692_v31  ;;  %v3760_v30 = vld [vmem:[%s4015_s13 + $0x128] ss:$36 sps:$4 sm:$0xff]  }
  0x35   : > { %3231 = vmatpush3.bf16.msra.mxu1 %v3694_v33  ;;  %1754 = vmatprep.mubr.bf16.mxu0 %v3699_v35  ;;  %v3763_v31 = vld [vmem:[%s4015_s13 + $0x28c] ss:$36 sps:$4 sm:$0xff]  }
  0x36   : > { %3232 = vmatprep.subr.bf16.mxu1 %v3695_v34  ;;  %1850 = vmatprep.mubr.bf16.mxu1 %v3701_v36  ;;  %v3808_v33 = vld [vmem:[%s5154_s1 + $0x1d0] sm:$0xff]   ;;  %v3767_v34 = vld [vmem:[%s4015_s13 + $0x288] ss:$36 sps:$4 sm:$0xff]  }
  0x37   : > { %3343 = vmatpush3.bf16.msra.mxu0 %v3718_v44  ;;  %v3768_v35 = vld [vmem:[%s4015_s13 + $0x170] ss:$36 sps:$4 sm:$0xff]   ;;  %v3783_v44 = vld [vmem:[%s4015_s13 + $0x204] ss:$36 sps:$4 sm:$0xff]  }
  0x38   : > { %3344 = vmatprep.subr.bf16.mxu0 %v3729_v54  ;;  %v3810_v36 = vld [vmem:[%s5154_s1 + $0x190] sm:$0xff]   ;;  %v3798_v54 = vld [vmem:[%s4015_s13 + $0x5c] ss:$36 sps:$4 sm:$0xff]  }
  0x39   : > { %3233 = vmatpush3.bf16.msra.mxu1 %v3697_v37  ;;  %v3771_v37 = vld [vmem:[%s4015_s13 + $0x2d4] ss:$36 sps:$4 sm:$0xff]  }
  0x3a   : > { %3234 = vmatprep.subr.bf16.mxu1 %v3705_v38  ;;  %v3773_v38 = vld [vmem:[%s4015_s13 + $0x1bc] ss:$36 sps:$4 sm:$0xff]  }
  0x3b   : > { %3345 = vmatpush3.bf16.msra.mxu0 %v3730_v55  ;;  %v3809_v55 = vld [vmem:[%s5154_s1 + $0x230] sm:$0xff]  }
  0x3c   : > { %1755 = vmatmul.mubr.bf16.gmra.mxu0 %v3703_v39  ;;  %1851 = vmatmul.mubr.bf16.gmra.mxu1 %v3704_v40  ;;  %v3775_v39 = vld [vmem:[%s4015_s13 + $0x2d0] ss:$36 sps:$4 sm:$0xff]   ;;  %v3776_v40 = vld [vmem:[%s4015_s13 + $0x1b8] ss:$36 sps:$4 sm:$0xff]  }
  0x3d   : > { %3235 = vmatpush3.bf16.msra.mxu1 %v3706_v42  ;;  %1762 = vmatprep.mubr.bf16.mxu0 %v3709_v45  ;;  %v3781_v42 = vld [vmem:[%s4015_s13 + $0x31c] ss:$36 sps:$4 sm:$0xff]  }
  0x3e   : > { %3236 = vmatprep.subr.bf16.mxu1 %v3707_v43  ;;  %1858 = vmatprep.mubr.bf16.mxu1 %v3711_v46  ;;  %v3825_v43 = vld [vmem:[%s5154_s1 + $0x188] sm:$0xff]   ;;  %v3785_v45 = vld [vmem:[%s4015_s13 + $0x318] ss:$36 sps:$4 sm:$0xff]   ;;  %v3786_v46 = vld [vmem:[%s4015_s13 + $0x200] ss:$36 sps:$4 sm:$0xff]  }
  0x3f   : > { %3346 = vmatprep.subr.bf16.mxu0 %v3743_v63  ;;  %v3853_v63 = vld [vmem:[%s5154_s1 + $0x218] sm:$0xff]  }
  0x40   : > { %3347 = vmatpush3.bf16.msra.mxu0 %v3745_v1  ;;  %v3811_v1 = vld [vmem:[%s4015_s13 + $0x324] ss:$36 sps:$4 sm:$0xff]  }
  0x41   : > { %3237 = vmatpush3.bf16.msra.mxu1 %v3708_v47  ;;  %3348 = vmatprep.subr.bf16.mxu0 %v3753_v5  ;;  %v3838_v47 = vld [vmem:[%s5154_s1 + $0x1c0] sm:$0xff]   ;;  %v3879_v5 = vld [vmem:[%s5154_s1 + $0x208] sm:$0xff]  }
  0x42   : > { %3238 = vmatprep.subr.bf16.mxu1 %v3715_v50  ;;  %v3791_v50 = vld [vmem:[%s4015_s13 + $0x14] ss:$36 sps:$4 sm:$0xff]  }
  0x44   : > { %1763 = vmatmul.mubr.bf16.gmra.mxu0 %v3713_v48  ;;  %1859 = vmatmul.mubr.bf16.gmra.mxu1 %v3714_v49  ;;  %v3787_v48 = vld [vmem:[%s4015_s13 + $0x24c] ss:$36 sps:$4 sm:$0xff]   ;;  %v3840_v49 = vld [vmem:[%s5154_s1 + $0x180] sm:$0xff]  }
  0x45   : > { %3239 = vmatpush3.bf16.msra.mxu1 %v3717_v51  ;;  %1770 = vmatprep.mubr.bf16.mxu0 %v3721_v52  ;;  %v3789_v51 = vld [vmem:[%s4015_s13 + $0x10] ss:$36 sps:$4 sm:$0xff]   ;;  %v3792_v52 = vld [vmem:[%s4015_s13 + $0x248] ss:$36 sps:$4 sm:$0xff]  }
  0x46   : > { %3240 = vmatprep.subr.bf16.mxu1 %v3719_v53  ;;  %1899 = vmatprep.mubr.bf16.mxu1 %v3725_v56  ;;  %v3796_v53 = vld [vmem:[%s4015_s13 + $0x294] ss:$36 sps:$4 sm:$0xff]   ;;  %v3824_v56 = vld [vmem:[%s5154_s1 + $0x228] sm:$0xff]  }
  0x47   : > { %3349 = vmatpush3.bf16.msra.mxu0 %v3754_v6  ;;  %v3816_v6 = vld [vmem:[%s4015_s13 + $0xe8] ss:$36 sps:$4 sm:$0xff]  }
  0x48   : > { %3350 = vmatprep.subr.bf16.mxu0 %v3769_v15  ;;  %v3831_v15 = vld [vmem:[%s4015_s13 + $0x178] ss:$36 sps:$4 sm:$0xff]  }
  0x49   : > { %3241 = vmatpush3.bf16.msra.mxu1 %v3720_v57  ;;  %v3800_v57 = vld [vmem:[%s4015_s13 + $0x290] ss:$36 sps:$4 sm:$0xff]  }
  0x4a   : > { %3450 = vmatprep.subr.bf16.mxu1 %v3727_v60  ;;  %v3804_v60 = vld [vmem:[%s4015_s13 + $0xa4] ss:$36 sps:$4 sm:$0xff]  }
  0x4b   : > { %3351 = vmatpush3.bf16.msra.mxu0 %v3770_v16  ;;  %v3832_v16 = vld [vmem:[%s4015_s13 + $0x3fc] ss:$36 sps:$4 sm:$0xff]  }
  0x4c   : > { %1771 = vmatmul.mubr.bf16.gmra.mxu0 %v3726_v59  ;;  %1900 = vmatmul.mubr.bf16.vlgmr.msra.gmra.mxu1 %v3723_v58  ;;  %v3801_v58 = vld [vmem:[%s4015_s13 + $0x58] ss:$36 sps:$4 sm:$0xff]  }
  0x4d   : > { %3451 = vmatpush3.bf16.msra.mxu1 %v3728_v61  ;;  %1778 = vmatprep.mubr.bf16.mxu0 %v3731_v62  ;;  %v3802_v59 = vld [vmem:[%s4015_s13 + $0x2dc] ss:$36 sps:$4 sm:$0xff]  }
  0x4e   : > { %1907 = vmatprep.mubr.bf16.mxu1 %v3733_v0  ;;  %3452 = vmatprep.subr.bf16.mxu1 %v3744_v2  ;;  %v3839_v61 = vld [vmem:[%s5154_s1 + $0x220] sm:$0xff]   ;;  %v3806_v62 = vld [vmem:[%s4015_s13 + $0x2d8] ss:$36 sps:$4 sm:$0xff]   ;;  %v3813_v2 = vld [vmem:[%s4015_s13 + $0xec] ss:$36 sps:$4 sm:$0xff]  }
  0x4f   : > { %3352 = vmatprep.subr.bf16.mxu0 %v3779_v21  ;;  %v3807_v0 = vld [vmem:[%s4015_s13 + $0xa0] ss:$36 sps:$4 sm:$0xff]   ;;  %v3843_v21 = vld [vmem:[%s4015_s13 + $0x20c] ss:$36 sps:$4 sm:$0xff]  }
  0x50   : > { %3353 = vmatpush3.bf16.msra.mxu0 %v3780_v22  ;;  %v3845_v22 = vld [vmem:[%s4015_s13 + $0x440] ss:$36 sps:$4 sm:$0xff]  }
  0x51   : > { %3453 = vmatpush3.bf16.msra.mxu1 %v3746_v3  ;;  %3586 = vmatprep.subr.bf16.mxu0 %v3794_v28  ;;  %v3866_v3 = vld [vmem:[%s5154_s1 + $0x210] sm:$0xff]  }
  0x52   : > { %3454 = vmatprep.subr.bf16.mxu1 %v3761_v10  ;;  %v3821_v10 = vld [vmem:[%s4015_s13 + $0x368] ss:$36 sps:$4 sm:$0xff]  }
  0x54   : > { %1779 = vmatmul.mubr.bf16.gmra.mxu0 %v3735_v4  ;;  %1908 = vmatmul.mubr.bf16.gmra.mxu1 %v3736_v7  ;;  %v3815_v4 = vld [vmem:[%s4015_s13 + $0x320] ss:$36 sps:$4 sm:$0xff]   ;;  %v3817_v7 = vld [vmem:[%s4015_s13 + $0x36c] ss:$36 sps:$4 sm:$0xff]  }
  0x55   : > { %1786 = vmatprep.mubr.bf16.mxu0 %v3737_v8  ;;  %1915 = vmatprep.mubr.bf16.mxu1 %v3739_v9  ;;  %v3819_v8 = vld [vmem:[%s4015_s13 + $0x134] ss:$36 sps:$4 sm:$0xff]   ;;  %v3892_v9 = vld [vmem:[%s5154_s1 + $0x200] sm:$0xff]  }
  0x56   : > { %3455 = vmatpush3.bf16.msra.mxu1 %v3762_v11  ;;  %v3822_v11 = vld [vmem:[%s4015_s13 + $0x130] ss:$36 sps:$4 sm:$0xff]  }
  0x57   : > { %3456 = vmatprep.subr.bf16.mxu1 %v3777_v18  ;;  %v3836_v18 = vld [vmem:[%s4015_s13 + $0x3f8] ss:$36 sps:$4 sm:$0xff]  }
  0x5a   : > { %3457 = vmatpush3.bf16.msra.mxu1 %v3778_v19  ;;  %v3837_v19 = vld [vmem:[%s4015_s13 + $0x1c0] ss:$36 sps:$4 sm:$0xff]  }
  0x5b   : > { %3458 = vmatprep.subr.bf16.mxu1 %v3793_v26  ;;  %v3849_v26 = vld [vmem:[%s4015_s13 + $0x18] ss:$36 sps:$4 sm:$0xff]  }
  0x5c   : > { %1787 = vmatmul.mubr.bf16.gmra.mxu0 %v3741_v12  ;;  %1916 = vmatmul.mubr.bf16.gmra.mxu1 %v3742_v13  ;;  %v3826_v12 = vld [vmem:[%s4015_s13 + $0x3b4] ss:$36 sps:$4 sm:$0xff]   ;;  %v3828_v13 = vld [vmem:[%s4015_s13 + $0x17c] ss:$36 sps:$4 sm:$0xff]  }
  0x5d   : > { %1794 = vmatprep.mubr.bf16.mxu0 %v3747_v14  ;;  %1923 = vmatprep.mubr.bf16.mxu1 %v3749_v17  ;;  %v3830_v14 = vld [vmem:[%s4015_s13 + $0x3b0] ss:$36 sps:$4 sm:$0xff]   ;;  %v3834_v17 = vld [vmem:[%s4015_s13 + $0x1c4] ss:$36 sps:$4 sm:$0xff]  }
  0x5e   : > { %3459 = vmatpush3.bf16.msra.mxu1 %v3795_v29  ;;  %v3856_v29 = vld [vmem:[%s4015_s13 + $0x64] ss:$36 sps:$4 sm:$0xff]  }
  0x5f   : > { %3460 = vmatprep.subr.bf16.mxu1 %v3808_v33  ;;  %v3862_v33 = vld [vmem:[%s4015_s13 + $0xac] ss:$36 sps:$4 sm:$0xff]  }
  0x62   : > { %3461 = vmatpush3.bf16.msra.mxu1 %v3810_v36  ;;  %v3867_v36 = vld [vmem:[%s4015_s13 + $0x32c] ss:$36 sps:$4 sm:$0xff]  }
  0x63   : > { %3462 = vmatprep.subr.bf16.mxu1 %v3823_v41  ;;  %v3875_v41 = vld [vmem:[%s4015_s13 + $0x13c] ss:$36 sps:$4 sm:$0xff]  }
  0x64   : > { %1795 = vmatmul.mubr.bf16.gmra.mxu0 %v3751_v20  ;;  %1924 = vmatmul.mubr.bf16.gmra.mxu1 %v3752_v23  ;;  %v3841_v20 = vld [vmem:[%s4015_s13 + $0x444] ss:$36 sps:$4 sm:$0xff]  }
  0x65   : > { %1802 = vmatprep.mubr.bf16.mxu0 %v3755_v24  ;;  %1931 = vmatprep.mubr.bf16.mxu1 %v3757_v25  ;;  %v3846_v23 = vld [vmem:[%s4015_s13 + $0x208] ss:$36 sps:$4 sm:$0xff]   ;;  %v3847_v24 = vld [vmem:[%s4015_s13 + $0x254] ss:$36 sps:$4 sm:$0xff]   ;;  %v3851_v25 = vld [vmem:[%s4015_s13 + $0x1c] ss:$36 sps:$4 sm:$0xff]  }
  0x66   : > { %3463 = vmatpush3.bf16.msra.mxu1 %v3825_v43  ;;  %v3878_v43 = vld [vmem:[%s4015_s13 + $0x138] ss:$36 sps:$4 sm:$0xff]  }
  0x67   : > { %3464 = vmatprep.subr.bf16.mxu1 %v3838_v47 }
  0x6a   : > { %3465 = vmatpush3.bf16.msra.mxu1 %v3840_v49 }
  0x6c   : > { %1803 = vmatmul.mubr.bf16.gmra.mxu0 %v3759_v27  ;;  %1932 = vmatmul.mubr.bf16.gmra.mxu1 %v3760_v30  ;;  %v3852_v27 = vld [vmem:[%s4015_s13 + $0x250] ss:$36 sps:$4 sm:$0xff]   ;;  %v3858_v30 = vld [vmem:[%s4015_s13 + $0x298] ss:$36 sps:$4 sm:$0xff]  }
  0x6d   : > { %1810 = vmatprep.mubr.bf16.mxu0 %v3763_v31  ;;  %1939 = vmatprep.mubr.bf16.mxu1 %v3765_v32  ;;  %v3859_v31 = vld [vmem:[%s4015_s13 + $0x60] ss:$36 sps:$4 sm:$0xff]  }
  0x6e   : > { %v3860_v32 = vld [vmem:[%s4015_s13 + $0x2e4] ss:$36 sps:$4 sm:$0xff]  }
  0x74   : > { %1811 = vmatmul.mubr.bf16.gmra.mxu0 %v3767_v34  ;;  %1940 = vmatmul.mubr.bf16.gmra.mxu1 %v3768_v35  ;;  %v3864_v34 = vld [vmem:[%s4015_s13 + $0x2e0] ss:$36 sps:$4 sm:$0xff]   ;;  %v3865_v35 = vld [vmem:[%s4015_s13 + $0xa8] ss:$36 sps:$4 sm:$0xff]  }
  0x75   : > { %1818 = vmatprep.mubr.bf16.mxu0 %v3771_v37  ;;  %1947 = vmatprep.mubr.bf16.mxu1 %v3773_v38  ;;  %v3869_v37 = vld [vmem:[%s4015_s13 + $0xf4] ss:$36 sps:$4 sm:$0xff]   ;;  %v3871_v38 = vld [vmem:[%s4015_s13 + $0x328] ss:$36 sps:$4 sm:$0xff]  }
  0x7c   : > { %1819 = vmatmul.mubr.bf16.gmra.mxu0 %v3775_v39  ;;  %1948 = vmatmul.mubr.bf16.gmra.mxu1 %v3776_v40  ;;  %v3872_v39 = vld [vmem:[%s4015_s13 + $0xf0] ss:$36 sps:$4 sm:$0xff]  }
  0x7d   : > { %1826 = vmatprep.mubr.bf16.mxu0 %v3781_v42  ;;  %1955 = vmatprep.mubr.bf16.mxu1 %v3783_v44  ;;  %v3873_v40 = vld [vmem:[%s4015_s13 + $0x374] ss:$36 sps:$4 sm:$0xff]   ;;  %v3880_v44 = vld [vmem:[%s4015_s13 + $0x3bc] ss:$36 sps:$4 sm:$0xff]  }
  0x7e   : > { %v3877_v42 = vld [vmem:[%s4015_s13 + $0x370] ss:$36 sps:$4 sm:$0xff]  }
  0x84   : > { %1827 = vmatmul.mubr.bf16.gmra.mxu0 %v3785_v45  ;;  %1956 = vmatmul.mubr.bf16.gmra.mxu1 %v3786_v46  ;;  %v3882_v45 = vld [vmem:[%s4015_s13 + $0x184] ss:$36 sps:$4 sm:$0xff]  }
  0x85   : > { %1963 = vmatprep.mubr.bf16.mxu1 %v3787_v48  ;;  %2060 = vmatprep.mubr.bf16.mxu0 %v3791_v50 }
  0x8c   : > { %1964 = vmatmul.mubr.bf16.gmra.mxu1 %v3792_v52  ;;  %2061 = vmatmul.mubr.bf16.vlgmr.msra.gmra.mxu0 %v3789_v51 }
  0x8d   : > { %3587 = vmatpush3.bf16.msra.mxu0 %v3794_v28  ;;  %1971 = vmatprep.mubr.bf16.mxu1 %v3796_v53  ;;  %v3854_v28 = vld [vmem:[%s4015_s13 + $0x29c] ss:$36 sps:$4 sm:$0xff]  }
  0x8e   : > { %2068 = vmatprep.mubr.bf16.mxu0 %v3798_v54  ;;  %3588 = vmatprep.subr.bf16.mxu0 %v3809_v55  ;;  %v3884_v54 = vld [vmem:[%s4015_s13 + $0x3b8] ss:$36 sps:$4 sm:$0xff]  }
  0x91   : > { %3589 = vmatpush3.bf16.msra.mxu0 %v3809_v55  ;;  %v3885_v55 = vld [vmem:[%s4015_s13 + $0x180] ss:$36 sps:$4 sm:$0xff]  }
  0x92   : > { %3590 = vmatprep.subr.bf16.mxu0 %v3824_v56 }
  0x94   : > { %1972 = vmatmul.mubr.bf16.gmra.mxu1 %v3800_v57  ;;  %2069 = vmatmul.mubr.bf16.gmra.mxu0 %v3801_v58  ;;  %v3888_v57 = vld [vmem:[%s4015_s13 + $0x1cc] ss:$36 sps:$4 sm:$0xff]  }
  0x95   : > { %1979 = vmatprep.mubr.bf16.mxu1 %v3802_v59  ;;  %2076 = vmatprep.mubr.bf16.mxu0 %v3804_v60 }
  0x96   : > { %3591 = vmatpush3.bf16.msra.mxu0 %v3824_v56  ;;  %v3886_v56 = vld [vmem:[%s4015_s13 + $0x404] ss:$36 sps:$4 sm:$0xff]  }
  0x97   : > { %3592 = vmatprep.subr.bf16.mxu0 %v3839_v61 }
  0x9a   : > { %3593 = vmatpush3.bf16.msra.mxu0 %v3839_v61 }
  0x9b   : > { %3594 = vmatprep.subr.bf16.mxu0 %v3853_v63 }
  0x9c   : > { %1980 = vmatmul.mubr.bf16.gmra.mxu1 %v3806_v62  ;;  %2077 = vmatmul.mubr.bf16.gmra.mxu0 %v3807_v0 }
  0x9d   : > { %1987 = vmatprep.mubr.bf16.mxu1 %v3811_v1  ;;  %2084 = vmatprep.mubr.bf16.mxu0 %v3813_v2 }
  0x9e   : > { %3595 = vmatpush3.bf16.msra.mxu0 %v3853_v63 }
  0x9f   : > { %3596 = vmatprep.subr.bf16.mxu0 %v3866_v3 }
  0xa2   : > { %3597 = vmatpush3.bf16.msra.mxu0 %v3866_v3 }
  0xa3   : > { %3598 = vmatprep.subr.bf16.mxu0 %v3879_v5 }
  0xa4   : > { %1988 = vmatmul.mubr.bf16.gmra.mxu1 %v3815_v4  ;;  %2085 = vmatmul.mubr.bf16.gmra.mxu0 %v3816_v6  ;;  %v3890_v6 = vld [vmem:[%s4015_s13 + $0x400] ss:$36 sps:$4 sm:$0xff]  }
  0xa5   : > { %1995 = vmatprep.mubr.bf16.mxu1 %v3817_v7  ;;  %2092 = vmatprep.mubr.bf16.mxu0 %v3819_v8  ;;  %v3891_v7 = vld [vmem:[%s4015_s13 + $0x1c8] ss:$36 sps:$4 sm:$0xff]  }
  0xa6   : > { %3599 = vmatpush3.bf16.msra.mxu0 %v3879_v5  ;;  %v3893_v8 = vld [vmem:[%s4015_s13 + $0x44c] ss:$36 sps:$4 sm:$0xff]  }
  0xa7   : > { %3600 = vmatprep.subr.bf16.mxu0 %v3892_v9 }
  0xaa   : > { %3601 = vmatpush3.bf16.msra.mxu0 %v3892_v9  ;;  %v3895_v9 = vld [vmem:[%s4015_s13 + $0x214] ss:$36 sps:$4 sm:$0xff]  }
  0xac   : > { %1996 = vmatmul.mubr.bf16.gmra.mxu1 %v3821_v10  ;;  %2093 = vmatmul.mubr.bf16.gmra.mxu0 %v3822_v11 }
  0xad   : > { %2003 = vmatprep.mubr.bf16.mxu1 %v3826_v12  ;;  %2100 = vmatprep.mubr.bf16.mxu0 %v3828_v13 }
  0xb4   : > { %2004 = vmatmul.mubr.bf16.gmra.mxu1 %v3830_v14  ;;  %2101 = vmatmul.mubr.bf16.gmra.mxu0 %v3831_v15 }
  0xb5   : > { %2011 = vmatprep.mubr.bf16.mxu1 %v3832_v16  ;;  %2108 = vmatprep.mubr.bf16.mxu0 %v3834_v17 }
  0xbc   : > { %2012 = vmatmul.mubr.bf16.gmra.mxu1 %v3836_v18  ;;  %2109 = vmatmul.mubr.bf16.gmra.mxu0 %v3837_v19 }
  0xbd   : > { %2019 = vmatprep.mubr.bf16.mxu1 %v3841_v20  ;;  %2116 = vmatprep.mubr.bf16.mxu0 %v3843_v21 }
  0xc4   : > { %2020 = vmatmul.mubr.bf16.gmra.mxu1 %v3845_v22  ;;  %2117 = vmatmul.mubr.bf16.gmra.mxu0 %v3846_v23  ;;  %v3897_v22 = vld [vmem:[%s4015_s13 + $0x448] ss:$36 sps:$4 sm:$0xff]   ;;  %v3898_v23 = vld [vmem:[%s4015_s13 + $0x210] ss:$36 sps:$4 sm:$0xff]  }
  0xc5   : > { %2124 = vmatprep.mubr.bf16.mxu0 %v3847_v24  ;;  %2221 = vmatprep.mubr.bf16.mxu1 %v3851_v25  ;;  %v3901_v24 = vld [vmem:[%s4015_s13 + $0x25c] ss:$36 sps:$4 sm:$0xff]  }
  0xc6   : > { %v3902_v25 = vld [vmem:[%s4015_s13 + $0x20] ss:$36 sps:$4 sm:$0xff]  }
  0xcc   : > { %2125 = vmatmul.mubr.bf16.gmra.mxu0 %v3852_v27  ;;  %2222 = vmatmul.mubr.bf16.vlgmr.msra.gmra.mxu1 %v3849_v26 }
  0xcd   : > { %2132 = vmatprep.mubr.bf16.mxu0 %v3854_v28  ;;  %2229 = vmatprep.mubr.bf16.mxu1 %v3856_v29 }
  0xd4   : > { %2133 = vmatmul.mubr.bf16.gmra.mxu0 %v3858_v30  ;;  %2230 = vmatmul.mubr.bf16.gmra.mxu1 %v3859_v31 }
  0xd5   : > { %2140 = vmatprep.mubr.bf16.mxu0 %v3860_v32  ;;  %2237 = vmatprep.mubr.bf16.mxu1 %v3862_v33 }
  0xdc   : > { %2141 = vmatmul.mubr.bf16.gmra.mxu0 %v3864_v34  ;;  %2238 = vmatmul.mubr.bf16.gmra.mxu1 %v3865_v35 }
  0xdd   : > { %2148 = vmatprep.mubr.bf16.mxu0 %v3867_v36  ;;  %2245 = vmatprep.mubr.bf16.mxu1 %v3869_v37 }
  0xe4   : > { %2149 = vmatmul.mubr.bf16.gmra.mxu0 %v3871_v38  ;;  %2246 = vmatmul.mubr.bf16.gmra.mxu1 %v3872_v39  ;;  %v3899_v38 = vld [vmem:[%s4015_s13 + $0x258] ss:$36 sps:$4 sm:$0xff]   ;;  %v3903_v39 = vld [vmem:[%s4015_s13 + $0x68] ss:$36 sps:$4 sm:$0xff]  }
  0xe5   : > { %2156 = vmatprep.mubr.bf16.mxu0 %v3873_v40  ;;  %2253 = vmatprep.mubr.bf16.mxu1 %v3875_v41  ;;  %v3906_v40 = vld [vmem:[%s4015_s13 + $0x2a4] ss:$36 sps:$4 sm:$0xff]   ;;  %v3907_v41 = vld [vmem:[%s4015_s13 + $0xb0] ss:$36 sps:$4 sm:$0xff]  }
  0xec   : > { %v3130_v46 = vpop.f32.mrf.mxu0  ;;  %v3202_v47 = vpop.f32.mrf.mxu1  ;;  %2157 = vmatmul.mubr.bf16.gmra.mxu0 %v3877_v42  ;;  %2254 = vmatmul.mubr.bf16.gmra.mxu1 %v3878_v43 }
  0xed   : > { %2164 = vmatprep.mubr.bf16.mxu0 %v3880_v44  ;;  %2261 = vmatprep.mubr.bf16.mxu1 %v3882_v45 }
  0xee   : > { %v3131_v48 = vpop.f32.mrf.mxu0  ;;  %v3203_v49 = vpop.f32.mrf.mxu1 }
  0xef   : > { %v4308_v50 = vadd.f32 %v3131_v48, %v3130_v46  ;;  %v4310_v51 = vadd.f32 %v3203_v49, %v3202_v47  ;;  %v4359_v46 = vld [vmem:[%s5155_s2] ss:$0 sm:$0xff] }
  0xf0   : > { %v3133_v52 = vpop.f32.mrf.mxu0  ;;  %v3205_v53 = vpop.f32.mrf.mxu1 }
  0xf2   : > { %v3134_v58 = vpop.f32.mrf.mxu0  ;;  %v3206_v59 = vpop.f32.mrf.mxu1 }
  0xf3   : > { %v4316_v60 = vadd.f32 %v3134_v58, %v3133_v52  ;;  %v4318_v61 = vadd.f32 %v3206_v59, %v3205_v53  ;;  %v1741_v53 = vadd.f32 %v4308_v50, %v4359_v46  ;;  %v3904_v58 = vld [vmem:[%s4015_s13 + $0x2a0] ss:$36 sps:$4 sm:$0xff]   ;;  %v3908_v59 = vld [vmem:[%s4015_s13 + $0xf8] ss:$36 sps:$4 sm:$0xff]  }
  0xf4   : > { %v3136_v62 = vpop.f32.mrf.mxu0  ;;  %v3208_v63 = vpop.f32.mrf.mxu1  ;;  %2165 = vmatmul.mubr.bf16.gmra.mxu0 %v3884_v54  ;;  %2262 = vmatmul.mubr.bf16.gmra.mxu1 %v3885_v55 }
  0xf5   : > { %2172 = vmatprep.mubr.bf16.mxu0 %v3886_v56  ;;  %2269 = vmatprep.mubr.bf16.mxu1 %v3888_v57 }
  0xf6   : > { %v3137_v0 = vpop.f32.mrf.mxu0  ;;  %v3209_v1 = vpop.f32.mrf.mxu1 }
  0xf7   : > { %v4320_v2 = vadd.f32 %v3137_v0, %v3136_v62  ;;  %v4322_v3 = vadd.f32 %v3209_v1, %v3208_v63  ;;  %v3911_v63 = vld [vmem:[%s4015_s13 + $0x2ec] ss:$36 sps:$4 sm:$0xff]   ;;  %v3912_v0 = vld [vmem:[%s4015_s13 + $0x140] ss:$36 sps:$4 sm:$0xff]  }
  0xf8   : > { %v3139_v4 = vpop.f32.mrf.mxu0  ;;  %v3211_v5 = vpop.f32.mrf.mxu1 }
  0xfa   : > { %v3140_v10 = vpop.f32.mrf.mxu0  ;;  %v3212_v11 = vpop.f32.mrf.mxu1 }
  0xfb   : > { %v4328_v12 = vadd.f32 %v3140_v10, %v3139_v4  ;;  %v4330_v13 = vadd.f32 %v3212_v11, %v3211_v5  ;;  %v1744_v5 = vadd.f32 %v4316_v60, %v4359_v46  ;;  %v1749_v60 = vadd.f32 %v4320_v2, %v4359_v46 }
  0xfc   : > { %v3142_v14 = vpop.f32.mrf.mxu0  ;;  %v3214_v15 = vpop.f32.mrf.mxu1  ;;  %2173 = vmatmul.mubr.bf16.gmra.mxu0 %v3890_v6  ;;  %2270 = vmatmul.mubr.bf16.gmra.mxu1 %v3891_v7 }
  0xfd   : > { %2180 = vmatprep.mubr.bf16.mxu0 %v3893_v8  ;;  %2277 = vmatprep.mubr.bf16.mxu1 %v3895_v9 }
  0xfe   : > { %v3143_v16 = vpop.f32.mrf.mxu0  ;;  %v3215_v17 = vpop.f32.mrf.mxu1 }
  0xff   : > { %v4332_v18 = vadd.f32 %v3143_v16, %v3142_v14  ;;  %v4334_v19 = vadd.f32 %v3215_v17, %v3214_v15 }
 0x100   : > { %v3145_v20 = vpop.f32.mrf.mxu0  ;;  %v3217_v21 = vpop.f32.mrf.mxu1 }
 0x102   : > { %v3146_v26 = vpop.f32.mrf.mxu0  ;;  %v3218_v27 = vpop.f32.mrf.mxu1 }
 0x103   : > { %v4340_v28 = vadd.f32 %v3146_v26, %v3145_v20  ;;  %v4342_v29 = vadd.f32 %v3218_v27, %v3217_v21  ;;  %v3909_v20 = vld [vmem:[%s4015_s13 + $0x2e8] ss:$36 sps:$4 sm:$0xff]   ;;  %v1752_v27 = vadd.f32 %v4328_v12, %v4359_v46  ;;  %v1757_v12 = vadd.f32 %v4332_v18, %v4359_v46 }
 0x104   : > { %v3148_v30 = vpop.f32.mrf.mxu0  ;;  %v3220_v31 = vpop.f32.mrf.mxu1  ;;  %2181 = vmatmul.mubr.bf16.gmra.mxu0 %v3897_v22  ;;  %2278 = vmatmul.mubr.bf16.gmra.mxu1 %v3898_v23  ;;  %v3913_v21 = vld [vmem:[%s4015_s13 + $0x188] ss:$36 sps:$4 sm:$0xff]   ;;  %v3916_v23 = vld [vmem:[%s4015_s13 + $0x334] ss:$36 sps:$4 sm:$0xff]  }
 0x105   : > { %2285 = vmatprep.mubr.bf16.mxu1 %v3901_v24  ;;  %3602 = vmatprep.mubr.bf16.mxu0 %v3902_v25  ;;  %v3917_v24 = vld [vmem:[%s4015_s13 + $0x1d0] ss:$36 sps:$4 sm:$0xff]  }
 0x106   : > { %v3149_v32 = vpop.f32.mrf.mxu0  ;;  %v3221_v33 = vpop.f32.mrf.mxu1 }
 0x107   : > { %v4344_v34 = vadd.f32 %v3149_v32, %v3148_v30  ;;  %v4346_v35 = vadd.f32 %v3221_v33, %v3220_v31 }
 0x108   : > { %v3151_v36 = vpop.f32.mrf.mxu0  ;;  %v3223_v37 = vpop.f32.mrf.mxu1 }
 0x10a   : > { %v3152_v42 = vpop.f32.mrf.mxu0  ;;  %v3224_v43 = vpop.f32.mrf.mxu1 }
 0x10b   : > { %v4352_v44 = vadd.f32 %v3152_v42, %v3151_v36  ;;  %v4354_v45 = vadd.f32 %v3224_v43, %v3223_v37  ;;  %v3914_v42 = vld [vmem:[%s4015_s13 + $0x330] ss:$36 sps:$4 sm:$0xff]   ;;  %v3918_v43 = vld [vmem:[%s4015_s13 + $0x218] ss:$36 sps:$4 sm:$0xff]  }
 0x10c   : > { %v3154_v47 = vpop.f32.mrf.mxu0  ;;  %v3242_v48 = vpop.f32.mrf.mxu1  ;;  %2286 = vmatmul.mubr.bf16.gmra.mxu1 %v3899_v38  ;;  %3603 = vmatmul.mubr.bf16.vlgmr.msra.gmra.mxu0 %v3903_v39 }
 0x10d   : > { %2293 = vmatprep.mubr.bf16.mxu1 %v3906_v40  ;;  %3606 = vmatprep.mubr.bf16.mxu0 %v3907_v41 }
 0x10e   : > { %v3155_v49 = vpop.f32.mrf.mxu0  ;;  %v3243_v52 = vpop.f32.mrf.mxu1 }
 0x10f   : > { %v4363_v54 = vadd.f32 %v3155_v49, %v3154_v47  ;;  %v3244_v55 = vadd.f32 %v3243_v52, %v3242_v48  ;;  %v3921_v48 = vld [vmem:[%s4015_s13 + $0x37c] ss:$36 sps:$4 sm:$0xff]  }
 0x110   : > { %v3157_v56 = vpop.f32.mrf.mxu0  ;;  %v3245_v57 = vpop.f32.mrf.mxu1  ;;  %v3922_v49 = vld [vmem:[%s4015_s13 + $0x260] ss:$36 sps:$4 sm:$0xff]  }
 0x111   : > { %v4367_v62 = vadd.f32 %v3244_v55, %v1741_v53  ;;  %v1760_v55 = vadd.f32 %v4340_v28, %v4359_v46  ;;  %v1765_v28 = vadd.f32 %v4344_v34, %v4359_v46 }
 0x112   : > { %v3158_v1 = vpop.f32.mrf.mxu0  ;;  %v3246_v4 = vpop.f32.mrf.mxu1 }
 0x113   : > { %v4373_v6 = vadd.f32 %v3158_v1, %v3157_v56  ;;  %v3247_v50 = vadd.f32 %v3246_v4, %v3245_v57 }
 0x114   : > { %v3160_v7 = vpop.f32.mrf.mxu0  ;;  %v3248_v8 = vpop.f32.mrf.mxu1  ;;  %2294 = vmatmul.mubr.bf16.gmra.mxu1 %v3904_v58  ;;  %3607 = vmatmul.mubr.bf16.gmra.mxu0 %v3908_v59 }
 0x115   : > { %v4375_v9 = vadd.f32 %v3247_v50, %v1744_v5  ;;  %2301 = vmatprep.mubr.bf16.mxu1 %v3911_v63  ;;  %3610 = vmatprep.mubr.bf16.mxu0 %v3912_v0 }
 0x116   : > { %v3161_v10 = vpop.f32.mrf.mxu0  ;;  %v3249_v11 = vpop.f32.mrf.mxu1 }
 0x117   : > { %v4379_v14 = vadd.f32 %v3161_v10, %v3160_v7  ;;  %v3250_v15 = vadd.f32 %v3249_v11, %v3248_v8  ;;  %v3919_v7 = vld [vmem:[%s4015_s13 + $0x378] ss:$36 sps:$4 sm:$0xff]   ;;  %v3923_v8 = vld [vmem:[%s4015_s13 + $0x2a8] ss:$36 sps:$4 sm:$0xff]  }
 0x118   : > { %v3163_v16 = vpop.f32.mrf.mxu0  ;;  %v3251_v17 = vpop.f32.mrf.mxu1  ;;  %v3926_v11 = vld [vmem:[%s4015_s13 + $0x3c4] ss:$36 sps:$4 sm:$0xff]  }
 0x119   : > { %v4383_v22 = vadd.f32 %v3250_v15, %v1749_v60  ;;  %v3927_v60 = vld [vmem:[%s4015_s13 + $0x2f0] ss:$36 sps:$4 sm:$0xff]  }
 0x11a   : > { %v3164_v25 = vpop.f32.mrf.mxu0  ;;  %v3252_v26 = vpop.f32.mrf.mxu1 }
 0x11b   : > { %v4389_v30 = vadd.f32 %v3164_v25, %v3163_v16  ;;  %v3253_v2 = vadd.f32 %v3252_v26, %v3251_v17  ;;  %v1768_v17 = vadd.f32 %v4352_v44, %v4359_v46  ;;  %v1773_v44 = vadd.f32 %v4363_v54, %v4359_v46 }
 0x11c   : > { %v3166_v31 = vpop.f32.mrf.mxu0  ;;  %v3254_v32 = vpop.f32.mrf.mxu1  ;;  %2302 = vmatmul.mubr.bf16.gmra.mxu1 %v3909_v20  ;;  %3611 = vmatmul.mubr.bf16.gmra.mxu0 %v3913_v21 }
 0x11d   : > { %v4391_v33 = vadd.f32 %v3253_v2, %v1752_v27  ;;  %2309 = vmatprep.mubr.bf16.mxu1 %v3916_v23  ;;  %3614 = vmatprep.mubr.bf16.mxu0 %v3917_v24 }
 0x11e   : > { %v3167_v36 = vpop.f32.mrf.mxu0  ;;  %v3255_v37 = vpop.f32.mrf.mxu1 }
 0x11f   : > { %v4395_v38 = vadd.f32 %v3167_v36, %v3166_v31  ;;  %v3256_v39 = vadd.f32 %v3255_v37, %v3254_v32  ;;  %v3924_v36 = vld [vmem:[%s4015_s13 + $0x3c0] ss:$36 sps:$4 sm:$0xff]   ;;  %v3928_v37 = vld [vmem:[%s4015_s13 + $0x338] ss:$36 sps:$4 sm:$0xff]  }
 0x120   : > { %v3169_v40 = vpop.f32.mrf.mxu0  ;;  %v3257_v41 = vpop.f32.mrf.mxu1 }
 0x121   : > { %v4399_v47 = vadd.f32 %v3256_v39, %v1757_v12  ;;  %v3931_v39 = vld [vmem:[%s4015_s13 + $0x40c] ss:$36 sps:$4 sm:$0xff]  }
 0x122   : > { %v3170_v52 = vpop.f32.mrf.mxu0  ;;  %v3258_v53 = vpop.f32.mrf.mxu1 }
 0x123   : > { %v4405_v56 = vadd.f32 %v3170_v52, %v3169_v40  ;;  %v3259_v18 = vadd.f32 %v3258_v53, %v3257_v41  ;;  %v3932_v40 = vld [vmem:[%s4015_s13 + $0x380] ss:$36 sps:$4 sm:$0xff]  }
 0x124   : > { %v3172_v57 = vpop.f32.mrf.mxu0  ;;  %v3260_v58 = vpop.f32.mrf.mxu1  ;;  %2310 = vmatmul.mubr.bf16.gmra.mxu1 %v3914_v42  ;;  %3615 = vmatmul.mubr.bf16.gmra.mxu0 %v3918_v43  ;;  %v1776_v43 = vadd.f32 %v4373_v6, %v4359_v46  ;;  %v1781_v6 = vadd.f32 %v4379_v14, %v4359_v46 }
 0x125   : > { %v4407_v59 = vadd.f32 %v3259_v18, %v1760_v55  ;;  %2317 = vmatprep.mubr.bf16.mxu1 %v3921_v48  ;;  %3618 = vmatprep.mubr.bf16.mxu0 %v3922_v49 }
 0x126   : > { %v3173_v63 = vpop.f32.mrf.mxu0  ;;  %v3261_v0 = vpop.f32.mrf.mxu1 }
 0x127   : > { %v4411_v1 = vadd.f32 %v3173_v63, %v3172_v57  ;;  %v3262_v4 = vadd.f32 %v3261_v0, %v3260_v58 }
 0x128   : > { %v3175_v5 = vpop.f32.mrf.mxu0  ;;  %v3263_v50 = vpop.f32.mrf.mxu1 }
 0x129   : > { %v4415_v10 = vadd.f32 %v3262_v4, %v1765_v28  ;;  %v3929_v28 = vld [vmem:[%s4015_s13 + $0x408] ss:$36 sps:$4 sm:$0xff]  }
 0x12a   : > { %v3176_v15 = vpop.f32.mrf.mxu0  ;;  %v3264_v16 = vpop.f32.mrf.mxu1  ;;  %v3933_v4 = vld [vmem:[%s4015_s13 + $0x3c8] ss:$36 sps:$4 sm:$0xff]  }
 0x12b   : > { %v4421_v20 = vadd.f32 %v3176_v15, %v3175_v5  ;;  %v3265_v34 = vadd.f32 %v3264_v16, %v3263_v50  ;;  %v3936_v50 = vld [vmem:[%s4015_s13 + $0x454] ss:$36 sps:$4 sm:$0xff]  }
 0x12c   : > { %v3178_v21 = vpop.f32.mrf.mxu0  ;;  %v3266_v23 = vpop.f32.mrf.mxu1  ;;  %2318 = vmatmul.mubr.bf16.gmra.mxu1 %v3919_v7  ;;  %3619 = vmatmul.mubr.bf16.gmra.mxu0 %v3923_v8  ;;  %v3937_v7 = vld [vmem:[%s4015_s13 + $0x410] ss:$36 sps:$4 sm:$0xff]  }
 0x12d   : > { %v4423_v24 = vadd.f32 %v3265_v34, %v1768_v17  ;;  %2325 = vmatprep.mubr.bf16.mxu1 %v3926_v11  ;;  %3622 = vmatprep.mubr.bf16.mxu0 %v3927_v60  ;;  %v1784_v60 = vadd.f32 %v4389_v30, %v4359_v46 }
 0x12e   : > { %v3179_v25 = vpop.f32.mrf.mxu0  ;;  %v3267_v26 = vpop.f32.mrf.mxu1 }
 0x12f   : > { %v4427_v27 = vadd.f32 %v3179_v25, %v3178_v21  ;;  %v3268_v2 = vadd.f32 %v3267_v26, %v3266_v23  ;;  %v1789_v25 = vadd.f32 %v4395_v38, %v4359_v46 }
 0x130   : > { %v3181_v31 = vpop.f32.mrf.mxu0  ;;  %v3269_v32 = vpop.f32.mrf.mxu1 }
 0x131   : > { %v4431_v12 = vadd.f32 %v3268_v2, %v1773_v44 }
 0x132   : > { %v3182_v41 = vpop.f32.mrf.mxu0  ;;  %v3270_v42 = vpop.f32.mrf.mxu1 }
 0x133   : > { %v4437_v48 = vadd.f32 %v3182_v41, %v3181_v31  ;;  %v3271_v54 = vadd.f32 %v3270_v42, %v3269_v32  ;;  %v3934_v31 = vld [vmem:[%s4015_s13 + $0x450] ss:$36 sps:$4 sm:$0xff]   ;;  %v3938_v32 = vld [vmem:[%s4015_s13 + $0x458] ss:$36 sps:$4 sm:$0xff]   ;;  %s2892_s13 = sshll.u32 %s5181_s19, 3 }
 0x134   : > { %v3184_v49 = vpop.f32.mrf.mxu0  ;;  %v3272_v52 = vpop.f32.mrf.mxu1  ;;  %2326 = vmatmul.mubr.bf16.gmra.mxu1 %v3924_v36  ;;  %3623 = vmatmul.mubr.bf16.gmra.mxu0 %v3928_v37  ;;  %s5041_s5 = scalar_lea.vmem %s5156_s3, %s2892_s13  ;;  %s5096_s8 = scalar_lea.vmem %s5157_s4, %s2892_s13 }
 0x135   : > { %v4439_v53 = vadd.f32 %v3271_v54, %v1776_v43  ;;  %2333 = vmatprep.mubr.bf16.mxu1 %v3931_v39  ;;  %3626 = vmatprep.mubr.bf16.mxu0 %v3932_v40  ;;  %v1792_v40 = vadd.f32 %v4405_v56, %v4359_v46 }
 0x136   : > { %v3185_v55 = vpop.f32.mrf.mxu0  ;;  %v3273_v18 = vpop.f32.mrf.mxu1 }
 0x137   : > { %v4443_v57 = vadd.f32 %v3185_v55, %v3184_v49  ;;  %v3274_v58 = vadd.f32 %v3273_v18, %v3272_v52  ;;  %v1797_v55 = vadd.f32 %v4411_v1, %v4359_v46 }
 0x138   : > { %v3187_v63 = vpop.f32.mrf.mxu0  ;;  %v3275_v0 = vpop.f32.mrf.mxu1 }
 0x139   : > { %v4447_v5 = vadd.f32 %v3274_v58, %v1781_v6 }
 0x13a   : > { %v3188_v8 = vpop.f32.mrf.mxu0  ;;  %v3276_v11 = vpop.f32.mrf.mxu1 }
 0x13b   : > { %v4453_v15 = vadd.f32 %v3188_v8, %v3187_v63  ;;  %v3277_v14 = vadd.f32 %v3276_v11, %v3275_v0 }
 0x13c   : > { %v3190_v16 = vpop.f32.mrf.mxu0  ;;  %v3278_v17 = vpop.f32.mrf.mxu1  ;;  %2334 = vmatmul.mubr.bf16.gmra.mxu1 %v3929_v28  ;;  %3627 = vmatmul.mubr.bf16.gmra.mxu0 %v3933_v4  ;;  %v1800_v4 = vadd.f32 %v4421_v20, %v4359_v46 }
 0x13d   : > { %v4455_v34 = vadd.f32 %v3277_v14, %v1784_v60  ;;  %2341 = vmatprep.mubr.bf16.mxu1 %v3936_v50  ;;  %3630 = vmatprep.mubr.bf16.mxu0 %v3937_v7 }
 0x13e   : > { %v3191_v21 = vpop.f32.mrf.mxu0  ;;  %v3279_v23 = vpop.f32.mrf.mxu1 }
 0x13f   : > { %v4459_v26 = vadd.f32 %v3191_v21, %v3190_v16  ;;  %v3280_v30 = vadd.f32 %v3279_v23, %v3278_v17  ;;  %v1805_v16 = vadd.f32 %v4427_v27, %v4359_v46 }
 0x140   : > { %v3193_v44 = vpop.f32.mrf.mxu0  ;;  %v3281_v2 = vpop.f32.mrf.mxu1 }
 0x141   : > { %v4463_v36 = vadd.f32 %v3280_v30, %v1789_v25 }
 0x142   : > { %v3194_v37 = vpop.f32.mrf.mxu0  ;;  %v3282_v39 = vpop.f32.mrf.mxu1 }
 0x143   : > { %v4467_v41 = vadd.f32 %v3194_v37, %v3193_v44  ;;  %v3283_v42 = vadd.f32 %v3282_v39, %v3281_v2 }
 0x144   : > { %v3196_v43 = vpop.f32.mrf.mxu0  ;;  %v3284_v54 = vpop.f32.mrf.mxu1  ;;  %2342 = vmatmul.mubr.bf16.gmra.mxu1 %v3934_v31  ;;  %3631 = vmatmul.mubr.bf16.gmra.mxu0 %v3938_v32  ;;  %v1808_v31 = vadd.f32 %v4437_v48, %v4359_v46 }
 0x145   : > { %v4469_v38 = vadd.f32 %v3283_v42, %v1792_v40 }
 0x146   : > { %v3197_v49 = vpop.f32.mrf.mxu0  ;;  %v3285_v52 = vpop.f32.mrf.mxu1 }
 0x147   : > { %v4473_v18 = vadd.f32 %v3197_v49, %v3196_v43  ;;  %v3286_v6 = vadd.f32 %v3285_v52, %v3284_v54 }
 0x148   : > { %v3199_v58 = vpop.f32.mrf.mxu0  ;;  %v3287_v63 = vpop.f32.mrf.mxu1 }
 0x149   : > { %v4475_v56 = vadd.f32 %v3286_v6, %v1797_v55 }
 0x14a   : > { %v3200_v0 = vpop.f32.mrf.mxu0  ;;  %v3288_v28 = vpop.f32.mrf.mxu1 }
 0x14b   : > { %v4479_v50 = vadd.f32 %v3200_v0, %v3199_v58  ;;  %v3289_v7 = vadd.f32 %v3288_v28, %v3287_v63 }
 0x14c   : > { %v3290_v8 = vpop.f32.mrf.mxu1  ;;  %v3354_v11 = vpop.f32.mrf.mxu0 }
 0x14d   : > { %v4481_v60 = vadd.f32 %v3289_v7, %v1800_v4 }
 0x14e   : > { %v3291_v1 = vpop.f32.mrf.mxu1  ;;  %v3355_v14 = vpop.f32.mrf.mxu0 }
 0x14f   : > { %v3292_v17 = vadd.f32 %v3291_v1, %v3290_v8  ;;  %v3356_v21 = vadd.f32 %v3355_v14, %v3354_v11 }
 0x150   : > { %v3293_v23 = vpop.f32.mrf.mxu1  ;;  %v3357_v25 = vpop.f32.mrf.mxu0 }
 0x151   : > { %v4485_v30 = vadd.f32 %v3292_v17, %v1805_v16  ;;  %v4488_v20 = vadd.f32 %v3356_v21, %v4367_v62  ;;  %v1813_v62 = vadd.f32 %v4443_v57, %v4359_v46 }
 0x152   : > { %v3294_v44 = vpop.f32.mrf.mxu1  ;;  %v3358_v2 = vpop.f32.mrf.mxu0 }
 0x153   : > { %v3295_v32 = vadd.f32 %v3294_v44, %v3293_v23  ;;  %v3359_v37 = vadd.f32 %v3358_v2, %v3357_v25 }
 0x154   : > { %v3296_v39 = vpop.f32.mrf.mxu1  ;;  %v3360_v40 = vpop.f32.mrf.mxu0 }
 0x155   : > { %v4492_v42 = vadd.f32 %v3295_v32, %v1808_v31  ;;  %v4495_v27 = vadd.f32 %v3359_v37, %v4375_v9  ;;  %v1816_v9 = vadd.f32 %v4453_v15, %v4359_v46 }
 0x156   : > { %v3297_v43 = vpop.f32.mrf.mxu1  ;;  %v3361_v54 = vpop.f32.mrf.mxu0 }
 0x157   : > { %v3298_v49 = vadd.f32 %v3297_v43, %v3296_v39  ;;  %v3362_v52 = vadd.f32 %v3361_v54, %v3360_v40 }
 0x158   : > { %v3299_v55 = vpop.f32.mrf.mxu1  ;;  %v3363_v6 = vpop.f32.mrf.mxu0 }
 0x159   : > { %v4499_v58 = vadd.f32 %v3298_v49, %v1813_v62  ;;  %v4502_v48 = vadd.f32 %v3362_v52, %v4383_v22  ;;  %v1821_v22 = vadd.f32 %v4459_v26, %v4359_v46 }
 0x15a   : > { %v3300_v63 = vpop.f32.mrf.mxu1  ;;  %v3364_v0 = vpop.f32.mrf.mxu0 }
 0x15b   : > { %v3301_v28 = vadd.f32 %v3300_v63, %v3299_v55  ;;  %v3365_v4 = vadd.f32 %v3364_v0, %v3363_v6 }
 0x15c   : > { %v3302_v7 = vpop.f32.mrf.mxu1  ;;  %v3366_v8 = vpop.f32.mrf.mxu0 }
 0x15d   : > { %v4506_v11 = vadd.f32 %v3301_v28, %v1816_v9  ;;  %v4509_v57 = vadd.f32 %v3365_v4, %v4391_v33  ;;  %v1824_v33 = vadd.f32 %v4467_v41, %v4359_v46 }
 0x15e   : > { %v3303_v1 = vpop.f32.mrf.mxu1  ;;  %v3367_v14 = vpop.f32.mrf.mxu0 }
 0x15f   : > { %v3304_v16 = vadd.f32 %v3303_v1, %v3302_v7  ;;  %v3368_v17 = vadd.f32 %v3367_v14, %v3366_v8 }
 0x160   : > { %v3305_v21 = vpop.f32.mrf.mxu1  ;;  %v3369_v23 = vpop.f32.mrf.mxu0 }
 0x161   : > { %v4513_v25 = vadd.f32 %v3304_v16, %v1821_v22  ;;  %v4516_v15 = vadd.f32 %v3368_v17, %v4399_v47  ;;  %v1829_v47 = vadd.f32 %v4473_v18, %v4359_v46 }
 0x162   : > { %v3306_v44 = vpop.f32.mrf.mxu1  ;;  %v3370_v2 = vpop.f32.mrf.mxu0 }
 0x163   : > { %v3307_v31 = vadd.f32 %v3306_v44, %v3305_v21  ;;  %v3371_v32 = vadd.f32 %v3370_v2, %v3369_v23 }
 0x164   : > { %v3308_v37 = vpop.f32.mrf.mxu1  ;;  %v3372_v39 = vpop.f32.mrf.mxu0 }
 0x165   : > { %v4520_v40 = vadd.f32 %v3307_v31, %v1824_v33  ;;  %v4523_v26 = vadd.f32 %v3371_v32, %v4407_v59  ;;  %v1832_v59 = vadd.f32 %v4479_v50, %v4359_v46 }
 0x166   : > { %v3309_v43 = vpop.f32.mrf.mxu1  ;;  %v3373_v54 = vpop.f32.mrf.mxu0 }
 0x167   : > { %v3310_v62 = vadd.f32 %v3309_v43, %v3308_v37  ;;  %v3374_v49 = vadd.f32 %v3373_v54, %v3372_v39 }
 0x168   : > { %v3311_v52 = vpop.f32.mrf.mxu1  ;;  %v3375_v55 = vpop.f32.mrf.mxu0 }
 0x169   : > { %v4527_v6 = vadd.f32 %v3310_v62, %v1829_v47  ;;  %v4530_v41 = vadd.f32 %v3374_v49, %v4415_v10  ;;  %v1837_v10 = vadd.f32 %v4310_v51, %v4359_v46 }
 0x16a   : > { %v3312_v63 = vpop.f32.mrf.mxu1  ;;  %v3376_v0 = vpop.f32.mrf.mxu0 }
 0x16b   : > { %v3313_v9 = vadd.f32 %v3312_v63, %v3311_v52  ;;  %v3377_v28 = vadd.f32 %v3376_v0, %v3375_v55 }
 0x16c   : > { %v3314_v4 = vpop.f32.mrf.mxu1  ;;  %v3378_v7 = vpop.f32.mrf.mxu0 }
 0x16d   : > { %v4534_v8 = vadd.f32 %v3313_v9, %v1832_v59  ;;  %v4537_v18 = vadd.f32 %v3377_v28, %v4423_v24  ;;  %v1840_v24 = vadd.f32 %v4318_v61, %v4359_v46 }
 0x16e   : > { %v3315_v1 = vpop.f32.mrf.mxu1  ;;  %v3379_v14 = vpop.f32.mrf.mxu0 }
 0x16f   : > { %v3316_v22 = vadd.f32 %v3315_v1, %v3314_v4  ;;  %v3380_v16 = vadd.f32 %v3379_v14, %v3378_v7 }
 0x170   : > { %v3317_v17 = vpop.f32.mrf.mxu1  ;;  %v3381_v21 = vpop.f32.mrf.mxu0 }
 0x171   : > { %v4541_v23 = vadd.f32 %v3316_v22, %v1837_v10  ;;  %v4544_v50 = vadd.f32 %v3380_v16, %v4431_v12  ;;  %v1845_v12 = vadd.f32 %v4322_v3, %v4359_v46 }
 0x172   : > { %v3318_v44 = vpop.f32.mrf.mxu1  ;;  %v3382_v2 = vpop.f32.mrf.mxu0 }
 0x173   : > { %v3319_v33 = vadd.f32 %v3318_v44, %v3317_v17  ;;  %v3383_v31 = vadd.f32 %v3382_v2, %v3381_v21 }
 0x174   : > { %v3320_v32 = vpop.f32.mrf.mxu1  ;;  %v3384_v37 = vpop.f32.mrf.mxu0 }
 0x175   : > { %v4548_v39 = vadd.f32 %v3319_v33, %v1840_v24  ;;  %v4551_v51 = vadd.f32 %v3383_v31, %v4439_v53  ;;  %v1848_v53 = vadd.f32 %v4330_v13, %v4359_v46 }
 0x176   : > { %v3321_v43 = vpop.f32.mrf.mxu1  ;;  %v3385_v54 = vpop.f32.mrf.mxu0 }
 0x177   : > { %v3322_v47 = vadd.f32 %v3321_v43, %v3320_v32  ;;  %v3386_v62 = vadd.f32 %v3385_v54, %v3384_v37 }
 0x178   : > { %v3323_v49 = vpop.f32.mrf.mxu1  ;;  %v3387_v52 = vpop.f32.mrf.mxu0 }
 0x179   : > { %v4555_v55 = vadd.f32 %v3322_v47, %v1845_v12  ;;  %v4558_v61 = vadd.f32 %v3386_v62, %v4447_v5  ;;  %v1853_v5 = vadd.f32 %v4334_v19, %v4359_v46 }
 0x17a   : > { %v3324_v63 = vpop.f32.mrf.mxu1  ;;  %v3388_v0 = vpop.f32.mrf.mxu0 }
 0x17b   : > { %v3325_v59 = vadd.f32 %v3324_v63, %v3323_v49  ;;  %v3389_v9 = vadd.f32 %v3388_v0, %v3387_v52 }
 0x17c   : > { %v3326_v28 = vpop.f32.mrf.mxu1  ;;  %v3390_v4 = vpop.f32.mrf.mxu0 }
 0x17d   : > { %v4562_v7 = vadd.f32 %v3325_v59, %v1848_v53  ;;  %v4565_v3 = vadd.f32 %v3389_v9, %v4455_v34  ;;  %v1856_v34 = vadd.f32 %v4342_v29, %v4359_v46 }
 0x17e   : > { %v3327_v1 = vpop.f32.mrf.mxu1  ;;  %v3391_v14 = vpop.f32.mrf.mxu0 }
 0x17f   : > { %v3328_v10 = vadd.f32 %v3327_v1, %v3326_v28  ;;  %v3392_v22 = vadd.f32 %v3391_v14, %v3390_v4 }
 0x180   : > { %v3329_v16 = vpop.f32.mrf.mxu1  ;;  %v3393_v17 = vpop.f32.mrf.mxu0 }
 0x181   : > { %v4569_v21 = vadd.f32 %v3328_v10, %v1853_v5  ;;  %v4572_v13 = vadd.f32 %v3392_v22, %v4463_v36  ;;  %v1861_v36 = vadd.f32 %v4346_v35, %v4359_v46 }
 0x182   : > { %v3330_v44 = vpop.f32.mrf.mxu1  ;;  %v3394_v2 = vpop.f32.mrf.mxu0 }
 0x183   : > { %v3331_v24 = vadd.f32 %v3330_v44, %v3329_v16  ;;  %v3395_v33 = vadd.f32 %v3394_v2, %v3393_v17 }
 0x184   : > { %v3332_v31 = vpop.f32.mrf.mxu1  ;;  %v3396_v32 = vpop.f32.mrf.mxu0 }
 0x185   : > { %v4576_v37 = vadd.f32 %v3331_v24, %v1856_v34  ;;  %v4579_v19 = vadd.f32 %v3395_v33, %v4469_v38  ;;  %v1864_v38 = vadd.f32 %v4354_v45, %v4359_v46 }
 0x186   : > { %v3333_v43 = vpop.f32.mrf.mxu1  ;;  %v3397_v54 = vpop.f32.mrf.mxu0 }
 0x187   : > { %v3334_v12 = vadd.f32 %v3333_v43, %v3332_v31  ;;  %v3398_v47 = vadd.f32 %v3397_v54, %v3396_v32 }
 0x188   : > { %v3335_v62 = vpop.f32.mrf.mxu1  ;;  %v3399_v49 = vpop.f32.mrf.mxu0 }
 0x189   : > { %v4583_v52 = vadd.f32 %v3334_v12, %v1861_v36  ;;  %v4586_v29 = vadd.f32 %v3398_v47, %v4475_v56 }
 0x18a   : > { %v3336_v63 = vpop.f32.mrf.mxu1  ;;  %v3400_v0 = vpop.f32.mrf.mxu0 }
 0x18b   : > { %v3337_v53 = vadd.f32 %v3336_v63, %v3335_v62  ;;  %v3401_v59 = vadd.f32 %v3400_v0, %v3399_v49 }
 0x18c   : > { %v3402_v9 = vpop.f32.mrf.mxu0  ;;  %v3466_v28 = vpop.f32.mrf.mxu1 }
 0x18d   : > { %v4590_v4 = vadd.f32 %v3337_v53, %v1864_v38  ;;  %v4593_v35 = vadd.f32 %v3401_v59, %v4481_v60 }
 0x18e   : > { %v3403_v1 = vpop.f32.mrf.mxu0  ;;  %v3467_v14 = vpop.f32.mrf.mxu1 }
 0x18f   : > { %v3404_v5 = vadd.f32 %v3403_v1, %v3402_v9  ;;  %v3468_v10 = vadd.f32 %v3467_v14, %v3466_v28 }
 0x190   : > { %v3405_v56 = vpop.f32.mrf.mxu0  ;;  %v4595_v22 = vpop.f32.mrf.mxu1 }
 0x191   : > { %v4598_v16 = vadd.f32 %v3404_v5, %v4485_v30  ;;  %v4601_v45 = vadd.f32 %v3468_v10, %v4488_v20 }
 0x192   : > { %v3406_v46 = vpop.f32.mrf.mxu0  ;;  %v4603_v17 = vpop.f32.mrf.mxu1 }
 0x193   : > { %v3407_v44 = vadd.f32 %v3406_v46, %v3405_v56 }
 0x194   : > { %v3408_v2 = vpop.f32.mrf.mxu0  ;;  %v4605_v60 = vpop.f32.mrf.mxu1 }
 0x195   : > { %v4608_v34 = vadd.f32 %v3407_v44, %v4492_v42 }
 0x196   : > { %v3409_v24 = vpop.f32.mrf.mxu0  ;;  %v4610_v33 = vpop.f32.mrf.mxu1 }
 0x197   : > { %v3410_v31 = vadd.f32 %v3409_v24, %v3408_v2 }
 0x198   : > { %v3411_v32 = vpop.f32.mrf.mxu0  ;;  %v4612_v30 = vpop.f32.mrf.mxu1 }
 0x199   : > { %v4615_v20 = vadd.f32 %v3410_v31, %v4499_v58 }
 0x19a   : > { %v3412_v43 = vpop.f32.mrf.mxu0  ;;  %v4617_v54 = vpop.f32.mrf.mxu1 }
 0x19b   : > { %v3413_v36 = vadd.f32 %v3412_v43, %v3411_v32 }
 0x19c   : > { %v3414_v12 = vpop.f32.mrf.mxu0  ;;  %v4619_v47 = vpop.f32.mrf.mxu1 }
 0x19d   : > { %v4622_v42 = vadd.f32 %v3413_v36, %v4506_v11 }
 0x19e   : > { %v3415_v62 = vpop.f32.mrf.mxu0  ;;  %v4624_v49 = vpop.f32.mrf.mxu1 }
 0x19f   : > { %v3416_v63 = vadd.f32 %v3415_v62, %v3414_v12 }
 0x1a0   : > { %v3417_v0 = vpop.f32.mrf.mxu0  ;;  %v4626_v38 = vpop.f32.mrf.mxu1 }
 0x1a1   : > { %v4629_v58 = vadd.f32 %v3416_v63, %v4513_v25 }
 0x1a2   : > { %v3418_v53 = vpop.f32.mrf.mxu0  ;;  %v4631_v59 = vpop.f32.mrf.mxu1 }
 0x1a3   : > { %5158 = vst [vmem:[#allocation2_spill] sm:$0xff] %v4629_v58  ;;  %v3419_v9 = vadd.f32 %v3418_v53, %v3417_v0 }
 0x1a4   : > { %v3420_v28 = vpop.f32.mrf.mxu0  ;;  %v4633_v1 = vpop.f32.mrf.mxu1 }
 0x1a5   : > { %v4636_v11 = vadd.f32 %v3419_v9, %v4520_v40 }
 0x1a6   : > { %v3421_v14 = vpop.f32.mrf.mxu0  ;;  %v4638_v5 = vpop.f32.mrf.mxu1 }
 0x1a7   : > { %5159 = vst [vmem:[#allocation3_spill] sm:$0xff] %v4636_v11  ;;  %v3422_v10 = vadd.f32 %v3421_v14, %v3420_v28 }
 0x1a8   : > { %v3423_v56 = vpop.f32.mrf.mxu0  ;;  %v4640_v46 = vpop.f32.mrf.mxu1 }
 0x1a9   : > { %v4643_v25 = vadd.f32 %v3422_v10, %v4527_v6 }
 0x1aa   : > { %v3424_v44 = vpop.f32.mrf.mxu0  ;;  %v4645_v2 = vpop.f32.mrf.mxu1 }
 0x1ab   : > { %5160 = vst [vmem:[#allocation4_spill] sm:$0xff] %v4643_v25  ;;  %v3425_v24 = vadd.f32 %v3424_v44, %v3423_v56 }
 0x1ac   : > { %v3426_v31 = vpop.f32.mrf.mxu0  ;;  %v4647_v32 = vpop.f32.mrf.mxu1 }
 0x1ad   : > { %v4650_v40 = vadd.f32 %v3425_v24, %v4534_v8 }
 0x1ae   : > { %v3427_v43 = vpop.f32.mrf.mxu0  ;;  %v4652_v36 = vpop.f32.mrf.mxu1 }
 0x1af   : > { %5161 = vst [vmem:[#allocation5_spill] sm:$0xff] %v4650_v40  ;;  %v3428_v12 = vadd.f32 %v3427_v43, %v3426_v31 }
 0x1b0   : > { %v3429_v62 = vpop.f32.mrf.mxu0  ;;  %v4654_v63 = vpop.f32.mrf.mxu1 }
 0x1b1   : > { %v4657_v6 = vadd.f32 %v3428_v12, %v4541_v23 }
 0x1b2   : > { %v3430_v0 = vpop.f32.mrf.mxu0  ;;  %v4659_v53 = vpop.f32.mrf.mxu1 }
 0x1b3   : > { %5162 = vst [vmem:[#allocation6_spill] sm:$0xff] %v4657_v6  ;;  %v3431_v9 = vadd.f32 %v3430_v0, %v3429_v62 }
 0x1b4   : > { %v3432_v28 = vpop.f32.mrf.mxu0  ;;  %v4661_v14 = vpop.f32.mrf.mxu1 }
 0x1b5   : > { %v4664_v8 = vadd.f32 %v3431_v9, %v4548_v39 }
 0x1b6   : > { %v3433_v10 = vpop.f32.mrf.mxu0  ;;  %v4666_v56 = vpop.f32.mrf.mxu1 }
 0x1b7   : > { %5163 = vst [vmem:[#allocation7_spill] sm:$0xff] %v4664_v8  ;;  %v3434_v44 = vadd.f32 %v3433_v10, %v3432_v28 }
 0x1b8   : > { %v3435_v24 = vpop.f32.mrf.mxu0  ;;  %v4668_v31 = vpop.f32.mrf.mxu1 }
 0x1b9   : > { %v4671_v23 = vadd.f32 %v3434_v44, %v4555_v55 }
 0x1ba   : > { %v3436_v43 = vpop.f32.mrf.mxu0  ;;  %v4673_v12 = vpop.f32.mrf.mxu1 }
 0x1bb   : > { %5164 = vst [vmem:[#allocation8_spill] sm:$0xff] %v4671_v23  ;;  %v3437_v62 = vadd.f32 %v3436_v43, %v3435_v24 }
 0x1bc   : > { %v3438_v0 = vpop.f32.mrf.mxu0  ;;  %v4675_v6 = vpop.f32.mrf.mxu1 }
 0x1bd   : > { %v4678_v39 = vadd.f32 %v3437_v62, %v4562_v7 }
 0x1be   : > { %v3439_v9 = vpop.f32.mrf.mxu0  ;;  %v4680_v8 = vpop.f32.mrf.mxu1 }
 0x1bf   : > { %5165 = vst [vmem:[#allocation9_spill] sm:$0xff] %v4678_v39  ;;  %v3440_v28 = vadd.f32 %v3439_v9, %v3438_v0 }
 0x1c0   : > { %v3441_v10 = vpop.f32.mrf.mxu0  ;;  %v4682_v40 = vpop.f32.mrf.mxu1 }
 0x1c1   : > { %v4685_v55 = vadd.f32 %v3440_v28, %v4569_v21 }
 0x1c2   : > { %v3442_v44 = vpop.f32.mrf.mxu0  ;;  %v4687_v23 = vpop.f32.mrf.mxu1 }
 0x1c3   : > { %5166 = vst [vmem:[#allocation10_spill] sm:$0xff] %v4685_v55  ;;  %v3443_v24 = vadd.f32 %v3442_v44, %v3441_v10 }
 0x1c4   : > { %v3444_v43 = vpop.f32.mrf.mxu0  ;;  %v4689_v11 = vpop.f32.mrf.mxu1 }
 0x1c5   : > { %v4692_v7 = vadd.f32 %v3443_v24, %v4576_v37  ;;  %v3471_v37 = vadd.f32 %v4603_v17, %v4595_v22  ;;  %v3474_v24 = vadd.f32 %v4610_v33, %v4605_v60 }
 0x1c6   : > { %v3445_v62 = vpop.f32.mrf.mxu0  ;;  %v4694_v39 = vpop.f32.mrf.mxu1 }
 0x1c7   : > { %5167 = vst [vmem:[#allocation11_spill] sm:$0xff] %v4692_v7  ;;  %v3446_v0 = vadd.f32 %v3445_v62, %v3444_v43  ;;  %v2227_v22 = vadd.f32 %v3471_v37, %v4495_v27 }
 0x1c8   : > { %v3447_v9 = vpop.f32.mrf.mxu0  ;;  %v4696_v25 = vpop.f32.mrf.mxu1 }
 0x1c9   : > { %v4699_v21 = vadd.f32 %v3446_v0, %v4583_v52  ;;  %v3477_v0 = vadd.f32 %v4617_v54, %v4612_v30 }
 0x1ca   : > { %v3448_v28 = vpop.f32.mrf.mxu0  ;;  %v4701_v55 = vpop.f32.mrf.mxu1 }
 0x1cb   : > { %5168 = vst [vmem:[#allocation12_spill] sm:$0xff] %v4699_v21  ;;  %v3449_v10 = vadd.f32 %v3448_v28, %v3447_v9  ;;  %v2232_v28 = vadd.f32 %v3474_v24, %v4502_v48  ;;  %v2235_v30 = vadd.f32 %v3477_v0, %v4509_v57  ;;  %v3486_v57 = vadd.f32 %v4638_v5, %v4633_v1 }
 0x1cc   : > { %v4703_v44 = vpop.f32.mrf.mxu1  ;;  %v3604_v58 = vpop.f32.mrf.mxu0 }
 0x1cd   : > { %v4710_v43 = vadd.f32 %v3449_v10, %v4590_v4  ;;  %v3480_v4 = vadd.f32 %v4624_v49, %v4619_v47  ;;  %v4727_v33 = vadd.f32 %v3604_v58, %v2232_v28  ;;  %v3483_v49 = vadd.f32 %v4631_v59, %v4626_v38 }
 0x1ce   : > { %v4712_v62 = vpop.f32.mrf.mxu1  ;;  %v2384_v52 = vpop.f32.mrf.mxu0 }
 0x1cf   : > { %v4720_v21 = vadd.f32 %v2384_v52, %v4601_v45  ;;  %v2240_v37 = vadd.f32 %v3480_v4, %v4516_v15  ;;  %v2551_v0 = vmul.f32 %v4727_v33, %v4727_v33  ;;  %v3492_v4 = vadd.f32 %v4652_v36, %v4647_v32 }
 0x1d0   : > { %v4716_v7 = vpop.f32.mrf.mxu1  ;;  %v3605_v9 = vpop.f32.mrf.mxu0  ;;  %v3495_v36 = vadd.f32 %v4659_v53, %v4654_v63 }
 0x1d1   : > { %v2549_v45 = vmul.f32 %v4720_v21, %v4720_v21  ;;  %v4736_v24 = vadd.f32 %v3605_v9, %v2235_v30  ;;  %v2248_v30 = vadd.f32 %v3486_v57, %v4530_v41 }
 0x1d2   : > { %v4725_v17 = vpop.f32.mrf.mxu1  ;;  %v2387_v60 = vpop.f32.mrf.mxu0 }
 0x1d3   : > { %v4730_v54 = vadd.f32 %v2387_v60, %v2227_v22  ;;  %v3489_v22 = vadd.f32 %v4645_v2, %v4640_v46  ;;  %v2552_v1 = vmul.f32 %v4736_v24, %v4736_v24  ;;  %v2243_v46 = vadd.f32 %v3483_v49, %v4523_v26 }
 0x1d4   : > { %v4732_v10 = vpop.f32.mrf.mxu1  ;;  %v3608_v48 = vpop.f32.mrf.mxu0  ;;  %v3498_v26 = vadd.f32 %v4666_v56, %v4661_v14 }
 0x1d5   : > { %v2511_v27 = vadd.f32 %v4730_v54, %v4720_v21  ;;  %v2550_v47 = vmul.f32 %v4730_v54, %v4730_v54 }
 0x1d6   : > { %v4746_v58 = vpop.f32.mrf.mxu1  ;;  %v2400_v52 = vpop.f32.mrf.mxu0 }
 0x1d7   : > { %v2512_v9 = vadd.f32 %v2511_v27, %v4727_v33  ;;  %v2581_v28 = vadd.f32 %v2550_v47, %v2549_v45  ;;  %v4754_v60 = vadd.f32 %v2400_v52, %v2240_v37  ;;  %v4770_v52 = vadd.f32 %v3608_v48, %v2248_v30 }
 0x1d8   : > { %v4756_v38 = vpop.f32.mrf.mxu1  ;;  %v3609_v59 = vpop.f32.mrf.mxu0  ;;  %v2264_v30 = vadd.f32 %v3498_v26, %v4558_v61  ;;  %v3507_v26 = vadd.f32 %v4687_v23, %v4682_v40 }
 0x1d9   : > { %v2582_v5 = vadd.f32 %v2581_v28, %v2551_v0  ;;  %v2513_v15 = vadd.f32 %v2512_v9, %v4736_v24  ;;  %v2553_v47 = vmul.f32 %v4754_v60, %v4754_v60  ;;  %v2251_v0 = vadd.f32 %v3489_v22, %v4537_v18 }
 0x1da   : > { %v4764_v45 = vpop.f32.mrf.mxu1  ;;  %v2403_v2 = vpop.f32.mrf.mxu0  ;;  %v2256_v22 = vadd.f32 %v3492_v4, %v4544_v50  ;;  %v2555_v63 = vmul.f32 %v4770_v52, %v4770_v52  ;;  %v3504_v50 = vadd.f32 %v4680_v8, %v4675_v6 }
 0x1db   : > { %v2514_v27 = vadd.f32 %v2513_v15, %v4754_v60  ;;  %v2583_v37 = vadd.f32 %v2582_v5, %v2552_v1  ;;  %v4773_v9 = vadd.f32 %v2403_v2, %v2243_v46  ;;  %v4781_v57 = vadd.f32 %v3609_v59, %v2251_v0 }
 0x1dc   : > { %v4775_v32 = vpop.f32.mrf.mxu1  ;;  %v3612_v41 = vpop.f32.mrf.mxu0  ;;  %v3501_v5 = vadd.f32 %v4673_v12, %v4668_v31  ;;  %v2259_v46 = vadd.f32 %v3495_v36, %v4551_v51 }
 0x1dd   : > { %v2584_v49 = vadd.f32 %v2583_v37, %v2553_v47  ;;  %v2515_v28 = vadd.f32 %v2514_v27, %v4773_v9  ;;  %v2554_v48 = vmul.f32 %v4773_v9, %v4773_v9  ;;  %v2556_v31 = vmul.f32 %v4781_v57, %v4781_v57 }
 0x1de   : > { %v4786_v18 = vpop.f32.mrf.mxu1  ;;  %v2416_v1 = vpop.f32.mrf.mxu0  ;;  %v2267_v47 = vadd.f32 %v3501_v5, %v4565_v3  ;;  %v4810_v0 = vadd.f32 %v3612_v41, %v2264_v30  ;;  %v2275_v30 = vadd.f32 %v3507_v26, %v4579_v19 }
 0x1df   : > { %v2516_v53 = vadd.f32 %v2515_v28, %v4770_v52  ;;  %v2585_v14 = vadd.f32 %v2584_v49, %v2554_v48  ;;  %v4794_v56 = vadd.f32 %v2416_v1, %v2256_v22  ;;  %v3510_v49 = vadd.f32 %v4694_v39, %v4689_v11 }
 0x1e0   : > { %v4796_v59 = vpop.f32.mrf.mxu1  ;;  %v3613_v15 = vpop.f32.mrf.mxu0  ;;  %v2272_v1 = vadd.f32 %v3504_v50, %v4572_v13  ;;  %v2559_v40 = vmul.f32 %v4810_v0, %v4810_v0  ;;  %v3516_v13 = vadd.f32 %v4712_v62, %v4703_v44 }
 0x1e1   : > { %v2586_v12 = vadd.f32 %v2585_v14, %v2555_v63  ;;  %v2517_v4 = vadd.f32 %v2516_v53, %v4781_v57  ;;  %v2557_v61 = vmul.f32 %v4794_v56, %v4794_v56  ;;  %v4823_v28 = vadd.f32 %v3613_v15, %v2267_v47 }
 0x1e2   : > { %v4805_v2 = vpop.f32.mrf.mxu1  ;;  %v2419_v27 = vpop.f32.mrf.mxu0  ;;  %v3513_v63 = vadd.f32 %v4701_v55, %v4696_v25  ;;  %v2280_v15 = vadd.f32 %v3510_v49, %v4586_v29 }
 0x1e3   : > { %v4808_v37 = vadd.f32 %v2419_v27, %v2259_v46  ;;  %v2518_v51 = vadd.f32 %v2517_v4, %v4794_v56  ;;  %v2587_v6 = vadd.f32 %v2586_v12, %v2556_v31  ;;  %v2560_v25 = vmul.f32 %v4823_v28, %v4823_v28 }
 0x1e4   : > { %v4815_v8 = vpop.f32.mrf.mxu1  ;;  %v3616_v36 = vpop.f32.mrf.mxu0  ;;  %v2283_v12 = vadd.f32 %v3513_v63, %v4593_v35 }
 0x1e5   : > { %v2558_v3 = vmul.f32 %v4808_v37, %v4808_v37  ;;  %v2588_v41 = vadd.f32 %v2587_v6, %v2557_v61  ;;  %v2519_v48 = vadd.f32 %v2518_v51, %v4808_v37  ;;  %v4844_v27 = vadd.f32 %v3616_v36, %v2280_v15 }
 0x1e6   : > { %v3533_v22 = vpop.f32.mrf.mxu1  ;;  %v2432_v5 = vpop.f32.mrf.mxu0  ;;  %v3519_v51 = vadd.f32 %v4725_v17, %v4716_v7  ;;  %v3522_v61 = vadd.f32 %v4746_v58, %v4732_v10 }
 0x1e7   : > { %v2520_v11 = vadd.f32 %v2519_v48, %v4810_v0  ;;  %v2589_v23 = vadd.f32 %v2588_v41, %v2558_v3  ;;  %v4832_v39 = vadd.f32 %v2432_v5, %v2272_v1  ;;  %v2288_v3 = vadd.f32 %v3516_v13, %v4598_v16 }
 0x1e8   : > { %v3535_v53 = vpop.f32.mrf.mxu1  ;;  %v3617_v14 = vpop.f32.mrf.mxu0  ;;  %v3525_v48 = vadd.f32 %v4764_v45, %v4756_v38  ;;  %v2563_v7 = vmul.f32 %v4844_v27, %v4844_v27  ;;  %v2296_v63 = vadd.f32 %v3522_v61, %v4615_v20  ;;  %v3528_v16 = vadd.f32 %v4786_v18, %v4775_v32 }
 0x1e9   : > { %v2590_v55 = vadd.f32 %v2589_v23, %v2559_v40  ;;  %v2521_v46 = vadd.f32 %v2520_v11, %v4823_v28  ;;  %v2561_v19 = vmul.f32 %v4832_v39, %v4832_v39  ;;  %v4855_v36 = vadd.f32 %v3617_v14, %v2283_v12 }
 0x1ea   : > { %v3536_v50 = vpop.f32.mrf.mxu1  ;;  %v2435_v31 = vpop.f32.mrf.mxu0  ;;  %v2291_v40 = vadd.f32 %v3519_v51, %v4608_v34  ;;  %v2299_v15 = vadd.f32 %v3525_v48, %v4622_v42 }
 0x1eb   : > { %v4842_v4 = vadd.f32 %v2435_v31, %v2275_v30  ;;  %v2522_v29 = vadd.f32 %v2521_v46, %v4832_v39  ;;  %v2591_v44 = vadd.f32 %v2590_v55, %v2560_v25  ;;  %v2564_v38 = vmul.f32 %v4855_v36, %v4855_v36 }
 0x1ec   : > { %v3538_v62 = vpop.f32.mrf.mxu1  ;;  %v3620_v47 = vpop.f32.mrf.mxu0  ;;  %v3531_v55 = vadd.f32 %v4805_v2, %v4796_v59  ;;  %v3534_v46 = vadd.f32 %v3533_v22, %v4815_v8  ;;  %v3537_v61 = vadd.f32 %v3536_v50, %v3535_v53 }
 0x1ed   : > { %v2562_v35 = vmul.f32 %v4842_v4, %v4842_v4  ;;  %v2592_v6 = vadd.f32 %v2591_v44, %v2561_v19  ;;  %v2523_v26 = vadd.f32 %v2522_v29, %v4842_v4  ;;  %v4876_v13 = vadd.f32 %v3620_v47, %v2296_v63  ;;  %v5169_v44 = vld [vmem:[#allocation2_spill] sm:$0xff] }
 0x1ee   : > { %v3539_v49 = vpop.f32.mrf.mxu1  ;;  %v2448_v41 = vpop.f32.mrf.mxu0  ;;  %v2304_v47 = vadd.f32 %v3528_v16, %v5169_v44 }
 0x1ef   : > { %v2524_v17 = vadd.f32 %v2523_v26, %v4844_v27  ;;  %v2593_v10 = vadd.f32 %v2592_v6, %v2562_v35  ;;  %v4864_v58 = vadd.f32 %v2448_v41, %v2288_v3  ;;  %v2567_v35 = vmul.f32 %v4876_v13, %v4876_v13  ;;  %v5170_v26 = vld [vmem:[#allocation4_spill] sm:$0xff]  ;;  %v5171_v41 = vld [vmem:[#allocation3_spill] sm:$0xff] }
 0x1f0   : > { %v3541_v1 = vpop.f32.mrf.mxu1  ;;  %v3621_v5 = vpop.f32.mrf.mxu0  ;;  %v2312_v3 = vadd.f32 %v3534_v46, %v5170_v26  ;;  %v2307_v48 = vadd.f32 %v3531_v55, %v5171_v41 }
 0x1f1   : > { %v2594_v45 = vadd.f32 %v2593_v10, %v2563_v7  ;;  %v2525_v11 = vadd.f32 %v2524_v17, %v4855_v36  ;;  %v2565_v34 = vmul.f32 %v4864_v58, %v4864_v58  ;;  %v4886_v12 = vadd.f32 %v3621_v5, %v2299_v15 }
 0x1f2   : > { %v3542_v23 = vpop.f32.mrf.mxu1  ;;  %v2451_v14 = vpop.f32.mrf.mxu0  ;;  %v3540_v7 = vadd.f32 %v3539_v49, %v3538_v62 }
 0x1f3   : > { %v4874_v30 = vadd.f32 %v2451_v14, %v2291_v40  ;;  %v2526_v20 = vadd.f32 %v2525_v11, %v4864_v58  ;;  %v2595_v32 = vadd.f32 %v2594_v45, %v2564_v38  ;;  %v2568_v17 = vmul.f32 %v4886_v12, %v4886_v12  ;;  %v5172_v11 = vld [vmem:[#allocation5_spill] sm:$0xff] }
 0x1f4   : > { %v3544_v18 = vpop.f32.mrf.mxu1  ;;  %v3624_v25 = vpop.f32.mrf.mxu0  ;;  %v2315_v62 = vadd.f32 %v3537_v61, %v5172_v11  ;;  %v3543_v15 = vadd.f32 %v3542_v23, %v3541_v1  ;;  %v5174_v61 = vld [vmem:[#allocation8_spill] sm:$0xff] }
 0x1f5   : > { %v2566_v42 = vmul.f32 %v4874_v30, %v4874_v30  ;;  %v2596_v31 = vadd.f32 %v2595_v32, %v2565_v34  ;;  %v2527_v29 = vadd.f32 %v2526_v20, %v4874_v30  ;;  %v4900_v63 = vadd.f32 %v3624_v25, %v2312_v3 }
 0x1f6   : > { %v3545_v19 = vpop.f32.mrf.mxu1  ;;  %v2464_v51 = vpop.f32.mrf.mxu0 }
 0x1f7   : > { %v2528_v59 = vadd.f32 %v2527_v29, %v4876_v13  ;;  %v2597_v2 = vadd.f32 %v2596_v31, %v2566_v42  ;;  %v4893_v8 = vadd.f32 %v2464_v51, %v2304_v47  ;;  %v3546_v20 = vadd.f32 %v3545_v19, %v3544_v18  ;;  %v5173_v42 = vld [vmem:[#allocation6_spill] sm:$0xff] }
 0x1f8   : > { %v3547_v22 = vpop.f32.mrf.mxu1  ;;  %v3625_v6 = vpop.f32.mrf.mxu0  ;;  %v2320_v31 = vadd.f32 %v3540_v7, %v5173_v42  ;;  %v2571_v44 = vmul.f32 %v4900_v63, %v4900_v63 }
 0x1f9   : > { %v2598_v10 = vadd.f32 %v2597_v2, %v2567_v35  ;;  %v2529_v53 = vadd.f32 %v2528_v59, %v4886_v12  ;;  %v2569_v38 = vmul.f32 %v4893_v8, %v4893_v8  ;;  %v4910_v25 = vadd.f32 %v3625_v6, %v2315_v62  ;;  %v5175_v59 = vld [vmem:[#allocation7_spill] sm:$0xff] }
 0x1fa   : > { %v3548_v50 = vpop.f32.mrf.mxu1  ;;  %v2467_v5 = vpop.f32.mrf.mxu0  ;;  %v2328_v35 = vadd.f32 %v3546_v20, %v5174_v61  ;;  %v2323_v2 = vadd.f32 %v3543_v15, %v5175_v59 }
 0x1fb   : > { %v4902_v40 = vadd.f32 %v2467_v5, %v2307_v48  ;;  %v2530_v16 = vadd.f32 %v2529_v53, %v4893_v8  ;;  %v2599_v45 = vadd.f32 %v2598_v10, %v2568_v17  ;;  %v3549_v47 = vadd.f32 %v3548_v50, %v3547_v22  ;;  %v5176_v5 = vld [vmem:[#allocation9_spill] sm:$0xff] }
 0x1fc   : > { %v3550_v49 = vpop.f32.mrf.mxu1  ;;  %v3628_v14 = vpop.f32.mrf.mxu0  ;;  %v2572_v6 = vmul.f32 %v4910_v25, %v4910_v25 }
 0x1fd   : > { %v2570_v34 = vmul.f32 %v4902_v40, %v4902_v40  ;;  %v2600_v32 = vadd.f32 %v2599_v45, %v2569_v38  ;;  %v2531_v55 = vadd.f32 %v2530_v16, %v4902_v40  ;;  %v4924_v7 = vadd.f32 %v3628_v14, %v2328_v35 }
 0x1fe   : > { %v3551_v46 = vpop.f32.mrf.mxu1  ;;  %v2480_v29 = vpop.f32.mrf.mxu0  ;;  %v2331_v16 = vadd.f32 %v3549_v47, %v5176_v5 }
 0x1ff   : > { %v2532_v51 = vadd.f32 %v2531_v55, %v4900_v63  ;;  %v2601_v1 = vadd.f32 %v2600_v32, %v2570_v34  ;;  %v4917_v23 = vadd.f32 %v2480_v29, %v2320_v31  ;;  %v3552_v3 = vadd.f32 %v3551_v46, %v3550_v49  ;;  %v5177_v34 = vld [vmem:[#allocation10_spill] sm:$0xff] }
 0x200   : > { %v3553_v18 = vpop.f32.mrf.mxu1  ;;  %v3629_v19 = vpop.f32.mrf.mxu0  ;;  %v2575_v42 = vmul.f32 %v4924_v7, %v4924_v7 }
 0x201   : > { %v2602_v26 = vadd.f32 %v2601_v1, %v2571_v44  ;;  %v2533_v41 = vadd.f32 %v2532_v51, %v4910_v25  ;;  %v2573_v53 = vmul.f32 %v4917_v23, %v4917_v23  ;;  %v4934_v15 = vadd.f32 %v3629_v19, %v2331_v16  ;;  %v5178_v1 = vld [vmem:[#allocation12_spill] sm:$0xff]  ;;  %v5179_v19 = vld [vmem:[#allocation11_spill] sm:$0xff] }
 0x202   : > { %v3554_v48 = vpop.f32.mrf.mxu1  ;;  %v2483_v22 = vpop.f32.mrf.mxu0  ;;  %v2336_v32 = vadd.f32 %v3552_v3, %v5177_v34 }
 0x203   : > { %v4926_v17 = vadd.f32 %v2483_v22, %v2323_v2  ;;  %v2534_v10 = vadd.f32 %v2533_v41, %v4917_v23  ;;  %v2603_v50 = vadd.f32 %v2602_v26, %v2572_v6  ;;  %v3555_v11 = vadd.f32 %v3554_v48, %v3553_v18 }
 0x204   : > { %v3556_v38 = vpop.f32.mrf.mxu1  ;;  %v3632_v45 = vpop.f32.mrf.mxu0  ;;  %v2576_v35 = vmul.f32 %v4934_v15, %v4934_v15 }
 0x205   : > { %v2574_v62 = vmul.f32 %v4926_v17, %v4926_v17  ;;  %v2604_v49 = vadd.f32 %v2603_v50, %v2573_v53  ;;  %v2535_v14 = vadd.f32 %v2534_v10, %v4926_v17  ;;  %v2339_v61 = vadd.f32 %v3555_v11, %v5179_v19 }
 0x206   : > { %v3557_v20 = vpop.f32.mrf.mxu1  ;;  %v2496_v55 = vpop.f32.mrf.mxu0 }
 0x207   : > { %v3558_v46 = vadd.f32 %v3557_v20, %v3556_v38  ;;  %v2536_v31 = vadd.f32 %v2535_v14, %v4924_v7  ;;  %v2605_v29 = vadd.f32 %v2604_v49, %v2574_v62  ;;  %v4941_v44 = vadd.f32 %v2496_v55, %v2336_v32 }
 0x208   : > { %v3559_v47 = vpop.f32.mrf.mxu1  ;;  %v3633_v51 = vpop.f32.mrf.mxu0 }
 0x209   : > { %v2344_v18 = vadd.f32 %v3558_v46, %v5178_v1  ;;  %v2606_v59 = vadd.f32 %v2605_v29, %v2575_v42  ;;  %v2537_v2 = vadd.f32 %v2536_v31, %v4934_v15  ;;  %v2577_v10 = vmul.f32 %v4941_v44, %v4941_v44 }
 0x20a   : > { %v3560_v6 = vpop.f32.mrf.mxu1  ;;  %v2499_v26 = vpop.f32.mrf.mxu0 }
 0x20b   : > { %v3561_v3 = vadd.f32 %v3560_v6, %v3559_v47  ;;  %v4948_v41 = vadd.f32 %v2499_v26, %v2339_v61  ;;  %v4950_v48 = vadd.f32 %v3632_v45, %v2344_v18  ;;  %v2538_v22 = vadd.f32 %v2537_v2, %v4941_v44 }
 0x20c   : > { %v2607_v53 = vadd.f32 %v2606_v59, %v2576_v35 }
 0x20d   : > { %v2347_v50 = vadd.f32 %v3561_v3, %v4710_v43  ;;  %v2578_v5 = vmul.f32 %v4948_v41, %v4948_v41  ;;  %v2539_v38 = vadd.f32 %v2538_v22, %v4948_v41  ;;  %v2579_v45 = vmul.f32 %v4950_v48, %v4950_v48 }
 0x20e   : > { %v2608_v16 = vadd.f32 %v2607_v53, %v2577_v10 }
 0x20f   : > { %v4959_v11 = vadd.f32 %v3633_v51, %v2347_v50  ;;  %v2540_v62 = vadd.f32 %v2539_v38, %v4950_v48 }
 0x210   : > { %v2609_v49 = vadd.f32 %v2608_v16, %v2578_v5 }
 0x211   : > { %v2580_v14 = vmul.f32 %v4959_v11, %v4959_v11  ;;  %v2541_v20 = vadd.f32 %v2540_v62, %v4959_v11 }
 0x212   : > { %v2610_v43 = vadd.f32 %v2609_v49, %v2579_v45 }
 0x213   : > { %v2542_v34 = vrot.slane %v2541_v20, 4 }
 0x214   : > { %v2611_v32 = vadd.f32 %v2610_v43, %v2580_v14 }
 0x215   : > { %v2543_v55 = vadd.f32 %v2542_v34, %v2541_v20 }
 0x216   : > { %v2612_v46 = vrot.slane %v2611_v32, 4 }
 0x217   : > { %v2544_v42 = vrot.slane %v2543_v55, 2 }
 0x218   : > { %v2613_v31 = vadd.f32 %v2612_v46, %v2611_v32 }
 0x219   : > { %v2545_v29 = vadd.f32 %v2544_v42, %v2543_v55  ;;  %v2688_v42 = vld [vmem:[%s5041_s5] sm:$0xff] }
 0x21a   : > { %v2614_v47 = vrot.slane %v2613_v31, 2 }
 0x21b   : > { %v2546_v51 = vrot.slane %v2545_v29, 1 }
 0x21c   : > { %v2615_v1 = vadd.f32 %v2614_v47, %v2613_v31  ;;  %v2689_v31 = vld [vmem:[%s5041_s5 + $0x8] sm:$0xff]  ;;  %v2691_v47 = vld [vmem:[%s5041_s5 + $0x18] sm:$0xff] }
 0x21d   : > { %v2547_v18 = vadd.f32 %v2546_v51, %v2545_v29  ;;  %v2690_v29 = vld [vmem:[%s5041_s5 + $0x10] sm:$0xff] }
 0x21e   : > { %v2616_v19 = vrot.slane %v2615_v1, 1 }
 0x21f   : > { %v4967_v61 = vmul.f32 0.00390625, %v2547_v18 }
 0x220   : > { %v2617_v35 = vadd.f32 %v2616_v19, %v2615_v1 }
 0x221   : > { %v2619_v2 = vmul.f32 %v4967_v61, %v4967_v61  ;;  %v2631_v26 = vsub.f32 %v4808_v37, %v4967_v61  ;;  %v2634_v3 = vsub.f32 %v4832_v39, %v4967_v61  ;;  %v2635_v10 = vsub.f32 %v4842_v4, %v4967_v61 }
 0x222   : > { %v2618_v59 = vmul.f32 0.00390625, %v2617_v35  ;;  %v2636_v53 = vsub.f32 %v4844_v27, %v4967_v61  ;;  %v2637_v50 = vsub.f32 %v4855_v36, %v4967_v61  ;;  %v2638_v5 = vsub.f32 %v4864_v58, %v4967_v61  ;;  %v2693_v35 = vld [vmem:[%s5041_s5 + $0x28] sm:$0xff] }
 0x223   : > { %v2639_v16 = vsub.f32 %v4874_v30, %v4967_v61  ;;  %v2640_v37 = vsub.f32 %v4876_v13, %v4967_v61  ;;  %v2641_v39 = vsub.f32 %v4886_v12, %v4967_v61  ;;  %v2642_v4 = vsub.f32 %v4893_v8, %v4967_v61 }
 0x224   : > { %v2620_v6 = vsub.f32 %v2618_v59, %v2619_v2  ;;  %v2643_v27 = vsub.f32 %v4902_v40, %v4967_v61  ;;  %v2644_v36 = vsub.f32 %v4900_v63, %v4967_v61  ;;  %v2645_v58 = vsub.f32 %v4910_v25, %v4967_v61  ;;  %v2694_v59 = vld [vmem:[%s5041_s5 + $0x30] sm:$0xff]  ;;  %v2695_v2 = vld [vmem:[%s5041_s5 + $0x38] sm:$0xff] }
 0x225   : > { %v2646_v30 = vsub.f32 %v4917_v23, %v4967_v61  ;;  %v2647_v13 = vsub.f32 %v4926_v17, %v4967_v61  ;;  %v2648_v12 = vsub.f32 %v4924_v7, %v4967_v61  ;;  %v2649_v8 = vsub.f32 %v4934_v15, %v4967_v61 }
 0x226   : > { %v2621_v22 = vmax.f32 %v2620_v6, 0.0  ;;  %v2650_v40 = vsub.f32 %v4941_v44, %v4967_v61  ;;  %v2651_v63 = vsub.f32 %v4948_v41, %v4967_v61  ;;  %v2652_v25 = vsub.f32 %v4950_v48, %v4967_v61 }
 0x227   : > { %v2653_v23 = vsub.f32 %v4959_v11, %v4967_v61  ;;  %v2622_v7 = vsub.f32 %v4720_v21, %v4967_v61  ;;  %v2623_v15 = vsub.f32 %v4730_v54, %v4967_v61  ;;  %v2624_v44 = vsub.f32 %v4727_v33, %v4967_v61 }
 0x228   : > { %v2654_v17 = vadd.f32 1e-05, %v2621_v22  ;;  %v2625_v41 = vsub.f32 %v4736_v24, %v4967_v61  ;;  %v2626_v48 = vsub.f32 %v4754_v60, %v4967_v61  ;;  %v2627_v38 = vsub.f32 %v4773_v9, %v4967_v61 }
 0x229   : > { %v2628_v11 = vsub.f32 %v4770_v52, %v4967_v61  ;;  %v2629_v21 = vsub.f32 %v4781_v57, %v4967_v61  ;;  %v2630_v54 = vsub.f32 %v4794_v56, %v4967_v61  ;;  %v2632_v33 = vsub.f32 %v4810_v0, %v4967_v61 }
 0x22a   : > { %3939 = vrsqrt.f32 %v2654_v17  ;;  %v2633_v24 = vsub.f32 %v4823_v28, %v4967_v61  ;;  %v2692_v61 = vld [vmem:[%s5041_s5 + $0x20] sm:$0xff]  ;;  %v2699_v17 = vld [vmem:[%s5041_s5 + $0x58] sm:$0xff] }
 0x237   : > { %v3940_v45 = vpop.eup %3939 }
 0x238   : > { %v2656_v60 = vmul.f32 %v3940_v45, %v2622_v7  ;;  %v2657_v52 = vmul.f32 %v3940_v45, %v2623_v15  ;;  %v2658_v9 = vmul.f32 %v3940_v45, %v2624_v44  ;;  %v2659_v57 = vmul.f32 %v3940_v45, %v2625_v41  ;;  %v2700_v7 = vld [vmem:[%s5041_s5 + $0x60] sm:$0xff]  ;;  %v2702_v44 = vld [vmem:[%s5041_s5 + $0x70] sm:$0xff]  ;;  %v2703_v41 = vld [vmem:[%s5041_s5 + $0x78] sm:$0xff] }
 0x239   : > { %v2660_v56 = vmul.f32 %v3940_v45, %v2626_v48  ;;  %v2661_v62 = vmul.f32 %v3940_v45, %v2627_v38  ;;  %v2662_v0 = vmul.f32 %v3940_v45, %v2628_v11  ;;  %v2663_v49 = vmul.f32 %v3940_v45, %v2629_v21  ;;  %v2704_v48 = vld [vmem:[%s5041_s5 + $0x80] sm:$0xff] }
 0x23a   : > { %v2664_v14 = vmul.f32 %v3940_v45, %v2630_v54  ;;  %v2665_v28 = vmul.f32 %v3940_v45, %v2631_v26  ;;  %v2666_v20 = vmul.f32 %v3940_v45, %v2632_v33  ;;  %v2667_v43 = vmul.f32 %v3940_v45, %v2633_v24  ;;  %v2711_v24 = vld [vmem:[%s5041_s5 + $0xb8] sm:$0xff] }
 0x23b   : > { %v2668_v34 = vmul.f32 %v3940_v45, %v2634_v3  ;;  %v2669_v32 = vmul.f32 %v3940_v45, %v2635_v10  ;;  %v2670_v55 = vmul.f32 %v3940_v45, %v2636_v53  ;;  %v2671_v46 = vmul.f32 %v3940_v45, %v2637_v50  ;;  %v2696_v10 = vld [vmem:[%s5041_s5 + $0x40] sm:$0xff]  ;;  %v2697_v53 = vld [vmem:[%s5041_s5 + $0x48] sm:$0xff]  ;;  %v2698_v50 = vld [vmem:[%s5041_s5 + $0x50] sm:$0xff] }
 0x23c   : > { %v2672_v51 = vmul.f32 %v3940_v45, %v2638_v5  ;;  %v2673_v1 = vmul.f32 %v3940_v45, %v2639_v16  ;;  %v2674_v18 = vmul.f32 %v3940_v45, %v2640_v37  ;;  %v2675_v19 = vmul.f32 %v3940_v45, %v2641_v39 }
 0x23d   : > { %v2676_v6 = vmul.f32 %v3940_v45, %v2642_v4  ;;  %v2677_v26 = vmul.f32 %v3940_v45, %v2643_v27  ;;  %v2678_v3 = vmul.f32 %v3940_v45, %v2644_v36  ;;  %v2679_v22 = vmul.f32 %v3940_v45, %v2645_v58  ;;  %v2701_v4 = vld [vmem:[%s5041_s5 + $0x68] sm:$0xff] }
 0x23e   : > { %v2680_v5 = vmul.f32 %v3940_v45, %v2646_v30  ;;  %v2681_v16 = vmul.f32 %v3940_v45, %v2647_v13  ;;  %v2682_v37 = vmul.f32 %v3940_v45, %v2648_v12  ;;  %v2683_v39 = vmul.f32 %v3940_v45, %v2649_v8  ;;  %v2705_v30 = vld [vmem:[%s5041_s5 + $0x88] sm:$0xff]  ;;  %v2706_v13 = vld [vmem:[%s5041_s5 + $0x90] sm:$0xff]  ;;  %v2707_v12 = vld [vmem:[%s5041_s5 + $0x98] sm:$0xff] }
 0x23f   : > { %v2684_v27 = vmul.f32 %v3940_v45, %v2650_v40  ;;  %v2685_v36 = vmul.f32 %v3940_v45, %v2651_v63  ;;  %v2686_v58 = vmul.f32 %v3940_v45, %v2652_v25  ;;  %v2687_v15 = vmul.f32 %v3940_v45, %v2653_v23  ;;  %v2708_v40 = vld [vmem:[%s5041_s5 + $0xa0] sm:$0xff]  ;;  %v2709_v63 = vld [vmem:[%s5041_s5 + $0xa8] sm:$0xff]  ;;  %v2710_v25 = vld [vmem:[%s5041_s5 + $0xb0] sm:$0xff] }
 0x240   : > { %v2720_v8 = vadd.f32 %v2688_v42, %v2656_v60  ;;  %v2721_v38 = vadd.f32 %v2689_v31, %v2657_v52  ;;  %v2722_v11 = vadd.f32 %v2690_v29, %v2658_v9  ;;  %v2723_v21 = vadd.f32 %v2691_v47, %v2659_v57  ;;  %v2712_v42 = vld [vmem:[%s5041_s5 + $0xc0] sm:$0xff]  ;;  %v2713_v60 = vld [vmem:[%s5041_s5 + $0xc8] sm:$0xff]  ;;  %v2714_v57 = vld [vmem:[%s5041_s5 + $0xd0] sm:$0xff] }
 0x241   : > { %v2724_v23 = vadd.f32 %v2692_v61, %v2660_v56  ;;  %v2725_v45 = vadd.f32 %v2693_v35, %v2661_v62  ;;  %v2726_v54 = vadd.f32 %v2694_v59, %v2662_v0  ;;  %v2727_v33 = vadd.f32 %v2695_v2, %v2663_v49  ;;  %v2715_v47 = vld [vmem:[%s5041_s5 + $0xd8] sm:$0xff]  ;;  %v2716_v56 = vld [vmem:[%s5041_s5 + $0xe0] sm:$0xff]  ;;  %v2717_v59 = vld [vmem:[%s5041_s5 + $0xe8] sm:$0xff] }
 0x242   : > { %v2728_v31 = vadd.f32 %v2696_v10, %v2664_v14  ;;  %v2729_v52 = vadd.f32 %v2697_v53, %v2665_v28  ;;  %v2730_v9 = vadd.f32 %v2698_v50, %v2666_v20  ;;  %v2731_v29 = vadd.f32 %v2699_v17, %v2667_v43  ;;  %v2718_v2 = vld [vmem:[%s5041_s5 + $0xf0] sm:$0xff]  ;;  %v2719_v49 = vld [vmem:[%s5041_s5 + $0xf8] sm:$0xff] }
 0x243   : > { %v2732_v61 = vadd.f32 %v2700_v7, %v2668_v34  ;;  %v2733_v35 = vadd.f32 %v2701_v4, %v2669_v32  ;;  %v2734_v62 = vadd.f32 %v2702_v44, %v2670_v55  ;;  %v2735_v0 = vadd.f32 %v2703_v41, %v2671_v46 }
 0x244   : > { %v2736_v10 = vadd.f32 %v2704_v48, %v2672_v51  ;;  %v2737_v14 = vadd.f32 %v2705_v30, %v2673_v1  ;;  %v2738_v28 = vadd.f32 %v2706_v13, %v2674_v18  ;;  %v2739_v53 = vadd.f32 %v2707_v12, %v2675_v19 }
 0x245   : > { %v5075_v20 = vadd.f32 %v2708_v40, %v2676_v6  ;;  %v5077_v50 = vadd.f32 %v2709_v63, %v2677_v26  ;;  %v5079_v43 = vadd.f32 %v2710_v25, %v2678_v3  ;;  %v5081_v17 = vadd.f32 %v2711_v24, %v2679_v22 }
 0x246   : > { %v5083_v34 = vadd.f32 %v2712_v42, %v2680_v5  ;;  %v5085_v32 = vadd.f32 %v2713_v60, %v2681_v16  ;;  %v5087_v55 = vadd.f32 %v2714_v57, %v2682_v37  ;;  %v5089_v46 = vadd.f32 %v2715_v47, %v2683_v39 }
 0x247   : > { %v5098_v51 = vadd.f32 %v2716_v56, %v2684_v27  ;;  %v5100_v1 = vadd.f32 %v2717_v59, %v2685_v36  ;;  %v5102_v18 = vadd.f32 %v2718_v2, %v2686_v58  ;;  %v5104_v19 = vadd.f32 %v2719_v49, %v2687_v15 }
 0x248   : > { %v2752_v6 = vmax.f32 %v2720_v8, 0.0  ;;  %v2753_v26 = vmax.f32 %v2721_v38, 0.0  ;;  %v2754_v3 = vmax.f32 %v2722_v11, 0.0  ;;  %v2755_v22 = vmax.f32 %v2723_v21, 0.0 }
 0x249   : > { %v2756_v5 = vmax.f32 %v2724_v23, 0.0  ;;  %v2757_v16 = vmax.f32 %v2725_v45, 0.0  ;;  %v2758_v37 = vmax.f32 %v2726_v54, 0.0  ;;  %v2759_v39 = vmax.f32 %v2727_v33, 0.0 }
 0x24a   : > { %v2760_v7 = vmax.f32 %v2728_v31, 0.0  ;;  %v2761_v4 = vmax.f32 %v2729_v52, 0.0  ;;  %v2762_v27 = vmax.f32 %v2730_v9, 0.0  ;;  %v2763_v36 = vmax.f32 %v2731_v29, 0.0  ;;  %2784 = vst [vmem:[%s5096_s8] sm:$0xff] %v2752_v6  ;;  %2785 = vst [vmem:[%s5096_s8 + $0x8] sm:$0xff] %v2753_v26 }
 0x24b   : > { %2786 = vst [vmem:[%s5096_s8 + $0x10] sm:$0xff] %v2754_v3  ;;  %2787 = vst [vmem:[%s5096_s8 + $0x18] sm:$0xff] %v2755_v22  ;;  %v2764_v58 = vmax.f32 %v2732_v61, 0.0  ;;  %v2765_v15 = vmax.f32 %v2733_v35, 0.0  ;;  %v2766_v44 = vmax.f32 %v2734_v62, 0.0  ;;  %v2767_v41 = vmax.f32 %v2735_v0, 0.0 }
 0x24c   : > { %2788 = vst [vmem:[%s5096_s8 + $0x20] sm:$0xff] %v2756_v5  ;;  %2789 = vst [vmem:[%s5096_s8 + $0x28] sm:$0xff] %v2757_v16  ;;  %v2768_v48 = vmax.f32 %v2736_v10, 0.0  ;;  %v2769_v30 = vmax.f32 %v2737_v14, 0.0  ;;  %v2770_v13 = vmax.f32 %v2738_v28, 0.0  ;;  %v2771_v12 = vmax.f32 %v2739_v53, 0.0 }
 0x24d   : > { %2790 = vst [vmem:[%s5096_s8 + $0x30] sm:$0xff] %v2758_v37  ;;  %2791 = vst [vmem:[%s5096_s8 + $0x38] sm:$0xff] %v2759_v39  ;;  %v2772_v8 = vmax.f32 %v5075_v20, 0.0  ;;  %v2773_v38 = vmax.f32 %v5077_v50, 0.0  ;;  %v2774_v11 = vmax.f32 %v5079_v43, 0.0  ;;  %v2775_v21 = vmax.f32 %v5081_v17, 0.0 }
 0x24e   : > { %2792 = vst [vmem:[%s5096_s8 + $0x40] sm:$0xff] %v2760_v7  ;;  %2793 = vst [vmem:[%s5096_s8 + $0x48] sm:$0xff] %v2761_v4  ;;  %v2776_v40 = vmax.f32 %v5083_v34, 0.0  ;;  %v2777_v63 = vmax.f32 %v5085_v32, 0.0  ;;  %v2778_v25 = vmax.f32 %v5087_v55, 0.0  ;;  %v2779_v23 = vmax.f32 %v5089_v46, 0.0 }
 0x24f   : > { %2794 = vst [vmem:[%s5096_s8 + $0x50] sm:$0xff] %v2762_v27  ;;  %2795 = vst [vmem:[%s5096_s8 + $0x58] sm:$0xff] %v2763_v36  ;;  %v2780_v45 = vmax.f32 %v5098_v51, 0.0  ;;  %v2781_v54 = vmax.f32 %v5100_v1, 0.0  ;;  %v2782_v33 = vmax.f32 %v5102_v18, 0.0  ;;  %v2783_v24 = vmax.f32 %v5104_v19, 0.0 }
 0x250   : > { %2796 = vst [vmem:[%s5096_s8 + $0x60] sm:$0xff] %v2764_v58  ;;  %2797 = vst [vmem:[%s5096_s8 + $0x68] sm:$0xff] %v2765_v15 }
 0x251   : > { %2798 = vst [vmem:[%s5096_s8 + $0x70] sm:$0xff] %v2766_v44  ;;  %2799 = vst [vmem:[%s5096_s8 + $0x78] sm:$0xff] %v2767_v41 }
 0x252   : > { %2800 = vst [vmem:[%s5096_s8 + $0x80] sm:$0xff] %v2768_v48  ;;  %2801 = vst [vmem:[%s5096_s8 + $0x88] sm:$0xff] %v2769_v30 }
 0x253   : > { %2802 = vst [vmem:[%s5096_s8 + $0x90] sm:$0xff] %v2770_v13  ;;  %2803 = vst [vmem:[%s5096_s8 + $0x98] sm:$0xff] %v2771_v12 }
 0x254   : > { %2804 = vst [vmem:[%s5096_s8 + $0xa0] sm:$0xff] %v2772_v8  ;;  %2805 = vst [vmem:[%s5096_s8 + $0xa8] sm:$0xff] %v2773_v38 }
 0x255   : > { %2806 = vst [vmem:[%s5096_s8 + $0xb0] sm:$0xff] %v2774_v11  ;;  %2807 = vst [vmem:[%s5096_s8 + $0xb8] sm:$0xff] %v2775_v21 }
 0x256   : > { %2808 = vst [vmem:[%s5096_s8 + $0xc0] sm:$0xff] %v2776_v40  ;;  %2809 = vst [vmem:[%s5096_s8 + $0xc8] sm:$0xff] %v2777_v63 }
 0x257   : > { %2810 = vst [vmem:[%s5096_s8 + $0xd0] sm:$0xff] %v2778_v25  ;;  %2811 = vst [vmem:[%s5096_s8 + $0xd8] sm:$0xff] %v2779_v23 }
 0x258   : > { %2812 = vst [vmem:[%s5096_s8 + $0xe0] sm:$0xff] %v2780_v45  ;;  %2813 = vst [vmem:[%s5096_s8 + $0xe8] sm:$0xff] %v2781_v54 }
 0x259   : > { %2814 = vst [vmem:[%s5096_s8 + $0xf0] sm:$0xff] %v2782_v33  ;;  %2815 = vst [vmem:[%s5096_s8 + $0xf8] sm:$0xff] %v2783_v24 }
 0x25a PF: > { %s14_s15 = sadd.s32 1, %s3947_s15  }
 0x25b   : > { %p11_p4 = scmp.ge.s32.totalorder %s14_s15, 4  }
 0x25d   :  { %13 = sbr.rel (!%p11_p4) target bundleno = 1 (0x1), region = 69 }

// kernel: forward.16
= control target key start
LH: loop header
LB: loop body
LE: loop exit
PB: predicated region body
PF: predicated region fallthrough
CT: control target
= control target key end

     0   :  { %s1934_s12 = smov 0   ;;  %s2289_s0 = inlined_call_operand.vmem [shape: bf16[128,1152], index: 0, kind: input, shape index: {}]   ;;  %s2290_s1 = inlined_call_operand.vmem [shape: bf16[1152,128], index: 1, kind: input, shape index: {}]   ;;  %s2291_s2 = inlined_call_operand.vmem [shape: f32[1,128], index: 2, kind: input, shape index: {}]   ;;  %s2292_s3 = inlined_call_operand.vmem [shape: f32[128,128], index: 3, kind: output, shape index: {}]  }
   0x1 LB: > { %s1439_s13 = sadd.s32 4294967295, %s1912_s12   ;;  %p1443_p0 = scmp.ge.s32.totalorder %s1912_s12, 1  ;;  %s1912_s12 = sphi %s1934_s12, %s13_s12  }
   0x2   : > { %p139_p1 = scmp.lt.s32.totalorder %s1912_s12, 3 }
   0x4   : > { %p140_p2 = pnand %p1443_p0, %p139_p1 }
   0x6   : > { %143 = sbr.rel (%p140_p2) target bundleno = 369 (0x171), region = 32 }
   0xb   : > { %v1780_v0 = vld [vmem:[%s2290_s1 + $0x78] sm:$0xff]   ;;  %v1784_v4 = vld [vmem:[%s2290_s1 + $0x70] sm:$0xff]   ;;  %v1788_v8 = vld [vmem:[%s2290_s1 + $0x68] sm:$0xff]   ;;  %s1444_s19 = sshll.u32 %s1439_s13, 3 }
   0xc   : > { %v1781_v1 = vld [vmem:[%s2290_s1 + $0xf8] sm:$0xff]   ;;  %1559 = vmatprep.subr.bf16.mxu0 %v1780_v0  ;;  %v1785_v5 = vld [vmem:[%s2290_s1 + $0xf0] sm:$0xff]   ;;  %v1789_v9 = vld [vmem:[%s2290_s1 + $0xe8] sm:$0xff]   ;;  %p165_p3 = scmp.lt.s32.totalorder %s1444_s19, 15 }
   0xd   : > { %v1782_v2 = vld [vmem:[%s2290_s1 + $0x38] sm:$0xff]   ;;  %1599 = vmatprep.subr.bf16.mxu1 %v1781_v1  ;;  %v1786_v6 = vld [vmem:[%s2290_s1 + $0x30] sm:$0xff]   ;;  %v1790_v10 = vld [vmem:[%s2290_s1 + $0x28] sm:$0xff]  }
   0xe   : > { %v1783_v3 = vld [vmem:[%s2290_s1 + $0xb8] sm:$0xff]   ;;  %1560 = vmatpush3.bf16.msra.mxu0 %v1782_v2  ;;  %v1787_v7 = vld [vmem:[%s2290_s1 + $0xb0] sm:$0xff]   ;;  %v1791_v11 = vld [vmem:[%s2290_s1 + $0xa8] sm:$0xff]   ;;  %s2314_s19 = smov (!%p165_p3, %s1444_s19), 15 }
   0xf   : > { %1600 = vmatpush3.bf16.msra.mxu1 %v1783_v3  ;;  %1561 = vmatprep.subr.bf16.mxu0 %v1784_v4  ;;  %v1792_v12 = vld [vmem:[%s2290_s1 + $0x60] sm:$0xff]   ;;  %v1796_v16 = vld [vmem:[%s2290_s1 + $0x58] sm:$0xff]   ;;  %v1800_v20 = vld [vmem:[%s2290_s1 + $0x50] sm:$0xff]   ;;  %s1771_s16 = smul.u32 36, %s2314_s19 }
  0x10   : > { %1601 = vmatprep.subr.bf16.mxu1 %v1785_v5  ;;  %v1793_v13 = vld [vmem:[%s2290_s1 + $0xe0] sm:$0xff]   ;;  %v1797_v17 = vld [vmem:[%s2290_s1 + $0xd8] sm:$0xff]   ;;  %v1801_v21 = vld [vmem:[%s2290_s1 + $0xd0] sm:$0xff]  }
  0x11   : > { %v1794_v14 = vld [vmem:[%s2290_s1 + $0x20] sm:$0xff]   ;;  %v1798_v18 = vld [vmem:[%s2290_s1 + $0x18] sm:$0xff]   ;;  %v1802_v22 = vld [vmem:[%s2290_s1 + $0x10] sm:$0xff]   ;;  %s2040_s13 = scalar_lea.vmem %s2289_s0, %s1771_s16  ;;  %s1447_s16 = sshll.u32 %s2314_s19, 3 }
  0x12   : > { %1562 = vmatpush3.bf16.msra.mxu0 %v1786_v6  ;;  %v1795_v15 = vld [vmem:[%s2290_s1 + $0xa0] sm:$0xff]   ;;  %v1799_v19 = vld [vmem:[%s2290_s1 + $0x98] sm:$0xff]   ;;  %v1803_v23 = vld [vmem:[%s2290_s1 + $0x90] sm:$0xff]   ;;  %s175_s19 = scalar_lea.vmem %s2292_s3, %s1447_s16 }
  0x13   : > { %1602 = vmatpush3.bf16.msra.mxu1 %v1787_v7  ;;  %1563 = vmatprep.subr.bf16.mxu0 %v1788_v8  ;;  %v1804_v24 = vld [vmem:[%s2290_s1 + $0x48] sm:$0xff]   ;;  %v1808_v28 = vld [vmem:[%s2290_s1 + $0x40] sm:$0xff]   ;;  %v1818_v36 = vld [vmem:[%s2290_s1 + $0x178] sm:$0xff]  }
  0x14   : > { %1603 = vmatprep.subr.bf16.mxu1 %v1789_v9  ;;  %v1805_v25 = vld [vmem:[%s2290_s1 + $0xc8] sm:$0xff]   ;;  %v1809_v29 = vld [vmem:[%s2290_s1 + $0xc0] sm:$0xff]   ;;  %v1819_v37 = vld [vmem:[%s2290_s1 + $0x1f8] sm:$0xff]  }
  0x15   : > { %v1806_v26 = vld [vmem:[%s2290_s1 + $0x8] sm:$0xff]   ;;  %v1810_v30 = vld [vmem:[%s2290_s1] sm:$0xff]   ;;  %v1820_v38 = vld [vmem:[%s2290_s1 + $0x138] sm:$0xff]  }
  0x16   : > { %1564 = vmatpush3.bf16.msra.mxu0 %v1790_v10  ;;  %v1807_v27 = vld [vmem:[%s2290_s1 + $0x88] sm:$0xff]   ;;  %v1811_v31 = vld [vmem:[%s2290_s1 + $0x80] sm:$0xff]   ;;  %v1821_v39 = vld [vmem:[%s2290_s1 + $0x1b8] sm:$0xff]  }
  0x17   : > { %1604 = vmatpush3.bf16.msra.mxu1 %v1791_v11  ;;  %1565 = vmatprep.subr.bf16.mxu0 %v1792_v12  ;;  %v1812_v32 = vld [vmem:[%s2040_s13] ss:$36 sps:$4 sm:$0xff]   ;;  %v1815_v34 = vld [vmem:[%s2040_s13 + $0x8] ss:$36 sps:$4 sm:$0xff]   ;;  %v1822_v40 = vld [vmem:[%s2290_s1 + $0x170] sm:$0xff]  }
  0x18   : > { %1605 = vmatprep.subr.bf16.mxu1 %v1793_v13  ;;  %v1814_v33 = vld [vmem:[%s2040_s13 + $0x4] ss:$36 sps:$4 sm:$0xff]   ;;  %v1817_v35 = vld [vmem:[%s2040_s13 + $0xc] ss:$36 sps:$4 sm:$0xff]   ;;  %v1828_v45 = vld [vmem:[%s2040_s13 + $0x54] ss:$36 sps:$4 sm:$0xff]  }
  0x19   : > { %1017 = vmatprep.mubr.bf16.mxu0 %v1814_v33  ;;  %1082 = vmatprep.mubr.bf16.mxu1 %v1817_v35  ;;  %v1823_v41 = vld [vmem:[%s2290_s1 + $0x1f0] sm:$0xff]   ;;  %v1830_v46 = vld [vmem:[%s2040_s13 + $0x48] ss:$36 sps:$4 sm:$0xff]   ;;  %v1836_v52 = vld [vmem:[%s2290_s1 + $0x160] sm:$0xff]  }
  0x1a   : > { %1566 = vmatpush3.bf16.msra.mxu0 %v1794_v14  ;;  %v1824_v42 = vld [vmem:[%s2290_s1 + $0x130] sm:$0xff]   ;;  %v1832_v48 = vld [vmem:[%s2290_s1 + $0x168] sm:$0xff]   ;;  %v1837_v53 = vld [vmem:[%s2290_s1 + $0x1e0] sm:$0xff]  }
  0x1b   : > { %1606 = vmatpush3.bf16.msra.mxu1 %v1795_v15  ;;  %1567 = vmatprep.subr.bf16.mxu0 %v1796_v16  ;;  %v1825_v43 = vld [vmem:[%s2290_s1 + $0x1b0] sm:$0xff]   ;;  %v1833_v49 = vld [vmem:[%s2290_s1 + $0x1e8] sm:$0xff]   ;;  %v1838_v54 = vld [vmem:[%s2290_s1 + $0x120] sm:$0xff]  }
  0x1c   : > { %1607 = vmatprep.subr.bf16.mxu1 %v1797_v17  ;;  %v1826_v44 = vld [vmem:[%s2040_s13 + $0x4c] ss:$36 sps:$4 sm:$0xff]   ;;  %v1839_v55 = vld [vmem:[%s2290_s1 + $0x1a0] sm:$0xff]   ;;  %v1840_v56 = vld [vmem:[%s2040_s13 + $0x94] ss:$36 sps:$4 sm:$0xff]  }
  0x1d   : > { %v1831_v47 = vld [vmem:[%s2040_s13 + $0x50] ss:$36 sps:$4 sm:$0xff]   ;;  %v1834_v50 = vld [vmem:[%s2290_s1 + $0x128] sm:$0xff]   ;;  %v1842_v57 = vld [vmem:[%s2040_s13 + $0x9c] ss:$36 sps:$4 sm:$0xff]  }
  0x1e   : > { %1568 = vmatpush3.bf16.msra.mxu0 %v1798_v18  ;;  %v1835_v51 = vld [vmem:[%s2290_s1 + $0x1a8] sm:$0xff]   ;;  %v1844_v58 = vld [vmem:[%s2040_s13 + $0x90] ss:$36 sps:$4 sm:$0xff]   ;;  %v1845_v59 = vld [vmem:[%s2040_s13 + $0x98] ss:$36 sps:$4 sm:$0xff]  }
  0x1f   : > { %1608 = vmatpush3.bf16.msra.mxu1 %v1799_v19  ;;  %1569 = vmatprep.subr.bf16.mxu0 %v1800_v20  ;;  %v1846_v60 = vld [vmem:[%s2290_s1 + $0x158] sm:$0xff]   ;;  %v1850_v0 = vld [vmem:[%s2290_s1 + $0x150] sm:$0xff]   ;;  %v1856_v5 = vld [vmem:[%s2040_s13 + $0xe4] ss:$36 sps:$4 sm:$0xff]  }
  0x20   : > { %1609 = vmatprep.subr.bf16.mxu1 %v1801_v21  ;;  %v1847_v61 = vld [vmem:[%s2290_s1 + $0x1d8] sm:$0xff]   ;;  %v1851_v1 = vld [vmem:[%s2290_s1 + $0x1d0] sm:$0xff]   ;;  %v1859_v7 = vld [vmem:[%s2040_s13 + $0xe0] ss:$36 sps:$4 sm:$0xff]  }
  0x21   : > { %v1848_v62 = vld [vmem:[%s2290_s1 + $0x118] sm:$0xff]   ;;  %v1852_v2 = vld [vmem:[%s2290_s1 + $0x110] sm:$0xff]   ;;  %v1860_v8 = vld [vmem:[%s2290_s1 + $0x148] sm:$0xff]  }
  0x22   : > { %1570 = vmatpush3.bf16.msra.mxu0 %v1802_v22  ;;  %v1849_v63 = vld [vmem:[%s2290_s1 + $0x198] sm:$0xff]   ;;  %v1853_v3 = vld [vmem:[%s2290_s1 + $0x190] sm:$0xff]   ;;  %v1861_v9 = vld [vmem:[%s2290_s1 + $0x1c8] sm:$0xff]  }
  0x23   : > { %1610 = vmatpush3.bf16.msra.mxu1 %v1803_v23  ;;  %1571 = vmatprep.subr.bf16.mxu0 %v1804_v24  ;;  %v1854_v4 = vld [vmem:[%s2040_s13 + $0xdc] ss:$36 sps:$4 sm:$0xff]   ;;  %v1862_v10 = vld [vmem:[%s2290_s1 + $0x108] sm:$0xff]   ;;  %v1868_v16 = vld [vmem:[%s2040_s13 + $0x10] ss:$36 sps:$4 sm:$0xff]  }
  0x24   : > { %1611 = vmatprep.subr.bf16.mxu1 %v1805_v25  ;;  %v1858_v6 = vld [vmem:[%s2040_s13 + $0xd8] ss:$36 sps:$4 sm:$0xff]   ;;  %v1863_v11 = vld [vmem:[%s2290_s1 + $0x188] sm:$0xff]   ;;  %v1864_v12 = vld [vmem:[%s2290_s1 + $0x140] sm:$0xff]  }
  0x25   : > { %v1865_v13 = vld [vmem:[%s2290_s1 + $0x1c0] sm:$0xff]   ;;  %v1870_v17 = vld [vmem:[%s2040_s13 + $0x14] ss:$36 sps:$4 sm:$0xff]   ;;  %v1892_v33 = vld [vmem:[%s2040_s13 + $0xec] ss:$36 sps:$4 sm:$0xff]  }
  0x26   : > { %1572 = vmatpush3.bf16.msra.mxu0 %v1806_v26  ;;  %v1866_v14 = vld [vmem:[%s2290_s1 + $0x100] sm:$0xff]   ;;  %v1871_v18 = vld [vmem:[%s2040_s13 + $0x18] ss:$36 sps:$4 sm:$0xff]   ;;  %v1875_v21 = vld [vmem:[%s2290_s1 + $0x230] sm:$0xff]  }
  0x27   : > { %1612 = vmatpush3.bf16.msra.mxu1 %v1807_v27  ;;  %1573 = vmatprep.subr.bf16.mxu0 %v1808_v28  ;;  %v1867_v15 = vld [vmem:[%s2290_s1 + $0x180] sm:$0xff]   ;;  %v1874_v20 = vld [vmem:[%s2290_s1 + $0x238] sm:$0xff]   ;;  %v1882_v26 = vld [vmem:[%s2290_s1 + $0x228] sm:$0xff]  }
  0x28   : > { %1613 = vmatprep.subr.bf16.mxu1 %v1809_v29  ;;  %v1873_v19 = vld [vmem:[%s2040_s13 + $0x1c] ss:$36 sps:$4 sm:$0xff]   ;;  %v1878_v23 = vld [vmem:[%s2040_s13 + $0x64] ss:$36 sps:$4 sm:$0xff]   ;;  %v1886_v28 = vld [vmem:[%s2040_s13 + $0xac] ss:$36 sps:$4 sm:$0xff]  }
  0x29   : > { %v1876_v22 = vld [vmem:[%s2040_s13 + $0x5c] ss:$36 sps:$4 sm:$0xff]   ;;  %v1884_v27 = vld [vmem:[%s2040_s13 + $0xa4] ss:$36 sps:$4 sm:$0xff]   ;;  %v1891_v35 = vld [vmem:[%s2290_s1 + $0x210] sm:$0xff]  }
  0x2a   : > { %1574 = vmatpush3.bf16.msra.mxu0 %v1810_v30  ;;  %v1880_v24 = vld [vmem:[%s2040_s13 + $0x58] ss:$36 sps:$4 sm:$0xff]   ;;  %v1881_v25 = vld [vmem:[%s2040_s13 + $0x60] ss:$36 sps:$4 sm:$0xff]  }
  0x2b   : > { %1614 = vmatpush3.bf16.msra.mxu1 %v1811_v31  ;;  %1639 = vmatprep.subr.bf16.mxu0 %v1818_v36  ;;  %v1883_v29 = vld [vmem:[%s2290_s1 + $0x220] sm:$0xff]   ;;  %v1889_v31 = vld [vmem:[%s2040_s13 + $0xa8] ss:$36 sps:$4 sm:$0xff]  }
  0x2c   : > { %1679 = vmatprep.subr.bf16.mxu1 %v1819_v37  ;;  %v1888_v30 = vld [vmem:[%s2040_s13 + $0xa0] ss:$36 sps:$4 sm:$0xff]   ;;  %v1896_v36 = vld [vmem:[%s2040_s13 + $0xe8] ss:$36 sps:$4 sm:$0xff]  }
  0x2d   : > { %1018 = vmatmul.mubr.bf16.vlgmr.msra.gmra.mxu0 %v1812_v32  ;;  %v1890_v32 = vld [vmem:[%s2290_s1 + $0x218] sm:$0xff]   ;;  %v1898_v37 = vld [vmem:[%s2290_s1 + $0x208] sm:$0xff]  }
  0x2e   : > { %1083 = vmatmul.mubr.bf16.vlgmr.msra.gmra.mxu1 %v1815_v34  ;;  %1640 = vmatpush3.bf16.msra.mxu0 %v1820_v38  ;;  %v1894_v34 = vld [vmem:[%s2040_s13 + $0xf4] ss:$36 sps:$4 sm:$0xff]  }
  0x2f   : > { %1680 = vmatpush3.bf16.msra.mxu1 %v1821_v39  ;;  %1641 = vmatprep.subr.bf16.mxu0 %v1822_v40  ;;  %v1897_v38 = vld [vmem:[%s2040_s13 + $0xf0] ss:$36 sps:$4 sm:$0xff]   ;;  %v1900_v39 = vld [vmem:[%s2040_s13 + $0x20] ss:$36 sps:$4 sm:$0xff]  }
  0x30   : > { %1681 = vmatprep.subr.bf16.mxu1 %v1823_v41  ;;  %1025 = vmatprep.mubr.bf16.mxu0 %v1826_v44  ;;  %v1901_v40 = vld [vmem:[%s2040_s13 + $0xb0] ss:$36 sps:$4 sm:$0xff]   ;;  %v1899_v41 = vld [vmem:[%s2290_s1 + $0x200] sm:$0xff]  }
  0x31   : > { %1090 = vmatprep.mubr.bf16.mxu1 %v1828_v45 }
  0x32   : > { %1642 = vmatpush3.bf16.msra.mxu0 %v1824_v42  ;;  %v1902_v42 = vld [vmem:[%s2040_s13 + $0x68] ss:$36 sps:$4 sm:$0xff]  }
  0x33   : > { %1682 = vmatpush3.bf16.msra.mxu1 %v1825_v43  ;;  %1643 = vmatprep.subr.bf16.mxu0 %v1832_v48  ;;  %v1903_v43 = vld [vmem:[%s2040_s13 + $0xf8] ss:$36 sps:$4 sm:$0xff]  }
  0x34   : > { %1683 = vmatprep.subr.bf16.mxu1 %v1833_v49 }
  0x35   : > { %1026 = vmatmul.mubr.bf16.gmra.mxu0 %v1830_v46 }
  0x36   : > { %1091 = vmatmul.mubr.bf16.gmra.mxu1 %v1831_v47  ;;  %1644 = vmatpush3.bf16.msra.mxu0 %v1834_v50 }
  0x37   : > { %1684 = vmatpush3.bf16.msra.mxu1 %v1835_v51  ;;  %1645 = vmatprep.subr.bf16.mxu0 %v1836_v52 }
  0x38   : > { %1685 = vmatprep.subr.bf16.mxu1 %v1837_v53  ;;  %1033 = vmatprep.mubr.bf16.mxu0 %v1840_v56 }
  0x39   : > { %1098 = vmatprep.mubr.bf16.mxu1 %v1842_v57 }
  0x3a   : > { %1646 = vmatpush3.bf16.msra.mxu0 %v1838_v54 }
  0x3b   : > { %1686 = vmatpush3.bf16.msra.mxu1 %v1839_v55  ;;  %1647 = vmatprep.subr.bf16.mxu0 %v1846_v60 }
  0x3c   : > { %1687 = vmatprep.subr.bf16.mxu1 %v1847_v61 }
  0x3d   : > { %1034 = vmatmul.mubr.bf16.gmra.mxu0 %v1844_v58 }
  0x3e   : > { %1099 = vmatmul.mubr.bf16.gmra.mxu1 %v1845_v59  ;;  %1648 = vmatpush3.bf16.msra.mxu0 %v1848_v62 }
  0x3f   : > { %1688 = vmatpush3.bf16.msra.mxu1 %v1849_v63  ;;  %1649 = vmatprep.subr.bf16.mxu0 %v1850_v0 }
  0x40   : > { %1689 = vmatprep.subr.bf16.mxu1 %v1851_v1  ;;  %1041 = vmatprep.mubr.bf16.mxu0 %v1854_v4 }
  0x41   : > { %1106 = vmatprep.mubr.bf16.mxu1 %v1856_v5 }
  0x42   : > { %1650 = vmatpush3.bf16.msra.mxu0 %v1852_v2 }
  0x43   : > { %1690 = vmatpush3.bf16.msra.mxu1 %v1853_v3  ;;  %1651 = vmatprep.subr.bf16.mxu0 %v1860_v8 }
  0x44   : > { %1691 = vmatprep.subr.bf16.mxu1 %v1861_v9 }
  0x45   : > { %1042 = vmatmul.mubr.bf16.gmra.mxu0 %v1858_v6 }
  0x46   : > { %1107 = vmatmul.mubr.bf16.gmra.mxu1 %v1859_v7  ;;  %1652 = vmatpush3.bf16.msra.mxu0 %v1862_v10 }
  0x47   : > { %1692 = vmatpush3.bf16.msra.mxu1 %v1863_v11  ;;  %1653 = vmatprep.subr.bf16.mxu0 %v1864_v12 }
  0x48   : > { %1693 = vmatprep.subr.bf16.mxu1 %v1865_v13  ;;  %1147 = vmatprep.mubr.bf16.mxu0 %v1870_v17 }
  0x49   : > { %1212 = vmatprep.mubr.bf16.mxu1 %v1873_v19 }
  0x4a   : > { %1654 = vmatpush3.bf16.msra.mxu0 %v1866_v14 }
  0x4b   : > { %1694 = vmatpush3.bf16.msra.mxu1 %v1867_v15  ;;  %1731 = vmatprep.subr.bf16.mxu0 %v1874_v20 }
  0x4c   : > { %1755 = vmatprep.subr.bf16.mxu1 %v1874_v20 }
  0x4d   : > { %1148 = vmatmul.mubr.bf16.vlgmr.msra.gmra.mxu0 %v1868_v16 }
  0x4e   : > { %1213 = vmatmul.mubr.bf16.vlgmr.msra.gmra.mxu1 %v1871_v18  ;;  %1732 = vmatpush3.bf16.msra.mxu0 %v1874_v20 }
  0x4f   : > { %1763 = vmatpush3.bf16.msra.mxu1 %v1874_v20  ;;  %1733 = vmatprep.subr.bf16.mxu0 %v1875_v21 }
  0x50   : > { %1756 = vmatprep.subr.bf16.mxu1 %v1875_v21  ;;  %1155 = vmatprep.mubr.bf16.mxu0 %v1876_v22 }
  0x51   : > { %1220 = vmatprep.mubr.bf16.mxu1 %v1878_v23 }
  0x52   : > { %1734 = vmatpush3.bf16.msra.mxu0 %v1875_v21 }
  0x53   : > { %1764 = vmatpush3.bf16.msra.mxu1 %v1875_v21  ;;  %1735 = vmatprep.subr.bf16.mxu0 %v1882_v26 }
  0x54   : > { %1757 = vmatprep.subr.bf16.mxu1 %v1882_v26 }
  0x55   : > { %1156 = vmatmul.mubr.bf16.gmra.mxu0 %v1880_v24 }
  0x56   : > { %1221 = vmatmul.mubr.bf16.gmra.mxu1 %v1881_v25  ;;  %1163 = vmatprep.mubr.bf16.mxu0 %v1884_v27 }
  0x57   : > { %1736 = vmatpush3.bf16.msra.mxu0 %v1882_v26  ;;  %1228 = vmatprep.mubr.bf16.mxu1 %v1886_v28 }
  0x58   : > { %1765 = vmatpush3.bf16.msra.mxu1 %v1882_v26  ;;  %1737 = vmatprep.subr.bf16.mxu0 %v1883_v29 }
  0x59   : > { %1758 = vmatprep.subr.bf16.mxu1 %v1883_v29 }
  0x5b   : > { %1738 = vmatpush3.bf16.msra.mxu0 %v1883_v29 }
  0x5c   : > { %1766 = vmatpush3.bf16.msra.mxu1 %v1883_v29  ;;  %1739 = vmatprep.subr.bf16.mxu0 %v1890_v32 }
  0x5d   : > { %1164 = vmatmul.mubr.bf16.gmra.mxu0 %v1888_v30  ;;  %1759 = vmatprep.subr.bf16.mxu1 %v1890_v32 }
  0x5e   : > { %1229 = vmatmul.mubr.bf16.gmra.mxu1 %v1889_v31  ;;  %1171 = vmatprep.mubr.bf16.mxu0 %v1892_v33 }
  0x5f   : > { %1740 = vmatpush3.bf16.msra.mxu0 %v1890_v32  ;;  %1236 = vmatprep.mubr.bf16.mxu1 %v1894_v34 }
  0x60   : > { %1767 = vmatpush3.bf16.msra.mxu1 %v1890_v32  ;;  %1741 = vmatprep.subr.bf16.mxu0 %v1891_v35 }
  0x61   : > { %1760 = vmatprep.subr.bf16.mxu1 %v1891_v35 }
  0x63   : > { %1742 = vmatpush3.bf16.msra.mxu0 %v1891_v35 }
  0x64   : > { %1768 = vmatpush3.bf16.msra.mxu1 %v1891_v35  ;;  %1743 = vmatprep.subr.bf16.mxu0 %v1898_v37 }
  0x65   : > { %1172 = vmatmul.mubr.bf16.gmra.mxu0 %v1896_v36  ;;  %1761 = vmatprep.subr.bf16.mxu1 %v1898_v37 }
  0x66   : > { %1237 = vmatmul.mubr.bf16.gmra.mxu1 %v1897_v38  ;;  %1747 = vmatprep.mubr.bf16.mxu0 %v1900_v39 }
  0x67   : > { %1744 = vmatpush3.bf16.msra.mxu0 %v1898_v37  ;;  %1751 = vmatprep.mubr.bf16.mxu1 %v1901_v40 }
  0x68   : > { %1769 = vmatpush3.bf16.msra.mxu1 %v1898_v37  ;;  %1745 = vmatprep.subr.bf16.mxu0 %v1899_v41  ;;  %v1448_v37 = vld [vmem:[%s2291_s2] ss:$0 sm:$0xff] }
  0x69   : > { %1762 = vmatprep.subr.bf16.mxu1 %v1899_v41 }
  0x6b   : > { %1746 = vmatpush3.bf16.msra.mxu0 %v1899_v41 }
  0x6c   : > { %1770 = vmatpush3.bf16.msra.mxu1 %v1899_v41 }
  0x6e   : > { %1748 = vmatmul.mubr.bf16.vlgmr.msra.gmra.mxu0 %v1902_v42 }
  0x6f   : > { %1752 = vmatmul.mubr.bf16.vlgmr.msra.gmra.mxu1 %v1903_v43 }
  0xed   : > { %v1575_v44 = vpop.f32.mrf.mxu0 }
  0xee   : > { %v1615_v45 = vpop.f32.mrf.mxu1 }
  0xef   : > { %v1576_v46 = vpop.f32.mrf.mxu0 }
  0xf0   : > { %v1616_v47 = vpop.f32.mrf.mxu1  ;;  %v1577_v33 = vadd.f32 %v1576_v46, %v1575_v44 }
  0xf1   : > { %v1578_v48 = vpop.f32.mrf.mxu0  ;;  %v1617_v43 = vadd.f32 %v1616_v47, %v1615_v45 }
  0xf2   : > { %v1618_v49 = vpop.f32.mrf.mxu1  ;;  %v1020_v42 = vadd.f32 %v1577_v33, %v1448_v37 }
  0xf3   : > { %v1579_v50 = vpop.f32.mrf.mxu0 }
  0xf4   : > { %v1619_v51 = vpop.f32.mrf.mxu1  ;;  %v1580_v34 = vadd.f32 %v1579_v50, %v1578_v48 }
  0xf5   : > { %v1581_v52 = vpop.f32.mrf.mxu0 }
  0xf6   : > { %v1621_v53 = vpop.f32.mrf.mxu1 }
  0xf7   : > { %v1582_v54 = vpop.f32.mrf.mxu0 }
  0xf8   : > { %v1622_v55 = vpop.f32.mrf.mxu1  ;;  %v1583_v38 = vadd.f32 %v1582_v54, %v1581_v52  ;;  %v1085_v52 = vadd.f32 %v1617_v43, %v1020_v42 }
  0xf9   : > { %v1584_v56 = vpop.f32.mrf.mxu0  ;;  %v1623_v46 = vadd.f32 %v1622_v55, %v1621_v53 }
  0xfa   : > { %v1624_v57 = vpop.f32.mrf.mxu1  ;;  %v1028_v44 = vadd.f32 %v1583_v38, %v1448_v37 }
  0xfb   : > { %v1585_v58 = vpop.f32.mrf.mxu0 }
  0xfc   : > { %v1625_v59 = vpop.f32.mrf.mxu1  ;;  %v1586_v39 = vadd.f32 %v1585_v58, %v1584_v56  ;;  %v1093_v45 = vadd.f32 %v1623_v46, %v1028_v44 }
  0xfd   : > { %v1587_v60 = vpop.f32.mrf.mxu0  ;;  %v1626_v50 = vadd.f32 %v1625_v59, %v1624_v57 }
  0xfe   : > { %v2204_v61 = vpop.f32.mrf.mxu1  ;;  %v1031_v48 = vadd.f32 %v1586_v39, %v1448_v37 }
  0xff   : > { %v1588_v62 = vpop.f32.mrf.mxu0 }
 0x100   : > { %v2206_v63 = vpop.f32.mrf.mxu1  ;;  %v1096_v47 = vadd.f32 %v1626_v50, %v1031_v48 }
 0x101   : > { %v1590_v0 = vpop.f32.mrf.mxu0  ;;  %v1629_v53 = vadd.f32 %v2206_v63, %v2204_v61 }
 0x102   : > { %v2208_v1 = vpop.f32.mrf.mxu1 }
 0x103   : > { %v1591_v2 = vpop.f32.mrf.mxu0 }
 0x104   : > { %v2210_v3 = vpop.f32.mrf.mxu1 }
 0x105   : > { %v1593_v4 = vpop.f32.mrf.mxu0  ;;  %v1632_v57 = vadd.f32 %v2210_v3, %v2208_v1 }
 0x106   : > { %v2212_v5 = vpop.f32.mrf.mxu1 }
 0x107   : > { %v1594_v6 = vpop.f32.mrf.mxu0 }
 0x108   : > { %v2214_v7 = vpop.f32.mrf.mxu1  ;;  %v1595_v56 = vadd.f32 %v1594_v6, %v1593_v4 }
 0x109   : > { %v1596_v8 = vpop.f32.mrf.mxu0 }
 0x10a   : > { %v2216_v9 = vpop.f32.mrf.mxu1  ;;  %v1044_v4 = vadd.f32 %v1595_v56, %v1448_v37 }
 0x10b   : > { %v1597_v10 = vpop.f32.mrf.mxu0 }
 0x10c   : > { %v2218_v11 = vpop.f32.mrf.mxu1  ;;  %v1598_v58 = vadd.f32 %v1597_v10, %v1596_v8 }
 0x10d   : > { %2293 = vst [vmem:[#allocation2_spill] sm:$0xff] %v2218_v11  ;;  %v1655_v12 = vpop.f32.mrf.mxu0 }
 0x10e   : > { %v1695_v13 = vpop.f32.mrf.mxu1  ;;  %v1047_v6 = vadd.f32 %v1598_v58, %v1448_v37 }
 0x10f   : > { %v1656_v14 = vpop.f32.mrf.mxu0 }
 0x110   : > { %v1696_v15 = vpop.f32.mrf.mxu1  ;;  %v1657_v11 = vadd.f32 %v1656_v14, %v1655_v12 }
 0x111   : > { %v1658_v16 = vpop.f32.mrf.mxu0 }
 0x112   : > { %v2220_v17 = vpop.f32.mrf.mxu1 }
 0x113   : > { %2294 = vst [vmem:[#allocation3_spill] sm:$0xff] %v2220_v17  ;;  %v1659_v18 = vpop.f32.mrf.mxu0 }
 0x114   : > { %v2222_v19 = vpop.f32.mrf.mxu1  ;;  %v2303_v8 = vld [vmem:[#allocation2_spill] sm:$0xff] }
 0x115   : > { %2295 = vst [vmem:[#allocation4_spill] sm:$0xff] %v2222_v19  ;;  %v1661_v20 = vpop.f32.mrf.mxu0  ;;  %v1638_v10 = vadd.f32 %v2303_v8, %v2216_v9 }
 0x116   : > { %v2224_v21 = vpop.f32.mrf.mxu1 }
 0x117   : > { %2296 = vst [vmem:[#allocation5_spill] sm:$0xff] %v2224_v21  ;;  %v1662_v22 = vpop.f32.mrf.mxu0  ;;  %v1592_v21 = vadd.f32 %v1591_v2, %v1590_v0  ;;  %v1697_v0 = vadd.f32 %v1696_v15, %v1695_v13 }
 0x118   : > { %v1702_v23 = vpop.f32.mrf.mxu1 }
 0x119   : > { %v1664_v24 = vpop.f32.mrf.mxu0  ;;  %v1039_v55 = vadd.f32 %v1592_v21, %v1448_v37 }
 0x11a   : > { %v2226_v25 = vpop.f32.mrf.mxu1  ;;  %v2304_v61 = vld [vmem:[#allocation3_spill] sm:$0xff] }
 0x11b   : > { %2297 = vst [vmem:[#allocation6_spill] sm:$0xff] %v2226_v25  ;;  %v1665_v26 = vpop.f32.mrf.mxu0  ;;  %v1104_v13 = vadd.f32 %v1632_v57, %v1039_v55 }
 0x11c   : > { %v2228_v27 = vpop.f32.mrf.mxu1  ;;  %v1666_v2 = vadd.f32 %v1665_v26, %v1664_v24  ;;  %v2305_v63 = vld [vmem:[#allocation4_spill] sm:$0xff] }
 0x11d   : > { %2298 = vst [vmem:[#allocation7_spill] sm:$0xff] %v2228_v27  ;;  %v1667_v28 = vpop.f32.mrf.mxu0  ;;  %v1620_v27 = vadd.f32 %v1619_v51, %v1618_v49  ;;  %v1660_v49 = vadd.f32 %v1659_v18, %v1658_v16  ;;  %v1663_v51 = vadd.f32 %v1662_v22, %v1661_v20  ;;  %v1700_v18 = vadd.f32 %v2305_v63, %v2304_v61 }
 0x11e   : > { %v2230_v29 = vpop.f32.mrf.mxu1  ;;  %v2306_v1 = vld [vmem:[#allocation5_spill] sm:$0xff]  ;;  %v1161_v15 = vadd.f32 %v1666_v2, %v1096_v47 }
 0x11f   : > { %2299 = vst [vmem:[#allocation8_spill] sm:$0xff] %v2230_v29  ;;  %v1668_v30 = vpop.f32.mrf.mxu0  ;;  %v1023_v29 = vadd.f32 %v1580_v34, %v1448_v37  ;;  %v1158_v20 = vadd.f32 %v1663_v51, %v1093_v45  ;;  %v1703_v3 = vadd.f32 %v1702_v23, %v2306_v1  ;;  %v1112_v23 = vadd.f32 %v1638_v10, %v1047_v6 }
 0x120   : > { %v2232_v31 = vpop.f32.mrf.mxu1  ;;  %v1669_v12 = vadd.f32 %v1668_v30, %v1667_v28 }
 0x121   : > { %2300 = vst [vmem:[#allocation9_spill] sm:$0xff] %v2232_v31  ;;  %v1670_v32 = vpop.f32.mrf.mxu0  ;;  %v1088_v54 = vadd.f32 %v1620_v27, %v1023_v29  ;;  %v1223_v43 = vadd.f32 %v1703_v3, %v1158_v20 }
 0x122   : > { %v2234_v35 = vpop.f32.mrf.mxu1  ;;  %v2307_v24 = vld [vmem:[#allocation6_spill] sm:$0xff] }
 0x123   : > { %2301 = vst [vmem:[#allocation10_spill] sm:$0xff] %v2234_v35  ;;  %v1671_v36 = vpop.f32.mrf.mxu0  ;;  %v1589_v35 = vadd.f32 %v1588_v62, %v1587_v60  ;;  %v1635_v60 = vadd.f32 %v2214_v7, %v2212_v5  ;;  %v1150_v62 = vadd.f32 %v1657_v11, %v1085_v52  ;;  %v1153_v16 = vadd.f32 %v1660_v49, %v1088_v54 }
 0x124   : > { %v2239_v40 = vpop.f32.mrf.mxu1  ;;  %v1672_v5 = vadd.f32 %v1671_v36, %v1670_v32  ;;  %v2308_v26 = vld [vmem:[#allocation7_spill] sm:$0xff] }
 0x125   : > { %2302 = vst [vmem:[#allocation11_spill] sm:$0xff] %v2239_v40  ;;  %v1673_v41 = vpop.f32.mrf.mxu0  ;;  %v1036_v34 = vadd.f32 %v1589_v35, %v1448_v37  ;;  %v1706_v27 = vadd.f32 %v2308_v26, %v2307_v24  ;;  %v1215_v9 = vadd.f32 %v1697_v0, %v1150_v62  ;;  %v1109_v29 = vadd.f32 %v1635_v60, %v1044_v4 }
 0x126   : > { %v1713_v31 = vpop.f32.mrf.mxu1  ;;  %v2309_v35 = vld [vmem:[#allocation8_spill] sm:$0xff]  ;;  %v1169_v32 = vadd.f32 %v1672_v5, %v1104_v13 }
 0x127   : > { %v1674_v25 = vpop.f32.mrf.mxu0  ;;  %v1101_v22 = vadd.f32 %v1629_v53, %v1036_v34  ;;  %v1226_v58 = vadd.f32 %v1706_v27, %v1161_v15 }
 0x128   : > { %v1714_v19 = vpop.f32.mrf.mxu1  ;;  %v1675_v7 = vadd.f32 %v1674_v25, %v1673_v41  ;;  %v2310_v37 = vld [vmem:[#allocation9_spill] sm:$0xff]  ;;  %v1218_v25 = vadd.f32 %v1700_v18, %v1153_v16 }
 0x129   : > { %v1676_v17 = vpop.f32.mrf.mxu0  ;;  %v1166_v30 = vadd.f32 %v1669_v12, %v1101_v22  ;;  %v1709_v38 = vadd.f32 %v2310_v37, %v2309_v35  ;;  %v1715_v50 = vadd.f32 %v1714_v19, %v1713_v31 }
 0x12a   : > { %v1716_v40 = vpop.f32.mrf.mxu1  ;;  %v2311_v36 = vld [vmem:[#allocation10_spill] sm:$0xff]  ;;  %v1174_v48 = vadd.f32 %v1675_v7, %v1109_v29 }
 0x12b   : > { %v1677_v33 = vpop.f32.mrf.mxu0  ;;  %v1231_v47 = vadd.f32 %v1709_v38, %v1166_v30 }
 0x12c   : > { %v1717_v59 = vpop.f32.mrf.mxu1  ;;  %v1678_v39 = vadd.f32 %v1677_v33, %v1676_v17  ;;  %v2312_v41 = vld [vmem:[#allocation11_spill] sm:$0xff]  ;;  %v1239_v31 = vadd.f32 %v1715_v50, %v1174_v48 }
 0x12d   : > { %v1712_v46 = vadd.f32 %v2312_v41, %v2311_v36  ;;  %v1718_v33 = vadd.f32 %v1717_v59, %v1716_v40 }
 0x12e   : > { %v1749_v14 = vpop.f32.mrf.mxu0  ;;  %v1177_v17 = vadd.f32 %v1678_v39, %v1112_v23 }
 0x12f   : > { %v1753_v21 = vpop.f32.mrf.mxu1  ;;  %v2260_v56 = vadd.f32 %v1749_v14, %v1223_v43  ;;  %v1234_v53 = vadd.f32 %v1712_v46, %v1169_v32 }
 0x130   : > { %v1279_v11 = vpop.f32.mrf.mxu0  ;;  %v1242_v62 = vadd.f32 %v1718_v33, %v1177_v17  ;;  %v1304_v8 = vadd.f32 %v1753_v21, %v1239_v31 }
 0x131   : > { %v1295_v28 = vpop.f32.mrf.mxu1  ;;  %v2256_v44 = vadd.f32 %v1279_v11, %v1215_v9  ;;  %v1326_v57 = vmul.f32 %v2260_v56, %v2260_v56 }
 0x132   : > { %v1750_v42 = vpop.f32.mrf.mxu0  ;;  %v1296_v60 = vadd.f32 %v1295_v28, %v1231_v47  ;;  %v1330_v20 = vmul.f32 %v1304_v8, %v1304_v8 }
 0x133   : > { %v1754_v52 = vpop.f32.mrf.mxu1  ;;  %v1324_v49 = vmul.f32 %v2256_v44, %v2256_v44  ;;  %v2266_v51 = vadd.f32 %v1750_v42, %v1226_v58 }
 0x134   : > { %v1282_v54 = vpop.f32.mrf.mxu0  ;;  %v1328_v10 = vmul.f32 %v1296_v60, %v1296_v60  ;;  %v1307_v16 = vadd.f32 %v1754_v52, %v1242_v62 }
 0x135   : > { %v2262_v45 = vadd.f32 %v1282_v54, %v1218_v25  ;;  %v1298_v55 = vpop.f32.mrf.mxu1  ;;  %v1327_v0 = vmul.f32 %v2266_v51, %v2266_v51 }
 0x136   : > { %v1299_v4 = vadd.f32 %v1298_v55, %v1234_v53  ;;  %v1331_v22 = vmul.f32 %v1307_v16, %v1307_v16 }
 0x137   : > { %v1310_v34 = vadd.f32 %v2262_v45, %v2256_v44  ;;  %v1325_v19 = vmul.f32 %v2262_v45, %v2262_v45 }
 0x138   : > { %v1329_v63 = vmul.f32 %v1299_v4, %v1299_v4 }
 0x139   : > { %v1311_v40 = vadd.f32 %v1310_v34, %v2260_v56  ;;  %v1332_v59 = vadd.f32 %v1325_v19, %v1324_v49 }
 0x13b   : > { %v1333_v2 = vadd.f32 %v1332_v59, %v1326_v57  ;;  %v1312_v6 = vadd.f32 %v1311_v40, %v2266_v51 }
 0x13d   : > { %v1313_v12 = vadd.f32 %v1312_v6, %v1296_v60  ;;  %v1334_v14 = vadd.f32 %v1333_v2, %v1327_v0 }
 0x13f   : > { %v1314_v61 = vadd.f32 %v1313_v12, %v1299_v4  ;;  %v1335_v18 = vadd.f32 %v1334_v14, %v1328_v10 }
 0x141   : > { %v1315_v1 = vadd.f32 %v1314_v61, %v1304_v8  ;;  %v1336_v3 = vadd.f32 %v1335_v18, %v1329_v63 }
 0x143   : > { %v1316_v5 = vadd.f32 %v1315_v1, %v1307_v16  ;;  %v1337_v7 = vadd.f32 %v1336_v3, %v1330_v20 }
 0x145   : > { %v1317_v11 = vrot.slane %v1316_v5, 4  ;;  %v1338_v13 = vadd.f32 %v1337_v7, %v1331_v22 }
 0x147   : > { %v1318_v15 = vadd.f32 %v1317_v11, %v1316_v5  ;;  %v1339_v24 = vrot.slane %v1338_v13, 4 }
 0x149   : > { %v1319_v26 = vrot.slane %v1318_v15, 2  ;;  %v1340_v21 = vadd.f32 %v1339_v24, %v1338_v13 }
 0x14b   : > { %v1320_v27 = vadd.f32 %v1319_v26, %v1318_v15  ;;  %v1341_v9 = vrot.slane %v1340_v21, 2 }
 0x14d   : > { %v1321_v28 = vrot.slane %v1320_v27, 1  ;;  %v1342_v29 = vadd.f32 %v1341_v9, %v1340_v21 }
 0x14f   : > { %v1322_v30 = vadd.f32 %v1321_v28, %v1320_v27  ;;  %v1343_v35 = vrot.slane %v1342_v29, 1 }
 0x151   : > { %v1323_v37 = vmul.f32 0.015625, %v1322_v30  ;;  %v1344_v38 = vadd.f32 %v1343_v35, %v1342_v29 }
 0x153   : > { %v1345_v39 = vmul.f32 0.015625, %v1344_v38  ;;  %v1346_v42 = vmul.f32 %v1323_v37, %v1323_v37  ;;  %v1349_v32 = vsub.f32 %v2256_v44, %v1323_v37  ;;  %v1350_v36 = vsub.f32 %v2262_v45, %v1323_v37 }
 0x154   : > { %v1351_v41 = vsub.f32 %v2260_v56, %v1323_v37  ;;  %v1352_v46 = vsub.f32 %v2266_v51, %v1323_v37  ;;  %v1353_v50 = vsub.f32 %v1296_v60, %v1323_v37  ;;  %v1354_v52 = vsub.f32 %v1299_v4, %v1323_v37 }
 0x155   : > { %v1347_v23 = vsub.f32 %v1345_v39, %v1346_v42  ;;  %v1355_v54 = vsub.f32 %v1304_v8, %v1323_v37  ;;  %v1356_v58 = vsub.f32 %v1307_v16, %v1323_v37 }
 0x157   : > { %v1348_v43 = vmax.f32 %v1347_v23, 0.0 }
 0x159   : > { %v1357_v25 = vadd.f32 1e-05, %v1348_v43 }
 0x15b   : > { %1904 = vrsqrt.f32 %v1357_v25 }
 0x168   : > { %v1905_v48 = vpop.eup %1904 }
 0x169   : > { %v1359_v17 = vmul.f32 %v1905_v48, %v1349_v32  ;;  %v1360_v33 = vmul.f32 %v1905_v48, %v1350_v36  ;;  %v1361_v47 = vmul.f32 %v1905_v48, %v1351_v41  ;;  %v1362_v49 = vmul.f32 %v1905_v48, %v1352_v46 }
 0x16a   : > { %v1363_v44 = vmul.f32 %v1905_v48, %v1353_v50  ;;  %v1364_v34 = vmul.f32 %v1905_v48, %v1354_v52  ;;  %v1365_v45 = vmul.f32 %v1905_v48, %v1355_v54  ;;  %v1366_v19 = vmul.f32 %v1905_v48, %v1356_v58 }
 0x16b   : > { %v1367_v56 = vmax.f32 %v1359_v17, 0.0  ;;  %v1368_v31 = vmax.f32 %v1360_v33, 0.0  ;;  %v1369_v51 = vmax.f32 %v1361_v47, 0.0  ;;  %v1370_v53 = vmax.f32 %v1362_v49, 0.0 }
 0x16c   : > { %v1371_v55 = vmax.f32 %v1363_v44, 0.0  ;;  %v1372_v57 = vmax.f32 %v1364_v34, 0.0  ;;  %v1373_v60 = vmax.f32 %v1365_v45, 0.0  ;;  %v1374_v40 = vmax.f32 %v1366_v19, 0.0 }
 0x16d   : > { %1375 = vst [vmem:[%s175_s19] sm:$0xff] %v1367_v56  ;;  %1376 = vst [vmem:[%s175_s19 + $0x8] sm:$0xff] %v1368_v31 }
 0x16e   : > { %1377 = vst [vmem:[%s175_s19 + $0x10] sm:$0xff] %v1369_v51  ;;  %1378 = vst [vmem:[%s175_s19 + $0x18] sm:$0xff] %v1370_v53 }
 0x16f   : > { %1379 = vst [vmem:[%s175_s19 + $0x20] sm:$0xff] %v1371_v55  ;;  %1380 = vst [vmem:[%s175_s19 + $0x28] sm:$0xff] %v1372_v57 }
 0x170   : > { %1381 = vst [vmem:[%s175_s19 + $0x30] sm:$0xff] %v1373_v60  ;;  %1382 = vst [vmem:[%s175_s19 + $0x38] sm:$0xff] %v1374_v40 }
 0x171 PF: > { %s13_s12 = sadd.s32 1, %s1912_s12  }
 0x172   : > { %p10_p4 = scmp.ge.s32.totalorder %s13_s12, 4  }
 0x174   :  { %12 = sbr.rel (!%p10_p4) target bundleno = 1 (0x1), region = 62 }

// kernel: forward.17
= control target key start
LH: loop header
LB: loop body
LE: loop exit
PB: predicated region body
PF: predicated region fallthrough
CT: control target
= control target key end

     0   :  { %s590_s12 = smov 0   ;;  %s656_s0 = inlined_call_operand.vmem [shape: bf16[128,128], index: 0, kind: input, shape index: {}]   ;;  %s657_s1 = inlined_call_operand.vmem [shape: bf16[128,128], index: 1, kind: input, shape index: {}]   ;;  %s658_s2 = inlined_call_operand.vmem [shape: f32[1,128], index: 2, kind: input, shape index: {}]   ;;  %s659_s3 = inlined_call_operand.vmem [shape: f32[128,128], index: 3, kind: output, shape index: {}]  }
   0x1 LB: > { %s464_s13 = sadd.s32 4294967295, %s568_s12   ;;  %p468_p0 = scmp.ge.s32.totalorder %s568_s12, 1  ;;  %s568_s12 = sphi %s590_s12, %s13_s12  }
   0x2   : > { %p138_p1 = scmp.lt.s32.totalorder %s568_s12, 3 }
   0x4   : > { %p139_p2 = pnand %p468_p0, %p138_p1 }
   0x5   : > { %s469_s16 = sshll.u32 (!%p139_p2), %s464_s13, 3 }
   0x6   : > { %142 = sbr.rel (%p139_p2) target bundleno = 301 (0x12d), region = 32  ;;  %p163_p3 = scmp.lt.s32.totalorder (!%p139_p2), %s469_s16, 15 }
   0xb   : > { %v548_v0 = vld [vmem:[%s657_s1 + $0x38] sm:$0xff]   ;;  %v549_v1 = vld [vmem:[%s657_s1 + $0x30] sm:$0xff]   ;;  %s661_s16 = smov (!%p163_p3, %s469_s16), 15  ;;  %v550_v2 = vld [vmem:[%s657_s1 + $0x28] sm:$0xff]  }
   0xc   : > { %500 = vmatprep.subr.bf16.mxu0 %v548_v0  ;;  %524 = vmatprep.subr.bf16.mxu1 %v548_v0  ;;  %s470_s21 = sshll.u32 %s661_s16, 2  ;;  %v551_v3 = vld [vmem:[%s657_s1 + $0x20] sm:$0xff]   ;;  %v552_v6 = vld [vmem:[%s657_s1 + $0x18] sm:$0xff]   ;;  %v553_v7 = vld [vmem:[%s657_s1 + $0x10] sm:$0xff]   ;;  %s472_s10 = sshll.u32 %s661_s16, 3 }
   0xd   : > { %501 = vmatpush3.bf16.msra.mxu0 %v548_v0  ;;  %532 = vmatpush3.bf16.msra.mxu1 %v548_v0  ;;  %s613_s24 = scalar_lea.vmem %s656_s0, %s470_s21  ;;  %v554_v8 = vld [vmem:[%s657_s1 + $0x8] sm:$0xff]   ;;  %v555_v9 = vld [vmem:[%s657_s1] sm:$0xff]   ;;  %s172_s14 = scalar_lea.vmem %s659_s3, %s472_s10 }
   0xe   : > { %502 = vmatprep.subr.bf16.mxu0 %v549_v1  ;;  %525 = vmatprep.subr.bf16.mxu1 %v549_v1  ;;  %v556_v4 = vld [vmem:[%s613_s24] sm:$0xff]   ;;  %v558_v5 = vld [vmem:[%s613_s24 + $0x10] sm:$0xff]   ;;  %v557_v10 = vld [vmem:[%s613_s24 + $0x8] sm:$0xff]  }
   0xf   : > { %516 = vmatprep.mubr.bf16.mxu0 %v556_v4  ;;  %520 = vmatprep.mubr.bf16.mxu1 %v558_v5  ;;  %v559_v11 = vld [vmem:[%s613_s24 + $0x18] sm:$0xff]   ;;  %v473_v16 = vld [vmem:[%s658_s2] ss:$0 sm:$0xff] }
  0x11   : > { %503 = vmatpush3.bf16.msra.mxu0 %v549_v1  ;;  %533 = vmatpush3.bf16.msra.mxu1 %v549_v1 }
  0x12   : > { %504 = vmatprep.subr.bf16.mxu0 %v550_v2  ;;  %526 = vmatprep.subr.bf16.mxu1 %v550_v2 }
  0x15   : > { %505 = vmatpush3.bf16.msra.mxu0 %v550_v2  ;;  %534 = vmatpush3.bf16.msra.mxu1 %v550_v2 }
  0x16   : > { %506 = vmatprep.subr.bf16.mxu0 %v551_v3  ;;  %527 = vmatprep.subr.bf16.mxu1 %v551_v3 }
  0x19   : > { %507 = vmatpush3.bf16.msra.mxu0 %v551_v3  ;;  %535 = vmatpush3.bf16.msra.mxu1 %v551_v3 }
  0x1a   : > { %508 = vmatprep.subr.bf16.mxu0 %v552_v6  ;;  %528 = vmatprep.subr.bf16.mxu1 %v552_v6 }
  0x1d   : > { %509 = vmatpush3.bf16.msra.mxu0 %v552_v6  ;;  %536 = vmatpush3.bf16.msra.mxu1 %v552_v6 }
  0x1e   : > { %510 = vmatprep.subr.bf16.mxu0 %v553_v7  ;;  %529 = vmatprep.subr.bf16.mxu1 %v553_v7 }
  0x21   : > { %511 = vmatpush3.bf16.msra.mxu0 %v553_v7  ;;  %537 = vmatpush3.bf16.msra.mxu1 %v553_v7 }
  0x22   : > { %512 = vmatprep.subr.bf16.mxu0 %v554_v8  ;;  %530 = vmatprep.subr.bf16.mxu1 %v554_v8 }
  0x25   : > { %513 = vmatpush3.bf16.msra.mxu0 %v554_v8  ;;  %538 = vmatpush3.bf16.msra.mxu1 %v554_v8 }
  0x26   : > { %514 = vmatprep.subr.bf16.mxu0 %v555_v9  ;;  %531 = vmatprep.subr.bf16.mxu1 %v555_v9 }
  0x29   : > { %515 = vmatpush3.bf16.msra.mxu0 %v555_v9  ;;  %539 = vmatpush3.bf16.msra.mxu1 %v555_v9 }
  0x2c   : > { %517 = vmatmul.mubr.bf16.vlgmr.msra.gmra.mxu0 %v557_v10  ;;  %521 = vmatmul.mubr.bf16.vlgmr.msra.gmra.mxu1 %v559_v11 }
  0xec   : > { %v518_v12 = vpop.f32.mrf.mxu0  ;;  %v522_v13 = vpop.f32.mrf.mxu1 }
  0xed   : > { %v639_v21 = vadd.f32 %v518_v12, %v473_v16  ;;  %v337_v36 = vadd.f32 %v522_v13, %v473_v16 }
  0xee   : > { %v312_v14 = vpop.f32.mrf.mxu0  ;;  %v328_v15 = vpop.f32.mrf.mxu1 }
  0xef   : > { %v637_v18 = vadd.f32 %v473_v16, %v312_v14  ;;  %v359_v28 = vmul.f32 %v639_v21, %v639_v21  ;;  %v329_v29 = vadd.f32 %v473_v16, %v328_v15  ;;  %v363_v44 = vmul.f32 %v337_v36, %v337_v36 }
  0xf0   : > { %v519_v17 = vpop.f32.mrf.mxu0  ;;  %v523_v20 = vpop.f32.mrf.mxu1 }
  0xf1   : > { %v357_v23 = vmul.f32 %v637_v18, %v637_v18  ;;  %v324_v24 = vadd.f32 %v519_v17, %v473_v16  ;;  %v361_v37 = vmul.f32 %v329_v29, %v329_v29  ;;  %v340_v40 = vadd.f32 %v523_v20, %v473_v16 }
  0xf2   : > { %v315_v19 = vpop.f32.mrf.mxu0  ;;  %v331_v27 = vpop.f32.mrf.mxu1 }
  0xf3   : > { %v316_v22 = vadd.f32 %v473_v16, %v315_v19  ;;  %v360_v32 = vmul.f32 %v324_v24, %v324_v24  ;;  %v332_v34 = vadd.f32 %v473_v16, %v331_v27  ;;  %v364_v47 = vmul.f32 %v340_v40, %v340_v40 }
  0xf5   : > { %v343_v25 = vadd.f32 %v316_v22, %v637_v18  ;;  %v358_v26 = vmul.f32 %v316_v22, %v316_v22  ;;  %v362_v42 = vmul.f32 %v332_v34, %v332_v34 }
  0xf7   : > { %v344_v30 = vadd.f32 %v343_v25, %v639_v21  ;;  %v365_v31 = vadd.f32 %v358_v26, %v357_v23 }
  0xf9   : > { %v366_v33 = vadd.f32 %v365_v31, %v359_v28  ;;  %v345_v35 = vadd.f32 %v344_v30, %v324_v24 }
  0xfb   : > { %v346_v38 = vadd.f32 %v345_v35, %v329_v29  ;;  %v367_v39 = vadd.f32 %v366_v33, %v360_v32 }
  0xfd   : > { %v347_v41 = vadd.f32 %v346_v38, %v332_v34  ;;  %v368_v43 = vadd.f32 %v367_v39, %v361_v37 }
  0xff   : > { %v348_v45 = vadd.f32 %v347_v41, %v337_v36  ;;  %v369_v46 = vadd.f32 %v368_v43, %v362_v42 }
 0x101   : > { %v349_v48 = vadd.f32 %v348_v45, %v340_v40  ;;  %v370_v49 = vadd.f32 %v369_v46, %v363_v44 }
 0x103   : > { %v350_v50 = vrot.slane %v349_v48, 4  ;;  %v371_v51 = vadd.f32 %v370_v49, %v364_v47 }
 0x105   : > { %v351_v52 = vadd.f32 %v350_v50, %v349_v48  ;;  %v372_v53 = vrot.slane %v371_v51, 4 }
 0x107   : > { %v352_v54 = vrot.slane %v351_v52, 2  ;;  %v373_v55 = vadd.f32 %v372_v53, %v371_v51 }
 0x109   : > { %v353_v56 = vadd.f32 %v352_v54, %v351_v52  ;;  %v374_v57 = vrot.slane %v373_v55, 2 }
 0x10b   : > { %v354_v58 = vrot.slane %v353_v56, 1  ;;  %v375_v59 = vadd.f32 %v374_v57, %v373_v55 }
 0x10d   : > { %v355_v60 = vadd.f32 %v354_v58, %v353_v56  ;;  %v376_v61 = vrot.slane %v375_v59, 1 }
 0x10f   : > { %v356_v62 = vmul.f32 0.015625, %v355_v60  ;;  %v377_v63 = vadd.f32 %v376_v61, %v375_v59 }
 0x111   : > { %v378_v0 = vmul.f32 0.015625, %v377_v63  ;;  %v379_v1 = vmul.f32 %v356_v62, %v356_v62  ;;  %v382_v5 = vsub.f32 %v637_v18, %v356_v62  ;;  %v383_v6 = vsub.f32 %v316_v22, %v356_v62 }
 0x112   : > { %v384_v7 = vsub.f32 %v639_v21, %v356_v62  ;;  %v385_v8 = vsub.f32 %v324_v24, %v356_v62  ;;  %v386_v10 = vsub.f32 %v329_v29, %v356_v62  ;;  %v387_v11 = vsub.f32 %v332_v34, %v356_v62 }
 0x113   : > { %v380_v2 = vsub.f32 %v378_v0, %v379_v1  ;;  %v388_v12 = vsub.f32 %v337_v36, %v356_v62  ;;  %v389_v13 = vsub.f32 %v340_v40, %v356_v62 }
 0x115   : > { %v381_v3 = vmax.f32 %v380_v2, 0.0 }
 0x117   : > { %v390_v4 = vadd.f32 1e-05, %v381_v3 }
 0x119   : > { %560 = vrsqrt.f32 %v390_v4 }
 0x126   : > { %v561_v9 = vpop.eup %560 }
 0x127   : > { %v392_v14 = vmul.f32 %v561_v9, %v382_v5  ;;  %v393_v15 = vmul.f32 %v561_v9, %v383_v6  ;;  %v394_v16 = vmul.f32 %v561_v9, %v384_v7  ;;  %v395_v17 = vmul.f32 %v561_v9, %v385_v8 }
 0x128   : > { %v396_v19 = vmul.f32 %v561_v9, %v386_v10  ;;  %v397_v20 = vmul.f32 %v561_v9, %v387_v11  ;;  %v398_v18 = vmul.f32 %v561_v9, %v388_v12  ;;  %v399_v22 = vmul.f32 %v561_v9, %v389_v13 }
 0x129   : > { %400 = vst [vmem:[%s172_s14] sm:$0xff] %v392_v14  ;;  %401 = vst [vmem:[%s172_s14 + $0x8] sm:$0xff] %v393_v15 }
 0x12a   : > { %402 = vst [vmem:[%s172_s14 + $0x10] sm:$0xff] %v394_v16  ;;  %403 = vst [vmem:[%s172_s14 + $0x18] sm:$0xff] %v395_v17 }
 0x12b   : > { %404 = vst [vmem:[%s172_s14 + $0x20] sm:$0xff] %v396_v19  ;;  %405 = vst [vmem:[%s172_s14 + $0x28] sm:$0xff] %v397_v20 }
 0x12c   : > { %406 = vst [vmem:[%s172_s14 + $0x30] sm:$0xff] %v398_v18  ;;  %407 = vst [vmem:[%s172_s14 + $0x38] sm:$0xff] %v399_v22 }
 0x12d PF: > { %s13_s12 = sadd.s32 1, %s568_s12  }
 0x12e   : > { %p10_p4 = scmp.ge.s32.totalorder %s13_s12, 4  }
 0x130   :  { %12 = sbr.rel (!%p10_p4) target bundleno = 1 (0x1), region = 62 }

// kernel: forward.18
= control target key start
LH: loop header
LB: loop body
LE: loop exit
PB: predicated region body
PF: predicated region fallthrough
CT: control target
= control target key end

     0   :  { %s2018_s15 = smov 0   ;;  %s2386_s0 = inlined_call_operand.vmem [shape: bf16[128,1152], index: 0, kind: input, shape index: {}]   ;;  %s2387_s1 = inlined_call_operand.vmem [shape: bf16[1152,128], index: 1, kind: input, shape index: {}]   ;;  %s2388_s2 = inlined_call_operand.vmem [shape: f32[1,128], index: 2, kind: input, shape index: {}]   ;;  %s2389_s3 = inlined_call_operand.vmem [shape: f32[128,128], index: 3, kind: input, shape index: {}]   ;;  %s2390_s4 = inlined_call_operand.vmem [shape: f32[128,128], index: 4, kind: output, shape index: {}]  }
   0x1 LB: > { %s1516_s16 = sadd.s32 4294967295, %s1991_s15   ;;  %p1520_p0 = scmp.ge.s32.totalorder %s1991_s15, 1  ;;  %s1991_s15 = sphi %s2018_s15, %s14_s15  }
   0x2   : > { %p175_p1 = scmp.lt.s32.totalorder %s1991_s15, 3 }
   0x4   : > { %p176_p2 = pnand %p1520_p0, %p175_p1 }
   0x6   : > { %179 = sbr.rel (%p176_p2) target bundleno = 371 (0x173), region = 36 }
   0xb   : > { %v1859_v0 = vld [vmem:[%s2387_s1 + $0x78] sm:$0xff]   ;;  %v1863_v4 = vld [vmem:[%s2387_s1 + $0x70] sm:$0xff]   ;;  %v1867_v8 = vld [vmem:[%s2387_s1 + $0x68] sm:$0xff]   ;;  %s1521_s23 = sshll.u32 %s1516_s16, 3 }
   0xc   : > { %v1860_v1 = vld [vmem:[%s2387_s1 + $0xf8] sm:$0xff]   ;;  %1638 = vmatprep.subr.bf16.mxu0 %v1859_v0  ;;  %v1864_v5 = vld [vmem:[%s2387_s1 + $0xf0] sm:$0xff]   ;;  %v1868_v9 = vld [vmem:[%s2387_s1 + $0xe8] sm:$0xff]   ;;  %p208_p3 = scmp.lt.s32.totalorder %s1521_s23, 15 }
   0xd   : > { %v1861_v2 = vld [vmem:[%s2387_s1 + $0x38] sm:$0xff]   ;;  %1678 = vmatprep.subr.bf16.mxu1 %v1860_v1  ;;  %v1865_v6 = vld [vmem:[%s2387_s1 + $0x30] sm:$0xff]   ;;  %v1869_v10 = vld [vmem:[%s2387_s1 + $0x28] sm:$0xff]  }
   0xe   : > { %v1862_v3 = vld [vmem:[%s2387_s1 + $0xb8] sm:$0xff]   ;;  %1639 = vmatpush3.bf16.msra.mxu0 %v1861_v2  ;;  %v1866_v7 = vld [vmem:[%s2387_s1 + $0xb0] sm:$0xff]   ;;  %v1870_v11 = vld [vmem:[%s2387_s1 + $0xa8] sm:$0xff]   ;;  %s2412_s23 = smov (!%p208_p3, %s1521_s23), 15 }
   0xf   : > { %1679 = vmatpush3.bf16.msra.mxu1 %v1862_v3  ;;  %1640 = vmatprep.subr.bf16.mxu0 %v1863_v4  ;;  %v1871_v12 = vld [vmem:[%s2387_s1 + $0x60] sm:$0xff]   ;;  %v1875_v16 = vld [vmem:[%s2387_s1 + $0x58] sm:$0xff]   ;;  %v1879_v20 = vld [vmem:[%s2387_s1 + $0x50] sm:$0xff]   ;;  %s1850_s21 = smul.u32 36, %s2412_s23  ;;  %s1524_s26 = sshll.u32 %s2412_s23, 3 }
  0x10   : > { %1680 = vmatprep.subr.bf16.mxu1 %v1864_v5  ;;  %v1872_v13 = vld [vmem:[%s2387_s1 + $0xe0] sm:$0xff]   ;;  %v1876_v17 = vld [vmem:[%s2387_s1 + $0xd8] sm:$0xff]   ;;  %v1880_v21 = vld [vmem:[%s2387_s1 + $0xd0] sm:$0xff]   ;;  %s218_s29 = scalar_lea.vmem %s2389_s3, %s1524_s26  ;;  %s224_s16 = scalar_lea.vmem %s2390_s4, %s1524_s26 }
  0x11   : > { %v1873_v14 = vld [vmem:[%s2387_s1 + $0x20] sm:$0xff]   ;;  %v1877_v18 = vld [vmem:[%s2387_s1 + $0x18] sm:$0xff]   ;;  %v1881_v22 = vld [vmem:[%s2387_s1 + $0x10] sm:$0xff]   ;;  %s2124_s6 = scalar_lea.vmem %s2386_s0, %s1850_s21 }
  0x12   : > { %1641 = vmatpush3.bf16.msra.mxu0 %v1865_v6  ;;  %v1874_v15 = vld [vmem:[%s2387_s1 + $0xa0] sm:$0xff]   ;;  %v1878_v19 = vld [vmem:[%s2387_s1 + $0x98] sm:$0xff]   ;;  %v1882_v23 = vld [vmem:[%s2387_s1 + $0x90] sm:$0xff]  }
  0x13   : > { %1681 = vmatpush3.bf16.msra.mxu1 %v1866_v7  ;;  %1642 = vmatprep.subr.bf16.mxu0 %v1867_v8  ;;  %v1883_v24 = vld [vmem:[%s2387_s1 + $0x48] sm:$0xff]   ;;  %v1887_v28 = vld [vmem:[%s2387_s1 + $0x40] sm:$0xff]   ;;  %v1897_v36 = vld [vmem:[%s2387_s1 + $0x178] sm:$0xff]  }
  0x14   : > { %1682 = vmatprep.subr.bf16.mxu1 %v1868_v9  ;;  %v1884_v25 = vld [vmem:[%s2387_s1 + $0xc8] sm:$0xff]   ;;  %v1888_v29 = vld [vmem:[%s2387_s1 + $0xc0] sm:$0xff]   ;;  %v1898_v37 = vld [vmem:[%s2387_s1 + $0x1f8] sm:$0xff]  }
  0x15   : > { %v1885_v26 = vld [vmem:[%s2387_s1 + $0x8] sm:$0xff]   ;;  %v1889_v30 = vld [vmem:[%s2387_s1] sm:$0xff]   ;;  %v1899_v38 = vld [vmem:[%s2387_s1 + $0x138] sm:$0xff]  }
  0x16   : > { %1643 = vmatpush3.bf16.msra.mxu0 %v1869_v10  ;;  %v1886_v27 = vld [vmem:[%s2387_s1 + $0x88] sm:$0xff]   ;;  %v1890_v31 = vld [vmem:[%s2387_s1 + $0x80] sm:$0xff]   ;;  %v1900_v39 = vld [vmem:[%s2387_s1 + $0x1b8] sm:$0xff]  }
  0x17   : > { %1683 = vmatpush3.bf16.msra.mxu1 %v1870_v11  ;;  %1644 = vmatprep.subr.bf16.mxu0 %v1871_v12  ;;  %v1891_v32 = vld [vmem:[%s2124_s6] ss:$36 sps:$4 sm:$0xff]   ;;  %v1894_v34 = vld [vmem:[%s2124_s6 + $0x8] ss:$36 sps:$4 sm:$0xff]   ;;  %v1901_v40 = vld [vmem:[%s2387_s1 + $0x170] sm:$0xff]  }
  0x18   : > { %1684 = vmatprep.subr.bf16.mxu1 %v1872_v13  ;;  %v1893_v33 = vld [vmem:[%s2124_s6 + $0x4] ss:$36 sps:$4 sm:$0xff]   ;;  %v1896_v35 = vld [vmem:[%s2124_s6 + $0xc] ss:$36 sps:$4 sm:$0xff]   ;;  %v1907_v45 = vld [vmem:[%s2124_s6 + $0x54] ss:$36 sps:$4 sm:$0xff]  }
  0x19   : > { %1066 = vmatprep.mubr.bf16.mxu0 %v1893_v33  ;;  %1131 = vmatprep.mubr.bf16.mxu1 %v1896_v35  ;;  %v1902_v41 = vld [vmem:[%s2387_s1 + $0x1f0] sm:$0xff]   ;;  %v1909_v46 = vld [vmem:[%s2124_s6 + $0x48] ss:$36 sps:$4 sm:$0xff]   ;;  %v1915_v52 = vld [vmem:[%s2387_s1 + $0x160] sm:$0xff]  }
  0x1a   : > { %1645 = vmatpush3.bf16.msra.mxu0 %v1873_v14  ;;  %v1903_v42 = vld [vmem:[%s2387_s1 + $0x130] sm:$0xff]   ;;  %v1911_v48 = vld [vmem:[%s2387_s1 + $0x168] sm:$0xff]   ;;  %v1916_v53 = vld [vmem:[%s2387_s1 + $0x1e0] sm:$0xff]  }
  0x1b   : > { %1685 = vmatpush3.bf16.msra.mxu1 %v1874_v15  ;;  %1646 = vmatprep.subr.bf16.mxu0 %v1875_v16  ;;  %v1904_v43 = vld [vmem:[%s2387_s1 + $0x1b0] sm:$0xff]   ;;  %v1912_v49 = vld [vmem:[%s2387_s1 + $0x1e8] sm:$0xff]   ;;  %v1917_v54 = vld [vmem:[%s2387_s1 + $0x120] sm:$0xff]  }
  0x1c   : > { %1686 = vmatprep.subr.bf16.mxu1 %v1876_v17  ;;  %v1905_v44 = vld [vmem:[%s2124_s6 + $0x4c] ss:$36 sps:$4 sm:$0xff]   ;;  %v1918_v55 = vld [vmem:[%s2387_s1 + $0x1a0] sm:$0xff]   ;;  %v1919_v56 = vld [vmem:[%s2124_s6 + $0x94] ss:$36 sps:$4 sm:$0xff]  }
  0x1d   : > { %v1910_v47 = vld [vmem:[%s2124_s6 + $0x50] ss:$36 sps:$4 sm:$0xff]   ;;  %v1913_v50 = vld [vmem:[%s2387_s1 + $0x128] sm:$0xff]   ;;  %v1921_v57 = vld [vmem:[%s2124_s6 + $0x9c] ss:$36 sps:$4 sm:$0xff]  }
  0x1e   : > { %1647 = vmatpush3.bf16.msra.mxu0 %v1877_v18  ;;  %v1914_v51 = vld [vmem:[%s2387_s1 + $0x1a8] sm:$0xff]   ;;  %v1923_v58 = vld [vmem:[%s2124_s6 + $0x90] ss:$36 sps:$4 sm:$0xff]   ;;  %v1924_v59 = vld [vmem:[%s2124_s6 + $0x98] ss:$36 sps:$4 sm:$0xff]  }
  0x1f   : > { %1687 = vmatpush3.bf16.msra.mxu1 %v1878_v19  ;;  %1648 = vmatprep.subr.bf16.mxu0 %v1879_v20  ;;  %v1925_v60 = vld [vmem:[%s2387_s1 + $0x158] sm:$0xff]   ;;  %v1929_v0 = vld [vmem:[%s2387_s1 + $0x150] sm:$0xff]   ;;  %v1935_v5 = vld [vmem:[%s2124_s6 + $0xe4] ss:$36 sps:$4 sm:$0xff]  }
  0x20   : > { %1688 = vmatprep.subr.bf16.mxu1 %v1880_v21  ;;  %v1926_v61 = vld [vmem:[%s2387_s1 + $0x1d8] sm:$0xff]   ;;  %v1930_v1 = vld [vmem:[%s2387_s1 + $0x1d0] sm:$0xff]   ;;  %v1938_v7 = vld [vmem:[%s2124_s6 + $0xe0] ss:$36 sps:$4 sm:$0xff]  }
  0x21   : > { %v1927_v62 = vld [vmem:[%s2387_s1 + $0x118] sm:$0xff]   ;;  %v1931_v2 = vld [vmem:[%s2387_s1 + $0x110] sm:$0xff]   ;;  %v1939_v8 = vld [vmem:[%s2387_s1 + $0x148] sm:$0xff]  }
  0x22   : > { %1649 = vmatpush3.bf16.msra.mxu0 %v1881_v22  ;;  %v1928_v63 = vld [vmem:[%s2387_s1 + $0x198] sm:$0xff]   ;;  %v1932_v3 = vld [vmem:[%s2387_s1 + $0x190] sm:$0xff]   ;;  %v1940_v9 = vld [vmem:[%s2387_s1 + $0x1c8] sm:$0xff]  }
  0x23   : > { %1689 = vmatpush3.bf16.msra.mxu1 %v1882_v23  ;;  %1650 = vmatprep.subr.bf16.mxu0 %v1883_v24  ;;  %v1933_v4 = vld [vmem:[%s2124_s6 + $0xdc] ss:$36 sps:$4 sm:$0xff]   ;;  %v1941_v10 = vld [vmem:[%s2387_s1 + $0x108] sm:$0xff]   ;;  %v1947_v16 = vld [vmem:[%s2124_s6 + $0x10] ss:$36 sps:$4 sm:$0xff]  }
  0x24   : > { %1690 = vmatprep.subr.bf16.mxu1 %v1884_v25  ;;  %v1937_v6 = vld [vmem:[%s2124_s6 + $0xd8] ss:$36 sps:$4 sm:$0xff]   ;;  %v1942_v11 = vld [vmem:[%s2387_s1 + $0x188] sm:$0xff]   ;;  %v1943_v12 = vld [vmem:[%s2387_s1 + $0x140] sm:$0xff]  }
  0x25   : > { %v1944_v13 = vld [vmem:[%s2387_s1 + $0x1c0] sm:$0xff]   ;;  %v1949_v17 = vld [vmem:[%s2124_s6 + $0x14] ss:$36 sps:$4 sm:$0xff]   ;;  %v1971_v33 = vld [vmem:[%s2124_s6 + $0xec] ss:$36 sps:$4 sm:$0xff]  }
  0x26   : > { %1651 = vmatpush3.bf16.msra.mxu0 %v1885_v26  ;;  %v1945_v14 = vld [vmem:[%s2387_s1 + $0x100] sm:$0xff]   ;;  %v1950_v18 = vld [vmem:[%s2124_s6 + $0x18] ss:$36 sps:$4 sm:$0xff]   ;;  %v1954_v21 = vld [vmem:[%s2387_s1 + $0x230] sm:$0xff]  }
  0x27   : > { %1691 = vmatpush3.bf16.msra.mxu1 %v1886_v27  ;;  %1652 = vmatprep.subr.bf16.mxu0 %v1887_v28  ;;  %v1946_v15 = vld [vmem:[%s2387_s1 + $0x180] sm:$0xff]   ;;  %v1953_v20 = vld [vmem:[%s2387_s1 + $0x238] sm:$0xff]   ;;  %v1961_v26 = vld [vmem:[%s2387_s1 + $0x228] sm:$0xff]  }
  0x28   : > { %1692 = vmatprep.subr.bf16.mxu1 %v1888_v29  ;;  %v1952_v19 = vld [vmem:[%s2124_s6 + $0x1c] ss:$36 sps:$4 sm:$0xff]   ;;  %v1957_v23 = vld [vmem:[%s2124_s6 + $0x64] ss:$36 sps:$4 sm:$0xff]   ;;  %v1965_v28 = vld [vmem:[%s2124_s6 + $0xac] ss:$36 sps:$4 sm:$0xff]  }
  0x29   : > { %v1955_v22 = vld [vmem:[%s2124_s6 + $0x5c] ss:$36 sps:$4 sm:$0xff]   ;;  %v1963_v27 = vld [vmem:[%s2124_s6 + $0xa4] ss:$36 sps:$4 sm:$0xff]   ;;  %v1970_v35 = vld [vmem:[%s2387_s1 + $0x210] sm:$0xff]  }
  0x2a   : > { %1653 = vmatpush3.bf16.msra.mxu0 %v1889_v30  ;;  %v1959_v24 = vld [vmem:[%s2124_s6 + $0x58] ss:$36 sps:$4 sm:$0xff]   ;;  %v1960_v25 = vld [vmem:[%s2124_s6 + $0x60] ss:$36 sps:$4 sm:$0xff]  }
  0x2b   : > { %1693 = vmatpush3.bf16.msra.mxu1 %v1890_v31  ;;  %1718 = vmatprep.subr.bf16.mxu0 %v1897_v36  ;;  %v1962_v29 = vld [vmem:[%s2387_s1 + $0x220] sm:$0xff]   ;;  %v1968_v31 = vld [vmem:[%s2124_s6 + $0xa8] ss:$36 sps:$4 sm:$0xff]  }
  0x2c   : > { %1758 = vmatprep.subr.bf16.mxu1 %v1898_v37  ;;  %v1967_v30 = vld [vmem:[%s2124_s6 + $0xa0] ss:$36 sps:$4 sm:$0xff]   ;;  %v1975_v36 = vld [vmem:[%s2124_s6 + $0xe8] ss:$36 sps:$4 sm:$0xff]  }
  0x2d   : > { %1067 = vmatmul.mubr.bf16.vlgmr.msra.gmra.mxu0 %v1891_v32  ;;  %v1969_v32 = vld [vmem:[%s2387_s1 + $0x218] sm:$0xff]   ;;  %v1977_v37 = vld [vmem:[%s2387_s1 + $0x208] sm:$0xff]  }
  0x2e   : > { %1132 = vmatmul.mubr.bf16.vlgmr.msra.gmra.mxu1 %v1894_v34  ;;  %1719 = vmatpush3.bf16.msra.mxu0 %v1899_v38  ;;  %v1973_v34 = vld [vmem:[%s2124_s6 + $0xf4] ss:$36 sps:$4 sm:$0xff]  }
  0x2f   : > { %1759 = vmatpush3.bf16.msra.mxu1 %v1900_v39  ;;  %1720 = vmatprep.subr.bf16.mxu0 %v1901_v40  ;;  %v1976_v38 = vld [vmem:[%s2124_s6 + $0xf0] ss:$36 sps:$4 sm:$0xff]   ;;  %v1979_v39 = vld [vmem:[%s2124_s6 + $0x20] ss:$36 sps:$4 sm:$0xff]  }
  0x30   : > { %1760 = vmatprep.subr.bf16.mxu1 %v1902_v41  ;;  %1074 = vmatprep.mubr.bf16.mxu0 %v1905_v44  ;;  %v1980_v40 = vld [vmem:[%s2124_s6 + $0xb0] ss:$36 sps:$4 sm:$0xff]   ;;  %v1978_v41 = vld [vmem:[%s2387_s1 + $0x200] sm:$0xff]  }
  0x31   : > { %1139 = vmatprep.mubr.bf16.mxu1 %v1907_v45 }
  0x32   : > { %1721 = vmatpush3.bf16.msra.mxu0 %v1903_v42  ;;  %v1981_v42 = vld [vmem:[%s2124_s6 + $0x68] ss:$36 sps:$4 sm:$0xff]  }
  0x33   : > { %1761 = vmatpush3.bf16.msra.mxu1 %v1904_v43  ;;  %1722 = vmatprep.subr.bf16.mxu0 %v1911_v48  ;;  %v1982_v43 = vld [vmem:[%s2124_s6 + $0xf8] ss:$36 sps:$4 sm:$0xff]  }
  0x34   : > { %1762 = vmatprep.subr.bf16.mxu1 %v1912_v49 }
  0x35   : > { %1075 = vmatmul.mubr.bf16.gmra.mxu0 %v1909_v46 }
  0x36   : > { %1140 = vmatmul.mubr.bf16.gmra.mxu1 %v1910_v47  ;;  %1723 = vmatpush3.bf16.msra.mxu0 %v1913_v50 }
  0x37   : > { %1763 = vmatpush3.bf16.msra.mxu1 %v1914_v51  ;;  %1724 = vmatprep.subr.bf16.mxu0 %v1915_v52 }
  0x38   : > { %1764 = vmatprep.subr.bf16.mxu1 %v1916_v53  ;;  %1082 = vmatprep.mubr.bf16.mxu0 %v1919_v56 }
  0x39   : > { %1147 = vmatprep.mubr.bf16.mxu1 %v1921_v57 }
  0x3a   : > { %1725 = vmatpush3.bf16.msra.mxu0 %v1917_v54 }
  0x3b   : > { %1765 = vmatpush3.bf16.msra.mxu1 %v1918_v55  ;;  %1726 = vmatprep.subr.bf16.mxu0 %v1925_v60 }
  0x3c   : > { %1766 = vmatprep.subr.bf16.mxu1 %v1926_v61 }
  0x3d   : > { %1083 = vmatmul.mubr.bf16.gmra.mxu0 %v1923_v58 }
  0x3e   : > { %1148 = vmatmul.mubr.bf16.gmra.mxu1 %v1924_v59  ;;  %1727 = vmatpush3.bf16.msra.mxu0 %v1927_v62 }
  0x3f   : > { %1767 = vmatpush3.bf16.msra.mxu1 %v1928_v63  ;;  %1728 = vmatprep.subr.bf16.mxu0 %v1929_v0 }
  0x40   : > { %1768 = vmatprep.subr.bf16.mxu1 %v1930_v1  ;;  %1090 = vmatprep.mubr.bf16.mxu0 %v1933_v4 }
  0x41   : > { %1155 = vmatprep.mubr.bf16.mxu1 %v1935_v5 }
  0x42   : > { %1729 = vmatpush3.bf16.msra.mxu0 %v1931_v2 }
  0x43   : > { %1769 = vmatpush3.bf16.msra.mxu1 %v1932_v3  ;;  %1730 = vmatprep.subr.bf16.mxu0 %v1939_v8 }
  0x44   : > { %1770 = vmatprep.subr.bf16.mxu1 %v1940_v9 }
  0x45   : > { %1091 = vmatmul.mubr.bf16.gmra.mxu0 %v1937_v6 }
  0x46   : > { %1156 = vmatmul.mubr.bf16.gmra.mxu1 %v1938_v7  ;;  %1731 = vmatpush3.bf16.msra.mxu0 %v1941_v10 }
  0x47   : > { %1771 = vmatpush3.bf16.msra.mxu1 %v1942_v11  ;;  %1732 = vmatprep.subr.bf16.mxu0 %v1943_v12 }
  0x48   : > { %1772 = vmatprep.subr.bf16.mxu1 %v1944_v13  ;;  %1196 = vmatprep.mubr.bf16.mxu0 %v1949_v17 }
  0x49   : > { %1261 = vmatprep.mubr.bf16.mxu1 %v1952_v19 }
  0x4a   : > { %1733 = vmatpush3.bf16.msra.mxu0 %v1945_v14 }
  0x4b   : > { %1773 = vmatpush3.bf16.msra.mxu1 %v1946_v15  ;;  %1810 = vmatprep.subr.bf16.mxu0 %v1953_v20 }
  0x4c   : > { %1834 = vmatprep.subr.bf16.mxu1 %v1953_v20 }
  0x4d   : > { %1197 = vmatmul.mubr.bf16.vlgmr.msra.gmra.mxu0 %v1947_v16 }
  0x4e   : > { %1262 = vmatmul.mubr.bf16.vlgmr.msra.gmra.mxu1 %v1950_v18  ;;  %1811 = vmatpush3.bf16.msra.mxu0 %v1953_v20 }
  0x4f   : > { %1842 = vmatpush3.bf16.msra.mxu1 %v1953_v20  ;;  %1812 = vmatprep.subr.bf16.mxu0 %v1954_v21 }
  0x50   : > { %1835 = vmatprep.subr.bf16.mxu1 %v1954_v21  ;;  %1204 = vmatprep.mubr.bf16.mxu0 %v1955_v22 }
  0x51   : > { %1269 = vmatprep.mubr.bf16.mxu1 %v1957_v23 }
  0x52   : > { %1813 = vmatpush3.bf16.msra.mxu0 %v1954_v21 }
  0x53   : > { %1843 = vmatpush3.bf16.msra.mxu1 %v1954_v21  ;;  %1814 = vmatprep.subr.bf16.mxu0 %v1961_v26 }
  0x54   : > { %1836 = vmatprep.subr.bf16.mxu1 %v1961_v26 }
  0x55   : > { %1205 = vmatmul.mubr.bf16.gmra.mxu0 %v1959_v24 }
  0x56   : > { %1270 = vmatmul.mubr.bf16.gmra.mxu1 %v1960_v25  ;;  %1212 = vmatprep.mubr.bf16.mxu0 %v1963_v27 }
  0x57   : > { %1815 = vmatpush3.bf16.msra.mxu0 %v1961_v26  ;;  %1277 = vmatprep.mubr.bf16.mxu1 %v1965_v28 }
  0x58   : > { %1844 = vmatpush3.bf16.msra.mxu1 %v1961_v26  ;;  %1816 = vmatprep.subr.bf16.mxu0 %v1962_v29 }
  0x59   : > { %1837 = vmatprep.subr.bf16.mxu1 %v1962_v29 }
  0x5b   : > { %1817 = vmatpush3.bf16.msra.mxu0 %v1962_v29 }
  0x5c   : > { %1845 = vmatpush3.bf16.msra.mxu1 %v1962_v29  ;;  %1818 = vmatprep.subr.bf16.mxu0 %v1969_v32 }
  0x5d   : > { %1213 = vmatmul.mubr.bf16.gmra.mxu0 %v1967_v30  ;;  %1838 = vmatprep.subr.bf16.mxu1 %v1969_v32 }
  0x5e   : > { %1278 = vmatmul.mubr.bf16.gmra.mxu1 %v1968_v31  ;;  %1220 = vmatprep.mubr.bf16.mxu0 %v1971_v33 }
  0x5f   : > { %1819 = vmatpush3.bf16.msra.mxu0 %v1969_v32  ;;  %1285 = vmatprep.mubr.bf16.mxu1 %v1973_v34 }
  0x60   : > { %1846 = vmatpush3.bf16.msra.mxu1 %v1969_v32  ;;  %1820 = vmatprep.subr.bf16.mxu0 %v1970_v35 }
  0x61   : > { %1839 = vmatprep.subr.bf16.mxu1 %v1970_v35 }
  0x63   : > { %1821 = vmatpush3.bf16.msra.mxu0 %v1970_v35 }
  0x64   : > { %1847 = vmatpush3.bf16.msra.mxu1 %v1970_v35  ;;  %1822 = vmatprep.subr.bf16.mxu0 %v1977_v37 }
  0x65   : > { %1221 = vmatmul.mubr.bf16.gmra.mxu0 %v1975_v36  ;;  %1840 = vmatprep.subr.bf16.mxu1 %v1977_v37 }
  0x66   : > { %1286 = vmatmul.mubr.bf16.gmra.mxu1 %v1976_v38  ;;  %1826 = vmatprep.mubr.bf16.mxu0 %v1979_v39 }
  0x67   : > { %1823 = vmatpush3.bf16.msra.mxu0 %v1977_v37  ;;  %1830 = vmatprep.mubr.bf16.mxu1 %v1980_v40 }
  0x68   : > { %1848 = vmatpush3.bf16.msra.mxu1 %v1977_v37  ;;  %1824 = vmatprep.subr.bf16.mxu0 %v1978_v41  ;;  %v1527_v37 = vld [vmem:[%s2388_s2] ss:$0 sm:$0xff] }
  0x69   : > { %1841 = vmatprep.subr.bf16.mxu1 %v1978_v41 }
  0x6b   : > { %1825 = vmatpush3.bf16.msra.mxu0 %v1978_v41 }
  0x6c   : > { %1849 = vmatpush3.bf16.msra.mxu1 %v1978_v41 }
  0x6e   : > { %1827 = vmatmul.mubr.bf16.vlgmr.msra.gmra.mxu0 %v1981_v42 }
  0x6f   : > { %1831 = vmatmul.mubr.bf16.vlgmr.msra.gmra.mxu1 %v1982_v43 }
  0xed   : > { %v1654_v44 = vpop.f32.mrf.mxu0 }
  0xee   : > { %v1694_v45 = vpop.f32.mrf.mxu1 }
  0xef   : > { %v1655_v46 = vpop.f32.mrf.mxu0 }
  0xf0   : > { %v1695_v47 = vpop.f32.mrf.mxu1  ;;  %v1656_v33 = vadd.f32 %v1655_v46, %v1654_v44 }
  0xf1   : > { %v1657_v48 = vpop.f32.mrf.mxu0  ;;  %v1696_v43 = vadd.f32 %v1695_v47, %v1694_v45 }
  0xf2   : > { %v1697_v49 = vpop.f32.mrf.mxu1  ;;  %v1069_v42 = vadd.f32 %v1656_v33, %v1527_v37 }
  0xf3   : > { %v1658_v50 = vpop.f32.mrf.mxu0 }
  0xf4   : > { %v1698_v51 = vpop.f32.mrf.mxu1  ;;  %v1659_v34 = vadd.f32 %v1658_v50, %v1657_v48 }
  0xf5   : > { %v1660_v52 = vpop.f32.mrf.mxu0 }
  0xf6   : > { %v1700_v53 = vpop.f32.mrf.mxu1 }
  0xf7   : > { %v1661_v54 = vpop.f32.mrf.mxu0 }
  0xf8   : > { %v1701_v55 = vpop.f32.mrf.mxu1  ;;  %v1662_v38 = vadd.f32 %v1661_v54, %v1660_v52  ;;  %v1134_v52 = vadd.f32 %v1696_v43, %v1069_v42 }
  0xf9   : > { %v1663_v56 = vpop.f32.mrf.mxu0  ;;  %v1702_v46 = vadd.f32 %v1701_v55, %v1700_v53 }
  0xfa   : > { %v1703_v57 = vpop.f32.mrf.mxu1  ;;  %v1077_v44 = vadd.f32 %v1662_v38, %v1527_v37 }
  0xfb   : > { %v1664_v58 = vpop.f32.mrf.mxu0 }
  0xfc   : > { %v1704_v59 = vpop.f32.mrf.mxu1  ;;  %v1665_v39 = vadd.f32 %v1664_v58, %v1663_v56  ;;  %v1142_v45 = vadd.f32 %v1702_v46, %v1077_v44 }
  0xfd   : > { %v1666_v60 = vpop.f32.mrf.mxu0  ;;  %v1705_v50 = vadd.f32 %v1704_v59, %v1703_v57 }
  0xfe   : > { %v2288_v61 = vpop.f32.mrf.mxu1  ;;  %v1080_v48 = vadd.f32 %v1665_v39, %v1527_v37 }
  0xff   : > { %v1667_v62 = vpop.f32.mrf.mxu0 }
 0x100   : > { %v2290_v63 = vpop.f32.mrf.mxu1  ;;  %v1145_v47 = vadd.f32 %v1705_v50, %v1080_v48 }
 0x101   : > { %v1669_v0 = vpop.f32.mrf.mxu0  ;;  %v1708_v53 = vadd.f32 %v2290_v63, %v2288_v61 }
 0x102   : > { %v2292_v1 = vpop.f32.mrf.mxu1 }
 0x103   : > { %v1670_v2 = vpop.f32.mrf.mxu0 }
 0x104   : > { %v2294_v3 = vpop.f32.mrf.mxu1 }
 0x105   : > { %v1672_v4 = vpop.f32.mrf.mxu0  ;;  %v1711_v57 = vadd.f32 %v2294_v3, %v2292_v1 }
 0x106   : > { %v2296_v5 = vpop.f32.mrf.mxu1 }
 0x107   : > { %v1673_v6 = vpop.f32.mrf.mxu0 }
 0x108   : > { %v2298_v7 = vpop.f32.mrf.mxu1  ;;  %v1674_v56 = vadd.f32 %v1673_v6, %v1672_v4 }
 0x109   : > { %v1675_v8 = vpop.f32.mrf.mxu0 }
 0x10a   : > { %v2300_v9 = vpop.f32.mrf.mxu1  ;;  %v1093_v4 = vadd.f32 %v1674_v56, %v1527_v37 }
 0x10b   : > { %v1676_v10 = vpop.f32.mrf.mxu0 }
 0x10c   : > { %v2302_v11 = vpop.f32.mrf.mxu1  ;;  %v1677_v58 = vadd.f32 %v1676_v10, %v1675_v8 }
 0x10d   : > { %2391 = vst [vmem:[#allocation2_spill] sm:$0xff] %v2302_v11  ;;  %v1734_v12 = vpop.f32.mrf.mxu0 }
 0x10e   : > { %v1774_v13 = vpop.f32.mrf.mxu1  ;;  %v1096_v6 = vadd.f32 %v1677_v58, %v1527_v37 }
 0x10f   : > { %v1735_v14 = vpop.f32.mrf.mxu0 }
 0x110   : > { %v1775_v15 = vpop.f32.mrf.mxu1  ;;  %v1736_v11 = vadd.f32 %v1735_v14, %v1734_v12 }
 0x111   : > { %v1737_v16 = vpop.f32.mrf.mxu0 }
 0x112   : > { %v2304_v17 = vpop.f32.mrf.mxu1 }
 0x113   : > { %2392 = vst [vmem:[#allocation3_spill] sm:$0xff] %v2304_v17  ;;  %v1738_v18 = vpop.f32.mrf.mxu0 }
 0x114   : > { %v2306_v19 = vpop.f32.mrf.mxu1  ;;  %v2401_v8 = vld [vmem:[#allocation2_spill] sm:$0xff] }
 0x115   : > { %2393 = vst [vmem:[#allocation4_spill] sm:$0xff] %v2306_v19  ;;  %v1740_v20 = vpop.f32.mrf.mxu0  ;;  %v1717_v10 = vadd.f32 %v2401_v8, %v2300_v9 }
 0x116   : > { %v2308_v21 = vpop.f32.mrf.mxu1 }
 0x117   : > { %2394 = vst [vmem:[#allocation5_spill] sm:$0xff] %v2308_v21  ;;  %v1741_v22 = vpop.f32.mrf.mxu0  ;;  %v1671_v21 = vadd.f32 %v1670_v2, %v1669_v0  ;;  %v1776_v0 = vadd.f32 %v1775_v15, %v1774_v13 }
 0x118   : > { %v1781_v23 = vpop.f32.mrf.mxu1 }
 0x119   : > { %v1743_v24 = vpop.f32.mrf.mxu0  ;;  %v1088_v55 = vadd.f32 %v1671_v21, %v1527_v37 }
 0x11a   : > { %v2310_v25 = vpop.f32.mrf.mxu1  ;;  %v2402_v61 = vld [vmem:[#allocation3_spill] sm:$0xff] }
 0x11b   : > { %2395 = vst [vmem:[#allocation6_spill] sm:$0xff] %v2310_v25  ;;  %v1744_v26 = vpop.f32.mrf.mxu0  ;;  %v1153_v13 = vadd.f32 %v1711_v57, %v1088_v55 }
 0x11c   : > { %v2312_v27 = vpop.f32.mrf.mxu1  ;;  %v1745_v2 = vadd.f32 %v1744_v26, %v1743_v24  ;;  %v2403_v63 = vld [vmem:[#allocation4_spill] sm:$0xff] }
 0x11d   : > { %2396 = vst [vmem:[#allocation7_spill] sm:$0xff] %v2312_v27  ;;  %v1746_v28 = vpop.f32.mrf.mxu0  ;;  %v1699_v27 = vadd.f32 %v1698_v51, %v1697_v49  ;;  %v1739_v49 = vadd.f32 %v1738_v18, %v1737_v16  ;;  %v1742_v51 = vadd.f32 %v1741_v22, %v1740_v20  ;;  %v1779_v18 = vadd.f32 %v2403_v63, %v2402_v61 }
 0x11e   : > { %v2314_v29 = vpop.f32.mrf.mxu1  ;;  %v2404_v1 = vld [vmem:[#allocation5_spill] sm:$0xff]  ;;  %v1210_v15 = vadd.f32 %v1745_v2, %v1145_v47 }
 0x11f   : > { %2397 = vst [vmem:[#allocation8_spill] sm:$0xff] %v2314_v29  ;;  %v1747_v30 = vpop.f32.mrf.mxu0  ;;  %v1072_v29 = vadd.f32 %v1659_v34, %v1527_v37  ;;  %v1207_v20 = vadd.f32 %v1742_v51, %v1142_v45  ;;  %v1782_v3 = vadd.f32 %v1781_v23, %v2404_v1  ;;  %v1161_v23 = vadd.f32 %v1717_v10, %v1096_v6 }
 0x120   : > { %v2316_v31 = vpop.f32.mrf.mxu1  ;;  %v1748_v12 = vadd.f32 %v1747_v30, %v1746_v28 }
 0x121   : > { %2398 = vst [vmem:[#allocation9_spill] sm:$0xff] %v2316_v31  ;;  %v1749_v32 = vpop.f32.mrf.mxu0  ;;  %v1137_v54 = vadd.f32 %v1699_v27, %v1072_v29  ;;  %v1272_v43 = vadd.f32 %v1782_v3, %v1207_v20 }
 0x122   : > { %v2318_v35 = vpop.f32.mrf.mxu1  ;;  %v2405_v24 = vld [vmem:[#allocation6_spill] sm:$0xff] }
 0x123   : > { %2399 = vst [vmem:[#allocation10_spill] sm:$0xff] %v2318_v35  ;;  %v1750_v36 = vpop.f32.mrf.mxu0  ;;  %v1668_v35 = vadd.f32 %v1667_v62, %v1666_v60  ;;  %v1714_v60 = vadd.f32 %v2298_v7, %v2296_v5  ;;  %v1199_v62 = vadd.f32 %v1736_v11, %v1134_v52  ;;  %v1202_v16 = vadd.f32 %v1739_v49, %v1137_v54 }
 0x124   : > { %v2323_v40 = vpop.f32.mrf.mxu1  ;;  %v1751_v5 = vadd.f32 %v1750_v36, %v1749_v32  ;;  %v2406_v26 = vld [vmem:[#allocation7_spill] sm:$0xff] }
 0x125   : > { %2400 = vst [vmem:[#allocation11_spill] sm:$0xff] %v2323_v40  ;;  %v1752_v41 = vpop.f32.mrf.mxu0  ;;  %v1085_v34 = vadd.f32 %v1668_v35, %v1527_v37  ;;  %v1785_v27 = vadd.f32 %v2406_v26, %v2405_v24  ;;  %v1264_v9 = vadd.f32 %v1776_v0, %v1199_v62  ;;  %v1158_v29 = vadd.f32 %v1714_v60, %v1093_v4 }
 0x126   : > { %v1792_v31 = vpop.f32.mrf.mxu1  ;;  %v2407_v35 = vld [vmem:[#allocation8_spill] sm:$0xff]  ;;  %v1218_v32 = vadd.f32 %v1751_v5, %v1153_v13 }
 0x127   : > { %v1753_v25 = vpop.f32.mrf.mxu0  ;;  %v1150_v22 = vadd.f32 %v1708_v53, %v1085_v34  ;;  %v1275_v58 = vadd.f32 %v1785_v27, %v1210_v15 }
 0x128   : > { %v1793_v19 = vpop.f32.mrf.mxu1  ;;  %v1754_v7 = vadd.f32 %v1753_v25, %v1752_v41  ;;  %v2408_v37 = vld [vmem:[#allocation9_spill] sm:$0xff]  ;;  %v1267_v25 = vadd.f32 %v1779_v18, %v1202_v16 }
 0x129   : > { %v1755_v17 = vpop.f32.mrf.mxu0  ;;  %v1215_v30 = vadd.f32 %v1748_v12, %v1150_v22  ;;  %v1788_v38 = vadd.f32 %v2408_v37, %v2407_v35  ;;  %v1794_v50 = vadd.f32 %v1793_v19, %v1792_v31 }
 0x12a   : > { %v1795_v40 = vpop.f32.mrf.mxu1  ;;  %v2409_v36 = vld [vmem:[#allocation10_spill] sm:$0xff]  ;;  %v1223_v48 = vadd.f32 %v1754_v7, %v1158_v29 }
 0x12b   : > { %v1756_v33 = vpop.f32.mrf.mxu0  ;;  %v1280_v47 = vadd.f32 %v1788_v38, %v1215_v30 }
 0x12c   : > { %v1796_v59 = vpop.f32.mrf.mxu1  ;;  %v1757_v39 = vadd.f32 %v1756_v33, %v1755_v17  ;;  %v2410_v41 = vld [vmem:[#allocation11_spill] sm:$0xff]  ;;  %v1288_v31 = vadd.f32 %v1794_v50, %v1223_v48  ;;  %v1416_v48 = vld [vmem:[%s218_s29] sm:$0xff] }
 0x12d   : > { %v1791_v46 = vadd.f32 %v2410_v41, %v2409_v36  ;;  %v1797_v33 = vadd.f32 %v1796_v59, %v1795_v40  ;;  %v1417_v50 = vld [vmem:[%s218_s29 + $0x8] sm:$0xff] }
 0x12e   : > { %v1828_v14 = vpop.f32.mrf.mxu0  ;;  %v1226_v17 = vadd.f32 %v1757_v39, %v1161_v23 }
 0x12f   : > { %v1832_v21 = vpop.f32.mrf.mxu1  ;;  %v2344_v56 = vadd.f32 %v1828_v14, %v1272_v43  ;;  %v1283_v53 = vadd.f32 %v1791_v46, %v1218_v32 }
 0x130   : > { %v1328_v11 = vpop.f32.mrf.mxu0  ;;  %v1291_v62 = vadd.f32 %v1797_v33, %v1226_v17  ;;  %v1353_v8 = vadd.f32 %v1832_v21, %v1288_v31 }
 0x131   : > { %v1344_v28 = vpop.f32.mrf.mxu1  ;;  %v2340_v44 = vadd.f32 %v1328_v11, %v1264_v9  ;;  %v1375_v57 = vmul.f32 %v2344_v56, %v2344_v56 }
 0x132   : > { %v1829_v42 = vpop.f32.mrf.mxu0  ;;  %v2358_v60 = vadd.f32 %v1344_v28, %v1280_v47  ;;  %v1379_v20 = vmul.f32 %v1353_v8, %v1353_v8  ;;  %v1418_v47 = vld [vmem:[%s218_s29 + $0x10] sm:$0xff] }
 0x133   : > { %v1833_v52 = vpop.f32.mrf.mxu1  ;;  %v1373_v49 = vmul.f32 %v2340_v44, %v2340_v44  ;;  %v2350_v51 = vadd.f32 %v1829_v42, %v1275_v58 }
 0x134   : > { %v1331_v54 = vpop.f32.mrf.mxu0  ;;  %v1377_v10 = vmul.f32 %v2358_v60, %v2358_v60  ;;  %v1356_v16 = vadd.f32 %v1833_v52, %v1291_v62 }
 0x135   : > { %v2346_v45 = vadd.f32 %v1331_v54, %v1267_v25  ;;  %v1347_v55 = vpop.f32.mrf.mxu1  ;;  %v1376_v0 = vmul.f32 %v2350_v51, %v2350_v51 }
 0x136   : > { %v1348_v4 = vadd.f32 %v1347_v55, %v1283_v53  ;;  %v1380_v22 = vmul.f32 %v1356_v16, %v1356_v16  ;;  %v1421_v53 = vld [vmem:[%s218_s29 + $0x28] sm:$0xff]  ;;  %v1423_v55 = vld [vmem:[%s218_s29 + $0x38] sm:$0xff] }
 0x137   : > { %v1359_v34 = vadd.f32 %v2346_v45, %v2340_v44  ;;  %v1374_v19 = vmul.f32 %v2346_v45, %v2346_v45 }
 0x138   : > { %v1378_v63 = vmul.f32 %v1348_v4, %v1348_v4 }
 0x139   : > { %v1360_v40 = vadd.f32 %v1359_v34, %v2344_v56  ;;  %v1381_v59 = vadd.f32 %v1374_v19, %v1373_v49  ;;  %v1419_v49 = vld [vmem:[%s218_s29 + $0x18] sm:$0xff]  ;;  %v1420_v34 = vld [vmem:[%s218_s29 + $0x20] sm:$0xff] }
 0x13b   : > { %v1382_v2 = vadd.f32 %v1381_v59, %v1375_v57  ;;  %v1361_v6 = vadd.f32 %v1360_v40, %v2350_v51 }
 0x13d   : > { %v1362_v12 = vadd.f32 %v1361_v6, %v2358_v60  ;;  %v1383_v14 = vadd.f32 %v1382_v2, %v1376_v0 }
 0x13f   : > { %v1363_v61 = vadd.f32 %v1362_v12, %v1348_v4  ;;  %v1384_v18 = vadd.f32 %v1383_v14, %v1377_v10 }
 0x141   : > { %v1364_v1 = vadd.f32 %v1363_v61, %v1353_v8  ;;  %v1385_v3 = vadd.f32 %v1384_v18, %v1378_v63 }
 0x143   : > { %v1365_v5 = vadd.f32 %v1364_v1, %v1356_v16  ;;  %v1386_v7 = vadd.f32 %v1385_v3, %v1379_v20 }
 0x145   : > { %v1366_v11 = vrot.slane %v1365_v5, 4  ;;  %v1387_v13 = vadd.f32 %v1386_v7, %v1380_v22 }
 0x147   : > { %v1367_v15 = vadd.f32 %v1366_v11, %v1365_v5  ;;  %v1388_v21 = vrot.slane %v1387_v13, 4 }
 0x149   : > { %v1368_v24 = vrot.slane %v1367_v15, 2  ;;  %v1389_v26 = vadd.f32 %v1388_v21, %v1387_v13 }
 0x14b   : > { %v1369_v27 = vadd.f32 %v1368_v24, %v1367_v15  ;;  %v1390_v9 = vrot.slane %v1389_v26, 2 }
 0x14d   : > { %v1370_v28 = vrot.slane %v1369_v27, 1  ;;  %v1391_v29 = vadd.f32 %v1390_v9, %v1389_v26 }
 0x14f   : > { %v1371_v30 = vadd.f32 %v1370_v28, %v1369_v27  ;;  %v1392_v35 = vrot.slane %v1391_v29, 1 }
 0x151   : > { %v1372_v37 = vmul.f32 0.015625, %v1371_v30  ;;  %v1393_v38 = vadd.f32 %v1392_v35, %v1391_v29 }
 0x153   : > { %v1394_v39 = vmul.f32 0.015625, %v1393_v38  ;;  %v1395_v42 = vmul.f32 %v1372_v37, %v1372_v37  ;;  %v1398_v32 = vsub.f32 %v2340_v44, %v1372_v37  ;;  %v1399_v36 = vsub.f32 %v2346_v45, %v1372_v37 }
 0x154   : > { %v1400_v41 = vsub.f32 %v2344_v56, %v1372_v37  ;;  %v1401_v46 = vsub.f32 %v2350_v51, %v1372_v37  ;;  %v1402_v54 = vsub.f32 %v2358_v60, %v1372_v37  ;;  %v1403_v58 = vsub.f32 %v1348_v4, %v1372_v37  ;;  %v1422_v56 = vld [vmem:[%s218_s29 + $0x30] sm:$0xff] }
 0x155   : > { %v1396_v23 = vsub.f32 %v1394_v39, %v1395_v42  ;;  %v1404_v17 = vsub.f32 %v1353_v8, %v1372_v37  ;;  %v1405_v33 = vsub.f32 %v1356_v16, %v1372_v37 }
 0x157   : > { %v1397_v43 = vmax.f32 %v1396_v23, 0.0 }
 0x159   : > { %v1406_v25 = vadd.f32 1e-05, %v1397_v43 }
 0x15b   : > { %1983 = vrsqrt.f32 %v1406_v25 }
 0x168   : > { %v1984_v52 = vpop.eup %1983 }
 0x169   : > { %v1408_v19 = vmul.f32 %v1984_v52, %v1398_v32  ;;  %v1409_v44 = vmul.f32 %v1984_v52, %v1399_v36  ;;  %v1410_v31 = vmul.f32 %v1984_v52, %v1400_v41  ;;  %v1411_v45 = vmul.f32 %v1984_v52, %v1401_v46 }
 0x16a   : > { %v1412_v51 = vmul.f32 %v1984_v52, %v1402_v54  ;;  %v1413_v57 = vmul.f32 %v1984_v52, %v1403_v58  ;;  %v1414_v40 = vmul.f32 %v1984_v52, %v1404_v17  ;;  %v1415_v59 = vmul.f32 %v1984_v52, %v1405_v33 }
 0x16b   : > { %v1424_v62 = vadd.f32 %v1416_v48, %v1408_v19  ;;  %v1425_v60 = vadd.f32 %v1417_v50, %v1409_v44  ;;  %v1426_v0 = vadd.f32 %v1418_v47, %v1410_v31  ;;  %v1427_v2 = vadd.f32 %v1419_v49, %v1411_v45 }
 0x16c   : > { %v1428_v4 = vadd.f32 %v1420_v34, %v1412_v51  ;;  %v1429_v6 = vadd.f32 %v1421_v53, %v1413_v57  ;;  %v1430_v8 = vadd.f32 %v1422_v56, %v1414_v40  ;;  %v1431_v10 = vadd.f32 %v1423_v55, %v1415_v59 }
 0x16d   : > { %v1432_v12 = vmax.f32 %v1424_v62, 0.0  ;;  %v1433_v14 = vmax.f32 %v1425_v60, 0.0  ;;  %v1434_v16 = vmax.f32 %v1426_v0, 0.0  ;;  %v1435_v61 = vmax.f32 %v1427_v2, 0.0 }
 0x16e   : > { %v1436_v63 = vmax.f32 %v1428_v4, 0.0  ;;  %v1437_v18 = vmax.f32 %v1429_v6, 0.0  ;;  %v1438_v20 = vmax.f32 %v1430_v8, 0.0  ;;  %v1439_v1 = vmax.f32 %v1431_v10, 0.0 }
 0x16f   : > { %1440 = vst [vmem:[%s224_s16] sm:$0xff] %v1432_v12  ;;  %1441 = vst [vmem:[%s224_s16 + $0x8] sm:$0xff] %v1433_v14 }
 0x170   : > { %1442 = vst [vmem:[%s224_s16 + $0x10] sm:$0xff] %v1434_v16  ;;  %1443 = vst [vmem:[%s224_s16 + $0x18] sm:$0xff] %v1435_v61 }
 0x171   : > { %1444 = vst [vmem:[%s224_s16 + $0x20] sm:$0xff] %v1436_v63  ;;  %1445 = vst [vmem:[%s224_s16 + $0x28] sm:$0xff] %v1437_v18 }
 0x172   : > { %1446 = vst [vmem:[%s224_s16 + $0x30] sm:$0xff] %v1438_v20  ;;  %1447 = vst [vmem:[%s224_s16 + $0x38] sm:$0xff] %v1439_v1 }
 0x173 PF: > { %s14_s15 = sadd.s32 1, %s1991_s15  }
 0x174   : > { %p11_p4 = scmp.ge.s32.totalorder %s14_s15, 4  }
 0x176   :  { %13 = sbr.rel (!%p11_p4) target bundleno = 1 (0x1), region = 69 }

// kernel: forward.19
= control target key start
LH: loop header
LB: loop body
LE: loop exit
PB: predicated region body
PF: predicated region fallthrough
CT: control target
= control target key end

     0   :  { %s1885_s12 = smov 0   ;;  %s2360_s0 = inlined_call_operand.vmem [shape: bf16[32,1152], index: 0, kind: input, shape index: {}]   ;;  %s2361_s1 = inlined_call_operand.vmem [shape: bf16[1152,256], index: 1, kind: input, shape index: {}]   ;;  %s2362_s2 = inlined_call_operand.vmem [shape: f32[1,256], index: 2, kind: input, shape index: {}]   ;;  %s2363_s3 = inlined_call_operand.vmem [shape: f32[32,256], index: 3, kind: output, shape index: {}]  }
   0x1 LB: > { %s1447_s13 = sadd.s32 4294967295, %s1862_s12   ;;  %p1451_p0 = scmp.ge.s32.totalorder %s1862_s12, 1  ;;  %s1862_s12 = sphi %s1885_s12, %s13_s12  }
   0x2   : > { %p139_p1 = scmp.lt.s32.totalorder %s1862_s12, 3 }
   0x4   : > { %p140_p2 = pnand %p1451_p0, %p139_p1 }
   0x5   : > { %s1452_s22 = sshll.u32 (!%p140_p2), %s1447_s13, 1 }
   0x6   : > { %143 = sbr.rel (%p140_p2) target bundleno = 416 (0x1a0), region = 32  ;;  %p166_p3 = scmp.lt.s32.totalorder (!%p140_p2), %s1452_s22, 3 }
   0xb   : > { %v1623_v0 = vld [vmem:[%s2361_s1 + $0x74] ss:$8 sps:$4 sm:$0xff]   ;;  %v1625_v1 = vld [vmem:[%s2361_s1 + $0x70] ss:$8 sps:$4 sm:$0xff]   ;;  %v1629_v4 = vld [vmem:[%s2361_s1 + $0x64] ss:$8 sps:$4 sm:$0xff]  }
   0xc   : > { %1112 = vmatprep.subr.bf16.mxu0 %v1623_v0  ;;  %v1626_v2 = vld [vmem:[%s2361_s1 + $0x174] ss:$8 sps:$4 sm:$0xff]   ;;  %v1628_v3 = vld [vmem:[%s2361_s1 + $0x170] ss:$8 sps:$4 sm:$0xff]   ;;  %v1631_v5 = vld [vmem:[%s2361_s1 + $0x60] ss:$8 sps:$4 sm:$0xff]  }
   0xd   : > { %1113 = vmatpush1.bf16.msra.mxu0 %v1625_v1  ;;  %1155 = vmatprep.subr.bf16.mxu1 %v1626_v2  ;;  %v1632_v6 = vld [vmem:[%s2361_s1 + $0x164] ss:$8 sps:$4 sm:$0xff]   ;;  %v1634_v7 = vld [vmem:[%s2361_s1 + $0x160] ss:$8 sps:$4 sm:$0xff]   ;;  %v1635_v8 = vld [vmem:[%s2361_s1 + $0x54] ss:$8 sps:$4 sm:$0xff]  }
   0xe   : > { %1156 = vmatpush1.bf16.msra.mxu1 %v1628_v3  ;;  %1114 = vmatprep.subr.bf16.mxu0 %v1629_v4  ;;  %v1637_v9 = vld [vmem:[%s2361_s1 + $0x50] ss:$8 sps:$4 sm:$0xff]   ;;  %v1638_v10 = vld [vmem:[%s2361_s1 + $0x154] ss:$8 sps:$4 sm:$0xff]   ;;  %v1641_v11 = vld [vmem:[%s2361_s1 + $0x44] ss:$8 sps:$4 sm:$0xff]  }
   0xf   : > { %1157 = vmatprep.subr.bf16.mxu1 %v1632_v6  ;;  %v1640_v12 = vld [vmem:[%s2361_s1 + $0x150] ss:$8 sps:$4 sm:$0xff]   ;;  %v1644_v13 = vld [vmem:[%s2361_s1 + $0x144] ss:$8 sps:$4 sm:$0xff]   ;;  %v1643_v14 = vld [vmem:[%s2361_s1 + $0x40] ss:$8 sps:$4 sm:$0xff]  }
  0x10   : > { %v1647_v15 = vld [vmem:[%s2361_s1 + $0x34] ss:$8 sps:$4 sm:$0xff]   ;;  %v1646_v16 = vld [vmem:[%s2361_s1 + $0x140] ss:$8 sps:$4 sm:$0xff]   ;;  %v1649_v18 = vld [vmem:[%s2361_s1 + $0x30] ss:$8 sps:$4 sm:$0xff]  }
  0x11   : > { %1115 = vmatpush1.bf16.msra.mxu0 %v1631_v5  ;;  %v1650_v17 = vld [vmem:[%s2361_s1 + $0x134] ss:$8 sps:$4 sm:$0xff]   ;;  %v1653_v19 = vld [vmem:[%s2361_s1 + $0x24] ss:$8 sps:$4 sm:$0xff]   ;;  %v1652_v20 = vld [vmem:[%s2361_s1 + $0x130] ss:$8 sps:$4 sm:$0xff]  }
  0x12   : > { %1116 = vmatprep.subr.bf16.mxu0 %v1635_v8  ;;  %1158 = vmatpush1.bf16.msra.mxu1 %v1634_v7  ;;  %v1656_v21 = vld [vmem:[%s2361_s1 + $0x124] ss:$8 sps:$4 sm:$0xff]   ;;  %v1655_v22 = vld [vmem:[%s2361_s1 + $0x20] ss:$8 sps:$4 sm:$0xff]   ;;  %v1659_v23 = vld [vmem:[%s2361_s1 + $0x14] ss:$8 sps:$4 sm:$0xff]  }
  0x13   : > { %1159 = vmatprep.subr.bf16.mxu1 %v1638_v10  ;;  %v1658_v24 = vld [vmem:[%s2361_s1 + $0x120] ss:$8 sps:$4 sm:$0xff]   ;;  %v1662_v25 = vld [vmem:[%s2361_s1 + $0x114] ss:$8 sps:$4 sm:$0xff]   ;;  %v1661_v26 = vld [vmem:[%s2361_s1 + $0x10] ss:$8 sps:$4 sm:$0xff]  }
  0x14   : > { %v1665_v27 = vld [vmem:[%s2361_s1 + $0x4] ss:$8 sps:$4 sm:$0xff]   ;;  %v1664_v28 = vld [vmem:[%s2361_s1 + $0x110] ss:$8 sps:$4 sm:$0xff]   ;;  %v1667_v30 = vld [vmem:[%s2361_s1] ss:$8 sps:$4 sm:$0xff]  }
  0x15   : > { %1117 = vmatpush1.bf16.msra.mxu0 %v1637_v9  ;;  %v1668_v29 = vld [vmem:[%s2361_s1 + $0x104] ss:$8 sps:$4 sm:$0xff]   ;;  %v1671_v31 = vld [vmem:[%s2361_s1 + $0xf4] ss:$8 sps:$4 sm:$0xff]   ;;  %v1670_v32 = vld [vmem:[%s2361_s1 + $0x100] ss:$8 sps:$4 sm:$0xff]  }
  0x16   : > { %1118 = vmatprep.subr.bf16.mxu0 %v1641_v11  ;;  %1160 = vmatpush1.bf16.msra.mxu1 %v1640_v12  ;;  %v1674_v33 = vld [vmem:[%s2361_s1 + $0x1f4] ss:$8 sps:$4 sm:$0xff]   ;;  %v1673_v34 = vld [vmem:[%s2361_s1 + $0xf0] ss:$8 sps:$4 sm:$0xff]   ;;  %v1677_v35 = vld [vmem:[%s2361_s1 + $0xe4] ss:$8 sps:$4 sm:$0xff]  }
  0x17   : > { %1161 = vmatprep.subr.bf16.mxu1 %v1644_v13  ;;  %s2365_s22 = smov (!%p166_p3, %s1452_s22), 3  ;;  %v1676_v36 = vld [vmem:[%s2361_s1 + $0x1f0] ss:$8 sps:$4 sm:$0xff]   ;;  %v1680_v37 = vld [vmem:[%s2361_s1 + $0x1e4] ss:$8 sps:$4 sm:$0xff]  }
  0x18   : > { %v1679_v38 = vld [vmem:[%s2361_s1 + $0xe0] ss:$8 sps:$4 sm:$0xff]   ;;  %v1683_v39 = vld [vmem:[%s2361_s1 + $0xd4] ss:$8 sps:$4 sm:$0xff]   ;;  %s1613_s19 = smul.u32 36, %s2365_s22 }
  0x19   : > { %1119 = vmatpush1.bf16.msra.mxu0 %v1643_v14  ;;  %v1682_v40 = vld [vmem:[%s2361_s1 + $0x1e0] ss:$8 sps:$4 sm:$0xff]   ;;  %v1686_v41 = vld [vmem:[%s2361_s1 + $0x1d4] ss:$8 sps:$4 sm:$0xff]   ;;  %v1685_v42 = vld [vmem:[%s2361_s1 + $0xd0] ss:$8 sps:$4 sm:$0xff]  }
  0x1a   : > { %1120 = vmatprep.subr.bf16.mxu0 %v1647_v15  ;;  %1162 = vmatpush1.bf16.msra.mxu1 %v1646_v16  ;;  %v1689_v43 = vld [vmem:[%s2361_s1 + $0xc4] ss:$8 sps:$4 sm:$0xff]   ;;  %s2033_s13 = scalar_lea.vmem %s2360_s0, %s1613_s19  ;;  %v1688_v44 = vld [vmem:[%s2361_s1 + $0x1d0] ss:$8 sps:$4 sm:$0xff]   ;;  %v1691_v46 = vld [vmem:[%s2361_s1 + $0xc0] ss:$8 sps:$4 sm:$0xff]  }
  0x1b   : > { %1163 = vmatprep.subr.bf16.mxu1 %v1650_v17  ;;  %v1692_v45 = vld [vmem:[%s2361_s1 + $0x1c4] ss:$8 sps:$4 sm:$0xff]   ;;  %v1695_v48 = vld [vmem:[%s2361_s1 + $0xb4] ss:$8 sps:$4 sm:$0xff]   ;;  %v1694_v49 = vld [vmem:[%s2361_s1 + $0x1c0] ss:$8 sps:$4 sm:$0xff]  }
  0x1c   : > { %v1720_v47 = vld [vmem:[%s2033_s13 + $0x4] ss:$36 sps:$4 sm:$0xff]   ;;  %v1698_v50 = vld [vmem:[%s2361_s1 + $0x1b4] ss:$8 sps:$4 sm:$0xff]   ;;  %v1727_v51 = vld [vmem:[%s2033_s13 + $0xc] ss:$36 sps:$4 sm:$0xff]  }
  0x1d   : > { %1121 = vmatpush1.bf16.msra.mxu0 %v1649_v18  ;;  %1144 = vmatprep.mubr.bf16.mxu0 %v1720_v47  ;;  %v1697_v52 = vld [vmem:[%s2361_s1 + $0xb0] ss:$8 sps:$4 sm:$0xff]   ;;  %v1701_v53 = vld [vmem:[%s2361_s1 + $0xa4] ss:$8 sps:$4 sm:$0xff]   ;;  %v1703_v56 = vld [vmem:[%s2361_s1 + $0xa0] ss:$8 sps:$4 sm:$0xff]  }
  0x1e   : > { %1122 = vmatprep.subr.bf16.mxu0 %v1653_v19  ;;  %1164 = vmatpush1.bf16.msra.mxu1 %v1652_v20  ;;  %v1700_v54 = vld [vmem:[%s2361_s1 + $0x1b0] ss:$8 sps:$4 sm:$0xff]   ;;  %v1704_v55 = vld [vmem:[%s2361_s1 + $0x1a4] ss:$8 sps:$4 sm:$0xff]   ;;  %v1707_v57 = vld [vmem:[%s2361_s1 + $0x94] ss:$8 sps:$4 sm:$0xff]  }
  0x1f   : > { %1165 = vmatprep.subr.bf16.mxu1 %v1656_v21  ;;  %1187 = vmatprep.mubr.bf16.mxu1 %v1727_v51  ;;  %v1706_v58 = vld [vmem:[%s2361_s1 + $0x1a0] ss:$8 sps:$4 sm:$0xff]   ;;  %v1710_v59 = vld [vmem:[%s2361_s1 + $0x194] ss:$8 sps:$4 sm:$0xff]   ;;  %v1709_v60 = vld [vmem:[%s2361_s1 + $0x90] ss:$8 sps:$4 sm:$0xff]  }
  0x20   : > { %v1713_v61 = vld [vmem:[%s2361_s1 + $0x84] ss:$8 sps:$4 sm:$0xff]   ;;  %v1712_v62 = vld [vmem:[%s2361_s1 + $0x190] ss:$8 sps:$4 sm:$0xff]   ;;  %v1715_v0 = vld [vmem:[%s2361_s1 + $0x80] ss:$8 sps:$4 sm:$0xff]  }
  0x21   : > { %1123 = vmatpush1.bf16.msra.mxu0 %v1655_v22  ;;  %v1716_v63 = vld [vmem:[%s2361_s1 + $0x184] ss:$8 sps:$4 sm:$0xff]   ;;  %v1724_v1 = vld [vmem:[%s2361_s1 + $0x274] ss:$8 sps:$4 sm:$0xff]   ;;  %v1721_v2 = vld [vmem:[%s2361_s1 + $0x180] ss:$8 sps:$4 sm:$0xff]  }
  0x22   : > { %1124 = vmatprep.subr.bf16.mxu0 %v1659_v23  ;;  %1166 = vmatpush1.bf16.msra.mxu1 %v1658_v24  ;;  %v1718_v3 = vld [vmem:[%s2033_s13] ss:$36 sps:$4 sm:$0xff]   ;;  %v1730_v4 = vld [vmem:[%s2361_s1 + $0x374] ss:$8 sps:$4 sm:$0xff]   ;;  %v1722_v5 = vld [vmem:[%s2361_s1 + $0x270] ss:$8 sps:$4 sm:$0xff]  }
  0x23   : > { %1167 = vmatprep.subr.bf16.mxu1 %v1662_v25  ;;  %v1725_v6 = vld [vmem:[%s2033_s13 + $0x8] ss:$36 sps:$4 sm:$0xff]   ;;  %v1728_v8 = vld [vmem:[%s2361_s1 + $0x370] ss:$8 sps:$4 sm:$0xff]   ;;  %v1739_v11 = vld [vmem:[%s2361_s1 + $0x254] ss:$8 sps:$4 sm:$0xff]  }
  0x24   : > { %v1733_v7 = vld [vmem:[%s2361_s1 + $0x264] ss:$8 sps:$4 sm:$0xff]   ;;  %v1731_v10 = vld [vmem:[%s2361_s1 + $0x260] ss:$8 sps:$4 sm:$0xff]   ;;  %v1742_v13 = vld [vmem:[%s2361_s1 + $0x354] ss:$8 sps:$4 sm:$0xff]  }
  0x25   : > { %1125 = vmatpush1.bf16.msra.mxu0 %v1661_v26  ;;  %v1736_v9 = vld [vmem:[%s2361_s1 + $0x364] ss:$8 sps:$4 sm:$0xff]   ;;  %v1734_v12 = vld [vmem:[%s2361_s1 + $0x360] ss:$8 sps:$4 sm:$0xff]   ;;  %v1737_v14 = vld [vmem:[%s2361_s1 + $0x250] ss:$8 sps:$4 sm:$0xff]  }
  0x26   : > { %1126 = vmatprep.subr.bf16.mxu0 %v1665_v27  ;;  %1168 = vmatpush1.bf16.msra.mxu1 %v1664_v28  ;;  %v1745_v15 = vld [vmem:[%s2361_s1 + $0x244] ss:$8 sps:$4 sm:$0xff]   ;;  %v1740_v16 = vld [vmem:[%s2361_s1 + $0x350] ss:$8 sps:$4 sm:$0xff]   ;;  %v1743_v18 = vld [vmem:[%s2361_s1 + $0x240] ss:$8 sps:$4 sm:$0xff]  }
  0x27   : > { %1169 = vmatprep.subr.bf16.mxu1 %v1668_v29  ;;  %v1748_v17 = vld [vmem:[%s2361_s1 + $0x344] ss:$8 sps:$4 sm:$0xff]   ;;  %v1751_v19 = vld [vmem:[%s2361_s1 + $0x234] ss:$8 sps:$4 sm:$0xff]   ;;  %v1746_v20 = vld [vmem:[%s2361_s1 + $0x340] ss:$8 sps:$4 sm:$0xff]  }
  0x28   : > { %v1754_v21 = vld [vmem:[%s2361_s1 + $0x334] ss:$8 sps:$4 sm:$0xff]   ;;  %v1749_v22 = vld [vmem:[%s2361_s1 + $0x230] ss:$8 sps:$4 sm:$0xff]   ;;  %v1757_v23 = vld [vmem:[%s2361_s1 + $0x224] ss:$8 sps:$4 sm:$0xff]  }
  0x29   : > { %1127 = vmatpush1.bf16.msra.mxu0 %v1667_v30  ;;  %v1752_v24 = vld [vmem:[%s2361_s1 + $0x330] ss:$8 sps:$4 sm:$0xff]   ;;  %v1760_v25 = vld [vmem:[%s2361_s1 + $0x324] ss:$8 sps:$4 sm:$0xff]   ;;  %v1755_v26 = vld [vmem:[%s2361_s1 + $0x220] ss:$8 sps:$4 sm:$0xff]  }
  0x2a   : > { %1128 = vmatprep.subr.bf16.mxu0 %v1671_v31  ;;  %1170 = vmatpush1.bf16.msra.mxu1 %v1670_v32  ;;  %v1763_v27 = vld [vmem:[%s2361_s1 + $0x214] ss:$8 sps:$4 sm:$0xff]   ;;  %v1758_v28 = vld [vmem:[%s2361_s1 + $0x320] ss:$8 sps:$4 sm:$0xff]   ;;  %v1761_v30 = vld [vmem:[%s2361_s1 + $0x210] ss:$8 sps:$4 sm:$0xff]  }
  0x2b   : > { %1171 = vmatprep.subr.bf16.mxu1 %v1674_v33  ;;  %v1766_v29 = vld [vmem:[%s2361_s1 + $0x314] ss:$8 sps:$4 sm:$0xff]   ;;  %v1764_v31 = vld [vmem:[%s2361_s1 + $0x310] ss:$8 sps:$4 sm:$0xff]   ;;  %v1769_v32 = vld [vmem:[%s2361_s1 + $0x204] ss:$8 sps:$4 sm:$0xff]  }
  0x2c   : > { %v1823_v33 = vld [vmem:[%s2033_s13 + $0x14] ss:$36 sps:$4 sm:$0xff]   ;;  %v1796_v51 = vld [vmem:[%s2361_s1 + $0x3c4] ss:$8 sps:$4 sm:$0xff]  }
  0x2d   : > { %1129 = vmatpush2.bf16.msra.mxu0 %v1673_v34  ;;  %v1772_v34 = vld [vmem:[%s2361_s1 + $0x304] ss:$8 sps:$4 sm:$0xff]   ;;  %v1790_v47 = vld [vmem:[%s2361_s1 + $0x3d4] ss:$8 sps:$4 sm:$0xff]  }
  0x2e   : > { %1130 = vmatprep.subr.bf16.mxu0 %v1677_v35  ;;  %1172 = vmatpush2.bf16.msra.mxu1 %v1676_v36  ;;  %v1767_v35 = vld [vmem:[%s2361_s1 + $0x200] ss:$8 sps:$4 sm:$0xff]  }
  0x2f   : > { %1173 = vmatprep.subr.bf16.mxu1 %v1680_v37  ;;  %v1829_v36 = vld [vmem:[%s2033_s13 + $0x1c] ss:$36 sps:$4 sm:$0xff]  }
  0x30   : > { %v1775_v37 = vld [vmem:[%s2361_s1 + $0x2f4] ss:$8 sps:$4 sm:$0xff]  }
  0x31   : > { %1131 = vmatpush2.bf16.msra.mxu0 %v1679_v38  ;;  %v1770_v38 = vld [vmem:[%s2361_s1 + $0x300] ss:$8 sps:$4 sm:$0xff]  }
  0x32   : > { %1132 = vmatprep.subr.bf16.mxu0 %v1683_v39  ;;  %1174 = vmatpush2.bf16.msra.mxu1 %v1682_v40  ;;  %v1778_v39 = vld [vmem:[%s2361_s1 + $0x3f4] ss:$8 sps:$4 sm:$0xff]   ;;  %v1773_v40 = vld [vmem:[%s2361_s1 + $0x2f0] ss:$8 sps:$4 sm:$0xff]  }
  0x33   : > { %1175 = vmatprep.subr.bf16.mxu1 %v1686_v41  ;;  %v1781_v41 = vld [vmem:[%s2361_s1 + $0x2e4] ss:$8 sps:$4 sm:$0xff]  }
  0x35   : > { %1133 = vmatpush2.bf16.msra.mxu0 %v1685_v42  ;;  %v1776_v42 = vld [vmem:[%s2361_s1 + $0x3f0] ss:$8 sps:$4 sm:$0xff]  }
  0x36   : > { %1134 = vmatprep.subr.bf16.mxu0 %v1689_v43  ;;  %1176 = vmatpush2.bf16.msra.mxu1 %v1688_v44  ;;  %v1784_v43 = vld [vmem:[%s2361_s1 + $0x3e4] ss:$8 sps:$4 sm:$0xff]   ;;  %v1779_v44 = vld [vmem:[%s2361_s1 + $0x2e0] ss:$8 sps:$4 sm:$0xff]  }
  0x37   : > { %1177 = vmatprep.subr.bf16.mxu1 %v1692_v45  ;;  %v1787_v45 = vld [vmem:[%s2361_s1 + $0x2d4] ss:$8 sps:$4 sm:$0xff]  }
  0x39   : > { %1135 = vmatpush2.bf16.msra.mxu0 %v1691_v46  ;;  %v1782_v46 = vld [vmem:[%s2361_s1 + $0x3e0] ss:$8 sps:$4 sm:$0xff]  }
  0x3a   : > { %1136 = vmatprep.subr.bf16.mxu0 %v1695_v48  ;;  %1178 = vmatpush2.bf16.msra.mxu1 %v1694_v49  ;;  %v1785_v48 = vld [vmem:[%s2361_s1 + $0x2d0] ss:$8 sps:$4 sm:$0xff]   ;;  %v1793_v49 = vld [vmem:[%s2361_s1 + $0x2c4] ss:$8 sps:$4 sm:$0xff]  }
  0x3b   : > { %1179 = vmatprep.subr.bf16.mxu1 %v1698_v50  ;;  %v1788_v50 = vld [vmem:[%s2361_s1 + $0x3d0] ss:$8 sps:$4 sm:$0xff]  }
  0x3d   : > { %1137 = vmatpush2.bf16.msra.mxu0 %v1697_v52  ;;  %v1791_v52 = vld [vmem:[%s2361_s1 + $0x2c0] ss:$8 sps:$4 sm:$0xff]  }
  0x3e   : > { %1138 = vmatprep.subr.bf16.mxu0 %v1701_v53  ;;  %1180 = vmatpush2.bf16.msra.mxu1 %v1700_v54  ;;  %v1799_v53 = vld [vmem:[%s2361_s1 + $0x2b4] ss:$8 sps:$4 sm:$0xff]   ;;  %v1794_v54 = vld [vmem:[%s2361_s1 + $0x3c0] ss:$8 sps:$4 sm:$0xff]  }
  0x3f   : > { %1181 = vmatprep.subr.bf16.mxu1 %v1704_v55  ;;  %v1802_v55 = vld [vmem:[%s2361_s1 + $0x3b4] ss:$8 sps:$4 sm:$0xff]  }
  0x41   : > { %1139 = vmatpush2.bf16.msra.mxu0 %v1703_v56  ;;  %v1797_v56 = vld [vmem:[%s2361_s1 + $0x2b0] ss:$8 sps:$4 sm:$0xff]  }
  0x42   : > { %1140 = vmatprep.subr.bf16.mxu0 %v1707_v57  ;;  %1182 = vmatpush2.bf16.msra.mxu1 %v1706_v58  ;;  %v1805_v57 = vld [vmem:[%s2361_s1 + $0x2a4] ss:$8 sps:$4 sm:$0xff]   ;;  %v1800_v58 = vld [vmem:[%s2361_s1 + $0x3b0] ss:$8 sps:$4 sm:$0xff]  }
  0x43   : > { %1183 = vmatprep.subr.bf16.mxu1 %v1710_v59  ;;  %v1808_v59 = vld [vmem:[%s2361_s1 + $0x3a4] ss:$8 sps:$4 sm:$0xff]  }
  0x45   : > { %1141 = vmatpush2.bf16.msra.mxu0 %v1709_v60  ;;  %v1803_v60 = vld [vmem:[%s2361_s1 + $0x2a0] ss:$8 sps:$4 sm:$0xff]  }
  0x46   : > { %1142 = vmatprep.subr.bf16.mxu0 %v1713_v61  ;;  %1184 = vmatpush2.bf16.msra.mxu1 %v1712_v62  ;;  %v1811_v61 = vld [vmem:[%s2361_s1 + $0x294] ss:$8 sps:$4 sm:$0xff]   ;;  %v1806_v62 = vld [vmem:[%s2361_s1 + $0x3a0] ss:$8 sps:$4 sm:$0xff]  }
  0x47   : > { %1185 = vmatprep.subr.bf16.mxu1 %v1716_v63  ;;  %v1814_v63 = vld [vmem:[%s2361_s1 + $0x394] ss:$8 sps:$4 sm:$0xff]  }
  0x49   : > { %1143 = vmatpush2.bf16.msra.mxu0 %v1715_v0  ;;  %v1809_v0 = vld [vmem:[%s2361_s1 + $0x290] ss:$8 sps:$4 sm:$0xff]  }
  0x4a   : > { %1198 = vmatprep.subr.bf16.mxu0 %v1724_v1  ;;  %1186 = vmatpush2.bf16.msra.mxu1 %v1721_v2  ;;  %v1817_v1 = vld [vmem:[%s2361_s1 + $0x284] ss:$8 sps:$4 sm:$0xff]   ;;  %v1812_v2 = vld [vmem:[%s2361_s1 + $0x390] ss:$8 sps:$4 sm:$0xff]  }
  0x4b   : > { %1241 = vmatprep.subr.bf16.mxu1 %v1730_v4  ;;  %v1815_v4 = vld [vmem:[%s2361_s1 + $0x280] ss:$8 sps:$4 sm:$0xff]  }
  0x4c   : > { %1145 = vmatmul.mubr.bf16.vlgmr.msra.gmra.mxu0 %v1718_v3  ;;  %v1820_v3 = vld [vmem:[%s2361_s1 + $0x384] ss:$8 sps:$4 sm:$0xff]  }
  0x4d   : > { %1199 = vmatpush1.bf16.msra.mxu0 %v1722_v5  ;;  %1188 = vmatmul.mubr.bf16.vlgmr.msra.gmra.mxu1 %v1725_v6  ;;  %v1826_v5 = vld [vmem:[%s2361_s1 + $0x474] ss:$8 sps:$4 sm:$0xff]   ;;  %v1818_v6 = vld [vmem:[%s2361_s1 + $0x380] ss:$8 sps:$4 sm:$0xff]  }
  0x4e   : > { %1200 = vmatprep.subr.bf16.mxu0 %v1733_v7  ;;  %1242 = vmatpush1.bf16.msra.mxu1 %v1728_v8  ;;  %v1821_v7 = vld [vmem:[%s2033_s13 + $0x10] ss:$36 sps:$4 sm:$0xff]  }
  0x4f   : > { %1243 = vmatprep.subr.bf16.mxu1 %v1736_v9  ;;  %1230 = vmatprep.mubr.bf16.mxu0 %v1823_v33  ;;  %v1824_v8 = vld [vmem:[%s2361_s1 + $0x470] ss:$8 sps:$4 sm:$0xff]  }
  0x50   : > { %1273 = vmatprep.mubr.bf16.mxu1 %v1829_v36  ;;  %v1827_v9 = vld [vmem:[%s2033_s13 + $0x18] ss:$36 sps:$4 sm:$0xff]  }
  0x51   : > { %1201 = vmatpush1.bf16.msra.mxu0 %v1731_v10  ;;  %v1832_v10 = vld [vmem:[%s2361_s1 + $0x464] ss:$8 sps:$4 sm:$0xff]  }
  0x52   : > { %1202 = vmatprep.subr.bf16.mxu0 %v1739_v11  ;;  %1244 = vmatpush1.bf16.msra.mxu1 %v1734_v12  ;;  %v1830_v11 = vld [vmem:[%s2361_s1 + $0x460] ss:$8 sps:$4 sm:$0xff]   ;;  %v1864_v12 = vmov 0  }
  0x53   : > { %1245 = vmatprep.subr.bf16.mxu1 %v1742_v13  ;;  %v1835_v13 = vld [vmem:[%s2361_s1 + $0x454] ss:$8 sps:$4 sm:$0xff]  }
  0x55   : > { %1203 = vmatpush1.bf16.msra.mxu0 %v1737_v14  ;;  %v1833_v14 = vld [vmem:[%s2361_s1 + $0x450] ss:$8 sps:$4 sm:$0xff]  }
  0x56   : > { %1204 = vmatprep.subr.bf16.mxu0 %v1745_v15  ;;  %1246 = vmatpush1.bf16.msra.mxu1 %v1740_v16  ;;  %v1838_v15 = vld [vmem:[%s2361_s1 + $0x444] ss:$8 sps:$4 sm:$0xff]   ;;  %v1836_v16 = vld [vmem:[%s2361_s1 + $0x440] ss:$8 sps:$4 sm:$0xff]  }
  0x57   : > { %1247 = vmatprep.subr.bf16.mxu1 %v1748_v17  ;;  %v1841_v17 = vld [vmem:[%s2361_s1 + $0x434] ss:$8 sps:$4 sm:$0xff]  }
  0x59   : > { %1205 = vmatpush1.bf16.msra.mxu0 %v1743_v18  ;;  %v1839_v18 = vld [vmem:[%s2361_s1 + $0x430] ss:$8 sps:$4 sm:$0xff]  }
  0x5a   : > { %1206 = vmatprep.subr.bf16.mxu0 %v1751_v19  ;;  %1248 = vmatpush1.bf16.msra.mxu1 %v1746_v20  ;;  %v1844_v19 = vld [vmem:[%s2361_s1 + $0x424] ss:$8 sps:$4 sm:$0xff]   ;;  %v1842_v20 = vld [vmem:[%s2361_s1 + $0x420] ss:$8 sps:$4 sm:$0xff]  }
  0x5b   : > { %1249 = vmatprep.subr.bf16.mxu1 %v1754_v21  ;;  %v1847_v21 = vld [vmem:[%s2361_s1 + $0x414] ss:$8 sps:$4 sm:$0xff]  }
  0x5d   : > { %1207 = vmatpush1.bf16.msra.mxu0 %v1749_v22  ;;  %v1845_v22 = vld [vmem:[%s2361_s1 + $0x410] ss:$8 sps:$4 sm:$0xff]  }
  0x5e   : > { %1208 = vmatprep.subr.bf16.mxu0 %v1757_v23  ;;  %1250 = vmatpush1.bf16.msra.mxu1 %v1752_v24  ;;  %v1850_v23 = vld [vmem:[%s2361_s1 + $0x404] ss:$8 sps:$4 sm:$0xff]   ;;  %v1848_v24 = vld [vmem:[%s2361_s1 + $0x400] ss:$8 sps:$4 sm:$0xff]  }
  0x5f   : > { %1251 = vmatprep.subr.bf16.mxu1 %v1760_v25  ;;  %v1851_v25 = vld [vmem:[%s2033_s13 + $0x20] ss:$36 sps:$4 sm:$0xff]   ;;  %s1612_s13 = sshll.u32 %s2365_s22, 4 }
  0x60   : > { %s177_s18 = scalar_lea.vmem %s2363_s3, %s1612_s13 }
  0x61   : > { %1209 = vmatpush1.bf16.msra.mxu0 %v1755_v26 }
  0x62   : > { %1210 = vmatprep.subr.bf16.mxu0 %v1763_v27  ;;  %1252 = vmatpush1.bf16.msra.mxu1 %v1758_v28  ;;  %v336_v27 = vlaneseq }
  0x63   : > { %1253 = vmatprep.subr.bf16.mxu1 %v1766_v29 }
  0x65   : > { %1211 = vmatpush1.bf16.msra.mxu0 %v1761_v30  ;;  %v337_v30 = vshrl.u32 %v336_v27, 7 }
  0x66   : > { %1212 = vmatprep.subr.bf16.mxu0 %v1769_v32  ;;  %1254 = vmatpush1.bf16.msra.mxu1 %v1764_v31 }
  0x67   : > { %1255 = vmatprep.subr.bf16.mxu1 %v1772_v34  ;;  %v338_v33 = vsub.s32 0, %v337_v30  ;;  %v334_v34 = vld [vmem:[%s2362_s2] sm:$0x3] }
  0x69   : > { %1213 = vmatpush1.bf16.msra.mxu0 %v1767_v35  ;;  %v342_v35 = vsub.s32 1, %v337_v30 }
  0x6a   : > { %1214 = vmatprep.subr.bf16.mxu0 %v1775_v37  ;;  %1256 = vmatpush1.bf16.msra.mxu1 %v1770_v38 }
  0x6b   : > { %1257 = vmatprep.subr.bf16.mxu1 %v1778_v39  ;;  %v339_v39 = vrot.slane %v334_v34, %v338_v33 }
  0x6d   : > { %1215 = vmatpush2.bf16.msra.mxu0 %v1773_v40  ;;  %v343_v40 = vrot.slane %v334_v34, %v342_v35 }
  0x6e   : > { %1216 = vmatprep.subr.bf16.mxu0 %v1781_v41  ;;  %1258 = vmatpush2.bf16.msra.mxu1 %v1776_v42 }
  0x6f   : > { %1259 = vmatprep.subr.bf16.mxu1 %v1784_v43 }
  0x71   : > { %1217 = vmatpush2.bf16.msra.mxu0 %v1779_v44 }
  0x72   : > { %1218 = vmatprep.subr.bf16.mxu0 %v1787_v45  ;;  %1260 = vmatpush2.bf16.msra.mxu1 %v1782_v46 }
  0x73   : > { %1261 = vmatprep.subr.bf16.mxu1 %v1790_v47 }
  0x75   : > { %1219 = vmatpush2.bf16.msra.mxu0 %v1785_v48 }
  0x76   : > { %1220 = vmatprep.subr.bf16.mxu0 %v1793_v49  ;;  %1262 = vmatpush2.bf16.msra.mxu1 %v1788_v50 }
  0x77   : > { %1263 = vmatprep.subr.bf16.mxu1 %v1796_v51 }
  0x79   : > { %1221 = vmatpush2.bf16.msra.mxu0 %v1791_v52 }
  0x7a   : > { %1222 = vmatprep.subr.bf16.mxu0 %v1799_v53  ;;  %1264 = vmatpush2.bf16.msra.mxu1 %v1794_v54 }
  0x7b   : > { %1265 = vmatprep.subr.bf16.mxu1 %v1802_v55 }
  0x7d   : > { %1223 = vmatpush2.bf16.msra.mxu0 %v1797_v56 }
  0x7e   : > { %1224 = vmatprep.subr.bf16.mxu0 %v1805_v57  ;;  %1266 = vmatpush2.bf16.msra.mxu1 %v1800_v58 }
  0x7f   : > { %1267 = vmatprep.subr.bf16.mxu1 %v1808_v59 }
  0x81   : > { %1225 = vmatpush2.bf16.msra.mxu0 %v1803_v60 }
  0x82   : > { %1226 = vmatprep.subr.bf16.mxu0 %v1811_v61  ;;  %1268 = vmatpush2.bf16.msra.mxu1 %v1806_v62 }
  0x83   : > { %1269 = vmatprep.subr.bf16.mxu1 %v1814_v63 }
  0x85   : > { %1227 = vmatpush2.bf16.msra.mxu0 %v1809_v0 }
  0x86   : > { %1228 = vmatprep.subr.bf16.mxu0 %v1817_v1  ;;  %1270 = vmatpush2.bf16.msra.mxu1 %v1812_v2 }
  0x87   : > { %1271 = vmatprep.subr.bf16.mxu1 %v1820_v3 }
  0x89   : > { %1229 = vmatpush2.bf16.msra.mxu0 %v1815_v4 }
  0x8a   : > { %1284 = vmatprep.subr.bf16.mxu0 %v1826_v5  ;;  %1272 = vmatpush2.bf16.msra.mxu1 %v1818_v6 }
  0x8c   : > { %1231 = vmatmul.mubr.bf16.vlgmr.msra.gmra.mxu0 %v1821_v7 }
  0x8d   : > { %1285 = vmatpush1.bf16.msra.mxu0 %v1824_v8  ;;  %1316 = vmatprep.mubr.bf16.mxu0 %v1864_v12 }
  0x8e   : > { %1274 = vmatmul.mubr.bf16.vlgmr.msra.gmra.mxu1 %v1827_v9  ;;  %1286 = vmatprep.subr.bf16.mxu0 %v1832_v10 }
  0x91   : > { %1287 = vmatpush1.bf16.msra.mxu0 %v1830_v11 }
  0x92   : > { %1288 = vmatprep.subr.bf16.mxu0 %v1835_v13 }
  0x95   : > { %1289 = vmatpush1.bf16.msra.mxu0 %v1833_v14 }
  0x96   : > { %1290 = vmatprep.subr.bf16.mxu0 %v1838_v15 }
  0x99   : > { %1291 = vmatpush1.bf16.msra.mxu0 %v1836_v16 }
  0x9a   : > { %1292 = vmatprep.subr.bf16.mxu0 %v1841_v17 }
  0x9d   : > { %1293 = vmatpush1.bf16.msra.mxu0 %v1839_v18 }
  0x9e   : > { %1294 = vmatprep.subr.bf16.mxu0 %v1844_v19 }
  0xa1   : > { %1295 = vmatpush1.bf16.msra.mxu0 %v1842_v20 }
  0xa2   : > { %1296 = vmatprep.subr.bf16.mxu0 %v1847_v21 }
  0xa5   : > { %1297 = vmatpush1.bf16.msra.mxu0 %v1845_v22 }
  0xa6   : > { %1298 = vmatprep.subr.bf16.mxu0 %v1850_v23 }
  0xa9   : > { %1299 = vmatpush1.bf16.msra.mxu0 %v1848_v24 }
  0xac   : > { %1317 = vmatmul.mubr.bf16.vlgmr.msra.gmra.mxu0 %v1851_v25 }
 0x10c   : > { %v1146_v26 = vpop.f32.mrf.mxu0 }
 0x10d   : > { %v1189_v29 = vpop.f32.mrf.mxu1  ;;  %v1147_v44 = vadd.f32 %v1146_v26, %v339_v39 }
 0x10e   : > { %v1148_v28 = vpop.f32.mrf.mxu0 }
 0x10f   : > { %v1191_v32 = vpop.f32.mrf.mxu1  ;;  %v1149_v45 = vadd.f32 %v1148_v28, %v343_v40  ;;  %v1190_v49 = vadd.f32 %v1189_v29, %v1147_v44 }
 0x110   : > { %v1150_v31 = vpop.f32.mrf.mxu0 }
 0x111   : > { %v1193_v37 = vpop.f32.mrf.mxu1  ;;  %v1151_v46 = vadd.f32 %v1150_v31, %v339_v39  ;;  %v1192_v51 = vadd.f32 %v1191_v32, %v1149_v45 }
 0x112   : > { %v1152_v36 = vpop.f32.mrf.mxu0 }
 0x113   : > { %v1195_v41 = vpop.f32.mrf.mxu1  ;;  %v1153_v50 = vadd.f32 %v1152_v36, %v343_v40  ;;  %v1194_v52 = vadd.f32 %v1193_v37, %v1151_v46 }
 0x115   : > { %v1196_v57 = vadd.f32 %v1195_v41, %v1153_v50 }
 0x14c   : > { %v1232_v38 = vpop.f32.mrf.mxu0 }
 0x14d   : > { %v1233_v53 = vadd.f32 %v1232_v38, %v1190_v49 }
 0x14e   : > { %v1234_v42 = vpop.f32.mrf.mxu0  ;;  %v1275_v43 = vpop.f32.mrf.mxu1 }
 0x14f   : > { %v1235_v54 = vadd.f32 %v1234_v42, %v1192_v51  ;;  %v1276_v60 = vadd.f32 %v1275_v43, %v1233_v53 }
 0x150   : > { %v1236_v47 = vpop.f32.mrf.mxu0  ;;  %v1277_v48 = vpop.f32.mrf.mxu1 }
 0x151   : > { %v1237_v58 = vadd.f32 %v1236_v47, %v1194_v52  ;;  %v1278_v62 = vadd.f32 %v1277_v48, %v1235_v54 }
 0x152   : > { %v1238_v55 = vpop.f32.mrf.mxu0  ;;  %v1279_v56 = vpop.f32.mrf.mxu1 }
 0x153   : > { %v1239_v61 = vadd.f32 %v1238_v55, %v1196_v57  ;;  %v1280_v1 = vadd.f32 %v1279_v56, %v1237_v58 }
 0x154   : > { %v1281_v63 = vpop.f32.mrf.mxu1 }
 0x155   : > { %v1282_v5 = vadd.f32 %v1281_v63, %v1239_v61 }
 0x16c   : > { %v1318_v59 = vpop.f32.mrf.mxu0 }
 0x16d   : > { %v1319_v2 = vadd.f32 %v1318_v59, %v1276_v60 }
 0x16e   : > { %v1320_v0 = vpop.f32.mrf.mxu0 }
 0x16f   : > { %v2347_v3 = vadd.f32 %v1320_v0, %v1278_v62  ;;  %v1343_v8 = vmul.f32 %v1319_v2, %v1319_v2 }
 0x170   : > { %v1322_v4 = vpop.f32.mrf.mxu0 }
 0x171   : > { %v1323_v6 = vadd.f32 %v1322_v4, %v1280_v1  ;;  %v1344_v12 = vmul.f32 %v2347_v3, %v2347_v3 }
 0x172   : > { %v1324_v7 = vpop.f32.mrf.mxu0 }
 0x173   : > { %v1327_v9 = vadd.f32 %v1323_v6, %v1319_v2  ;;  %v1345_v10 = vmul.f32 %v1323_v6, %v1323_v6  ;;  %v1325_v11 = vadd.f32 %v1324_v7, %v1282_v5 }
 0x175   : > { %v1328_v13 = vrot.slane %v1327_v9, 4  ;;  %v1347_v14 = vadd.f32 %v1345_v10, %v1343_v8  ;;  %v1334_v15 = vadd.f32 %v1325_v11, %v2347_v3  ;;  %v1346_v16 = vmul.f32 %v1325_v11, %v1325_v11 }
 0x177   : > { %v1329_v17 = vadd.f32 %v1328_v13, %v1327_v9  ;;  %v1348_v18 = vrot.slane %v1347_v14, 4  ;;  %v1335_v19 = vrot.slane %v1334_v15, 4  ;;  %v1354_v20 = vadd.f32 %v1346_v16, %v1344_v12 }
 0x179   : > { %v1330_v21 = vrot.slane %v1329_v17, 2  ;;  %v1349_v22 = vadd.f32 %v1348_v18, %v1347_v14  ;;  %v1336_v23 = vadd.f32 %v1335_v19, %v1334_v15  ;;  %v1355_v24 = vrot.slane %v1354_v20, 4 }
 0x17b   : > { %v1331_v25 = vadd.f32 %v1330_v21, %v1329_v17  ;;  %v1350_v26 = vrot.slane %v1349_v22, 2  ;;  %v1337_v27 = vrot.slane %v1336_v23, 2  ;;  %v1356_v28 = vadd.f32 %v1355_v24, %v1354_v20 }
 0x17d   : > { %v1332_v29 = vrot.slane %v1331_v25, 1  ;;  %v1351_v30 = vadd.f32 %v1350_v26, %v1349_v22  ;;  %v1338_v31 = vadd.f32 %v1337_v27, %v1336_v23  ;;  %v1357_v32 = vrot.slane %v1356_v28, 2 }
 0x17f   : > { %v1333_v33 = vadd.f32 %v1332_v29, %v1331_v25  ;;  %v1352_v34 = vrot.slane %v1351_v30, 1  ;;  %v1339_v35 = vrot.slane %v1338_v31, 1  ;;  %v1358_v36 = vadd.f32 %v1357_v32, %v1356_v28 }
 0x181   : > { %v1341_v37 = vmul.f32 0.0625, %v1333_v33  ;;  %v1353_v38 = vadd.f32 %v1352_v34, %v1351_v30  ;;  %v1340_v39 = vadd.f32 %v1339_v35, %v1338_v31  ;;  %v1359_v40 = vrot.slane %v1358_v36, 1 }
 0x183   : > { %v1361_v41 = vmul.f32 0.0625, %v1353_v38  ;;  %v1363_v42 = vmul.f32 %v1341_v37, %v1341_v37  ;;  %v1342_v43 = vmul.f32 0.0625, %v1340_v39  ;;  %v1360_v44 = vadd.f32 %v1359_v40, %v1358_v36 }
 0x184   : > { %v1369_v53 = vsub.f32 %v1319_v2, %v1341_v37  ;;  %v1371_v54 = vsub.f32 %v1323_v6, %v1341_v37 }
 0x185   : > { %v1365_v45 = vsub.f32 %v1361_v41, %v1363_v42  ;;  %v1362_v46 = vmul.f32 0.0625, %v1360_v44  ;;  %v1364_v47 = vmul.f32 %v1342_v43, %v1342_v43  ;;  %v1370_v58 = vsub.f32 %v2347_v3, %v1342_v43 }
 0x186   : > { %v1372_v59 = vsub.f32 %v1325_v11, %v1342_v43 }
 0x187   : > { %v1367_v48 = vmax.f32 %v1365_v45, 0.0  ;;  %v1366_v49 = vsub.f32 %v1362_v46, %v1364_v47 }
 0x189   : > { %v1373_v50 = vadd.f32 1e-05, %v1367_v48  ;;  %v1368_v51 = vmax.f32 %v1366_v49, 0.0 }
 0x18b   : > { %1852 = vrsqrt.f32 %v1373_v50  ;;  %v1374_v52 = vadd.f32 1e-05, %v1368_v51 }
 0x18d   : > { %1854 = vrsqrt.f32 %v1374_v52 }
 0x198   : > { %v1853_v55 = vpop.eup %1852 }
 0x199   : > { %v1377_v56 = vmul.f32 %v1853_v55, %v1369_v53  ;;  %v1379_v57 = vmul.f32 %v1853_v55, %v1371_v54 }
 0x19a   : > { %v1855_v60 = vpop.eup %1854 }
 0x19b   : > { %v1381_v61 = vmax.f32 %v1377_v56, 0.0  ;;  %v1383_v62 = vmax.f32 %v1379_v57, 0.0  ;;  %v1378_v63 = vmul.f32 %v1855_v60, %v1370_v58  ;;  %v1380_v0 = vmul.f32 %v1855_v60, %v1372_v59 }
 0x19d   : > { %1385 = vst [vmem:[%s177_s18] sm:$0xff] %v1381_v61  ;;  %1387 = vst [vmem:[%s177_s18 + $0x10] sm:$0xff] %v1383_v62  ;;  %v1382_v1 = vmax.f32 %v1378_v63, 0.0  ;;  %v1384_v2 = vmax.f32 %v1380_v0, 0.0 }
 0x19f   : > { %1386 = vst [vmem:[%s177_s18 + $0x8] sm:$0xff] %v1382_v1  ;;  %1388 = vst [vmem:[%s177_s18 + $0x18] sm:$0xff] %v1384_v2 }
 0x1a0 PF: > { %s13_s12 = sadd.s32 1, %s1862_s12  }
 0x1a1   : > { %p10_p4 = scmp.ge.s32.totalorder %s13_s12, 4  }
 0x1a3   :  { %12 = sbr.rel (!%p10_p4) target bundleno = 1 (0x1), region = 62 }

// kernel: forward.20
= control target key start
LH: loop header
LB: loop body
LE: loop exit
PB: predicated region body
PF: predicated region fallthrough
CT: control target
= control target key end

     0   :  { %s549_s12 = smov 0   ;;  %s627_s0 = inlined_call_operand.vmem [shape: bf16[32,128], index: 0, kind: input, shape index: {}]   ;;  %s628_s1 = inlined_call_operand.vmem [shape: bf16[128,256], index: 1, kind: input, shape index: {}]   ;;  %s629_s2 = inlined_call_operand.vmem [shape: f32[1,256], index: 2, kind: input, shape index: {}]   ;;  %s630_s3 = inlined_call_operand.vmem [shape: f32[32,256], index: 3, kind: output, shape index: {}]  }
   0x1 LB: > { %s452_s13 = sadd.s32 4294967295, %s526_s12   ;;  %p456_p0 = scmp.ge.s32.totalorder %s526_s12, 1  ;;  %s526_s12 = sphi %s549_s12, %s13_s12  }
   0x2   : > { %p138_p1 = scmp.lt.s32.totalorder %s526_s12, 3 }
   0x4   : > { %p139_p2 = pnand %p456_p0, %p138_p1 }
   0x5   : > { %s457_s16 = sshll.u32 (!%p139_p2), %s452_s13, 1 }
   0x6   : > { %142 = sbr.rel (%p139_p2) target bundleno = 286 (0x11e), region = 32  ;;  %p164_p3 = scmp.lt.s32.totalorder (!%p139_p2), %s457_s16, 3 }
   0xb   : > { %v491_v0 = vld [vmem:[%s628_s1 + $0x74] ss:$8 sps:$4 sm:$0xff]   ;;  %v493_v1 = vld [vmem:[%s628_s1 + $0x70] ss:$8 sps:$4 sm:$0xff]   ;;  %v528_v2 = vmov 0   ;;  %s632_s16 = smov (!%p164_p3, %s457_s16), 3  ;;  %v197_v18 = vlaneseq }
   0xc   : > { %325 = vmatprep.mubr.bf16.mxu0 %v528_v2  ;;  %293 = vmatprep.subr.bf16.mxu0 %v491_v0  ;;  %v494_v3 = vld [vmem:[%s628_s1 + $0x64] ss:$8 sps:$4 sm:$0xff]   ;;  %v496_v4 = vld [vmem:[%s628_s1 + $0x60] ss:$8 sps:$4 sm:$0xff]   ;;  %v497_v5 = vld [vmem:[%s628_s1 + $0x54] ss:$8 sps:$4 sm:$0xff]  }
   0xd   : > { %294 = vmatpush1.bf16.msra.mxu0 %v493_v1  ;;  %s458_s25 = sshll.u32 %s632_s16, 2  ;;  %v499_v6 = vld [vmem:[%s628_s1 + $0x50] ss:$8 sps:$4 sm:$0xff]   ;;  %v500_v7 = vld [vmem:[%s628_s1 + $0x44] ss:$8 sps:$4 sm:$0xff]   ;;  %v198_v19 = vshrl.u32 %v197_v18, 7 }
   0xe   : > { %295 = vmatprep.subr.bf16.mxu0 %v494_v3  ;;  %s167_s5 = scalar_lea.vmem %s627_s0, %s458_s25  ;;  %v502_v8 = vld [vmem:[%s628_s1 + $0x40] ss:$8 sps:$4 sm:$0xff]   ;;  %v503_v9 = vld [vmem:[%s628_s1 + $0x34] ss:$8 sps:$4 sm:$0xff]   ;;  %v505_v10 = vld [vmem:[%s628_s1 + $0x30] ss:$8 sps:$4 sm:$0xff]  }
   0xf   : > { %v506_v11 = vld [vmem:[%s628_s1 + $0x24] ss:$8 sps:$4 sm:$0xff]   ;;  %v508_v12 = vld [vmem:[%s628_s1 + $0x20] ss:$8 sps:$4 sm:$0xff]   ;;  %v509_v13 = vld [vmem:[%s628_s1 + $0x14] ss:$8 sps:$4 sm:$0xff]  }
  0x10   : > { %v511_v14 = vld [vmem:[%s628_s1 + $0x10] ss:$8 sps:$4 sm:$0xff]   ;;  %v512_v15 = vld [vmem:[%s628_s1 + $0x4] ss:$8 sps:$4 sm:$0xff]   ;;  %v514_v16 = vld [vmem:[%s628_s1] ss:$8 sps:$4 sm:$0xff]  }
  0x11   : > { %296 = vmatpush1.bf16.msra.mxu0 %v496_v4  ;;  %v515_v17 = vld [vmem:[%s167_s5] sm:$0xff]   ;;  %v199_v20 = vsub.s32 0, %v198_v19  ;;  %v203_v22 = vsub.s32 1, %v198_v19  ;;  %s481_s28 = sshll.u32 %s632_s16, 4 }
  0x12   : > { %297 = vmatprep.subr.bf16.mxu0 %v497_v5  ;;  %v195_v21 = vld [vmem:[%s629_s2] sm:$0x3]  ;;  %s174_s4 = scalar_lea.vmem %s630_s3, %s481_s28 }
  0x13   : > { %v200_v23 = vrot.slane %v195_v21, %v199_v20  ;;  %v204_v25 = vrot.slane %v195_v21, %v203_v22 }
  0x15   : > { %298 = vmatpush1.bf16.msra.mxu0 %v499_v6 }
  0x16   : > { %299 = vmatprep.subr.bf16.mxu0 %v500_v7 }
  0x19   : > { %300 = vmatpush1.bf16.msra.mxu0 %v502_v8 }
  0x1a   : > { %301 = vmatprep.subr.bf16.mxu0 %v503_v9 }
  0x1d   : > { %302 = vmatpush1.bf16.msra.mxu0 %v505_v10 }
  0x1e   : > { %303 = vmatprep.subr.bf16.mxu0 %v506_v11 }
  0x21   : > { %304 = vmatpush1.bf16.msra.mxu0 %v508_v12 }
  0x22   : > { %305 = vmatprep.subr.bf16.mxu0 %v509_v13 }
  0x25   : > { %306 = vmatpush1.bf16.msra.mxu0 %v511_v14 }
  0x26   : > { %307 = vmatprep.subr.bf16.mxu0 %v512_v15 }
  0x29   : > { %308 = vmatpush1.bf16.msra.mxu0 %v514_v16 }
  0x2c   : > { %326 = vmatmul.mubr.bf16.vlgmr.msra.gmra.mxu0 %v515_v17 }
  0xec   : > { %v327_v24 = vpop.f32.mrf.mxu0 }
  0xed   : > { %v328_v27 = vadd.f32 %v327_v24, %v200_v23 }
  0xee   : > { %v329_v26 = vpop.f32.mrf.mxu0 }
  0xef   : > { %v614_v28 = vadd.f32 %v329_v26, %v204_v25  ;;  %v352_v32 = vmul.f32 %v328_v27, %v328_v27 }
  0xf0   : > { %v331_v29 = vpop.f32.mrf.mxu0 }
  0xf1   : > { %v332_v30 = vadd.f32 %v331_v29, %v200_v23  ;;  %v353_v36 = vmul.f32 %v614_v28, %v614_v28 }
  0xf2   : > { %v333_v31 = vpop.f32.mrf.mxu0 }
  0xf3   : > { %v336_v33 = vadd.f32 %v332_v30, %v328_v27  ;;  %v354_v34 = vmul.f32 %v332_v30, %v332_v30  ;;  %v334_v35 = vadd.f32 %v333_v31, %v204_v25 }
  0xf5   : > { %v337_v37 = vrot.slane %v336_v33, 4  ;;  %v356_v38 = vadd.f32 %v354_v34, %v352_v32  ;;  %v343_v39 = vadd.f32 %v334_v35, %v614_v28  ;;  %v355_v40 = vmul.f32 %v334_v35, %v334_v35 }
  0xf7   : > { %v338_v41 = vadd.f32 %v337_v37, %v336_v33  ;;  %v357_v42 = vrot.slane %v356_v38, 4  ;;  %v344_v43 = vrot.slane %v343_v39, 4  ;;  %v363_v44 = vadd.f32 %v355_v40, %v353_v36 }
  0xf9   : > { %v339_v45 = vrot.slane %v338_v41, 2  ;;  %v358_v46 = vadd.f32 %v357_v42, %v356_v38  ;;  %v345_v47 = vadd.f32 %v344_v43, %v343_v39  ;;  %v364_v48 = vrot.slane %v363_v44, 4 }
  0xfb   : > { %v340_v49 = vadd.f32 %v339_v45, %v338_v41  ;;  %v359_v50 = vrot.slane %v358_v46, 2  ;;  %v346_v51 = vrot.slane %v345_v47, 2  ;;  %v365_v52 = vadd.f32 %v364_v48, %v363_v44 }
  0xfd   : > { %v341_v53 = vrot.slane %v340_v49, 1  ;;  %v360_v54 = vadd.f32 %v359_v50, %v358_v46  ;;  %v347_v55 = vadd.f32 %v346_v51, %v345_v47  ;;  %v366_v56 = vrot.slane %v365_v52, 2 }
  0xff   : > { %v342_v57 = vadd.f32 %v341_v53, %v340_v49  ;;  %v361_v58 = vrot.slane %v360_v54, 1  ;;  %v348_v59 = vrot.slane %v347_v55, 1  ;;  %v367_v60 = vadd.f32 %v366_v56, %v365_v52 }
 0x101   : > { %v350_v61 = vmul.f32 0.0625, %v342_v57  ;;  %v362_v62 = vadd.f32 %v361_v58, %v360_v54  ;;  %v349_v63 = vadd.f32 %v348_v59, %v347_v55  ;;  %v368_v0 = vrot.slane %v367_v60, 1 }
 0x103   : > { %v370_v1 = vmul.f32 0.0625, %v362_v62  ;;  %v372_v2 = vmul.f32 %v350_v61, %v350_v61  ;;  %v351_v3 = vmul.f32 0.0625, %v349_v63  ;;  %v369_v4 = vadd.f32 %v368_v0, %v367_v60 }
 0x104   : > { %v378_v13 = vsub.f32 %v328_v27, %v350_v61  ;;  %v380_v14 = vsub.f32 %v332_v30, %v350_v61 }
 0x105   : > { %v374_v5 = vsub.f32 %v370_v1, %v372_v2  ;;  %v371_v6 = vmul.f32 0.0625, %v369_v4  ;;  %v373_v7 = vmul.f32 %v351_v3, %v351_v3  ;;  %v379_v18 = vsub.f32 %v614_v28, %v351_v3 }
 0x106   : > { %v381_v19 = vsub.f32 %v334_v35, %v351_v3 }
 0x107   : > { %v376_v8 = vmax.f32 %v374_v5, 0.0  ;;  %v375_v9 = vsub.f32 %v371_v6, %v373_v7 }
 0x109   : > { %v382_v10 = vadd.f32 1e-05, %v376_v8  ;;  %v377_v11 = vmax.f32 %v375_v9, 0.0 }
 0x10b   : > { %516 = vrsqrt.f32 %v382_v10  ;;  %v383_v12 = vadd.f32 1e-05, %v377_v11 }
 0x10d   : > { %518 = vrsqrt.f32 %v383_v12 }
 0x118   : > { %v517_v15 = vpop.eup %516 }
 0x119   : > { %v386_v16 = vmul.f32 %v517_v15, %v378_v13  ;;  %v388_v17 = vmul.f32 %v517_v15, %v380_v14 }
 0x11a   : > { %v519_v20 = vpop.eup %518 }
 0x11b   : > { %390 = vst [vmem:[%s174_s4] sm:$0xff] %v386_v16  ;;  %392 = vst [vmem:[%s174_s4 + $0x10] sm:$0xff] %v388_v17  ;;  %v387_v21 = vmul.f32 %v519_v20, %v379_v18  ;;  %v389_v22 = vmul.f32 %v519_v20, %v381_v19 }
 0x11d   : > { %391 = vst [vmem:[%s174_s4 + $0x8] sm:$0xff] %v387_v21  ;;  %393 = vst [vmem:[%s174_s4 + $0x18] sm:$0xff] %v389_v22 }
 0x11e PF: > { %s13_s12 = sadd.s32 1, %s526_s12  }
 0x11f   : > { %p10_p4 = scmp.ge.s32.totalorder %s13_s12, 4  }
 0x121   :  { %12 = sbr.rel (!%p10_p4) target bundleno = 1 (0x1), region = 62 }

// kernel: forward.22
= control target key start
LH: loop header
LB: loop body
LE: loop exit
PB: predicated region body
PF: predicated region fallthrough
CT: control target
= control target key end

     0   :  { %s978_s9 = smov 0   ;;  %s1209_s0 = inlined_call_operand.vmem [shape: bf16[32,256], index: 0, kind: input, shape index: {}]   ;;  %s1210_s1 = inlined_call_operand.vmem [shape: bf16[256,512], index: 1, kind: input, shape index: {}]   ;;  %s1211_s2 = inlined_call_operand.vmem [shape: f32[32,512], index: 2, kind: output, shape index: {}]  }
   0x1 LB: > { %s765_s10 = sadd.s32 4294967295, %s961_s9   ;;  %p769_p0 = scmp.ge.s32.totalorder %s961_s9, 1  ;;  %s961_s9 = sphi %s978_s9, %s12_s9  }
   0x2   : > { %p114_p1 = scmp.lt.s32.totalorder %s961_s9, 3 }
   0x4   : > { %p115_p2 = pnand %p769_p0, %p114_p1 }
   0x5   : > { %s770_s19 = sshll.u32 (!%p115_p2), %s765_s10, 1 }
   0x6   : > { %118 = sbr.rel (%p115_p2) target bundleno = 327 (0x147), region = 28  ;;  %p139_p3 = scmp.lt.s32.totalorder (!%p115_p2), %s770_s19, 3 }
   0xb   : > { %v854_v0 = vld [vmem:[%s1210_s1 + $0xe4] ss:$16 sps:$4 sm:$0xff]   ;;  %v856_v1 = vld [vmem:[%s1210_s1 + $0xec] ss:$16 sps:$4 sm:$0xff]   ;;  %v858_v2 = vld [vmem:[%s1210_s1 + $0xe0] ss:$16 sps:$4 sm:$0xff]  }
   0xc   : > { %548 = vmatprep.subr.bf16.mxu0 %v854_v0  ;;  %v859_v3 = vld [vmem:[%s1210_s1 + $0xe8] ss:$16 sps:$4 sm:$0xff]   ;;  %591 = vmatprep.subr.bf16.mxu1 %v856_v1  ;;  %v860_v4 = vld [vmem:[%s1210_s1 + $0xc4] ss:$16 sps:$4 sm:$0xff]   ;;  %v862_v5 = vld [vmem:[%s1210_s1 + $0xcc] ss:$16 sps:$4 sm:$0xff]  }
   0xd   : > { %549 = vmatpush1.bf16.msra.mxu0 %v858_v2  ;;  %592 = vmatpush1.bf16.msra.mxu1 %v859_v3  ;;  %v864_v6 = vld [vmem:[%s1210_s1 + $0xc0] ss:$16 sps:$4 sm:$0xff]   ;;  %v865_v7 = vld [vmem:[%s1210_s1 + $0xc8] ss:$16 sps:$4 sm:$0xff]   ;;  %v866_v8 = vld [vmem:[%s1210_s1 + $0xa4] ss:$16 sps:$4 sm:$0xff]  }
   0xe   : > { %550 = vmatprep.subr.bf16.mxu0 %v860_v4  ;;  %593 = vmatprep.subr.bf16.mxu1 %v862_v5  ;;  %v868_v9 = vld [vmem:[%s1210_s1 + $0xac] ss:$16 sps:$4 sm:$0xff]   ;;  %v870_v10 = vld [vmem:[%s1210_s1 + $0xa0] ss:$16 sps:$4 sm:$0xff]   ;;  %v871_v11 = vld [vmem:[%s1210_s1 + $0xa8] ss:$16 sps:$4 sm:$0xff]  }
   0xf   : > { %v872_v12 = vld [vmem:[%s1210_s1 + $0x84] ss:$16 sps:$4 sm:$0xff]   ;;  %v874_v13 = vld [vmem:[%s1210_s1 + $0x8c] ss:$16 sps:$4 sm:$0xff]   ;;  %v876_v14 = vld [vmem:[%s1210_s1 + $0x80] ss:$16 sps:$4 sm:$0xff]  }
  0x10   : > { %v877_v15 = vld [vmem:[%s1210_s1 + $0x88] ss:$16 sps:$4 sm:$0xff]   ;;  %v878_v16 = vld [vmem:[%s1210_s1 + $0x64] ss:$16 sps:$4 sm:$0xff]   ;;  %v880_v17 = vld [vmem:[%s1210_s1 + $0x6c] ss:$16 sps:$4 sm:$0xff]  }
  0x11   : > { %551 = vmatpush1.bf16.msra.mxu0 %v864_v6  ;;  %594 = vmatpush1.bf16.msra.mxu1 %v865_v7  ;;  %v882_v18 = vld [vmem:[%s1210_s1 + $0x60] ss:$16 sps:$4 sm:$0xff]   ;;  %v883_v19 = vld [vmem:[%s1210_s1 + $0x68] ss:$16 sps:$4 sm:$0xff]   ;;  %v884_v20 = vld [vmem:[%s1210_s1 + $0x44] ss:$16 sps:$4 sm:$0xff]  }
  0x12   : > { %552 = vmatprep.subr.bf16.mxu0 %v866_v8  ;;  %595 = vmatprep.subr.bf16.mxu1 %v868_v9  ;;  %v886_v21 = vld [vmem:[%s1210_s1 + $0x4c] ss:$16 sps:$4 sm:$0xff]   ;;  %v888_v22 = vld [vmem:[%s1210_s1 + $0x40] ss:$16 sps:$4 sm:$0xff]   ;;  %v889_v23 = vld [vmem:[%s1210_s1 + $0x48] ss:$16 sps:$4 sm:$0xff]  }
  0x13   : > { %v890_v24 = vld [vmem:[%s1210_s1 + $0x24] ss:$16 sps:$4 sm:$0xff]   ;;  %v892_v25 = vld [vmem:[%s1210_s1 + $0x2c] ss:$16 sps:$4 sm:$0xff]   ;;  %v894_v26 = vld [vmem:[%s1210_s1 + $0x20] ss:$16 sps:$4 sm:$0xff]  }
  0x14   : > { %v895_v27 = vld [vmem:[%s1210_s1 + $0x28] ss:$16 sps:$4 sm:$0xff]   ;;  %v896_v28 = vld [vmem:[%s1210_s1 + $0x4] ss:$16 sps:$4 sm:$0xff]   ;;  %v898_v29 = vld [vmem:[%s1210_s1 + $0xc] ss:$16 sps:$4 sm:$0xff]  }
  0x15   : > { %553 = vmatpush1.bf16.msra.mxu0 %v870_v10  ;;  %596 = vmatpush1.bf16.msra.mxu1 %v871_v11  ;;  %v900_v30 = vld [vmem:[%s1210_s1] ss:$16 sps:$4 sm:$0xff]   ;;  %v901_v31 = vld [vmem:[%s1210_s1 + $0x8] ss:$16 sps:$4 sm:$0xff]   ;;  %v902_v32 = vld [vmem:[%s1210_s1 + $0x1e4] ss:$16 sps:$4 sm:$0xff]  }
  0x16   : > { %554 = vmatprep.subr.bf16.mxu0 %v872_v12  ;;  %597 = vmatprep.subr.bf16.mxu1 %v874_v13  ;;  %v904_v33 = vld [vmem:[%s1210_s1 + $0x1ec] ss:$16 sps:$4 sm:$0xff]   ;;  %v906_v34 = vld [vmem:[%s1210_s1 + $0x1e0] ss:$16 sps:$4 sm:$0xff]   ;;  %v907_v35 = vld [vmem:[%s1210_s1 + $0x1e8] ss:$16 sps:$4 sm:$0xff]  }
  0x17   : > { %v908_v36 = vld [vmem:[%s1210_s1 + $0x1c4] ss:$16 sps:$4 sm:$0xff]   ;;  %v910_v37 = vld [vmem:[%s1210_s1 + $0x1cc] ss:$16 sps:$4 sm:$0xff]   ;;  %s1213_s19 = smov (!%p139_p3, %s770_s19), 3 }
  0x18   : > { %v912_v38 = vld [vmem:[%s1210_s1 + $0x1c0] ss:$16 sps:$4 sm:$0xff]   ;;  %v913_v39 = vld [vmem:[%s1210_s1 + $0x1c8] ss:$16 sps:$4 sm:$0xff]   ;;  %v914_v40 = vld [vmem:[%s1210_s1 + $0x1a4] ss:$16 sps:$4 sm:$0xff]  }
  0x19   : > { %555 = vmatpush1.bf16.msra.mxu0 %v876_v14  ;;  %598 = vmatpush1.bf16.msra.mxu1 %v877_v15  ;;  %v916_v41 = vld [vmem:[%s1210_s1 + $0x1ac] ss:$16 sps:$4 sm:$0xff]   ;;  %s844_s17 = sshll.u32 %s1213_s19, 3  ;;  %v918_v42 = vld [vmem:[%s1210_s1 + $0x1a0] ss:$16 sps:$4 sm:$0xff]  }
  0x1a   : > { %556 = vmatprep.subr.bf16.mxu0 %v878_v16  ;;  %599 = vmatprep.subr.bf16.mxu1 %v880_v17  ;;  %v919_v43 = vld [vmem:[%s1210_s1 + $0x1a8] ss:$16 sps:$4 sm:$0xff]   ;;  %v920_v44 = vld [vmem:[%s1210_s1 + $0x184] ss:$16 sps:$4 sm:$0xff]   ;;  %s1129_s27 = scalar_lea.vmem %s1209_s0, %s844_s17  ;;  %v922_v45 = vld [vmem:[%s1210_s1 + $0x18c] ss:$16 sps:$4 sm:$0xff]  }
  0x1b   : > { %v952_v46 = vld [vmem:[%s1129_s27 + $0x4] ss:$8 sps:$4 sm:$0xff]   ;;  %v924_v47 = vld [vmem:[%s1210_s1 + $0x180] ss:$16 sps:$4 sm:$0xff]   ;;  %v925_v48 = vld [vmem:[%s1210_s1 + $0x188] ss:$16 sps:$4 sm:$0xff]  }
  0x1c   : > { %v926_v49 = vld [vmem:[%s1210_s1 + $0x164] ss:$16 sps:$4 sm:$0xff]   ;;  %v928_v50 = vld [vmem:[%s1210_s1 + $0x16c] ss:$16 sps:$4 sm:$0xff]   ;;  %580 = vmatprep.mubr.bf16.mxu0 %v952_v46  ;;  %623 = vmatprep.mubr.bf16.mxu1 %v952_v46  ;;  %v930_v51 = vld [vmem:[%s1210_s1 + $0x160] ss:$16 sps:$4 sm:$0xff]  }
  0x1d   : > { %557 = vmatpush1.bf16.msra.mxu0 %v882_v18  ;;  %600 = vmatpush1.bf16.msra.mxu1 %v883_v19  ;;  %v931_v52 = vld [vmem:[%s1210_s1 + $0x168] ss:$16 sps:$4 sm:$0xff]   ;;  %v932_v53 = vld [vmem:[%s1210_s1 + $0x144] ss:$16 sps:$4 sm:$0xff]   ;;  %v934_v54 = vld [vmem:[%s1210_s1 + $0x14c] ss:$16 sps:$4 sm:$0xff]  }
  0x1e   : > { %558 = vmatprep.subr.bf16.mxu0 %v884_v20  ;;  %601 = vmatprep.subr.bf16.mxu1 %v886_v21  ;;  %v936_v55 = vld [vmem:[%s1210_s1 + $0x140] ss:$16 sps:$4 sm:$0xff]   ;;  %v937_v56 = vld [vmem:[%s1210_s1 + $0x148] ss:$16 sps:$4 sm:$0xff]   ;;  %v938_v57 = vld [vmem:[%s1210_s1 + $0x124] ss:$16 sps:$4 sm:$0xff]  }
  0x1f   : > { %v940_v58 = vld [vmem:[%s1210_s1 + $0x12c] ss:$16 sps:$4 sm:$0xff]   ;;  %v942_v59 = vld [vmem:[%s1210_s1 + $0x120] ss:$16 sps:$4 sm:$0xff]   ;;  %v943_v60 = vld [vmem:[%s1210_s1 + $0x128] ss:$16 sps:$4 sm:$0xff]  }
  0x20   : > { %v944_v61 = vld [vmem:[%s1210_s1 + $0x104] ss:$16 sps:$4 sm:$0xff]   ;;  %v946_v62 = vld [vmem:[%s1210_s1 + $0x10c] ss:$16 sps:$4 sm:$0xff]   ;;  %v948_v63 = vld [vmem:[%s1210_s1 + $0x100] ss:$16 sps:$4 sm:$0xff]  }
  0x21   : > { %559 = vmatpush1.bf16.msra.mxu0 %v888_v22  ;;  %602 = vmatpush1.bf16.msra.mxu1 %v889_v23  ;;  %v949_v0 = vld [vmem:[%s1210_s1 + $0x108] ss:$16 sps:$4 sm:$0xff]  }
  0x22   : > { %560 = vmatprep.subr.bf16.mxu0 %v890_v24  ;;  %603 = vmatprep.subr.bf16.mxu1 %v892_v25  ;;  %v950_v1 = vld [vmem:[%s1129_s27] ss:$8 sps:$4 sm:$0xff]   ;;  %s845_s27 = sshll.u32 %s1213_s19, 5 }
  0x23   : > { %s150_s16 = scalar_lea.vmem %s1211_s2, %s845_s27 }
  0x25   : > { %561 = vmatpush1.bf16.msra.mxu0 %v894_v26  ;;  %604 = vmatpush1.bf16.msra.mxu1 %v895_v27 }
  0x26   : > { %562 = vmatprep.subr.bf16.mxu0 %v896_v28  ;;  %605 = vmatprep.subr.bf16.mxu1 %v898_v29 }
  0x29   : > { %563 = vmatpush1.bf16.msra.mxu0 %v900_v30  ;;  %606 = vmatpush1.bf16.msra.mxu1 %v901_v31 }
  0x2a   : > { %564 = vmatprep.subr.bf16.mxu0 %v902_v32  ;;  %607 = vmatprep.subr.bf16.mxu1 %v904_v33 }
  0x2d   : > { %565 = vmatpush2.bf16.msra.mxu0 %v906_v34  ;;  %608 = vmatpush2.bf16.msra.mxu1 %v907_v35 }
  0x2e   : > { %566 = vmatprep.subr.bf16.mxu0 %v908_v36  ;;  %609 = vmatprep.subr.bf16.mxu1 %v910_v37 }
  0x31   : > { %567 = vmatpush2.bf16.msra.mxu0 %v912_v38  ;;  %610 = vmatpush2.bf16.msra.mxu1 %v913_v39 }
  0x32   : > { %568 = vmatprep.subr.bf16.mxu0 %v914_v40  ;;  %611 = vmatprep.subr.bf16.mxu1 %v916_v41 }
  0x35   : > { %569 = vmatpush2.bf16.msra.mxu0 %v918_v42  ;;  %612 = vmatpush2.bf16.msra.mxu1 %v919_v43 }
  0x36   : > { %570 = vmatprep.subr.bf16.mxu0 %v920_v44  ;;  %613 = vmatprep.subr.bf16.mxu1 %v922_v45 }
  0x39   : > { %571 = vmatpush2.bf16.msra.mxu0 %v924_v47  ;;  %614 = vmatpush2.bf16.msra.mxu1 %v925_v48 }
  0x3a   : > { %572 = vmatprep.subr.bf16.mxu0 %v926_v49  ;;  %615 = vmatprep.subr.bf16.mxu1 %v928_v50 }
  0x3d   : > { %573 = vmatpush2.bf16.msra.mxu0 %v930_v51  ;;  %616 = vmatpush2.bf16.msra.mxu1 %v931_v52 }
  0x3e   : > { %574 = vmatprep.subr.bf16.mxu0 %v932_v53  ;;  %617 = vmatprep.subr.bf16.mxu1 %v934_v54 }
  0x41   : > { %575 = vmatpush2.bf16.msra.mxu0 %v936_v55  ;;  %618 = vmatpush2.bf16.msra.mxu1 %v937_v56 }
  0x42   : > { %576 = vmatprep.subr.bf16.mxu0 %v938_v57  ;;  %619 = vmatprep.subr.bf16.mxu1 %v940_v58 }
  0x45   : > { %577 = vmatpush2.bf16.msra.mxu0 %v942_v59  ;;  %620 = vmatpush2.bf16.msra.mxu1 %v943_v60 }
  0x46   : > { %578 = vmatprep.subr.bf16.mxu0 %v944_v61  ;;  %621 = vmatprep.subr.bf16.mxu1 %v946_v62 }
  0x49   : > { %579 = vmatpush2.bf16.msra.mxu0 %v948_v63  ;;  %622 = vmatpush2.bf16.msra.mxu1 %v949_v0 }
  0x4c   : > { %581 = vmatmul.mubr.bf16.vlgmr.msra.gmra.mxu0 %v950_v1  ;;  %624 = vmatmul.mubr.bf16.vlgmr.msra.gmra.mxu1 %v950_v1 }
 0x10c   : > { %v582_v2 = vpop.f32.mrf.mxu0  ;;  %v1190_v3 = vpop.f32.mrf.mxu1 }
 0x10d   : > { %v640_v6 = vmul.f32 %v582_v2, %v582_v2  ;;  %v646_v11 = vmul.f32 %v1190_v3, %v1190_v3 }
 0x10e   : > { %v584_v4 = vpop.f32.mrf.mxu0  ;;  %v1192_v5 = vpop.f32.mrf.mxu1 }
 0x10f   : > { %v634_v7 = vadd.f32 %v584_v4, %v582_v2  ;;  %v642_v8 = vmul.f32 %v584_v4, %v584_v4  ;;  %v650_v23 = vmul.f32 %v1192_v5, %v1192_v5 }
 0x110   : > { %v586_v9 = vpop.f32.mrf.mxu0  ;;  %v629_v10 = vpop.f32.mrf.mxu1 }
 0x111   : > { %v644_v12 = vadd.f32 %v642_v8, %v640_v6  ;;  %v636_v14 = vadd.f32 %v634_v7, %v1190_v3  ;;  %v641_v15 = vmul.f32 %v586_v9, %v586_v9  ;;  %v647_v20 = vmul.f32 %v629_v10, %v629_v10 }
 0x112   : > { %v588_v13 = vpop.f32.mrf.mxu0  ;;  %v631_v18 = vpop.f32.mrf.mxu1 }
 0x113   : > { %v635_v16 = vadd.f32 %v588_v13, %v586_v9  ;;  %v643_v17 = vmul.f32 %v588_v13, %v588_v13  ;;  %v648_v19 = vadd.f32 %v646_v11, %v644_v12  ;;  %v638_v24 = vadd.f32 %v636_v14, %v1192_v5 }
 0x114   : > { %v651_v27 = vmul.f32 %v631_v18, %v631_v18 }
 0x115   : > { %v645_v21 = vadd.f32 %v643_v17, %v641_v15  ;;  %v637_v22 = vadd.f32 %v635_v16, %v629_v10  ;;  %v652_v28 = vadd.f32 %v650_v23, %v648_v19 }
 0x117   : > { %v639_v25 = vadd.f32 %v637_v22, %v631_v18  ;;  %v649_v26 = vadd.f32 %v647_v20, %v645_v21 }
 0x119   : > { %v653_v29 = vadd.f32 %v651_v27, %v649_v26  ;;  %v654_v30 = vadd.f32 %v639_v25, %v638_v24 }
 0x11b   : > { %v655_v31 = vrot.slane %v654_v30, 4  ;;  %v662_v32 = vadd.f32 %v653_v29, %v652_v28 }
 0x11d   : > { %v656_v33 = vadd.f32 %v655_v31, %v654_v30  ;;  %v663_v34 = vrot.slane %v662_v32, 4 }
 0x11f   : > { %v657_v35 = vrot.slane %v656_v33, 2  ;;  %v664_v36 = vadd.f32 %v663_v34, %v662_v32 }
 0x121   : > { %v658_v37 = vadd.f32 %v657_v35, %v656_v33  ;;  %v665_v38 = vrot.slane %v664_v36, 2 }
 0x123   : > { %v659_v39 = vrot.slane %v658_v37, 1  ;;  %v666_v40 = vadd.f32 %v665_v38, %v664_v36 }
 0x125   : > { %v660_v41 = vadd.f32 %v659_v39, %v658_v37  ;;  %v667_v42 = vrot.slane %v666_v40, 1 }
 0x127   : > { %v661_v43 = vmul.f32 0.015625, %v660_v41  ;;  %v668_v44 = vadd.f32 %v667_v42, %v666_v40 }
 0x129   : > { %v669_v45 = vmul.f32 0.015625, %v668_v44  ;;  %v670_v46 = vmul.f32 %v661_v43, %v661_v43  ;;  %v675_v50 = vsub.f32 %v582_v2, %v661_v43  ;;  %v676_v51 = vsub.f32 %v586_v9, %v661_v43 }
 0x12a   : > { %v683_v52 = vsub.f32 %v584_v4, %v661_v43  ;;  %v684_v53 = vsub.f32 %v588_v13, %v661_v43  ;;  %v691_v55 = vsub.f32 %v1190_v3, %v661_v43  ;;  %v692_v56 = vsub.f32 %v629_v10, %v661_v43 }
 0x12b   : > { %v671_v47 = vsub.f32 %v669_v45, %v670_v46  ;;  %v699_v57 = vsub.f32 %v1192_v5, %v661_v43  ;;  %v700_v58 = vsub.f32 %v631_v18, %v661_v43 }
 0x12d   : > { %v672_v48 = vmax.f32 %v671_v47, 0.0 }
 0x12f   : > { %v673_v49 = vadd.f32 1e-05, %v672_v48 }
 0x131   : > { %953 = vrsqrt.f32 %v673_v49 }
 0x13e   : > { %v954_v54 = vpop.eup %953 }
 0x13f   : > { %v677_v59 = vmul.f32 %v954_v54, %v675_v50  ;;  %v678_v60 = vmul.f32 %v954_v54, %v676_v51  ;;  %v685_v61 = vmul.f32 %v954_v54, %v683_v52  ;;  %v686_v62 = vmul.f32 %v954_v54, %v684_v53 }
 0x140   : > { %v693_v63 = vmul.f32 %v954_v54, %v691_v55  ;;  %v694_v0 = vmul.f32 %v954_v54, %v692_v56  ;;  %v701_v1 = vmul.f32 %v954_v54, %v699_v57  ;;  %v702_v2 = vmul.f32 %v954_v54, %v700_v58 }
 0x141   : > { %v679_v4 = vmax.f32 %v677_v59, 0.0  ;;  %v680_v6 = vmax.f32 %v678_v60, 0.0  ;;  %v687_v7 = vmax.f32 %v685_v61, 0.0  ;;  %v688_v3 = vmax.f32 %v686_v62, 0.0 }
 0x142   : > { %v695_v8 = vmax.f32 %v693_v63, 0.0  ;;  %v696_v9 = vmax.f32 %v694_v0, 0.0  ;;  %v703_v5 = vmax.f32 %v701_v1, 0.0  ;;  %v704_v10 = vmax.f32 %v702_v2, 0.0 }
 0x143   : > { %681 = vst [vmem:[%s150_s16] sm:$0xff] %v679_v4  ;;  %689 = vst [vmem:[%s150_s16 + $0x8] sm:$0xff] %v687_v7 }
 0x144   : > { %682 = vst [vmem:[%s150_s16 + $0x20] sm:$0xff] %v680_v6  ;;  %690 = vst [vmem:[%s150_s16 + $0x28] sm:$0xff] %v688_v3 }
 0x145   : > { %697 = vst [vmem:[%s150_s16 + $0x10] sm:$0xff] %v695_v8  ;;  %705 = vst [vmem:[%s150_s16 + $0x18] sm:$0xff] %v703_v5 }
 0x146   : > { %698 = vst [vmem:[%s150_s16 + $0x30] sm:$0xff] %v696_v9  ;;  %706 = vst [vmem:[%s150_s16 + $0x38] sm:$0xff] %v704_v10 }
 0x147 PF: > { %s12_s9 = sadd.s32 1, %s961_s9  }
 0x148   : > { %p9_p4 = scmp.ge.s32.totalorder %s12_s9, 4  }
 0x14a   :  { %11 = sbr.rel (!%p9_p4) target bundleno = 1 (0x1), region = 58 }

// kernel: forward.21
= control target key start
LH: loop header
LB: loop body
LE: loop exit
PB: predicated region body
PF: predicated region fallthrough
CT: control target
= control target key end

     0   :  { %s3434_s15 = smov 0   ;;  %s4359_s0 = inlined_call_operand.vmem [shape: bf16[32,2304], index: 0, kind: input, shape index: {}]   ;;  %s4360_s1 = inlined_call_operand.vmem [shape: bf16[2304,256], index: 1, kind: input, shape index: {}]   ;;  %s4361_s2 = inlined_call_operand.vmem [shape: f32[1,256], index: 2, kind: input, shape index: {}]   ;;  %s4362_s3 = inlined_call_operand.vmem [shape: f32[32,256], index: 3, kind: input, shape index: {}]   ;;  %s4363_s4 = inlined_call_operand.vmem [shape: f32[32,256], index: 4, kind: output, shape index: {}]  }
   0x1 LB: > { %s2606_s16 = sadd.s32 4294967295, %s3407_s15   ;;  %p2610_p0 = scmp.ge.s32.totalorder %s3407_s15, 1  ;;  %s3407_s15 = sphi %s3434_s15, %s14_s15  }
   0x2   : > { %p176_p1 = scmp.lt.s32.totalorder %s3407_s15, 3 }
   0x4   : > { %p177_p2 = pnand %p2610_p0, %p176_p1 }
   0x5   : > { %s2611_s27 = sshll.u32 (!%p177_p2), %s2606_s16, 1 }
   0x6   : > { %180 = sbr.rel (%p177_p2) target bundleno = 578 (0x242), region = 36  ;;  %p211_p3 = scmp.lt.s32.totalorder (!%p177_p2), %s2611_s27, 3 }
   0xb   : > { %v2938_v0 = vld [vmem:[%s4360_s1 + $0x74] ss:$8 sps:$4 sm:$0xff]   ;;  %v2940_v1 = vld [vmem:[%s4360_s1 + $0x70] ss:$8 sps:$4 sm:$0xff]   ;;  %v2944_v4 = vld [vmem:[%s4360_s1 + $0x64] ss:$8 sps:$4 sm:$0xff]  }
   0xc   : > { %2079 = vmatprep.subr.bf16.mxu0 %v2938_v0  ;;  %v2941_v2 = vld [vmem:[%s4360_s1 + $0x174] ss:$8 sps:$4 sm:$0xff]   ;;  %v2943_v3 = vld [vmem:[%s4360_s1 + $0x170] ss:$8 sps:$4 sm:$0xff]   ;;  %v2946_v5 = vld [vmem:[%s4360_s1 + $0x60] ss:$8 sps:$4 sm:$0xff]  }
   0xd   : > { %2080 = vmatpush1.bf16.msra.mxu0 %v2940_v1  ;;  %2122 = vmatprep.subr.bf16.mxu1 %v2941_v2  ;;  %v2947_v6 = vld [vmem:[%s4360_s1 + $0x164] ss:$8 sps:$4 sm:$0xff]   ;;  %v2949_v7 = vld [vmem:[%s4360_s1 + $0x160] ss:$8 sps:$4 sm:$0xff]   ;;  %v2950_v8 = vld [vmem:[%s4360_s1 + $0x54] ss:$8 sps:$4 sm:$0xff]  }
   0xe   : > { %2123 = vmatpush1.bf16.msra.mxu1 %v2943_v3  ;;  %2081 = vmatprep.subr.bf16.mxu0 %v2944_v4  ;;  %v2952_v9 = vld [vmem:[%s4360_s1 + $0x50] ss:$8 sps:$4 sm:$0xff]   ;;  %v2953_v10 = vld [vmem:[%s4360_s1 + $0x154] ss:$8 sps:$4 sm:$0xff]   ;;  %v2956_v11 = vld [vmem:[%s4360_s1 + $0x44] ss:$8 sps:$4 sm:$0xff]  }
   0xf   : > { %2124 = vmatprep.subr.bf16.mxu1 %v2947_v6  ;;  %v2955_v12 = vld [vmem:[%s4360_s1 + $0x150] ss:$8 sps:$4 sm:$0xff]   ;;  %v2959_v13 = vld [vmem:[%s4360_s1 + $0x144] ss:$8 sps:$4 sm:$0xff]   ;;  %v2958_v14 = vld [vmem:[%s4360_s1 + $0x40] ss:$8 sps:$4 sm:$0xff]  }
  0x10   : > { %v2962_v15 = vld [vmem:[%s4360_s1 + $0x34] ss:$8 sps:$4 sm:$0xff]   ;;  %v2961_v16 = vld [vmem:[%s4360_s1 + $0x140] ss:$8 sps:$4 sm:$0xff]   ;;  %v2964_v18 = vld [vmem:[%s4360_s1 + $0x30] ss:$8 sps:$4 sm:$0xff]  }
  0x11   : > { %2082 = vmatpush1.bf16.msra.mxu0 %v2946_v5  ;;  %v2965_v17 = vld [vmem:[%s4360_s1 + $0x134] ss:$8 sps:$4 sm:$0xff]   ;;  %v2968_v19 = vld [vmem:[%s4360_s1 + $0x24] ss:$8 sps:$4 sm:$0xff]   ;;  %v2967_v20 = vld [vmem:[%s4360_s1 + $0x130] ss:$8 sps:$4 sm:$0xff]  }
  0x12   : > { %2083 = vmatprep.subr.bf16.mxu0 %v2950_v8  ;;  %2125 = vmatpush1.bf16.msra.mxu1 %v2949_v7  ;;  %v2971_v21 = vld [vmem:[%s4360_s1 + $0x124] ss:$8 sps:$4 sm:$0xff]   ;;  %v2970_v22 = vld [vmem:[%s4360_s1 + $0x20] ss:$8 sps:$4 sm:$0xff]   ;;  %v2974_v23 = vld [vmem:[%s4360_s1 + $0x14] ss:$8 sps:$4 sm:$0xff]  }
  0x13   : > { %2126 = vmatprep.subr.bf16.mxu1 %v2953_v10  ;;  %v2973_v24 = vld [vmem:[%s4360_s1 + $0x120] ss:$8 sps:$4 sm:$0xff]   ;;  %v2977_v25 = vld [vmem:[%s4360_s1 + $0x114] ss:$8 sps:$4 sm:$0xff]   ;;  %v2976_v26 = vld [vmem:[%s4360_s1 + $0x10] ss:$8 sps:$4 sm:$0xff]  }
  0x14   : > { %v2980_v27 = vld [vmem:[%s4360_s1 + $0x4] ss:$8 sps:$4 sm:$0xff]   ;;  %v2979_v28 = vld [vmem:[%s4360_s1 + $0x110] ss:$8 sps:$4 sm:$0xff]   ;;  %v2982_v30 = vld [vmem:[%s4360_s1] ss:$8 sps:$4 sm:$0xff]  }
  0x15   : > { %2084 = vmatpush1.bf16.msra.mxu0 %v2952_v9  ;;  %v2983_v29 = vld [vmem:[%s4360_s1 + $0x104] ss:$8 sps:$4 sm:$0xff]   ;;  %v2986_v31 = vld [vmem:[%s4360_s1 + $0xf4] ss:$8 sps:$4 sm:$0xff]   ;;  %v2985_v32 = vld [vmem:[%s4360_s1 + $0x100] ss:$8 sps:$4 sm:$0xff]  }
  0x16   : > { %2085 = vmatprep.subr.bf16.mxu0 %v2956_v11  ;;  %2127 = vmatpush1.bf16.msra.mxu1 %v2955_v12  ;;  %v2989_v33 = vld [vmem:[%s4360_s1 + $0x1f4] ss:$8 sps:$4 sm:$0xff]   ;;  %v2988_v34 = vld [vmem:[%s4360_s1 + $0xf0] ss:$8 sps:$4 sm:$0xff]   ;;  %v2992_v35 = vld [vmem:[%s4360_s1 + $0xe4] ss:$8 sps:$4 sm:$0xff]  }
  0x17   : > { %2128 = vmatprep.subr.bf16.mxu1 %v2959_v13  ;;  %s4365_s27 = smov (!%p211_p3, %s2611_s27), 3  ;;  %v2991_v36 = vld [vmem:[%s4360_s1 + $0x1f0] ss:$8 sps:$4 sm:$0xff]   ;;  %v2995_v37 = vld [vmem:[%s4360_s1 + $0x1e4] ss:$8 sps:$4 sm:$0xff]  }
  0x18   : > { %v2994_v38 = vld [vmem:[%s4360_s1 + $0xe0] ss:$8 sps:$4 sm:$0xff]   ;;  %v2998_v39 = vld [vmem:[%s4360_s1 + $0xd4] ss:$8 sps:$4 sm:$0xff]   ;;  %s2929_s25 = smul.u32 72, %s4365_s27  ;;  %s2927_s19 = sshll.u32 %s4365_s27, 4 }
  0x19   : > { %2086 = vmatpush1.bf16.msra.mxu0 %v2958_v14  ;;  %v2997_v40 = vld [vmem:[%s4360_s1 + $0x1e0] ss:$8 sps:$4 sm:$0xff]   ;;  %v3001_v41 = vld [vmem:[%s4360_s1 + $0x1d4] ss:$8 sps:$4 sm:$0xff]   ;;  %v3000_v42 = vld [vmem:[%s4360_s1 + $0xd0] ss:$8 sps:$4 sm:$0xff]   ;;  %s222_s22 = scalar_lea.vmem %s4362_s3, %s2927_s19  ;;  %s229_s24 = scalar_lea.vmem %s4363_s4, %s2927_s19 }
  0x1a   : > { %2087 = vmatprep.subr.bf16.mxu0 %v2962_v15  ;;  %2129 = vmatpush1.bf16.msra.mxu1 %v2961_v16  ;;  %v3004_v43 = vld [vmem:[%s4360_s1 + $0xc4] ss:$8 sps:$4 sm:$0xff]   ;;  %s3582_s10 = scalar_lea.vmem %s4359_s0, %s2929_s25  ;;  %v3003_v44 = vld [vmem:[%s4360_s1 + $0x1d0] ss:$8 sps:$4 sm:$0xff]   ;;  %v3006_v46 = vld [vmem:[%s4360_s1 + $0xc0] ss:$8 sps:$4 sm:$0xff]  }
  0x1b   : > { %2130 = vmatprep.subr.bf16.mxu1 %v2965_v17  ;;  %v3007_v45 = vld [vmem:[%s4360_s1 + $0x1c4] ss:$8 sps:$4 sm:$0xff]   ;;  %v3010_v48 = vld [vmem:[%s4360_s1 + $0xb4] ss:$8 sps:$4 sm:$0xff]   ;;  %v3009_v49 = vld [vmem:[%s4360_s1 + $0x1c0] ss:$8 sps:$4 sm:$0xff]  }
  0x1c   : > { %v3035_v47 = vld [vmem:[%s3582_s10 + $0x4] ss:$72 sps:$4 sm:$0xff]   ;;  %v3013_v50 = vld [vmem:[%s4360_s1 + $0x1b4] ss:$8 sps:$4 sm:$0xff]   ;;  %v3012_v52 = vld [vmem:[%s4360_s1 + $0xb0] ss:$8 sps:$4 sm:$0xff]  }
  0x1d   : > { %2088 = vmatpush1.bf16.msra.mxu0 %v2964_v18  ;;  %2111 = vmatprep.mubr.bf16.mxu0 %v3035_v47  ;;  %v3042_v51 = vld [vmem:[%s3582_s10 + $0xc] ss:$72 sps:$4 sm:$0xff]   ;;  %v3015_v54 = vld [vmem:[%s4360_s1 + $0x1b0] ss:$8 sps:$4 sm:$0xff]   ;;  %v3018_v56 = vld [vmem:[%s4360_s1 + $0xa0] ss:$8 sps:$4 sm:$0xff]  }
  0x1e   : > { %2089 = vmatprep.subr.bf16.mxu0 %v2968_v19  ;;  %2131 = vmatpush1.bf16.msra.mxu1 %v2967_v20  ;;  %v3016_v53 = vld [vmem:[%s4360_s1 + $0xa4] ss:$8 sps:$4 sm:$0xff]   ;;  %v3022_v57 = vld [vmem:[%s4360_s1 + $0x94] ss:$8 sps:$4 sm:$0xff]   ;;  %v3021_v58 = vld [vmem:[%s4360_s1 + $0x1a0] ss:$8 sps:$4 sm:$0xff]  }
  0x1f   : > { %2132 = vmatprep.subr.bf16.mxu1 %v2971_v21  ;;  %2154 = vmatprep.mubr.bf16.mxu1 %v3042_v51  ;;  %v3019_v55 = vld [vmem:[%s4360_s1 + $0x1a4] ss:$8 sps:$4 sm:$0xff]   ;;  %v3025_v59 = vld [vmem:[%s4360_s1 + $0x194] ss:$8 sps:$4 sm:$0xff]   ;;  %v3024_v60 = vld [vmem:[%s4360_s1 + $0x90] ss:$8 sps:$4 sm:$0xff]  }
  0x20   : > { %v3028_v61 = vld [vmem:[%s4360_s1 + $0x84] ss:$8 sps:$4 sm:$0xff]   ;;  %v3027_v62 = vld [vmem:[%s4360_s1 + $0x190] ss:$8 sps:$4 sm:$0xff]   ;;  %v3030_v0 = vld [vmem:[%s4360_s1 + $0x80] ss:$8 sps:$4 sm:$0xff]  }
  0x21   : > { %2090 = vmatpush1.bf16.msra.mxu0 %v2970_v22  ;;  %v3031_v63 = vld [vmem:[%s4360_s1 + $0x184] ss:$8 sps:$4 sm:$0xff]   ;;  %v3039_v1 = vld [vmem:[%s4360_s1 + $0x274] ss:$8 sps:$4 sm:$0xff]   ;;  %v3036_v2 = vld [vmem:[%s4360_s1 + $0x180] ss:$8 sps:$4 sm:$0xff]  }
  0x22   : > { %2091 = vmatprep.subr.bf16.mxu0 %v2974_v23  ;;  %2133 = vmatpush1.bf16.msra.mxu1 %v2973_v24  ;;  %v3033_v3 = vld [vmem:[%s3582_s10] ss:$72 sps:$4 sm:$0xff]   ;;  %v3045_v4 = vld [vmem:[%s4360_s1 + $0x374] ss:$8 sps:$4 sm:$0xff]   ;;  %v3037_v5 = vld [vmem:[%s4360_s1 + $0x270] ss:$8 sps:$4 sm:$0xff]  }
  0x23   : > { %2134 = vmatprep.subr.bf16.mxu1 %v2977_v25  ;;  %v3040_v6 = vld [vmem:[%s3582_s10 + $0x8] ss:$72 sps:$4 sm:$0xff]   ;;  %v3048_v7 = vld [vmem:[%s4360_s1 + $0x264] ss:$8 sps:$4 sm:$0xff]   ;;  %v3054_v11 = vld [vmem:[%s4360_s1 + $0x254] ss:$8 sps:$4 sm:$0xff]  }
  0x24   : > { %v3043_v8 = vld [vmem:[%s4360_s1 + $0x370] ss:$8 sps:$4 sm:$0xff]   ;;  %v3051_v9 = vld [vmem:[%s4360_s1 + $0x364] ss:$8 sps:$4 sm:$0xff]   ;;  %v3046_v10 = vld [vmem:[%s4360_s1 + $0x260] ss:$8 sps:$4 sm:$0xff]  }
  0x25   : > { %2092 = vmatpush1.bf16.msra.mxu0 %v2976_v26  ;;  %v3049_v12 = vld [vmem:[%s4360_s1 + $0x360] ss:$8 sps:$4 sm:$0xff]   ;;  %v3057_v13 = vld [vmem:[%s4360_s1 + $0x354] ss:$8 sps:$4 sm:$0xff]   ;;  %v3052_v14 = vld [vmem:[%s4360_s1 + $0x250] ss:$8 sps:$4 sm:$0xff]  }
  0x26   : > { %2093 = vmatprep.subr.bf16.mxu0 %v2980_v27  ;;  %2135 = vmatpush1.bf16.msra.mxu1 %v2979_v28  ;;  %v3060_v15 = vld [vmem:[%s4360_s1 + $0x244] ss:$8 sps:$4 sm:$0xff]   ;;  %v3055_v16 = vld [vmem:[%s4360_s1 + $0x350] ss:$8 sps:$4 sm:$0xff]   ;;  %v3058_v18 = vld [vmem:[%s4360_s1 + $0x240] ss:$8 sps:$4 sm:$0xff]  }
  0x27   : > { %2136 = vmatprep.subr.bf16.mxu1 %v2983_v29  ;;  %v3063_v17 = vld [vmem:[%s4360_s1 + $0x344] ss:$8 sps:$4 sm:$0xff]   ;;  %v3066_v19 = vld [vmem:[%s4360_s1 + $0x234] ss:$8 sps:$4 sm:$0xff]   ;;  %v3061_v20 = vld [vmem:[%s4360_s1 + $0x340] ss:$8 sps:$4 sm:$0xff]  }
  0x28   : > { %v3069_v21 = vld [vmem:[%s4360_s1 + $0x334] ss:$8 sps:$4 sm:$0xff]   ;;  %v3064_v22 = vld [vmem:[%s4360_s1 + $0x230] ss:$8 sps:$4 sm:$0xff]   ;;  %v3072_v23 = vld [vmem:[%s4360_s1 + $0x224] ss:$8 sps:$4 sm:$0xff]  }
  0x29   : > { %2094 = vmatpush1.bf16.msra.mxu0 %v2982_v30  ;;  %v3067_v24 = vld [vmem:[%s4360_s1 + $0x330] ss:$8 sps:$4 sm:$0xff]   ;;  %v3075_v25 = vld [vmem:[%s4360_s1 + $0x324] ss:$8 sps:$4 sm:$0xff]   ;;  %v3070_v26 = vld [vmem:[%s4360_s1 + $0x220] ss:$8 sps:$4 sm:$0xff]  }
  0x2a   : > { %2095 = vmatprep.subr.bf16.mxu0 %v2986_v31  ;;  %2137 = vmatpush1.bf16.msra.mxu1 %v2985_v32  ;;  %v3078_v27 = vld [vmem:[%s4360_s1 + $0x214] ss:$8 sps:$4 sm:$0xff]   ;;  %v3073_v28 = vld [vmem:[%s4360_s1 + $0x320] ss:$8 sps:$4 sm:$0xff]   ;;  %v3076_v30 = vld [vmem:[%s4360_s1 + $0x210] ss:$8 sps:$4 sm:$0xff]  }
  0x2b   : > { %2138 = vmatprep.subr.bf16.mxu1 %v2989_v33  ;;  %v3081_v29 = vld [vmem:[%s4360_s1 + $0x314] ss:$8 sps:$4 sm:$0xff]   ;;  %v3079_v31 = vld [vmem:[%s4360_s1 + $0x310] ss:$8 sps:$4 sm:$0xff]   ;;  %v3084_v32 = vld [vmem:[%s4360_s1 + $0x204] ss:$8 sps:$4 sm:$0xff]  }
  0x2c   : > { %v3138_v33 = vld [vmem:[%s3582_s10 + $0x14] ss:$72 sps:$4 sm:$0xff]   ;;  %v3111_v51 = vld [vmem:[%s4360_s1 + $0x3c4] ss:$8 sps:$4 sm:$0xff]  }
  0x2d   : > { %2096 = vmatpush2.bf16.msra.mxu0 %v2988_v34  ;;  %v3087_v34 = vld [vmem:[%s4360_s1 + $0x304] ss:$8 sps:$4 sm:$0xff]   ;;  %v3105_v47 = vld [vmem:[%s4360_s1 + $0x3d4] ss:$8 sps:$4 sm:$0xff]  }
  0x2e   : > { %2097 = vmatprep.subr.bf16.mxu0 %v2992_v35  ;;  %2139 = vmatpush2.bf16.msra.mxu1 %v2991_v36  ;;  %v3082_v35 = vld [vmem:[%s4360_s1 + $0x200] ss:$8 sps:$4 sm:$0xff]   ;;  %v3144_v36 = vld [vmem:[%s3582_s10 + $0x1c] ss:$72 sps:$4 sm:$0xff]  }
  0x2f   : > { %2140 = vmatprep.subr.bf16.mxu1 %v2995_v37  ;;  %v3090_v37 = vld [vmem:[%s4360_s1 + $0x2f4] ss:$8 sps:$4 sm:$0xff]  }
  0x31   : > { %2098 = vmatpush2.bf16.msra.mxu0 %v2994_v38  ;;  %v3085_v38 = vld [vmem:[%s4360_s1 + $0x300] ss:$8 sps:$4 sm:$0xff]  }
  0x32   : > { %2099 = vmatprep.subr.bf16.mxu0 %v2998_v39  ;;  %2141 = vmatpush2.bf16.msra.mxu1 %v2997_v40  ;;  %v3093_v39 = vld [vmem:[%s4360_s1 + $0x3f4] ss:$8 sps:$4 sm:$0xff]   ;;  %v3088_v40 = vld [vmem:[%s4360_s1 + $0x2f0] ss:$8 sps:$4 sm:$0xff]  }
  0x33   : > { %2142 = vmatprep.subr.bf16.mxu1 %v3001_v41  ;;  %v3096_v41 = vld [vmem:[%s4360_s1 + $0x2e4] ss:$8 sps:$4 sm:$0xff]  }
  0x35   : > { %2100 = vmatpush2.bf16.msra.mxu0 %v3000_v42  ;;  %v3091_v42 = vld [vmem:[%s4360_s1 + $0x3f0] ss:$8 sps:$4 sm:$0xff]  }
  0x36   : > { %2101 = vmatprep.subr.bf16.mxu0 %v3004_v43  ;;  %2143 = vmatpush2.bf16.msra.mxu1 %v3003_v44  ;;  %v3099_v43 = vld [vmem:[%s4360_s1 + $0x3e4] ss:$8 sps:$4 sm:$0xff]   ;;  %v3094_v44 = vld [vmem:[%s4360_s1 + $0x2e0] ss:$8 sps:$4 sm:$0xff]  }
  0x37   : > { %2144 = vmatprep.subr.bf16.mxu1 %v3007_v45  ;;  %v3102_v45 = vld [vmem:[%s4360_s1 + $0x2d4] ss:$8 sps:$4 sm:$0xff]  }
  0x39   : > { %2102 = vmatpush2.bf16.msra.mxu0 %v3006_v46  ;;  %v3097_v46 = vld [vmem:[%s4360_s1 + $0x3e0] ss:$8 sps:$4 sm:$0xff]  }
  0x3a   : > { %2103 = vmatprep.subr.bf16.mxu0 %v3010_v48  ;;  %2145 = vmatpush2.bf16.msra.mxu1 %v3009_v49  ;;  %v3100_v48 = vld [vmem:[%s4360_s1 + $0x2d0] ss:$8 sps:$4 sm:$0xff]   ;;  %v3108_v49 = vld [vmem:[%s4360_s1 + $0x2c4] ss:$8 sps:$4 sm:$0xff]  }
  0x3b   : > { %2146 = vmatprep.subr.bf16.mxu1 %v3013_v50  ;;  %v3103_v50 = vld [vmem:[%s4360_s1 + $0x3d0] ss:$8 sps:$4 sm:$0xff]  }
  0x3d   : > { %2104 = vmatpush2.bf16.msra.mxu0 %v3012_v52  ;;  %v3106_v52 = vld [vmem:[%s4360_s1 + $0x2c0] ss:$8 sps:$4 sm:$0xff]  }
  0x3e   : > { %2105 = vmatprep.subr.bf16.mxu0 %v3016_v53  ;;  %2147 = vmatpush2.bf16.msra.mxu1 %v3015_v54  ;;  %v3114_v53 = vld [vmem:[%s4360_s1 + $0x2b4] ss:$8 sps:$4 sm:$0xff]   ;;  %v3109_v54 = vld [vmem:[%s4360_s1 + $0x3c0] ss:$8 sps:$4 sm:$0xff]  }
  0x3f   : > { %2148 = vmatprep.subr.bf16.mxu1 %v3019_v55  ;;  %v3117_v55 = vld [vmem:[%s4360_s1 + $0x3b4] ss:$8 sps:$4 sm:$0xff]  }
  0x41   : > { %2106 = vmatpush2.bf16.msra.mxu0 %v3018_v56  ;;  %v3112_v56 = vld [vmem:[%s4360_s1 + $0x2b0] ss:$8 sps:$4 sm:$0xff]  }
  0x42   : > { %2107 = vmatprep.subr.bf16.mxu0 %v3022_v57  ;;  %2149 = vmatpush2.bf16.msra.mxu1 %v3021_v58  ;;  %v3120_v57 = vld [vmem:[%s4360_s1 + $0x2a4] ss:$8 sps:$4 sm:$0xff]   ;;  %v3115_v58 = vld [vmem:[%s4360_s1 + $0x3b0] ss:$8 sps:$4 sm:$0xff]  }
  0x43   : > { %2150 = vmatprep.subr.bf16.mxu1 %v3025_v59  ;;  %v3123_v59 = vld [vmem:[%s4360_s1 + $0x3a4] ss:$8 sps:$4 sm:$0xff]  }
  0x45   : > { %2108 = vmatpush2.bf16.msra.mxu0 %v3024_v60  ;;  %v3118_v60 = vld [vmem:[%s4360_s1 + $0x2a0] ss:$8 sps:$4 sm:$0xff]  }
  0x46   : > { %2109 = vmatprep.subr.bf16.mxu0 %v3028_v61  ;;  %2151 = vmatpush2.bf16.msra.mxu1 %v3027_v62  ;;  %v3126_v61 = vld [vmem:[%s4360_s1 + $0x294] ss:$8 sps:$4 sm:$0xff]   ;;  %v3121_v62 = vld [vmem:[%s4360_s1 + $0x3a0] ss:$8 sps:$4 sm:$0xff]  }
  0x47   : > { %2152 = vmatprep.subr.bf16.mxu1 %v3031_v63  ;;  %v3129_v63 = vld [vmem:[%s4360_s1 + $0x394] ss:$8 sps:$4 sm:$0xff]  }
  0x49   : > { %2110 = vmatpush2.bf16.msra.mxu0 %v3030_v0  ;;  %v3124_v0 = vld [vmem:[%s4360_s1 + $0x290] ss:$8 sps:$4 sm:$0xff]  }
  0x4a   : > { %2165 = vmatprep.subr.bf16.mxu0 %v3039_v1  ;;  %2153 = vmatpush2.bf16.msra.mxu1 %v3036_v2  ;;  %v3132_v1 = vld [vmem:[%s4360_s1 + $0x284] ss:$8 sps:$4 sm:$0xff]   ;;  %v3127_v2 = vld [vmem:[%s4360_s1 + $0x390] ss:$8 sps:$4 sm:$0xff]  }
  0x4b   : > { %2208 = vmatprep.subr.bf16.mxu1 %v3045_v4  ;;  %v3130_v4 = vld [vmem:[%s4360_s1 + $0x280] ss:$8 sps:$4 sm:$0xff]  }
  0x4c   : > { %2112 = vmatmul.mubr.bf16.vlgmr.msra.gmra.mxu0 %v3033_v3  ;;  %v3135_v3 = vld [vmem:[%s4360_s1 + $0x384] ss:$8 sps:$4 sm:$0xff]  }
  0x4d   : > { %2166 = vmatpush1.bf16.msra.mxu0 %v3037_v5  ;;  %2155 = vmatmul.mubr.bf16.vlgmr.msra.gmra.mxu1 %v3040_v6  ;;  %v3141_v5 = vld [vmem:[%s4360_s1 + $0x474] ss:$8 sps:$4 sm:$0xff]   ;;  %v3133_v6 = vld [vmem:[%s4360_s1 + $0x380] ss:$8 sps:$4 sm:$0xff]  }
  0x4e   : > { %2167 = vmatprep.subr.bf16.mxu0 %v3048_v7  ;;  %2209 = vmatpush1.bf16.msra.mxu1 %v3043_v8  ;;  %v3136_v7 = vld [vmem:[%s3582_s10 + $0x10] ss:$72 sps:$4 sm:$0xff]   ;;  %v3147_v8 = vld [vmem:[%s4360_s1 + $0x574] ss:$8 sps:$4 sm:$0xff]  }
  0x4f   : > { %2210 = vmatprep.subr.bf16.mxu1 %v3051_v9  ;;  %2197 = vmatprep.mubr.bf16.mxu0 %v3138_v33  ;;  %v3139_v9 = vld [vmem:[%s4360_s1 + $0x470] ss:$8 sps:$4 sm:$0xff]   ;;  %v3180_v33 = vld [vmem:[%s4360_s1 + $0x414] ss:$8 sps:$4 sm:$0xff]  }
  0x50   : > { %2240 = vmatprep.mubr.bf16.mxu1 %v3144_v36  ;;  %v3178_v36 = vld [vmem:[%s4360_s1 + $0x410] ss:$8 sps:$4 sm:$0xff]  }
  0x51   : > { %2168 = vmatpush1.bf16.msra.mxu0 %v3046_v10  ;;  %v3142_v10 = vld [vmem:[%s3582_s10 + $0x18] ss:$72 sps:$4 sm:$0xff]  }
  0x52   : > { %2169 = vmatprep.subr.bf16.mxu0 %v3054_v11  ;;  %2211 = vmatpush1.bf16.msra.mxu1 %v3049_v12  ;;  %v3150_v11 = vld [vmem:[%s4360_s1 + $0x464] ss:$8 sps:$4 sm:$0xff]   ;;  %v3145_v12 = vld [vmem:[%s4360_s1 + $0x570] ss:$8 sps:$4 sm:$0xff]  }
  0x53   : > { %2212 = vmatprep.subr.bf16.mxu1 %v3057_v13  ;;  %v3153_v13 = vld [vmem:[%s4360_s1 + $0x564] ss:$8 sps:$4 sm:$0xff]  }
  0x55   : > { %2170 = vmatpush1.bf16.msra.mxu0 %v3052_v14  ;;  %v3148_v14 = vld [vmem:[%s4360_s1 + $0x460] ss:$8 sps:$4 sm:$0xff]  }
  0x56   : > { %2171 = vmatprep.subr.bf16.mxu0 %v3060_v15  ;;  %2213 = vmatpush1.bf16.msra.mxu1 %v3055_v16  ;;  %v3156_v15 = vld [vmem:[%s4360_s1 + $0x454] ss:$8 sps:$4 sm:$0xff]   ;;  %v3151_v16 = vld [vmem:[%s4360_s1 + $0x560] ss:$8 sps:$4 sm:$0xff]  }
  0x57   : > { %2214 = vmatprep.subr.bf16.mxu1 %v3063_v17  ;;  %v3159_v17 = vld [vmem:[%s4360_s1 + $0x554] ss:$8 sps:$4 sm:$0xff]  }
  0x59   : > { %2172 = vmatpush1.bf16.msra.mxu0 %v3058_v18  ;;  %v3240_v18 = vld [vmem:[%s3582_s10 + $0x24] ss:$72 sps:$4 sm:$0xff]  }
  0x5a   : > { %2173 = vmatprep.subr.bf16.mxu0 %v3066_v19  ;;  %2215 = vmatpush1.bf16.msra.mxu1 %v3061_v20  ;;  %v3154_v19 = vld [vmem:[%s4360_s1 + $0x450] ss:$8 sps:$4 sm:$0xff]  }
  0x5b   : > { %2216 = vmatprep.subr.bf16.mxu1 %v3069_v21  ;;  %v3157_v20 = vld [vmem:[%s4360_s1 + $0x550] ss:$8 sps:$4 sm:$0xff]   ;;  %v3162_v21 = vld [vmem:[%s4360_s1 + $0x444] ss:$8 sps:$4 sm:$0xff]  }
  0x5d   : > { %2174 = vmatpush1.bf16.msra.mxu0 %v3064_v22  ;;  %v3246_v22 = vld [vmem:[%s3582_s10 + $0x2c] ss:$72 sps:$4 sm:$0xff]  }
  0x5e   : > { %2175 = vmatprep.subr.bf16.mxu0 %v3072_v23  ;;  %2217 = vmatpush1.bf16.msra.mxu1 %v3067_v24  ;;  %v3165_v23 = vld [vmem:[%s4360_s1 + $0x544] ss:$8 sps:$4 sm:$0xff]   ;;  %v3160_v24 = vld [vmem:[%s4360_s1 + $0x440] ss:$8 sps:$4 sm:$0xff]  }
  0x5f   : > { %2218 = vmatprep.subr.bf16.mxu1 %v3075_v25  ;;  %v3168_v25 = vld [vmem:[%s4360_s1 + $0x434] ss:$8 sps:$4 sm:$0xff]  }
  0x61   : > { %2176 = vmatpush1.bf16.msra.mxu0 %v3070_v26  ;;  %v3163_v26 = vld [vmem:[%s4360_s1 + $0x540] ss:$8 sps:$4 sm:$0xff]  }
  0x62   : > { %2177 = vmatprep.subr.bf16.mxu0 %v3078_v27  ;;  %2219 = vmatpush1.bf16.msra.mxu1 %v3073_v28  ;;  %v3171_v27 = vld [vmem:[%s4360_s1 + $0x534] ss:$8 sps:$4 sm:$0xff]   ;;  %v3166_v28 = vld [vmem:[%s4360_s1 + $0x430] ss:$8 sps:$4 sm:$0xff]  }
  0x63   : > { %2220 = vmatprep.subr.bf16.mxu1 %v3081_v29  ;;  %v3174_v29 = vld [vmem:[%s4360_s1 + $0x424] ss:$8 sps:$4 sm:$0xff]  }
  0x65   : > { %2178 = vmatpush1.bf16.msra.mxu0 %v3076_v30  ;;  %v3169_v30 = vld [vmem:[%s4360_s1 + $0x530] ss:$8 sps:$4 sm:$0xff]  }
  0x66   : > { %2179 = vmatprep.subr.bf16.mxu0 %v3084_v32  ;;  %2221 = vmatpush1.bf16.msra.mxu1 %v3079_v31  ;;  %v3177_v31 = vld [vmem:[%s4360_s1 + $0x524] ss:$8 sps:$4 sm:$0xff]   ;;  %v3172_v32 = vld [vmem:[%s4360_s1 + $0x420] ss:$8 sps:$4 sm:$0xff]  }
  0x67   : > { %2222 = vmatprep.subr.bf16.mxu1 %v3087_v34  ;;  %v3175_v34 = vld [vmem:[%s4360_s1 + $0x520] ss:$8 sps:$4 sm:$0xff]  }
  0x69   : > { %2180 = vmatpush1.bf16.msra.mxu0 %v3082_v35  ;;  %v3183_v35 = vld [vmem:[%s4360_s1 + $0x514] ss:$8 sps:$4 sm:$0xff]  }
  0x6a   : > { %2181 = vmatprep.subr.bf16.mxu0 %v3090_v37  ;;  %2223 = vmatpush1.bf16.msra.mxu1 %v3085_v38  ;;  %v3186_v37 = vld [vmem:[%s4360_s1 + $0x404] ss:$8 sps:$4 sm:$0xff]   ;;  %v3181_v38 = vld [vmem:[%s4360_s1 + $0x510] ss:$8 sps:$4 sm:$0xff]  }
  0x6b   : > { %2224 = vmatprep.subr.bf16.mxu1 %v3093_v39  ;;  %v3189_v39 = vld [vmem:[%s4360_s1 + $0x504] ss:$8 sps:$4 sm:$0xff]  }
  0x6d   : > { %2182 = vmatpush2.bf16.msra.mxu0 %v3088_v40  ;;  %v3184_v40 = vld [vmem:[%s4360_s1 + $0x400] ss:$8 sps:$4 sm:$0xff]  }
  0x6e   : > { %2183 = vmatprep.subr.bf16.mxu0 %v3096_v41  ;;  %2225 = vmatpush2.bf16.msra.mxu1 %v3091_v42  ;;  %v3192_v41 = vld [vmem:[%s4360_s1 + $0x4f4] ss:$8 sps:$4 sm:$0xff]   ;;  %v3187_v42 = vld [vmem:[%s4360_s1 + $0x500] ss:$8 sps:$4 sm:$0xff]  }
  0x6f   : > { %2226 = vmatprep.subr.bf16.mxu1 %v3099_v43  ;;  %v3195_v43 = vld [vmem:[%s4360_s1 + $0x5f4] ss:$8 sps:$4 sm:$0xff]  }
  0x71   : > { %2184 = vmatpush2.bf16.msra.mxu0 %v3094_v44  ;;  %v3190_v44 = vld [vmem:[%s4360_s1 + $0x4f0] ss:$8 sps:$4 sm:$0xff]  }
  0x72   : > { %2185 = vmatprep.subr.bf16.mxu0 %v3102_v45  ;;  %2227 = vmatpush2.bf16.msra.mxu1 %v3097_v46  ;;  %v3198_v45 = vld [vmem:[%s4360_s1 + $0x4e4] ss:$8 sps:$4 sm:$0xff]   ;;  %v3193_v46 = vld [vmem:[%s4360_s1 + $0x5f0] ss:$8 sps:$4 sm:$0xff]  }
  0x73   : > { %2228 = vmatprep.subr.bf16.mxu1 %v3105_v47  ;;  %v3201_v47 = vld [vmem:[%s4360_s1 + $0x5e4] ss:$8 sps:$4 sm:$0xff]  }
  0x75   : > { %2186 = vmatpush2.bf16.msra.mxu0 %v3100_v48  ;;  %v3196_v48 = vld [vmem:[%s4360_s1 + $0x4e0] ss:$8 sps:$4 sm:$0xff]  }
  0x76   : > { %2187 = vmatprep.subr.bf16.mxu0 %v3108_v49  ;;  %2229 = vmatpush2.bf16.msra.mxu1 %v3103_v50  ;;  %v3204_v49 = vld [vmem:[%s4360_s1 + $0x4d4] ss:$8 sps:$4 sm:$0xff]   ;;  %v3199_v50 = vld [vmem:[%s4360_s1 + $0x5e0] ss:$8 sps:$4 sm:$0xff]  }
  0x77   : > { %2230 = vmatprep.subr.bf16.mxu1 %v3111_v51  ;;  %v3207_v51 = vld [vmem:[%s4360_s1 + $0x5d4] ss:$8 sps:$4 sm:$0xff]  }
  0x79   : > { %2188 = vmatpush2.bf16.msra.mxu0 %v3106_v52  ;;  %v3202_v52 = vld [vmem:[%s4360_s1 + $0x4d0] ss:$8 sps:$4 sm:$0xff]  }
  0x7a   : > { %2189 = vmatprep.subr.bf16.mxu0 %v3114_v53  ;;  %2231 = vmatpush2.bf16.msra.mxu1 %v3109_v54  ;;  %v3210_v53 = vld [vmem:[%s4360_s1 + $0x4c4] ss:$8 sps:$4 sm:$0xff]   ;;  %v3205_v54 = vld [vmem:[%s4360_s1 + $0x5d0] ss:$8 sps:$4 sm:$0xff]  }
  0x7b   : > { %2232 = vmatprep.subr.bf16.mxu1 %v3117_v55  ;;  %v3213_v55 = vld [vmem:[%s4360_s1 + $0x5c4] ss:$8 sps:$4 sm:$0xff]  }
  0x7d   : > { %2190 = vmatpush2.bf16.msra.mxu0 %v3112_v56  ;;  %v3208_v56 = vld [vmem:[%s4360_s1 + $0x4c0] ss:$8 sps:$4 sm:$0xff]  }
  0x7e   : > { %2191 = vmatprep.subr.bf16.mxu0 %v3120_v57  ;;  %2233 = vmatpush2.bf16.msra.mxu1 %v3115_v58  ;;  %v3216_v57 = vld [vmem:[%s4360_s1 + $0x4b4] ss:$8 sps:$4 sm:$0xff]   ;;  %v3211_v58 = vld [vmem:[%s4360_s1 + $0x5c0] ss:$8 sps:$4 sm:$0xff]  }
  0x7f   : > { %2234 = vmatprep.subr.bf16.mxu1 %v3123_v59  ;;  %v3219_v59 = vld [vmem:[%s4360_s1 + $0x5b4] ss:$8 sps:$4 sm:$0xff]  }
  0x81   : > { %2192 = vmatpush2.bf16.msra.mxu0 %v3118_v60  ;;  %v3214_v60 = vld [vmem:[%s4360_s1 + $0x4b0] ss:$8 sps:$4 sm:$0xff]  }
  0x82   : > { %2193 = vmatprep.subr.bf16.mxu0 %v3126_v61  ;;  %2235 = vmatpush2.bf16.msra.mxu1 %v3121_v62  ;;  %v3222_v61 = vld [vmem:[%s4360_s1 + $0x4a4] ss:$8 sps:$4 sm:$0xff]   ;;  %v3217_v62 = vld [vmem:[%s4360_s1 + $0x5b0] ss:$8 sps:$4 sm:$0xff]  }
  0x83   : > { %2236 = vmatprep.subr.bf16.mxu1 %v3129_v63  ;;  %v3225_v63 = vld [vmem:[%s4360_s1 + $0x5a4] ss:$8 sps:$4 sm:$0xff]  }
  0x85   : > { %2194 = vmatpush2.bf16.msra.mxu0 %v3124_v0  ;;  %v3220_v0 = vld [vmem:[%s4360_s1 + $0x4a0] ss:$8 sps:$4 sm:$0xff]  }
  0x86   : > { %2195 = vmatprep.subr.bf16.mxu0 %v3132_v1  ;;  %2237 = vmatpush2.bf16.msra.mxu1 %v3127_v2  ;;  %v3228_v1 = vld [vmem:[%s4360_s1 + $0x494] ss:$8 sps:$4 sm:$0xff]   ;;  %v3223_v2 = vld [vmem:[%s4360_s1 + $0x5a0] ss:$8 sps:$4 sm:$0xff]  }
  0x87   : > { %2238 = vmatprep.subr.bf16.mxu1 %v3135_v3  ;;  %v3231_v3 = vld [vmem:[%s4360_s1 + $0x594] ss:$8 sps:$4 sm:$0xff]  }
  0x89   : > { %2196 = vmatpush2.bf16.msra.mxu0 %v3130_v4  ;;  %v3226_v4 = vld [vmem:[%s4360_s1 + $0x490] ss:$8 sps:$4 sm:$0xff]  }
  0x8a   : > { %2251 = vmatprep.subr.bf16.mxu0 %v3141_v5  ;;  %2239 = vmatpush2.bf16.msra.mxu1 %v3133_v6  ;;  %v3234_v5 = vld [vmem:[%s4360_s1 + $0x484] ss:$8 sps:$4 sm:$0xff]   ;;  %v3229_v6 = vld [vmem:[%s4360_s1 + $0x590] ss:$8 sps:$4 sm:$0xff]  }
  0x8b   : > { %2294 = vmatprep.subr.bf16.mxu1 %v3147_v8  ;;  %v3237_v8 = vld [vmem:[%s4360_s1 + $0x584] ss:$8 sps:$4 sm:$0xff]  }
  0x8c   : > { %2198 = vmatmul.mubr.bf16.vlgmr.msra.gmra.mxu0 %v3136_v7  ;;  %v3232_v7 = vld [vmem:[%s4360_s1 + $0x480] ss:$8 sps:$4 sm:$0xff]  }
  0x8d   : > { %2252 = vmatpush1.bf16.msra.mxu0 %v3139_v9  ;;  %2241 = vmatmul.mubr.bf16.vlgmr.msra.gmra.mxu1 %v3142_v10  ;;  %v3235_v9 = vld [vmem:[%s4360_s1 + $0x580] ss:$8 sps:$4 sm:$0xff]   ;;  %v3243_v10 = vld [vmem:[%s4360_s1 + $0x674] ss:$8 sps:$4 sm:$0xff]  }
  0x8e   : > { %2253 = vmatprep.subr.bf16.mxu0 %v3150_v11  ;;  %2295 = vmatpush1.bf16.msra.mxu1 %v3145_v12  ;;  %v3238_v11 = vld [vmem:[%s3582_s10 + $0x20] ss:$72 sps:$4 sm:$0xff]   ;;  %v3241_v12 = vld [vmem:[%s4360_s1 + $0x670] ss:$8 sps:$4 sm:$0xff]  }
  0x8f   : > { %2296 = vmatprep.subr.bf16.mxu1 %v3153_v13  ;;  %2283 = vmatprep.mubr.bf16.mxu0 %v3240_v18  ;;  %v3244_v13 = vld [vmem:[%s3582_s10 + $0x28] ss:$72 sps:$4 sm:$0xff]   ;;  %v3348_v18 = vld [vmem:[%s3582_s10 + $0x3c] ss:$72 sps:$4 sm:$0xff]  }
  0x90   : > { %2326 = vmatprep.mubr.bf16.mxu1 %v3246_v22  ;;  %v3253_v22 = vld [vmem:[%s4360_s1 + $0x760] ss:$8 sps:$4 sm:$0xff]  }
  0x91   : > { %2254 = vmatpush1.bf16.msra.mxu0 %v3148_v14  ;;  %v3249_v14 = vld [vmem:[%s4360_s1 + $0x774] ss:$8 sps:$4 sm:$0xff]  }
  0x92   : > { %2255 = vmatprep.subr.bf16.mxu0 %v3156_v15  ;;  %2297 = vmatpush1.bf16.msra.mxu1 %v3151_v16  ;;  %v3342_v15 = vld [vmem:[%s3582_s10 + $0x34] ss:$72 sps:$4 sm:$0xff]   ;;  %v3252_v16 = vld [vmem:[%s4360_s1 + $0x664] ss:$8 sps:$4 sm:$0xff]  }
  0x93   : > { %2298 = vmatprep.subr.bf16.mxu1 %v3159_v17  ;;  %v3247_v17 = vld [vmem:[%s4360_s1 + $0x770] ss:$8 sps:$4 sm:$0xff]  }
  0x95   : > { %2256 = vmatpush1.bf16.msra.mxu0 %v3154_v19  ;;  %v3255_v19 = vld [vmem:[%s4360_s1 + $0x764] ss:$8 sps:$4 sm:$0xff]  }
  0x96   : > { %2257 = vmatprep.subr.bf16.mxu0 %v3162_v21  ;;  %2299 = vmatpush1.bf16.msra.mxu1 %v3157_v20  ;;  %v3250_v20 = vld [vmem:[%s4360_s1 + $0x660] ss:$8 sps:$4 sm:$0xff]   ;;  %v3258_v21 = vld [vmem:[%s4360_s1 + $0x654] ss:$8 sps:$4 sm:$0xff]  }
  0x97   : > { %2300 = vmatprep.subr.bf16.mxu1 %v3165_v23  ;;  %v3261_v23 = vld [vmem:[%s4360_s1 + $0x754] ss:$8 sps:$4 sm:$0xff]  }
  0x99   : > { %2258 = vmatpush1.bf16.msra.mxu0 %v3160_v24  ;;  %v3256_v24 = vld [vmem:[%s4360_s1 + $0x650] ss:$8 sps:$4 sm:$0xff]  }
  0x9a   : > { %2259 = vmatprep.subr.bf16.mxu0 %v3168_v25  ;;  %2301 = vmatpush1.bf16.msra.mxu1 %v3163_v26  ;;  %v3264_v25 = vld [vmem:[%s4360_s1 + $0x644] ss:$8 sps:$4 sm:$0xff]   ;;  %v3259_v26 = vld [vmem:[%s4360_s1 + $0x750] ss:$8 sps:$4 sm:$0xff]  }
  0x9b   : > { %2302 = vmatprep.subr.bf16.mxu1 %v3171_v27  ;;  %v3267_v27 = vld [vmem:[%s4360_s1 + $0x744] ss:$8 sps:$4 sm:$0xff]  }
  0x9d   : > { %2260 = vmatpush1.bf16.msra.mxu0 %v3166_v28  ;;  %v3262_v28 = vld [vmem:[%s4360_s1 + $0x640] ss:$8 sps:$4 sm:$0xff]  }
  0x9e   : > { %2261 = vmatprep.subr.bf16.mxu0 %v3174_v29  ;;  %2303 = vmatpush1.bf16.msra.mxu1 %v3169_v30  ;;  %v3270_v29 = vld [vmem:[%s4360_s1 + $0x634] ss:$8 sps:$4 sm:$0xff]   ;;  %v3265_v30 = vld [vmem:[%s4360_s1 + $0x740] ss:$8 sps:$4 sm:$0xff]  }
  0x9f   : > { %2304 = vmatprep.subr.bf16.mxu1 %v3177_v31  ;;  %v3273_v31 = vld [vmem:[%s4360_s1 + $0x734] ss:$8 sps:$4 sm:$0xff]  }
  0xa1   : > { %2262 = vmatpush1.bf16.msra.mxu0 %v3172_v32  ;;  %v3268_v32 = vld [vmem:[%s4360_s1 + $0x630] ss:$8 sps:$4 sm:$0xff]  }
  0xa2   : > { %2263 = vmatprep.subr.bf16.mxu0 %v3180_v33  ;;  %2305 = vmatpush1.bf16.msra.mxu1 %v3175_v34  ;;  %v3276_v33 = vld [vmem:[%s4360_s1 + $0x624] ss:$8 sps:$4 sm:$0xff]   ;;  %v3271_v34 = vld [vmem:[%s4360_s1 + $0x730] ss:$8 sps:$4 sm:$0xff]  }
  0xa3   : > { %2306 = vmatprep.subr.bf16.mxu1 %v3183_v35  ;;  %v3279_v35 = vld [vmem:[%s4360_s1 + $0x724] ss:$8 sps:$4 sm:$0xff]  }
  0xa5   : > { %2264 = vmatpush1.bf16.msra.mxu0 %v3178_v36  ;;  %v3274_v36 = vld [vmem:[%s4360_s1 + $0x620] ss:$8 sps:$4 sm:$0xff]  }
  0xa6   : > { %2265 = vmatprep.subr.bf16.mxu0 %v3186_v37  ;;  %2307 = vmatpush1.bf16.msra.mxu1 %v3181_v38  ;;  %v3282_v37 = vld [vmem:[%s4360_s1 + $0x614] ss:$8 sps:$4 sm:$0xff]   ;;  %v3277_v38 = vld [vmem:[%s4360_s1 + $0x720] ss:$8 sps:$4 sm:$0xff]  }
  0xa7   : > { %2308 = vmatprep.subr.bf16.mxu1 %v3189_v39  ;;  %v3285_v39 = vld [vmem:[%s4360_s1 + $0x714] ss:$8 sps:$4 sm:$0xff]  }
  0xa9   : > { %2266 = vmatpush1.bf16.msra.mxu0 %v3184_v40  ;;  %v3280_v40 = vld [vmem:[%s4360_s1 + $0x610] ss:$8 sps:$4 sm:$0xff]  }
  0xaa   : > { %2267 = vmatprep.subr.bf16.mxu0 %v3192_v41  ;;  %2309 = vmatpush1.bf16.msra.mxu1 %v3187_v42  ;;  %v3288_v41 = vld [vmem:[%s4360_s1 + $0x604] ss:$8 sps:$4 sm:$0xff]   ;;  %v3283_v42 = vld [vmem:[%s4360_s1 + $0x710] ss:$8 sps:$4 sm:$0xff]  }
  0xab   : > { %2310 = vmatprep.subr.bf16.mxu1 %v3195_v43  ;;  %v3291_v43 = vld [vmem:[%s4360_s1 + $0x704] ss:$8 sps:$4 sm:$0xff]  }
  0xad   : > { %2268 = vmatpush2.bf16.msra.mxu0 %v3190_v44  ;;  %v3286_v44 = vld [vmem:[%s4360_s1 + $0x600] ss:$8 sps:$4 sm:$0xff]  }
  0xae   : > { %2269 = vmatprep.subr.bf16.mxu0 %v3198_v45  ;;  %2311 = vmatpush2.bf16.msra.mxu1 %v3193_v46  ;;  %v3294_v45 = vld [vmem:[%s4360_s1 + $0x6f4] ss:$8 sps:$4 sm:$0xff]   ;;  %v3289_v46 = vld [vmem:[%s4360_s1 + $0x700] ss:$8 sps:$4 sm:$0xff]  }
  0xaf   : > { %2312 = vmatprep.subr.bf16.mxu1 %v3201_v47  ;;  %v3297_v47 = vld [vmem:[%s4360_s1 + $0x7f4] ss:$8 sps:$4 sm:$0xff]  }
  0xb1   : > { %2270 = vmatpush2.bf16.msra.mxu0 %v3196_v48  ;;  %v3292_v48 = vld [vmem:[%s4360_s1 + $0x6f0] ss:$8 sps:$4 sm:$0xff]  }
  0xb2   : > { %2271 = vmatprep.subr.bf16.mxu0 %v3204_v49  ;;  %2313 = vmatpush2.bf16.msra.mxu1 %v3199_v50  ;;  %v3300_v49 = vld [vmem:[%s4360_s1 + $0x6e4] ss:$8 sps:$4 sm:$0xff]   ;;  %v3295_v50 = vld [vmem:[%s4360_s1 + $0x7f0] ss:$8 sps:$4 sm:$0xff]  }
  0xb3   : > { %2314 = vmatprep.subr.bf16.mxu1 %v3207_v51  ;;  %v3303_v51 = vld [vmem:[%s4360_s1 + $0x7e4] ss:$8 sps:$4 sm:$0xff]  }
  0xb5   : > { %2272 = vmatpush2.bf16.msra.mxu0 %v3202_v52  ;;  %v3298_v52 = vld [vmem:[%s4360_s1 + $0x6e0] ss:$8 sps:$4 sm:$0xff]  }
  0xb6   : > { %2273 = vmatprep.subr.bf16.mxu0 %v3210_v53  ;;  %2315 = vmatpush2.bf16.msra.mxu1 %v3205_v54  ;;  %v3306_v53 = vld [vmem:[%s4360_s1 + $0x6d4] ss:$8 sps:$4 sm:$0xff]   ;;  %v3301_v54 = vld [vmem:[%s4360_s1 + $0x7e0] ss:$8 sps:$4 sm:$0xff]  }
  0xb7   : > { %2316 = vmatprep.subr.bf16.mxu1 %v3213_v55  ;;  %v3309_v55 = vld [vmem:[%s4360_s1 + $0x7d4] ss:$8 sps:$4 sm:$0xff]  }
  0xb9   : > { %2274 = vmatpush2.bf16.msra.mxu0 %v3208_v56  ;;  %v3304_v56 = vld [vmem:[%s4360_s1 + $0x6d0] ss:$8 sps:$4 sm:$0xff]  }
  0xba   : > { %2275 = vmatprep.subr.bf16.mxu0 %v3216_v57  ;;  %2317 = vmatpush2.bf16.msra.mxu1 %v3211_v58  ;;  %v3312_v57 = vld [vmem:[%s4360_s1 + $0x6c4] ss:$8 sps:$4 sm:$0xff]   ;;  %v3307_v58 = vld [vmem:[%s4360_s1 + $0x7d0] ss:$8 sps:$4 sm:$0xff]  }
  0xbb   : > { %2318 = vmatprep.subr.bf16.mxu1 %v3219_v59  ;;  %v3315_v59 = vld [vmem:[%s4360_s1 + $0x7c4] ss:$8 sps:$4 sm:$0xff]  }
  0xbd   : > { %2276 = vmatpush2.bf16.msra.mxu0 %v3214_v60  ;;  %v3310_v60 = vld [vmem:[%s4360_s1 + $0x6c0] ss:$8 sps:$4 sm:$0xff]  }
  0xbe   : > { %2277 = vmatprep.subr.bf16.mxu0 %v3222_v61  ;;  %2319 = vmatpush2.bf16.msra.mxu1 %v3217_v62  ;;  %v3318_v61 = vld [vmem:[%s4360_s1 + $0x6b4] ss:$8 sps:$4 sm:$0xff]   ;;  %v3313_v62 = vld [vmem:[%s4360_s1 + $0x7c0] ss:$8 sps:$4 sm:$0xff]  }
  0xbf   : > { %2320 = vmatprep.subr.bf16.mxu1 %v3225_v63  ;;  %v3321_v63 = vld [vmem:[%s4360_s1 + $0x7b4] ss:$8 sps:$4 sm:$0xff]  }
  0xc1   : > { %2278 = vmatpush2.bf16.msra.mxu0 %v3220_v0  ;;  %v3316_v0 = vld [vmem:[%s4360_s1 + $0x6b0] ss:$8 sps:$4 sm:$0xff]  }
  0xc2   : > { %2279 = vmatprep.subr.bf16.mxu0 %v3228_v1  ;;  %2321 = vmatpush2.bf16.msra.mxu1 %v3223_v2  ;;  %v3324_v1 = vld [vmem:[%s4360_s1 + $0x6a4] ss:$8 sps:$4 sm:$0xff]   ;;  %v3319_v2 = vld [vmem:[%s4360_s1 + $0x7b0] ss:$8 sps:$4 sm:$0xff]  }
  0xc3   : > { %2322 = vmatprep.subr.bf16.mxu1 %v3231_v3  ;;  %v3327_v3 = vld [vmem:[%s4360_s1 + $0x7a4] ss:$8 sps:$4 sm:$0xff]  }
  0xc5   : > { %2280 = vmatpush2.bf16.msra.mxu0 %v3226_v4  ;;  %v3322_v4 = vld [vmem:[%s4360_s1 + $0x6a0] ss:$8 sps:$4 sm:$0xff]  }
  0xc6   : > { %2281 = vmatprep.subr.bf16.mxu0 %v3234_v5  ;;  %2323 = vmatpush2.bf16.msra.mxu1 %v3229_v6  ;;  %v3330_v5 = vld [vmem:[%s4360_s1 + $0x694] ss:$8 sps:$4 sm:$0xff]   ;;  %v3325_v6 = vld [vmem:[%s4360_s1 + $0x7a0] ss:$8 sps:$4 sm:$0xff]  }
  0xc7   : > { %2324 = vmatprep.subr.bf16.mxu1 %v3237_v8  ;;  %v3328_v8 = vld [vmem:[%s4360_s1 + $0x690] ss:$8 sps:$4 sm:$0xff]  }
  0xc9   : > { %2282 = vmatpush2.bf16.msra.mxu0 %v3232_v7  ;;  %v3333_v7 = vld [vmem:[%s4360_s1 + $0x794] ss:$8 sps:$4 sm:$0xff]  }
  0xca   : > { %2337 = vmatprep.subr.bf16.mxu0 %v3243_v10  ;;  %2325 = vmatpush2.bf16.msra.mxu1 %v3235_v9  ;;  %v3336_v9 = vld [vmem:[%s4360_s1 + $0x684] ss:$8 sps:$4 sm:$0xff]   ;;  %v3331_v10 = vld [vmem:[%s4360_s1 + $0x790] ss:$8 sps:$4 sm:$0xff]  }
  0xcb   : > { %2380 = vmatprep.subr.bf16.mxu1 %v3249_v14  ;;  %v3337_v14 = vld [vmem:[%s4360_s1 + $0x780] ss:$8 sps:$4 sm:$0xff]  }
  0xcc   : > { %2284 = vmatmul.mubr.bf16.vlgmr.msra.gmra.mxu0 %v3238_v11  ;;  %v3339_v11 = vld [vmem:[%s4360_s1 + $0x784] ss:$8 sps:$4 sm:$0xff]  }
  0xcd   : > { %2338 = vmatpush1.bf16.msra.mxu0 %v3241_v12  ;;  %2369 = vmatprep.mubr.bf16.mxu0 %v3342_v15  ;;  %v3334_v12 = vld [vmem:[%s4360_s1 + $0x680] ss:$8 sps:$4 sm:$0xff]   ;;  %v3340_v15 = vld [vmem:[%s3582_s10 + $0x30] ss:$72 sps:$4 sm:$0xff]  }
  0xce   : > { %2327 = vmatmul.mubr.bf16.vlgmr.msra.gmra.mxu1 %v3244_v13  ;;  %2339 = vmatprep.subr.bf16.mxu0 %v3252_v16  ;;  %v3345_v13 = vld [vmem:[%s4360_s1 + $0x874] ss:$8 sps:$4 sm:$0xff]   ;;  %v3343_v16 = vld [vmem:[%s4360_s1 + $0x870] ss:$8 sps:$4 sm:$0xff]  }
  0xcf   : > { %2381 = vmatpush1.bf16.msra.mxu1 %v3247_v17  ;;  %2412 = vmatprep.mubr.bf16.mxu1 %v3348_v18  ;;  %v3396_v17 = vld [vmem:[%s3582_s10 + $0x44] ss:$72 sps:$4 sm:$0xff]   ;;  %v3346_v18 = vld [vmem:[%s3582_s10 + $0x38] ss:$72 sps:$4 sm:$0xff]  }
  0xd0   : > { %2382 = vmatprep.subr.bf16.mxu1 %v3255_v19  ;;  %v3351_v19 = vld [vmem:[%s4360_s1 + $0x864] ss:$8 sps:$4 sm:$0xff]  }
  0xd1   : > { %2340 = vmatpush1.bf16.msra.mxu0 %v3250_v20  ;;  %v3349_v20 = vld [vmem:[%s4360_s1 + $0x860] ss:$8 sps:$4 sm:$0xff]  }
  0xd2   : > { %2341 = vmatprep.subr.bf16.mxu0 %v3258_v21  ;;  %v3354_v21 = vld [vmem:[%s4360_s1 + $0x854] ss:$8 sps:$4 sm:$0xff]  }
  0xd3   : > { %2383 = vmatpush1.bf16.msra.mxu1 %v3253_v22  ;;  %v3352_v22 = vld [vmem:[%s4360_s1 + $0x850] ss:$8 sps:$4 sm:$0xff]  }
  0xd4   : > { %2384 = vmatprep.subr.bf16.mxu1 %v3261_v23  ;;  %v3357_v23 = vld [vmem:[%s4360_s1 + $0x844] ss:$8 sps:$4 sm:$0xff]  }
  0xd5   : > { %2342 = vmatpush1.bf16.msra.mxu0 %v3256_v24  ;;  %v3355_v24 = vld [vmem:[%s4360_s1 + $0x840] ss:$8 sps:$4 sm:$0xff]  }
  0xd6   : > { %2343 = vmatprep.subr.bf16.mxu0 %v3264_v25  ;;  %v3360_v25 = vld [vmem:[%s4360_s1 + $0x834] ss:$8 sps:$4 sm:$0xff]  }
  0xd7   : > { %2385 = vmatpush1.bf16.msra.mxu1 %v3259_v26  ;;  %v3358_v26 = vld [vmem:[%s4360_s1 + $0x830] ss:$8 sps:$4 sm:$0xff]  }
  0xd8   : > { %2386 = vmatprep.subr.bf16.mxu1 %v3267_v27  ;;  %v3363_v27 = vld [vmem:[%s4360_s1 + $0x824] ss:$8 sps:$4 sm:$0xff]  }
  0xd9   : > { %2344 = vmatpush1.bf16.msra.mxu0 %v3262_v28  ;;  %v3361_v28 = vld [vmem:[%s4360_s1 + $0x820] ss:$8 sps:$4 sm:$0xff]  }
  0xda   : > { %2345 = vmatprep.subr.bf16.mxu0 %v3270_v29  ;;  %v3366_v29 = vld [vmem:[%s4360_s1 + $0x814] ss:$8 sps:$4 sm:$0xff]  }
  0xdb   : > { %2387 = vmatpush1.bf16.msra.mxu1 %v3265_v30  ;;  %v3364_v30 = vld [vmem:[%s4360_s1 + $0x810] ss:$8 sps:$4 sm:$0xff]  }
  0xdc   : > { %2388 = vmatprep.subr.bf16.mxu1 %v3273_v31  ;;  %v3369_v31 = vld [vmem:[%s4360_s1 + $0x804] ss:$8 sps:$4 sm:$0xff]  }
  0xdd   : > { %2346 = vmatpush1.bf16.msra.mxu0 %v3268_v32  ;;  %v3367_v32 = vld [vmem:[%s4360_s1 + $0x800] ss:$8 sps:$4 sm:$0xff]  }
  0xde   : > { %2347 = vmatprep.subr.bf16.mxu0 %v3276_v33  ;;  %v3372_v33 = vld [vmem:[%s4360_s1 + $0x8f4] ss:$8 sps:$4 sm:$0xff]  }
  0xdf   : > { %2389 = vmatpush1.bf16.msra.mxu1 %v3271_v34  ;;  %v3370_v34 = vld [vmem:[%s4360_s1 + $0x8f0] ss:$8 sps:$4 sm:$0xff]  }
  0xe0   : > { %2390 = vmatprep.subr.bf16.mxu1 %v3279_v35  ;;  %v3375_v35 = vld [vmem:[%s4360_s1 + $0x8e4] ss:$8 sps:$4 sm:$0xff]  }
  0xe1   : > { %2348 = vmatpush1.bf16.msra.mxu0 %v3274_v36  ;;  %v3373_v36 = vld [vmem:[%s4360_s1 + $0x8e0] ss:$8 sps:$4 sm:$0xff]  }
  0xe2   : > { %2349 = vmatprep.subr.bf16.mxu0 %v3282_v37  ;;  %v3378_v37 = vld [vmem:[%s4360_s1 + $0x8d4] ss:$8 sps:$4 sm:$0xff]  }
  0xe3   : > { %2391 = vmatpush1.bf16.msra.mxu1 %v3277_v38  ;;  %v3376_v38 = vld [vmem:[%s4360_s1 + $0x8d0] ss:$8 sps:$4 sm:$0xff]  }
  0xe4   : > { %2392 = vmatprep.subr.bf16.mxu1 %v3285_v39  ;;  %v3381_v39 = vld [vmem:[%s4360_s1 + $0x8c4] ss:$8 sps:$4 sm:$0xff]  }
  0xe5   : > { %2350 = vmatpush1.bf16.msra.mxu0 %v3280_v40  ;;  %v3379_v40 = vld [vmem:[%s4360_s1 + $0x8c0] ss:$8 sps:$4 sm:$0xff]  }
  0xe6   : > { %2351 = vmatprep.subr.bf16.mxu0 %v3288_v41  ;;  %v3384_v41 = vld [vmem:[%s4360_s1 + $0x8b4] ss:$8 sps:$4 sm:$0xff]  }
  0xe7   : > { %2393 = vmatpush1.bf16.msra.mxu1 %v3283_v42  ;;  %v3382_v42 = vld [vmem:[%s4360_s1 + $0x8b0] ss:$8 sps:$4 sm:$0xff]  }
  0xe8   : > { %2394 = vmatprep.subr.bf16.mxu1 %v3291_v43  ;;  %v3387_v43 = vld [vmem:[%s4360_s1 + $0x8a4] ss:$8 sps:$4 sm:$0xff]  }
  0xe9   : > { %2352 = vmatpush1.bf16.msra.mxu0 %v3286_v44  ;;  %v3385_v44 = vld [vmem:[%s4360_s1 + $0x8a0] ss:$8 sps:$4 sm:$0xff]  }
  0xea   : > { %2353 = vmatprep.subr.bf16.mxu0 %v3294_v45  ;;  %v3390_v45 = vld [vmem:[%s4360_s1 + $0x894] ss:$8 sps:$4 sm:$0xff]  }
  0xeb   : > { %2395 = vmatpush1.bf16.msra.mxu1 %v3289_v46  ;;  %v3388_v46 = vld [vmem:[%s4360_s1 + $0x890] ss:$8 sps:$4 sm:$0xff]  }
  0xec   : > { %2396 = vmatprep.subr.bf16.mxu1 %v3297_v47  ;;  %v3393_v47 = vld [vmem:[%s4360_s1 + $0x884] ss:$8 sps:$4 sm:$0xff]  }
  0xed   : > { %2354 = vmatpush2.bf16.msra.mxu0 %v3292_v48  ;;  %v3391_v48 = vld [vmem:[%s4360_s1 + $0x880] ss:$8 sps:$4 sm:$0xff]  }
  0xee   : > { %2355 = vmatprep.subr.bf16.mxu0 %v3300_v49  ;;  %v3394_v49 = vld [vmem:[%s3582_s10 + $0x40] ss:$72 sps:$4 sm:$0xff]  }
  0xef   : > { %2397 = vmatpush2.bf16.msra.mxu1 %v3295_v50 }
  0xf0   : > { %2398 = vmatprep.subr.bf16.mxu1 %v3303_v51 }
  0xf1   : > { %2356 = vmatpush2.bf16.msra.mxu0 %v3298_v52 }
  0xf2   : > { %2357 = vmatprep.subr.bf16.mxu0 %v3306_v53 }
  0xf3   : > { %2399 = vmatpush2.bf16.msra.mxu1 %v3301_v54 }
  0xf4   : > { %2400 = vmatprep.subr.bf16.mxu1 %v3309_v55 }
  0xf5   : > { %2358 = vmatpush2.bf16.msra.mxu0 %v3304_v56 }
  0xf6   : > { %2359 = vmatprep.subr.bf16.mxu0 %v3312_v57 }
  0xf7   : > { %2401 = vmatpush2.bf16.msra.mxu1 %v3307_v58 }
  0xf8   : > { %2402 = vmatprep.subr.bf16.mxu1 %v3315_v59 }
  0xf9   : > { %2360 = vmatpush2.bf16.msra.mxu0 %v3310_v60 }
  0xfa   : > { %2361 = vmatprep.subr.bf16.mxu0 %v3318_v61  ;;  %v539_v61 = vlaneseq }
  0xfb   : > { %2403 = vmatpush2.bf16.msra.mxu1 %v3313_v62 }
  0xfc   : > { %2404 = vmatprep.subr.bf16.mxu1 %v3321_v63 }
  0xfd   : > { %2362 = vmatpush2.bf16.msra.mxu0 %v3316_v0  ;;  %v540_v0 = vshrl.u32 %v539_v61, 7 }
  0xfe   : > { %2363 = vmatprep.subr.bf16.mxu0 %v3324_v1 }
  0xff   : > { %2405 = vmatpush2.bf16.msra.mxu1 %v3319_v2 }
 0x100   : > { %2406 = vmatprep.subr.bf16.mxu1 %v3327_v3  ;;  %v541_v3 = vsub.s32 0, %v540_v0 }
 0x101   : > { %2364 = vmatpush2.bf16.msra.mxu0 %v3322_v4  ;;  %v537_v4 = vld [vmem:[%s4361_s2] sm:$0x3] }
 0x102   : > { %2365 = vmatprep.subr.bf16.mxu0 %v3330_v5  ;;  %v545_v5 = vsub.s32 1, %v540_v0 }
 0x103   : > { %2407 = vmatpush2.bf16.msra.mxu1 %v3325_v6 }
 0x104   : > { %2408 = vmatprep.subr.bf16.mxu1 %v3333_v7 }
 0x105   : > { %2366 = vmatpush2.bf16.msra.mxu0 %v3328_v8  ;;  %v542_v8 = vrot.slane %v537_v4, %v541_v3 }
 0x106   : > { %2367 = vmatprep.subr.bf16.mxu0 %v3336_v9  ;;  %v546_v9 = vrot.slane %v537_v4, %v545_v5 }
 0x107   : > { %2409 = vmatpush2.bf16.msra.mxu1 %v3331_v10 }
 0x108   : > { %2410 = vmatprep.subr.bf16.mxu1 %v3339_v11 }
 0x109   : > { %2368 = vmatpush2.bf16.msra.mxu0 %v3334_v12 }
 0x10a   : > { %2423 = vmatprep.subr.bf16.mxu0 %v3345_v13 }
 0x10b   : > { %2411 = vmatpush2.bf16.msra.mxu1 %v3337_v14 }
 0x10c   : > { %2370 = vmatmul.mubr.bf16.vlgmr.msra.gmra.mxu0 %v3340_v15  ;;  %v2113_v50 = vpop.f32.mrf.mxu0 }
 0x10d   : > { %2424 = vmatpush1.bf16.msra.mxu0 %v3343_v16  ;;  %2455 = vmatprep.mubr.bf16.mxu0 %v3396_v17  ;;  %v2156_v52 = vpop.f32.mrf.mxu1  ;;  %v2114_v12 = vadd.f32 %v2113_v50, %v542_v8 }
 0x10e   : > { %2413 = vmatmul.mubr.bf16.vlgmr.msra.gmra.mxu1 %v3346_v18  ;;  %2425 = vmatprep.subr.bf16.mxu0 %v3351_v19  ;;  %v2115_v51 = vpop.f32.mrf.mxu0 }
 0x10f   : > { %v2158_v54 = vpop.f32.mrf.mxu1  ;;  %v2116_v13 = vadd.f32 %v2115_v51, %v546_v9  ;;  %v2157_v17 = vadd.f32 %v2156_v52, %v2114_v12 }
 0x110   : > { %v2117_v53 = vpop.f32.mrf.mxu0 }
 0x111   : > { %2426 = vmatpush1.bf16.msra.mxu0 %v3349_v20  ;;  %v2160_v56 = vpop.f32.mrf.mxu1  ;;  %v2118_v16 = vadd.f32 %v2117_v53, %v542_v8  ;;  %v2159_v19 = vadd.f32 %v2158_v54, %v2116_v13 }
 0x112   : > { %2427 = vmatprep.subr.bf16.mxu0 %v3354_v21  ;;  %v2119_v55 = vpop.f32.mrf.mxu0 }
 0x113   : > { %v2162_v58 = vpop.f32.mrf.mxu1  ;;  %v2120_v18 = vadd.f32 %v2119_v55, %v546_v9 }
 0x115   : > { %2428 = vmatpush1.bf16.msra.mxu0 %v3352_v22  ;;  %v2161_v22 = vadd.f32 %v2160_v56, %v2118_v16 }
 0x116   : > { %2429 = vmatprep.subr.bf16.mxu0 %v3357_v23 }
 0x119   : > { %2430 = vmatpush1.bf16.msra.mxu0 %v3355_v24 }
 0x11a   : > { %2431 = vmatprep.subr.bf16.mxu0 %v3360_v25 }
 0x11d   : > { %2432 = vmatpush1.bf16.msra.mxu0 %v3358_v26  ;;  %v2163_v26 = vadd.f32 %v2162_v58, %v2120_v18 }
 0x11e   : > { %2433 = vmatprep.subr.bf16.mxu0 %v3363_v27 }
 0x121   : > { %2434 = vmatpush1.bf16.msra.mxu0 %v3361_v28 }
 0x122   : > { %2435 = vmatprep.subr.bf16.mxu0 %v3366_v29 }
 0x125   : > { %2436 = vmatpush1.bf16.msra.mxu0 %v3364_v30 }
 0x126   : > { %2437 = vmatprep.subr.bf16.mxu0 %v3369_v31 }
 0x129   : > { %2438 = vmatpush1.bf16.msra.mxu0 %v3367_v32 }
 0x12a   : > { %2439 = vmatprep.subr.bf16.mxu0 %v3372_v33 }
 0x12d   : > { %2440 = vmatpush2.bf16.msra.mxu0 %v3370_v34 }
 0x12e   : > { %2441 = vmatprep.subr.bf16.mxu0 %v3375_v35 }
 0x131   : > { %2442 = vmatpush2.bf16.msra.mxu0 %v3373_v36 }
 0x132   : > { %2443 = vmatprep.subr.bf16.mxu0 %v3378_v37 }
 0x135   : > { %2444 = vmatpush2.bf16.msra.mxu0 %v3376_v38 }
 0x136   : > { %2445 = vmatprep.subr.bf16.mxu0 %v3381_v39 }
 0x139   : > { %2446 = vmatpush2.bf16.msra.mxu0 %v3379_v40 }
 0x13a   : > { %2447 = vmatprep.subr.bf16.mxu0 %v3384_v41 }
 0x13d   : > { %2448 = vmatpush2.bf16.msra.mxu0 %v3382_v42 }
 0x13e   : > { %2449 = vmatprep.subr.bf16.mxu0 %v3387_v43 }
 0x141   : > { %2450 = vmatpush2.bf16.msra.mxu0 %v3385_v44 }
 0x142   : > { %2451 = vmatprep.subr.bf16.mxu0 %v3390_v45 }
 0x145   : > { %2452 = vmatpush2.bf16.msra.mxu0 %v3388_v46 }
 0x146   : > { %2453 = vmatprep.subr.bf16.mxu0 %v3393_v47 }
 0x149   : > { %2454 = vmatpush2.bf16.msra.mxu0 %v3391_v48 }
 0x14c   : > { %2456 = vmatmul.mubr.bf16.vlgmr.msra.gmra.mxu0 %v3394_v49  ;;  %v2199_v57 = vpop.f32.mrf.mxu0 }
 0x14d   : > { %v2242_v60 = vpop.f32.mrf.mxu1  ;;  %v2200_v23 = vadd.f32 %v2199_v57, %v2157_v17 }
 0x14e   : > { %v2201_v59 = vpop.f32.mrf.mxu0 }
 0x14f   : > { %v2244_v63 = vpop.f32.mrf.mxu1  ;;  %v2202_v24 = vadd.f32 %v2201_v59, %v2159_v19  ;;  %v2243_v29 = vadd.f32 %v2242_v60, %v2200_v23 }
 0x150   : > { %v2203_v62 = vpop.f32.mrf.mxu0 }
 0x151   : > { %v2246_v2 = vpop.f32.mrf.mxu1  ;;  %v2204_v27 = vadd.f32 %v2203_v62, %v2161_v22  ;;  %v2245_v31 = vadd.f32 %v2244_v63, %v2202_v24 }
 0x152   : > { %v2205_v1 = vpop.f32.mrf.mxu0 }
 0x153   : > { %v2248_v7 = vpop.f32.mrf.mxu1  ;;  %v2206_v30 = vadd.f32 %v2205_v1, %v2163_v26  ;;  %v2247_v34 = vadd.f32 %v2246_v2, %v2204_v27 }
 0x155   : > { %v2249_v37 = vadd.f32 %v2248_v7, %v2206_v30 }
 0x18c   : > { %v2285_v6 = vpop.f32.mrf.mxu0 }
 0x18d   : > { %v2286_v35 = vadd.f32 %v2285_v6, %v2243_v29 }
 0x18e   : > { %v2287_v10 = vpop.f32.mrf.mxu0  ;;  %v2328_v11 = vpop.f32.mrf.mxu1 }
 0x18f   : > { %v2288_v36 = vadd.f32 %v2287_v10, %v2245_v31  ;;  %v2329_v41 = vadd.f32 %v2328_v11, %v2286_v35 }
 0x190   : > { %v2289_v14 = vpop.f32.mrf.mxu0  ;;  %v2330_v15 = vpop.f32.mrf.mxu1 }
 0x191   : > { %v2290_v38 = vadd.f32 %v2289_v14, %v2247_v34  ;;  %v2331_v43 = vadd.f32 %v2330_v15, %v2288_v36 }
 0x192   : > { %v2291_v20 = vpop.f32.mrf.mxu0  ;;  %v2332_v21 = vpop.f32.mrf.mxu1 }
 0x193   : > { %v2292_v42 = vadd.f32 %v2291_v20, %v2249_v37  ;;  %v2333_v44 = vadd.f32 %v2332_v21, %v2290_v38 }
 0x194   : > { %v2334_v28 = vpop.f32.mrf.mxu1 }
 0x195   : > { %v2335_v49 = vadd.f32 %v2334_v28, %v2292_v42 }
 0x1cc   : > { %v2371_v25 = vpop.f32.mrf.mxu0 }
 0x1cd   : > { %v2372_v45 = vadd.f32 %v2371_v25, %v2329_v41 }
 0x1ce   : > { %v2373_v32 = vpop.f32.mrf.mxu0  ;;  %v2414_v33 = vpop.f32.mrf.mxu1 }
 0x1cf   : > { %v2374_v46 = vadd.f32 %v2373_v32, %v2331_v43  ;;  %v2415_v52 = vadd.f32 %v2414_v33, %v2372_v45 }
 0x1d0   : > { %v2375_v39 = vpop.f32.mrf.mxu0  ;;  %v2416_v40 = vpop.f32.mrf.mxu1 }
 0x1d1   : > { %v2376_v50 = vadd.f32 %v2375_v39, %v2333_v44  ;;  %v2417_v54 = vadd.f32 %v2416_v40, %v2374_v46 }
 0x1d2   : > { %v2377_v47 = vpop.f32.mrf.mxu0  ;;  %v2418_v48 = vpop.f32.mrf.mxu1 }
 0x1d3   : > { %v2378_v53 = vadd.f32 %v2377_v47, %v2335_v49  ;;  %v2419_v57 = vadd.f32 %v2418_v48, %v2376_v50  ;;  %v2520_v48 = vld [vmem:[%s222_s22] sm:$0xff]  ;;  %v2522_v49 = vld [vmem:[%s222_s22 + $0x10] sm:$0xff] }
 0x1d4   : > { %v2420_v55 = vpop.f32.mrf.mxu1 }
 0x1d5   : > { %v2421_v61 = vadd.f32 %v2420_v55, %v2378_v53  ;;  %v2521_v55 = vld [vmem:[%s222_s22 + $0x8] sm:$0xff] }
 0x20c   : > { %v2457_v51 = vpop.f32.mrf.mxu0 }
 0x20d   : > { %v2458_v58 = vadd.f32 %v2457_v51, %v2415_v52 }
 0x20e   : > { %v2459_v56 = vpop.f32.mrf.mxu0 }
 0x20f   : > { %v4337_v59 = vadd.f32 %v2459_v56, %v2417_v54  ;;  %v2482_v0 = vmul.f32 %v2458_v58, %v2458_v58 }
 0x210   : > { %v2461_v60 = vpop.f32.mrf.mxu0 }
 0x211   : > { %v2462_v62 = vadd.f32 %v2461_v60, %v2419_v57  ;;  %v2483_v4 = vmul.f32 %v4337_v59, %v4337_v59  ;;  %v2523_v60 = vld [vmem:[%s222_s22 + $0x18] sm:$0xff] }
 0x212   : > { %v2463_v63 = vpop.f32.mrf.mxu0 }
 0x213   : > { %v2466_v1 = vadd.f32 %v2462_v62, %v2458_v58  ;;  %v2484_v2 = vmul.f32 %v2462_v62, %v2462_v62  ;;  %v4339_v3 = vadd.f32 %v2463_v63, %v2421_v61 }
 0x215   : > { %v2467_v5 = vrot.slane %v2466_v1, 4  ;;  %v2486_v6 = vadd.f32 %v2484_v2, %v2482_v0  ;;  %v2473_v7 = vadd.f32 %v4339_v3, %v4337_v59  ;;  %v2485_v8 = vmul.f32 %v4339_v3, %v4339_v3 }
 0x217   : > { %v2468_v9 = vadd.f32 %v2467_v5, %v2466_v1  ;;  %v2487_v10 = vrot.slane %v2486_v6, 4  ;;  %v2474_v11 = vrot.slane %v2473_v7, 4  ;;  %v2493_v12 = vadd.f32 %v2485_v8, %v2483_v4 }
 0x219   : > { %v2469_v13 = vrot.slane %v2468_v9, 2  ;;  %v2488_v14 = vadd.f32 %v2487_v10, %v2486_v6  ;;  %v2475_v15 = vadd.f32 %v2474_v11, %v2473_v7  ;;  %v2494_v16 = vrot.slane %v2493_v12, 4 }
 0x21b   : > { %v2470_v17 = vadd.f32 %v2469_v13, %v2468_v9  ;;  %v2489_v18 = vrot.slane %v2488_v14, 2  ;;  %v2476_v19 = vrot.slane %v2475_v15, 2  ;;  %v2495_v20 = vadd.f32 %v2494_v16, %v2493_v12 }
 0x21d   : > { %v2471_v21 = vrot.slane %v2470_v17, 1  ;;  %v2490_v22 = vadd.f32 %v2489_v18, %v2488_v14  ;;  %v2477_v23 = vadd.f32 %v2476_v19, %v2475_v15  ;;  %v2496_v24 = vrot.slane %v2495_v20, 2 }
 0x21f   : > { %v2472_v25 = vadd.f32 %v2471_v21, %v2470_v17  ;;  %v2491_v26 = vrot.slane %v2490_v22, 1  ;;  %v2478_v27 = vrot.slane %v2477_v23, 1  ;;  %v2497_v28 = vadd.f32 %v2496_v24, %v2495_v20 }
 0x221   : > { %v2480_v29 = vmul.f32 0.0625, %v2472_v25  ;;  %v2492_v30 = vadd.f32 %v2491_v26, %v2490_v22  ;;  %v2479_v31 = vadd.f32 %v2478_v27, %v2477_v23  ;;  %v2498_v32 = vrot.slane %v2497_v28, 1 }
 0x223   : > { %v2500_v33 = vmul.f32 0.0625, %v2492_v30  ;;  %v2502_v34 = vmul.f32 %v2480_v29, %v2480_v29  ;;  %v2481_v35 = vmul.f32 0.0625, %v2479_v31  ;;  %v2499_v36 = vadd.f32 %v2498_v32, %v2497_v28 }
 0x224   : > { %v2508_v45 = vsub.f32 %v2458_v58, %v2480_v29  ;;  %v2510_v46 = vsub.f32 %v2462_v62, %v2480_v29 }
 0x225   : > { %v2504_v37 = vsub.f32 %v2500_v33, %v2502_v34  ;;  %v2501_v38 = vmul.f32 0.0625, %v2499_v36  ;;  %v2503_v39 = vmul.f32 %v2481_v35, %v2481_v35  ;;  %v2509_v52 = vsub.f32 %v4337_v59, %v2481_v35 }
 0x226   : > { %v2511_v53 = vsub.f32 %v4339_v3, %v2481_v35 }
 0x227   : > { %v2506_v40 = vmax.f32 %v2504_v37, 0.0  ;;  %v2505_v41 = vsub.f32 %v2501_v38, %v2503_v39 }
 0x229   : > { %v2512_v42 = vadd.f32 1e-05, %v2506_v40  ;;  %v2507_v43 = vmax.f32 %v2505_v41, 0.0 }
 0x22b   : > { %3397 = vrsqrt.f32 %v2512_v42  ;;  %v2513_v44 = vadd.f32 1e-05, %v2507_v43 }
 0x22d   : > { %3399 = vrsqrt.f32 %v2513_v44 }
 0x238   : > { %v3398_v47 = vpop.eup %3397 }
 0x239   : > { %v2516_v50 = vmul.f32 %v3398_v47, %v2508_v45  ;;  %v2518_v51 = vmul.f32 %v3398_v47, %v2510_v46 }
 0x23a   : > { %v3400_v54 = vpop.eup %3399 }
 0x23b   : > { %v2524_v56 = vadd.f32 %v2520_v48, %v2516_v50  ;;  %v2526_v57 = vadd.f32 %v2522_v49, %v2518_v51  ;;  %v2517_v58 = vmul.f32 %v3400_v54, %v2509_v52  ;;  %v2519_v61 = vmul.f32 %v3400_v54, %v2511_v53 }
 0x23d   : > { %v2528_v62 = vmax.f32 %v2524_v56, 0.0  ;;  %v2530_v63 = vmax.f32 %v2526_v57, 0.0  ;;  %v2525_v0 = vadd.f32 %v2521_v55, %v2517_v58  ;;  %v2527_v1 = vadd.f32 %v2523_v60, %v2519_v61 }
 0x23f   : > { %2532 = vst [vmem:[%s229_s24] sm:$0xff] %v2528_v62  ;;  %2534 = vst [vmem:[%s229_s24 + $0x10] sm:$0xff] %v2530_v63  ;;  %v2529_v59 = vmax.f32 %v2525_v0, 0.0  ;;  %v2531_v2 = vmax.f32 %v2527_v1, 0.0 }
 0x241   : > { %2533 = vst [vmem:[%s229_s24 + $0x8] sm:$0xff] %v2529_v59  ;;  %2535 = vst [vmem:[%s229_s24 + $0x18] sm:$0xff] %v2531_v2 }
 0x242 PF: > { %s14_s15 = sadd.s32 1, %s3407_s15  }
 0x243   : > { %p11_p4 = scmp.ge.s32.totalorder %s14_s15, 4  }
 0x245   :  { %13 = sbr.rel (!%p11_p4) target bundleno = 1 (0x1), region = 69 }

// kernel: forward.23
= control target key start
LH: loop header
LB: loop body
LE: loop exit
PB: predicated region body
PF: predicated region fallthrough
CT: control target
= control target key end

     0   :  { %s955_s9 = smov 0   ;;  %s1430_s0 = inlined_call_operand.vmem [shape: bf16[128,128], index: 0, kind: input, shape index: {}]   ;;  %s1431_s1 = inlined_call_operand.vmem [shape: bf16[128,512], index: 1, kind: input, shape index: {}]   ;;  %s1432_s2 = inlined_call_operand.vmem [shape: f32[128,512], index: 2, kind: output, shape index: {}]  }
   0x1 LB: > { %s819_s10 = sadd.s32 4294967295, %s937_s9   ;;  %p823_p0 = scmp.ge.s32.totalorder %s937_s9, 1  ;;  %s937_s9 = sphi %s955_s9, %s12_s9  }
   0x2   : > { %p113_p1 = scmp.lt.s32.totalorder %s937_s9, 3 }
   0x4   : > { %p114_p2 = pnand %p823_p0, %p113_p1 }
   0x5   : > { %s824_s29 = sshll.u32 (!%p114_p2), %s819_s10, 3 }
   0x6   : > { %117 = sbr.rel (%p114_p2) target bundleno = 333 (0x14d), region = 28  ;;  %p137_p3 = scmp.lt.s32.totalorder (!%p114_p2), %s824_s29, 15 }
   0xb   : > { %v877_v0 = vld [vmem:[%s1431_s1 + $0xe4] ss:$16 sps:$4 sm:$0xff]   ;;  %v879_v1 = vld [vmem:[%s1431_s1 + $0xec] ss:$16 sps:$4 sm:$0xff]   ;;  %v939_v2 = vmov 0   ;;  %s1434_s29 = smov (!%p137_p3, %s824_s29), 15 }
   0xc   : > { %406 = vmatprep.mubr.bf16.mxu0 %v939_v2  ;;  %479 = vmatprep.mubr.bf16.mxu1 %v939_v2  ;;  %v881_v3 = vld [vmem:[%s1431_s1 + $0xe0] ss:$16 sps:$4 sm:$0xff]   ;;  %v882_v4 = vld [vmem:[%s1431_s1 + $0xe8] ss:$16 sps:$4 sm:$0xff]   ;;  %v883_v5 = vld [vmem:[%s1431_s1 + $0xc4] ss:$16 sps:$4 sm:$0xff]  }
   0xd   : > { %374 = vmatprep.subr.bf16.mxu0 %v877_v0  ;;  %447 = vmatprep.subr.bf16.mxu1 %v879_v1  ;;  %v885_v6 = vld [vmem:[%s1431_s1 + $0xcc] ss:$16 sps:$4 sm:$0xff]   ;;  %v887_v7 = vld [vmem:[%s1431_s1 + $0xc0] ss:$16 sps:$4 sm:$0xff]   ;;  %v888_v8 = vld [vmem:[%s1431_s1 + $0xc8] ss:$16 sps:$4 sm:$0xff]  }
   0xe   : > { %375 = vmatpush1.bf16.msra.mxu0 %v881_v3  ;;  %448 = vmatpush1.bf16.msra.mxu1 %v882_v4  ;;  %v889_v9 = vld [vmem:[%s1431_s1 + $0xa4] ss:$16 sps:$4 sm:$0xff]   ;;  %v891_v10 = vld [vmem:[%s1431_s1 + $0xac] ss:$16 sps:$4 sm:$0xff]   ;;  %v893_v11 = vld [vmem:[%s1431_s1 + $0xa0] ss:$16 sps:$4 sm:$0xff]  }
   0xf   : > { %376 = vmatprep.subr.bf16.mxu0 %v883_v5  ;;  %449 = vmatprep.subr.bf16.mxu1 %v885_v6  ;;  %v894_v12 = vld [vmem:[%s1431_s1 + $0xa8] ss:$16 sps:$4 sm:$0xff]   ;;  %v895_v13 = vld [vmem:[%s1431_s1 + $0x84] ss:$16 sps:$4 sm:$0xff]   ;;  %v897_v14 = vld [vmem:[%s1431_s1 + $0x8c] ss:$16 sps:$4 sm:$0xff]  }
  0x10   : > { %v899_v15 = vld [vmem:[%s1431_s1 + $0x80] ss:$16 sps:$4 sm:$0xff]   ;;  %v900_v16 = vld [vmem:[%s1431_s1 + $0x88] ss:$16 sps:$4 sm:$0xff]   ;;  %v901_v17 = vld [vmem:[%s1431_s1 + $0x64] ss:$16 sps:$4 sm:$0xff]  }
  0x11   : > { %v903_v18 = vld [vmem:[%s1431_s1 + $0x6c] ss:$16 sps:$4 sm:$0xff]   ;;  %v905_v19 = vld [vmem:[%s1431_s1 + $0x60] ss:$16 sps:$4 sm:$0xff]   ;;  %v906_v20 = vld [vmem:[%s1431_s1 + $0x68] ss:$16 sps:$4 sm:$0xff]  }
  0x12   : > { %377 = vmatpush1.bf16.msra.mxu0 %v887_v7  ;;  %450 = vmatpush1.bf16.msra.mxu1 %v888_v8  ;;  %v907_v21 = vld [vmem:[%s1431_s1 + $0x44] ss:$16 sps:$4 sm:$0xff]   ;;  %v909_v22 = vld [vmem:[%s1431_s1 + $0x4c] ss:$16 sps:$4 sm:$0xff]   ;;  %s825_s30 = sshll.u32 %s1434_s29, 2  ;;  %s867_s27 = sshll.u32 %s1434_s29, 5 }
  0x13   : > { %378 = vmatprep.subr.bf16.mxu0 %v889_v9  ;;  %451 = vmatprep.subr.bf16.mxu1 %v891_v10  ;;  %v911_v23 = vld [vmem:[%s1431_s1 + $0x40] ss:$16 sps:$4 sm:$0xff]   ;;  %v912_v24 = vld [vmem:[%s1431_s1 + $0x48] ss:$16 sps:$4 sm:$0xff]   ;;  %v913_v25 = vld [vmem:[%s1431_s1 + $0x24] ss:$16 sps:$4 sm:$0xff]   ;;  %s1046_s12 = scalar_lea.vmem %s1430_s0, %s825_s30  ;;  %s1317_s30 = scalar_lea.vmem %s1432_s2, %s867_s27 }
  0x14   : > { %v915_v26 = vld [vmem:[%s1431_s1 + $0x2c] ss:$16 sps:$4 sm:$0xff]   ;;  %v917_v27 = vld [vmem:[%s1431_s1 + $0x20] ss:$16 sps:$4 sm:$0xff]   ;;  %v918_v28 = vld [vmem:[%s1431_s1 + $0x28] ss:$16 sps:$4 sm:$0xff]  }
  0x15   : > { %v919_v29 = vld [vmem:[%s1431_s1 + $0x4] ss:$16 sps:$4 sm:$0xff]   ;;  %v921_v30 = vld [vmem:[%s1431_s1 + $0xc] ss:$16 sps:$4 sm:$0xff]   ;;  %v923_v31 = vld [vmem:[%s1431_s1] ss:$16 sps:$4 sm:$0xff]  }
  0x16   : > { %379 = vmatpush1.bf16.msra.mxu0 %v893_v11  ;;  %452 = vmatpush1.bf16.msra.mxu1 %v894_v12  ;;  %v924_v32 = vld [vmem:[%s1431_s1 + $0x8] ss:$16 sps:$4 sm:$0xff]   ;;  %v925_v33 = vld [vmem:[%s1046_s12] sm:$0xff]   ;;  %v927_v35 = vld [vmem:[%s1046_s12 + $0x10] sm:$0xff]  }
  0x17   : > { %380 = vmatprep.subr.bf16.mxu0 %v895_v13  ;;  %453 = vmatprep.subr.bf16.mxu1 %v897_v14  ;;  %v926_v34 = vld [vmem:[%s1046_s12 + $0x8] sm:$0xff]   ;;  %v928_v36 = vld [vmem:[%s1046_s12 + $0x18] sm:$0xff]  }
  0x1a   : > { %381 = vmatpush1.bf16.msra.mxu0 %v899_v15  ;;  %454 = vmatpush1.bf16.msra.mxu1 %v900_v16 }
  0x1b   : > { %382 = vmatprep.subr.bf16.mxu0 %v901_v17  ;;  %455 = vmatprep.subr.bf16.mxu1 %v903_v18 }
  0x1e   : > { %383 = vmatpush1.bf16.msra.mxu0 %v905_v19  ;;  %456 = vmatpush1.bf16.msra.mxu1 %v906_v20 }
  0x1f   : > { %384 = vmatprep.subr.bf16.mxu0 %v907_v21  ;;  %457 = vmatprep.subr.bf16.mxu1 %v909_v22 }
  0x22   : > { %385 = vmatpush1.bf16.msra.mxu0 %v911_v23  ;;  %458 = vmatpush1.bf16.msra.mxu1 %v912_v24 }
  0x23   : > { %386 = vmatprep.subr.bf16.mxu0 %v913_v25  ;;  %459 = vmatprep.subr.bf16.mxu1 %v915_v26 }
  0x26   : > { %387 = vmatpush1.bf16.msra.mxu0 %v917_v27  ;;  %460 = vmatpush1.bf16.msra.mxu1 %v918_v28 }
  0x27   : > { %388 = vmatprep.subr.bf16.mxu0 %v919_v29  ;;  %461 = vmatprep.subr.bf16.mxu1 %v921_v30 }
  0x2a   : > { %389 = vmatpush1.bf16.msra.mxu0 %v923_v31  ;;  %462 = vmatpush1.bf16.msra.mxu1 %v924_v32 }
  0x2d   : > { %407 = vmatmul.mubr.bf16.vlgmr.msra.gmra.mxu0 %v925_v33  ;;  %480 = vmatmul.mubr.bf16.vlgmr.msra.gmra.mxu1 %v925_v33 }
  0x2e   : > { %416 = vmatprep.mubr.bf16.mxu0 %v939_v2  ;;  %489 = vmatprep.mubr.bf16.mxu1 %v939_v2 }
  0x35   : > { %417 = vmatmul.mubr.bf16.gmra.mxu0 %v926_v34  ;;  %490 = vmatmul.mubr.bf16.gmra.mxu1 %v926_v34 }
  0x36   : > { %426 = vmatprep.mubr.bf16.mxu0 %v939_v2  ;;  %499 = vmatprep.mubr.bf16.mxu1 %v939_v2 }
  0x3d   : > { %427 = vmatmul.mubr.bf16.gmra.mxu0 %v927_v35  ;;  %500 = vmatmul.mubr.bf16.gmra.mxu1 %v927_v35 }
  0x3e   : > { %436 = vmatprep.mubr.bf16.mxu0 %v939_v2  ;;  %509 = vmatprep.mubr.bf16.mxu1 %v939_v2 }
  0x45   : > { %437 = vmatmul.mubr.bf16.gmra.mxu0 %v928_v36  ;;  %510 = vmatmul.mubr.bf16.gmra.mxu1 %v928_v36 }
  0xed   : > { %v1079_v37 = vpop.f32.mrf.mxu0  ;;  %v1081_v38 = vpop.f32.mrf.mxu1 }
  0xee   : > { %v544_v54 = vmul.f32 %v1079_v37, %v1079_v37  ;;  %v568_v60 = vmul.f32 %v1081_v38, %v1081_v38 }
  0xef   : > { %v1083_v39 = vpop.f32.mrf.mxu0  ;;  %v1085_v40 = vpop.f32.mrf.mxu1 }
  0xf0   : > { %v520_v48 = vadd.f32 %v1083_v39, %v1079_v37  ;;  %v552_v49 = vmul.f32 %v1083_v39, %v1083_v39  ;;  %v584_v14 = vmul.f32 %v1085_v40, %v1085_v40 }
  0xf1   : > { %v1087_v41 = vpop.f32.mrf.mxu0  ;;  %v1089_v42 = vpop.f32.mrf.mxu1 }
  0xf2   : > { %v545_v50 = vmul.f32 %v1087_v41, %v1087_v41  ;;  %v560_v61 = vadd.f32 %v552_v49, %v544_v54  ;;  %v528_v62 = vadd.f32 %v520_v48, %v1081_v38  ;;  %v569_v0 = vmul.f32 %v1089_v42, %v1089_v42 }
  0xf3   : > { %v1091_v43 = vpop.f32.mrf.mxu0  ;;  %v1093_v44 = vpop.f32.mrf.mxu1 }
  0xf4   : > { %v553_v45 = vmul.f32 %v1091_v43, %v1091_v43  ;;  %v521_v51 = vadd.f32 %v1091_v43, %v1087_v41  ;;  %v536_v12 = vadd.f32 %v528_v62, %v1085_v40  ;;  %v576_v13 = vadd.f32 %v568_v60, %v560_v61 }
  0xf5   : > { %v1097_v46 = vpop.f32.mrf.mxu0  ;;  %v1099_v47 = vpop.f32.mrf.mxu1  ;;  %v585_v17 = vmul.f32 %v1093_v44, %v1093_v44 }
  0xf6   : > { %v561_v56 = vadd.f32 %v553_v45, %v545_v50  ;;  %v546_v57 = vmul.f32 %v1097_v46, %v1097_v46  ;;  %v529_v1 = vadd.f32 %v521_v51, %v1089_v42  ;;  %v570_v2 = vmul.f32 %v1099_v47, %v1099_v47 }
  0xf7   : > { %v1109_v52 = vpop.f32.mrf.mxu0  ;;  %v1111_v53 = vpop.f32.mrf.mxu1  ;;  %v592_v32 = vadd.f32 %v584_v14, %v576_v13 }
  0xf8   : > { %v554_v55 = vmul.f32 %v1109_v52, %v1109_v52  ;;  %v522_v63 = vadd.f32 %v1109_v52, %v1097_v46  ;;  %v577_v7 = vadd.f32 %v569_v0, %v561_v56  ;;  %v537_v16 = vadd.f32 %v529_v1, %v1093_v44 }
  0xf9   : > { %v1119_v58 = vpop.f32.mrf.mxu0  ;;  %v1121_v59 = vpop.f32.mrf.mxu1  ;;  %v586_v27 = vmul.f32 %v1111_v53, %v1111_v53 }
  0xfa   : > { %v562_v3 = vadd.f32 %v554_v55, %v546_v57  ;;  %v547_v8 = vmul.f32 %v1119_v58, %v1119_v58  ;;  %v530_v15 = vadd.f32 %v522_v63, %v1099_v47  ;;  %v593_v26 = vadd.f32 %v585_v17, %v577_v7 }
  0xfb   : > { %v1133_v4 = vpop.f32.mrf.mxu0  ;;  %v1135_v5 = vpop.f32.mrf.mxu1  ;;  %v571_v28 = vmul.f32 %v1121_v59, %v1121_v59  ;;  %v600_v35 = vadd.f32 %v537_v16, %v536_v12 }
  0xfc   : > { %v523_v6 = vadd.f32 %v1133_v4, %v1119_v58  ;;  %v555_v9 = vmul.f32 %v1133_v4, %v1133_v4  ;;  %v578_v18 = vadd.f32 %v570_v2, %v562_v3  ;;  %v538_v33 = vadd.f32 %v530_v15, %v1111_v53 }
  0xfd   : > { %v1143_v10 = vpop.f32.mrf.mxu0  ;;  %v1145_v11 = vpop.f32.mrf.mxu1  ;;  %v614_v57 = vadd.f32 %v593_v26, %v592_v32  ;;  %v587_v60 = vmul.f32 %v1135_v5, %v1135_v5 }
  0xfe   : > { %v563_v19 = vadd.f32 %v555_v9, %v547_v8  ;;  %v531_v22 = vadd.f32 %v523_v6, %v1121_v59  ;;  %v548_v23 = vmul.f32 %v1143_v10, %v1143_v10  ;;  %v572_v29 = vmul.f32 %v1145_v11, %v1145_v11 }
  0xff   : > { %v1154_v20 = vpop.f32.mrf.mxu0  ;;  %v1156_v21 = vpop.f32.mrf.mxu1  ;;  %v594_v36 = vadd.f32 %v586_v27, %v578_v18  ;;  %v601_v0 = vadd.f32 %v600_v35, %v538_v33 }
 0x100   : > { %v524_v24 = vadd.f32 %v1154_v20, %v1143_v10  ;;  %v556_v25 = vmul.f32 %v1154_v20, %v1154_v20  ;;  %v579_v45 = vadd.f32 %v571_v28, %v563_v19  ;;  %v539_v51 = vadd.f32 %v531_v22, %v1135_v5 }
 0x101   : > { %v1171_v30 = vpop.f32.mrf.mxu0  ;;  %v1173_v31 = vpop.f32.mrf.mxu1  ;;  %v615_v6 = vadd.f32 %v614_v57, %v594_v36  ;;  %v588_v9 = vmul.f32 %v1156_v21, %v1156_v21 }
 0x102   : > { %v564_v34 = vadd.f32 %v556_v25, %v548_v23  ;;  %v532_v48 = vadd.f32 %v524_v24, %v1145_v11  ;;  %v549_v54 = vmul.f32 %v1171_v30, %v1171_v30  ;;  %v573_v1 = vmul.f32 %v1173_v31, %v1173_v31 }
 0x103   : > { %v1177_v49 = vpop.f32.mrf.mxu0  ;;  %v1179_v50 = vpop.f32.mrf.mxu1  ;;  %v595_v7 = vadd.f32 %v587_v60, %v579_v45  ;;  %v602_v14 = vadd.f32 %v601_v0, %v539_v51 }
 0x104   : > { %v525_v55 = vadd.f32 %v1177_v49, %v1171_v30  ;;  %v557_v56 = vmul.f32 %v1177_v49, %v1177_v49  ;;  %v580_v61 = vadd.f32 %v572_v29, %v564_v34  ;;  %v540_v8 = vadd.f32 %v532_v48, %v1156_v21 }
 0x105   : > { %v1190_v62 = vpop.f32.mrf.mxu0  ;;  %v1192_v63 = vpop.f32.mrf.mxu1  ;;  %v589_v16 = vmul.f32 %v1179_v50, %v1179_v50  ;;  %v616_v28 = vadd.f32 %v615_v6, %v595_v7 }
 0x106   : > { %v565_v2 = vadd.f32 %v557_v56, %v549_v54  ;;  %v533_v3 = vadd.f32 %v525_v55, %v1173_v31  ;;  %v596_v18 = vadd.f32 %v588_v9, %v580_v61  ;;  %v550_v19 = vmul.f32 %v1190_v62, %v1190_v62 }
 0x107   : > { %v1200_v12 = vpop.f32.mrf.mxu0  ;;  %v1202_v13 = vpop.f32.mrf.mxu1  ;;  %v574_v22 = vmul.f32 %v1192_v63, %v1192_v63  ;;  %v603_v29 = vadd.f32 %v602_v14, %v540_v8 }
 0x108   : > { %v581_v15 = vadd.f32 %v573_v1, %v565_v2  ;;  %v526_v17 = vadd.f32 %v1200_v12, %v1190_v62  ;;  %v558_v23 = vmul.f32 %v1200_v12, %v1200_v12  ;;  %v541_v26 = vadd.f32 %v533_v3, %v1179_v50 }
 0x109   : > { %v1214_v24 = vpop.f32.mrf.mxu0  ;;  %v1216_v25 = vpop.f32.mrf.mxu1  ;;  %v617_v51 = vadd.f32 %v616_v28, %v596_v18  ;;  %v590_v55 = vmul.f32 %v1202_v13, %v1202_v13 }
 0x10a   : > { %v534_v27 = vadd.f32 %v526_v17, %v1192_v63  ;;  %v597_v32 = vadd.f32 %v589_v16, %v581_v15  ;;  %v566_v33 = vadd.f32 %v558_v23, %v550_v19  ;;  %v551_v36 = vmul.f32 %v1214_v24, %v1214_v24 }
 0x10b   : > { %v1220_v34 = vpop.f32.mrf.mxu0  ;;  %v1231_v56 = vpop.f32.mrf.mxu1  ;;  %v604_v57 = vadd.f32 %v603_v29, %v541_v26  ;;  %v575_v60 = vmul.f32 %v1216_v25, %v1216_v25 }
 0x10c   : > { %v542_v35 = vadd.f32 %v534_v27, %v1202_v13  ;;  %v527_v45 = vadd.f32 %v1220_v34, %v1214_v24  ;;  %v559_v48 = vmul.f32 %v1220_v34, %v1220_v34  ;;  %v582_v54 = vadd.f32 %v574_v22, %v566_v33 }
 0x10d   : > { %v618_v1 = vadd.f32 %v617_v51, %v597_v32  ;;  %v591_v8 = vmul.f32 %v1231_v56, %v1231_v56 }
 0x10e   : > { %v567_v61 = vadd.f32 %v559_v48, %v551_v36  ;;  %v535_v0 = vadd.f32 %v527_v45, %v1216_v25  ;;  %v598_v2 = vadd.f32 %v590_v55, %v582_v54  ;;  %v605_v3 = vadd.f32 %v604_v57, %v542_v35 }
 0x110   : > { %v543_v6 = vadd.f32 %v535_v0, %v1231_v56  ;;  %v583_v7 = vadd.f32 %v575_v60, %v567_v61  ;;  %v619_v9 = vadd.f32 %v618_v1, %v598_v2 }
 0x112   : > { %v599_v14 = vadd.f32 %v591_v8, %v583_v7  ;;  %v606_v15 = vadd.f32 %v605_v3, %v543_v6 }
 0x114   : > { %v607_v16 = vrot.slane %v606_v15, 4  ;;  %v620_v17 = vadd.f32 %v619_v9, %v599_v14 }
 0x116   : > { %v608_v18 = vadd.f32 %v607_v16, %v606_v15  ;;  %v621_v19 = vrot.slane %v620_v17, 4 }
 0x118   : > { %v609_v22 = vrot.slane %v608_v18, 2  ;;  %v622_v23 = vadd.f32 %v621_v19, %v620_v17 }
 0x11a   : > { %v610_v26 = vadd.f32 %v609_v22, %v608_v18  ;;  %v623_v27 = vrot.slane %v622_v23, 2 }
 0x11c   : > { %v611_v28 = vrot.slane %v610_v26, 1  ;;  %v624_v29 = vadd.f32 %v623_v27, %v622_v23 }
 0x11e   : > { %v612_v32 = vadd.f32 %v611_v28, %v610_v26  ;;  %v625_v33 = vrot.slane %v624_v29, 1 }
 0x120   : > { %v1239_v35 = vmul.f32 0.00390625, %v612_v32  ;;  %v626_v36 = vadd.f32 %v625_v33, %v624_v29 }
 0x122   : > { %v627_v45 = vmul.f32 0.00390625, %v626_v36  ;;  %v628_v48 = vmul.f32 %v1239_v35, %v1239_v35  ;;  %v633_v57 = vsub.f32 %v1079_v37, %v1239_v35  ;;  %v634_v60 = vsub.f32 %v1087_v41, %v1239_v35 }
 0x123   : > { %v635_v61 = vsub.f32 %v1097_v46, %v1239_v35  ;;  %v636_v0 = vsub.f32 %v1119_v58, %v1239_v35  ;;  %v637_v1 = vsub.f32 %v1143_v10, %v1239_v35  ;;  %v638_v2 = vsub.f32 %v1171_v30, %v1239_v35 }
 0x124   : > { %v629_v51 = vsub.f32 %v627_v45, %v628_v48  ;;  %v639_v3 = vsub.f32 %v1190_v62, %v1239_v35  ;;  %v640_v37 = vsub.f32 %v1214_v24, %v1239_v35  ;;  %v665_v41 = vsub.f32 %v1083_v39, %v1239_v35 }
 0x125   : > { %v666_v46 = vsub.f32 %v1091_v43, %v1239_v35  ;;  %v667_v58 = vsub.f32 %v1109_v52, %v1239_v35  ;;  %v668_v10 = vsub.f32 %v1133_v4, %v1239_v35  ;;  %v669_v30 = vsub.f32 %v1154_v20, %v1239_v35 }
 0x126   : > { %v630_v54 = vmax.f32 %v629_v51, 0.0  ;;  %v670_v62 = vsub.f32 %v1177_v49, %v1239_v35  ;;  %v671_v24 = vsub.f32 %v1200_v12, %v1239_v35  ;;  %v672_v39 = vsub.f32 %v1220_v34, %v1239_v35 }
 0x127   : > { %v697_v43 = vsub.f32 %v1081_v38, %v1239_v35  ;;  %v698_v52 = vsub.f32 %v1089_v42, %v1239_v35  ;;  %v699_v4 = vsub.f32 %v1099_v47, %v1239_v35  ;;  %v700_v20 = vsub.f32 %v1121_v59, %v1239_v35 }
 0x128   : > { %v631_v55 = vadd.f32 1e-05, %v630_v54  ;;  %v701_v49 = vsub.f32 %v1145_v11, %v1239_v35  ;;  %v702_v12 = vsub.f32 %v1173_v31, %v1239_v35  ;;  %v703_v34 = vsub.f32 %v1192_v63, %v1239_v35 }
 0x129   : > { %v704_v6 = vsub.f32 %v1216_v25, %v1239_v35  ;;  %v729_v7 = vsub.f32 %v1085_v40, %v1239_v35  ;;  %v730_v8 = vsub.f32 %v1093_v44, %v1239_v35  ;;  %v731_v9 = vsub.f32 %v1111_v53, %v1239_v35 }
 0x12a   : > { %929 = vrsqrt.f32 %v631_v55  ;;  %v732_v14 = vsub.f32 %v1135_v5, %v1239_v35  ;;  %v733_v16 = vsub.f32 %v1156_v21, %v1239_v35  ;;  %v734_v17 = vsub.f32 %v1179_v50, %v1239_v35 }
 0x12b   : > { %v735_v18 = vsub.f32 %v1202_v13, %v1239_v35  ;;  %v736_v19 = vsub.f32 %v1231_v56, %v1239_v35 }
 0x137   : > { %v1300_v15 = vpop.eup %929 }
 0x138   : > { %v641_v22 = vmul.f32 %v1300_v15, %v633_v57  ;;  %v642_v23 = vmul.f32 %v1300_v15, %v634_v60  ;;  %v643_v26 = vmul.f32 %v1300_v15, %v635_v61  ;;  %v644_v27 = vmul.f32 %v1300_v15, %v636_v0 }
 0x139   : > { %v645_v28 = vmul.f32 %v1300_v15, %v637_v1  ;;  %v646_v29 = vmul.f32 %v1300_v15, %v638_v2  ;;  %v647_v32 = vmul.f32 %v1300_v15, %v639_v3  ;;  %v648_v33 = vmul.f32 %v1300_v15, %v640_v37 }
 0x13a   : > { %v649_v36 = vmax.f32 %v641_v22, 0.0  ;;  %v650_v45 = vmax.f32 %v642_v23, 0.0  ;;  %v651_v48 = vmax.f32 %v643_v26, 0.0  ;;  %v652_v51 = vmax.f32 %v644_v27, 0.0 }
 0x13b   : > { %v653_v54 = vmax.f32 %v645_v28, 0.0  ;;  %v654_v55 = vmax.f32 %v646_v29, 0.0  ;;  %v655_v57 = vmax.f32 %v647_v32, 0.0  ;;  %v656_v60 = vmax.f32 %v648_v33, 0.0 }
 0x13c   : > { %657 = vst [vmem:[%s1317_s30] sm:$0xff] %v649_v36  ;;  %658 = vst [vmem:[%s1317_s30 + $0x20] sm:$0xff] %v650_v45  ;;  %v673_v61 = vmul.f32 %v1300_v15, %v665_v41  ;;  %v674_v0 = vmul.f32 %v1300_v15, %v666_v46  ;;  %v675_v1 = vmul.f32 %v1300_v15, %v667_v58 }
 0x13d   : > { %659 = vst [vmem:[%s1317_s30 + $0x40] sm:$0xff] %v651_v48  ;;  %660 = vst [vmem:[%s1317_s30 + $0x60] sm:$0xff] %v652_v51  ;;  %v676_v2 = vmul.f32 %v1300_v15, %v668_v10  ;;  %v677_v3 = vmul.f32 %v1300_v15, %v669_v30  ;;  %v678_v37 = vmul.f32 %v1300_v15, %v670_v62 }
 0x13e   : > { %661 = vst [vmem:[%s1317_s30 + $0x80] sm:$0xff] %v653_v54  ;;  %662 = vst [vmem:[%s1317_s30 + $0xa0] sm:$0xff] %v654_v55  ;;  %v679_v41 = vmul.f32 %v1300_v15, %v671_v24  ;;  %v680_v46 = vmul.f32 %v1300_v15, %v672_v39  ;;  %v681_v22 = vmax.f32 %v673_v61, 0.0  ;;  %v682_v58 = vmax.f32 %v674_v0, 0.0 }
 0x13f   : > { %663 = vst [vmem:[%s1317_s30 + $0xc0] sm:$0xff] %v655_v57  ;;  %664 = vst [vmem:[%s1317_s30 + $0xe0] sm:$0xff] %v656_v60  ;;  %v683_v10 = vmax.f32 %v675_v1, 0.0  ;;  %v684_v23 = vmax.f32 %v676_v2, 0.0  ;;  %v685_v26 = vmax.f32 %v677_v3, 0.0  ;;  %v686_v27 = vmax.f32 %v678_v37, 0.0 }
 0x140   : > { %v687_v28 = vmax.f32 %v679_v41, 0.0  ;;  %v688_v29 = vmax.f32 %v680_v46, 0.0  ;;  %689 = vst [vmem:[%s1317_s30 + $0x8] sm:$0xff] %v681_v22  ;;  %690 = vst [vmem:[%s1317_s30 + $0x28] sm:$0xff] %v682_v58  ;;  %v705_v30 = vmul.f32 %v1300_v15, %v697_v43  ;;  %v706_v62 = vmul.f32 %v1300_v15, %v698_v52 }
 0x141   : > { %691 = vst [vmem:[%s1317_s30 + $0x48] sm:$0xff] %v683_v10  ;;  %692 = vst [vmem:[%s1317_s30 + $0x68] sm:$0xff] %v684_v23  ;;  %v707_v24 = vmul.f32 %v1300_v15, %v699_v4  ;;  %v708_v39 = vmul.f32 %v1300_v15, %v700_v20  ;;  %v709_v38 = vmul.f32 %v1300_v15, %v701_v49 }
 0x142   : > { %693 = vst [vmem:[%s1317_s30 + $0x88] sm:$0xff] %v685_v26  ;;  %694 = vst [vmem:[%s1317_s30 + $0xa8] sm:$0xff] %v686_v27  ;;  %v710_v42 = vmul.f32 %v1300_v15, %v702_v12  ;;  %v711_v47 = vmul.f32 %v1300_v15, %v703_v34  ;;  %v712_v59 = vmul.f32 %v1300_v15, %v704_v6  ;;  %v713_v43 = vmax.f32 %v705_v30, 0.0 }
 0x143   : > { %695 = vst [vmem:[%s1317_s30 + $0xc8] sm:$0xff] %v687_v28  ;;  %696 = vst [vmem:[%s1317_s30 + $0xe8] sm:$0xff] %v688_v29  ;;  %v714_v11 = vmax.f32 %v706_v62, 0.0  ;;  %v715_v52 = vmax.f32 %v707_v24, 0.0  ;;  %v716_v4 = vmax.f32 %v708_v39, 0.0  ;;  %v717_v31 = vmax.f32 %v709_v38, 0.0 }
 0x144   : > { %v718_v20 = vmax.f32 %v710_v42, 0.0  ;;  %v719_v49 = vmax.f32 %v711_v47, 0.0  ;;  %v720_v12 = vmax.f32 %v712_v59, 0.0  ;;  %721 = vst [vmem:[%s1317_s30 + $0x10] sm:$0xff] %v713_v43  ;;  %v737_v63 = vmul.f32 %v1300_v15, %v729_v7 }
 0x145   : > { %722 = vst [vmem:[%s1317_s30 + $0x30] sm:$0xff] %v714_v11  ;;  %723 = vst [vmem:[%s1317_s30 + $0x50] sm:$0xff] %v715_v52  ;;  %v738_v25 = vmul.f32 %v1300_v15, %v730_v8  ;;  %v739_v34 = vmul.f32 %v1300_v15, %v731_v9  ;;  %v740_v6 = vmul.f32 %v1300_v15, %v732_v14 }
 0x146   : > { %724 = vst [vmem:[%s1317_s30 + $0x70] sm:$0xff] %v716_v4  ;;  %725 = vst [vmem:[%s1317_s30 + $0x90] sm:$0xff] %v717_v31  ;;  %v741_v40 = vmul.f32 %v1300_v15, %v733_v16  ;;  %v742_v44 = vmul.f32 %v1300_v15, %v734_v17  ;;  %v743_v53 = vmul.f32 %v1300_v15, %v735_v18  ;;  %v745_v21 = vmax.f32 %v737_v63, 0.0 }
 0x147   : > { %726 = vst [vmem:[%s1317_s30 + $0xb0] sm:$0xff] %v718_v20  ;;  %727 = vst [vmem:[%s1317_s30 + $0xd0] sm:$0xff] %v719_v49  ;;  %v744_v5 = vmul.f32 %v1300_v15, %v736_v19  ;;  %v746_v7 = vmax.f32 %v738_v25, 0.0  ;;  %v747_v8 = vmax.f32 %v739_v34, 0.0  ;;  %v748_v50 = vmax.f32 %v740_v6, 0.0 }
 0x148   : > { %728 = vst [vmem:[%s1317_s30 + $0xf0] sm:$0xff] %v720_v12  ;;  %v749_v9 = vmax.f32 %v741_v40, 0.0  ;;  %v750_v14 = vmax.f32 %v742_v44, 0.0  ;;  %v751_v16 = vmax.f32 %v743_v53, 0.0  ;;  %753 = vst [vmem:[%s1317_s30 + $0x18] sm:$0xff] %v745_v21 }
 0x149   : > { %v752_v17 = vmax.f32 %v744_v5, 0.0  ;;  %754 = vst [vmem:[%s1317_s30 + $0x38] sm:$0xff] %v746_v7  ;;  %755 = vst [vmem:[%s1317_s30 + $0x58] sm:$0xff] %v747_v8 }
 0x14a   : > { %756 = vst [vmem:[%s1317_s30 + $0x78] sm:$0xff] %v748_v50  ;;  %757 = vst [vmem:[%s1317_s30 + $0x98] sm:$0xff] %v749_v9 }
 0x14b   : > { %758 = vst [vmem:[%s1317_s30 + $0xb8] sm:$0xff] %v750_v14  ;;  %759 = vst [vmem:[%s1317_s30 + $0xd8] sm:$0xff] %v751_v16 }
 0x14c   : > { %760 = vst [vmem:[%s1317_s30 + $0xf8] sm:$0xff] %v752_v17 }
 0x14d PF: > { %s12_s9 = sadd.s32 1, %s937_s9  }
 0x14e   : > { %p9_p4 = scmp.ge.s32.totalorder %s12_s9, 4  }
 0x150   :  { %11 = sbr.rel (!%p9_p4) target bundleno = 1 (0x1), region = 58 }

// kernel: forward.25
= control target key start
LH: loop header
LB: loop body
LE: loop exit
PB: predicated region body
PF: predicated region fallthrough
CT: control target
= control target key end

     0   :  { %s1113_s17 = smov 0   ;;  %s1649_s0 = inlined_call_operand.vmem [shape: bf16[512,128], index: 0, kind: input, shape index: {}]   ;;  %s1650_s1 = inlined_call_operand.vmem [shape: bf16[128,1], index: 1, kind: input, shape index: {}]   ;;  %s1651_s2 = inlined_call_operand.<no memory space> [shape: f32[1,1], index: 2, kind: input, shape index: {}]   ;;  %s1652_s3 = inlined_call_operand.vmem [shape: f32[512,1], index: 3, kind: input, shape index: {}]   ;;  %s1653_s4 = inlined_call_operand.vmem [shape: f32[512,1], index: 4, kind: output, shape index: {}]  }
   0x1   :  { %v9_v0 = vstv %s1651_s2 }
   0x2   :  { %10 = vst [vmem:[#allocation2] sm:$0x1] %v9_v0 }
   0x3 LB: > { %s917_s18 = sadd.s32 4294967295, %s1083_s17   ;;  %p921_p0 = scmp.ge.s32.totalorder %s1083_s17, 1  ;;  %s1083_s17 = sphi %s1113_s17, %s16_s17  }
   0x4   : > { %p176_p1 = scmp.lt.s32.totalorder %s1083_s17, 3 }
   0x6   : > { %p177_p2 = pnand %p921_p0, %p176_p1 }
   0x8   : > { %180 = sbr.rel (%p177_p2) target bundleno = 341 (0x155), region = 36 }
   0xd   : > { %v1051_v1 = vld [vmem:[%s1650_s1 + $0x38] sm:$0xff]   ;;  %s922_s2 = sshll.u32 %s917_s18, 5  ;;  %v1052_v2 = vld [vmem:[%s1650_s1 + $0x30] sm:$0xff]   ;;  %v1053_v3 = vld [vmem:[%s1650_s1 + $0x28] sm:$0xff]   ;;  %vm586_vm0 = vcmask 7168  }
   0xe   : > { %p208_p3 = scmp.lt.s32.totalorder %s922_s2, 63  ;;  %979 = vmatprep.subr.bf16.mxu0 %v1051_v1  ;;  %1027 = vmatprep.subr.bf16.mxu1 %v1051_v1  ;;  %v1054_v4 = vld [vmem:[%s1650_s1 + $0x20] sm:$0xff]   ;;  %v1055_v6 = vld [vmem:[%s1650_s1 + $0x18] sm:$0xff]   ;;  %v1056_v7 = vld [vmem:[%s1650_s1 + $0x10] sm:$0xff]  }
   0xf   : > { %980 = vmatpush3.bf16.msra.mxu0 %v1051_v1  ;;  %1035 = vmatpush3.bf16.msra.mxu1 %v1051_v1  ;;  %v1057_v8 = vld [vmem:[%s1650_s1 + $0x8] sm:$0xff]   ;;  %v1058_v10 = vld [vmem:[%s1650_s1] sm:$0xff]  }
  0x10   : > { %s1747_s2 = smov (!%p208_p3, %s922_s2), 63  ;;  %981 = vmatprep.subr.bf16.mxu0 %v1052_v2  ;;  %1028 = vmatprep.subr.bf16.mxu1 %v1052_v2  ;;  %v1171_v39 = vld [vmem:[#allocation2] ss:$0 sm:$0xff] }
  0x11   : > { %s923_s25 = sshll.u32 %s1747_s2, 2  ;;  %s925_s13 = sshll.u32 %s1747_s2, 3 }
  0x12   : > { %s1136_s28 = scalar_lea.vmem %s1649_s0, %s923_s25  ;;  %s1349_s16 = scalar_lea.vmem %s1652_s3, %s925_s13 }
  0x13   : > { %982 = vmatpush3.bf16.msra.mxu0 %v1052_v2  ;;  %1036 = vmatpush3.bf16.msra.mxu1 %v1052_v2  ;;  %v1059_v5 = vld [vmem:[%s1136_s28] sm:$0xff]   ;;  %v1060_v11 = vld [vmem:[%s1136_s28 + $0x8] sm:$0xff]   ;;  %v1063_v13 = vld [vmem:[%s1136_s28 + $0x10] sm:$0xff]   ;;  %s1516_s20 = scalar_lea.vmem %s1653_s4, %s925_s13 }
  0x14   : > { %983 = vmatprep.subr.bf16.mxu0 %v1053_v3  ;;  %1029 = vmatprep.subr.bf16.mxu1 %v1053_v3  ;;  %v1061_v9 = vld [vmem:[%s1136_s28 + $0x40] sm:$0xff]   ;;  %v1062_v12 = vld [vmem:[%s1136_s28 + $0x48] sm:$0xff]   ;;  %v1065_v14 = vld [vmem:[%s1136_s28 + $0x50] sm:$0xff]  }
  0x15   : > { %995 = vmatprep.mubr.bf16.mxu0 %v1059_v5  ;;  %1011 = vmatprep.mubr.bf16.mxu1 %v1061_v9  ;;  %v1064_v15 = vld [vmem:[%s1136_s28 + $0x18] sm:$0xff]   ;;  %v1067_v17 = vld [vmem:[%s1136_s28 + $0x20] sm:$0xff]   ;;  %v1068_v19 = vld [vmem:[%s1136_s28 + $0x28] sm:$0xff]  }
  0x16   : > { %v1066_v16 = vld [vmem:[%s1136_s28 + $0x58] sm:$0xff]   ;;  %v1069_v18 = vld [vmem:[%s1136_s28 + $0x60] sm:$0xff]   ;;  %v1070_v20 = vld [vmem:[%s1136_s28 + $0x68] sm:$0xff]  }
  0x17   : > { %984 = vmatpush3.bf16.msra.mxu0 %v1053_v3  ;;  %1037 = vmatpush3.bf16.msra.mxu1 %v1053_v3  ;;  %v1071_v21 = vld [vmem:[%s1136_s28 + $0x30] sm:$0xff]   ;;  %v1072_v23 = vld [vmem:[%s1136_s28 + $0x38] sm:$0xff]  }
  0x18   : > { %985 = vmatprep.subr.bf16.mxu0 %v1054_v4  ;;  %1030 = vmatprep.subr.bf16.mxu1 %v1054_v4  ;;  %v1073_v22 = vld [vmem:[%s1136_s28 + $0x70] sm:$0xff]   ;;  %v1074_v24 = vld [vmem:[%s1136_s28 + $0x78] sm:$0xff]  }
  0x1b   : > { %986 = vmatpush3.bf16.msra.mxu0 %v1054_v4  ;;  %1038 = vmatpush3.bf16.msra.mxu1 %v1054_v4 }
  0x1c   : > { %987 = vmatprep.subr.bf16.mxu0 %v1055_v6  ;;  %1031 = vmatprep.subr.bf16.mxu1 %v1055_v6 }
  0x1f   : > { %988 = vmatpush3.bf16.msra.mxu0 %v1055_v6  ;;  %1039 = vmatpush3.bf16.msra.mxu1 %v1055_v6 }
  0x20   : > { %989 = vmatprep.subr.bf16.mxu0 %v1056_v7  ;;  %1032 = vmatprep.subr.bf16.mxu1 %v1056_v7 }
  0x23   : > { %990 = vmatpush3.bf16.msra.mxu0 %v1056_v7  ;;  %1040 = vmatpush3.bf16.msra.mxu1 %v1056_v7 }
  0x24   : > { %991 = vmatprep.subr.bf16.mxu0 %v1057_v8  ;;  %1033 = vmatprep.subr.bf16.mxu1 %v1057_v8 }
  0x27   : > { %992 = vmatpush3.bf16.msra.mxu0 %v1057_v8  ;;  %1041 = vmatpush3.bf16.msra.mxu1 %v1057_v8 }
  0x28   : > { %993 = vmatprep.subr.bf16.mxu0 %v1058_v10  ;;  %1034 = vmatprep.subr.bf16.mxu1 %v1058_v10 }
  0x2b   : > { %994 = vmatpush3.bf16.msra.mxu0 %v1058_v10  ;;  %1042 = vmatpush3.bf16.msra.mxu1 %v1058_v10 }
  0x2e   : > { %996 = vmatmul.mubr.bf16.vlgmr.msra.gmra.mxu0 %v1060_v11  ;;  %1012 = vmatmul.mubr.bf16.vlgmr.msra.gmra.mxu1 %v1062_v12 }
  0x2f   : > { %999 = vmatprep.mubr.bf16.mxu0 %v1063_v13  ;;  %1015 = vmatprep.mubr.bf16.mxu1 %v1065_v14 }
  0x36   : > { %1000 = vmatmul.mubr.bf16.gmra.mxu0 %v1064_v15  ;;  %1016 = vmatmul.mubr.bf16.gmra.mxu1 %v1066_v16 }
  0x37   : > { %1003 = vmatprep.mubr.bf16.mxu0 %v1067_v17  ;;  %1019 = vmatprep.mubr.bf16.mxu1 %v1069_v18 }
  0x3e   : > { %1004 = vmatmul.mubr.bf16.gmra.mxu0 %v1068_v19  ;;  %1020 = vmatmul.mubr.bf16.gmra.mxu1 %v1070_v20 }
  0x3f   : > { %1007 = vmatprep.mubr.bf16.mxu0 %v1071_v21  ;;  %1023 = vmatprep.mubr.bf16.mxu1 %v1073_v22 }
  0x46   : > { %1008 = vmatmul.mubr.bf16.gmra.mxu0 %v1072_v23  ;;  %1024 = vmatmul.mubr.bf16.gmra.mxu1 %v1074_v24 }
  0xee   : > { %v997_v25 = vpop.f32.mrf.mxu0  ;;  %v1013_v26 = vpop.f32.mrf.mxu1 }
  0xef   : > { %v1176_v42 = vadd.f32 %v997_v25, %v1171_v39  ;;  %v1181_v45 = vadd.f32 %v1013_v26, %v1171_v39 }
  0xf0   : > { %v459_v27 = vpop.f32.mrf.mxu0  ;;  %v523_v28 = vpop.f32.mrf.mxu1 }
  0xf1   : > { %v1187_v47 = vadd.f32 %v1171_v39, %v459_v27  ;;  %v1190_v48 = vadd.f32 %v1171_v39, %v523_v28  ;;  %v589_v53 = vsel %vm586_vm0, %v1176_v42, -inf  ;;  %v619_v58 = vsel %vm586_vm0, %v1181_v45, -inf }
  0xf2   : > { %v998_v29 = vpop.f32.mrf.mxu0  ;;  %v1014_v30 = vpop.f32.mrf.mxu1 }
  0xf3   : > { %v1203_v54 = vadd.f32 %v998_v29, %v1171_v39  ;;  %v1206_v55 = vadd.f32 %v1014_v30, %v1171_v39  ;;  %v587_v62 = vsel %vm586_vm0, %v1187_v47, -inf  ;;  %v615_v63 = vsel %vm586_vm0, %v1190_v48, -inf }
  0xf4   : > { %v462_v31 = vpop.f32.mrf.mxu0  ;;  %v526_v32 = vpop.f32.mrf.mxu1 }
  0xf5   : > { %v1223_v0 = vadd.f32 %v1171_v39, %v462_v31  ;;  %v1226_v1 = vadd.f32 %v1171_v39, %v526_v32  ;;  %v590_v8 = vsel %vm586_vm0, %v1203_v54, -inf  ;;  %v621_v9 = vsel %vm586_vm0, %v1206_v55, -inf }
  0xf6   : > { %v1001_v33 = vpop.f32.mrf.mxu0  ;;  %v1017_v34 = vpop.f32.mrf.mxu1 }
  0xf7   : > { %v1184_v46 = vadd.f32 %v1001_v33, %v1171_v39  ;;  %v1243_v11 = vadd.f32 %v1017_v34, %v1171_v39  ;;  %v588_v18 = vsel %vm586_vm0, %v1223_v0, -inf  ;;  %v617_v19 = vsel %vm586_vm0, %v1226_v1, -inf }
  0xf8   : > { %v475_v35 = vpop.f32.mrf.mxu0  ;;  %v539_v36 = vpop.f32.mrf.mxu1 }
  0xf9   : > { %v1195_v51 = vadd.f32 %v1171_v39, %v475_v35  ;;  %v595_v59 = vsel %vm586_vm0, %v1184_v46, -inf  ;;  %v627_v28 = vsel %vm586_vm0, %v1243_v11, -inf  ;;  %v1271_v33 = vadd.f32 %v1171_v39, %v539_v36 }
  0xfa   : > { %v1002_v37 = vpop.f32.mrf.mxu0  ;;  %v1169_v38 = vpop.f32.mrf.mxu1  ;;  %v596_v10 = vmax.f32 %v589_v53, %v595_v59 }
  0xfb   : > { %v1213_v60 = vadd.f32 %v1002_v37, %v1171_v39  ;;  %v591_v4 = vsel %vm586_vm0, %v1195_v51, -inf }
  0xfc   : > { %v478_v40 = vpop.f32.mrf.mxu0  ;;  %v1173_v41 = vpop.f32.mrf.mxu1  ;;  %v592_v20 = vmax.f32 %v587_v62, %v591_v4  ;;  %v1282_v62 = vadd.f32 %v1169_v38, %v1171_v39  ;;  %v623_v38 = vsel %vm586_vm0, %v1271_v33, -inf }
  0xfd   : > { %v1231_v5 = vadd.f32 %v1171_v39, %v478_v40  ;;  %v597_v14 = vsel %vm586_vm0, %v1213_v60, -inf  ;;  %v1286_v36 = vadd.f32 %v1171_v39, %v1173_v41 }
  0xfe   : > { %v1005_v43 = vpop.f32.mrf.mxu0  ;;  %v1178_v44 = vpop.f32.mrf.mxu1  ;;  %v598_v29 = vmax.f32 %v590_v8, %v597_v14 }
  0xff   : > { %v1198_v52 = vadd.f32 %v1005_v43, %v1171_v39  ;;  %v593_v24 = vsel %vm586_vm0, %v1231_v5, -inf }
 0x100   : > { %v491_v49 = vpop.f32.mrf.mxu0  ;;  %v1192_v50 = vpop.f32.mrf.mxu1  ;;  %v594_v40 = vmax.f32 %v588_v18, %v593_v24  ;;  %v625_v24 = vsel %vm586_vm0, %v1286_v36, -inf }
 0x101   : > { %v1216_v61 = vadd.f32 %v1171_v39, %v491_v49  ;;  %v603_v6 = vsel %vm586_vm0, %v1198_v52, -inf  ;;  %v1301_v41 = vadd.f32 %v1171_v39, %v1192_v50 }
 0x102   : > { %v1006_v56 = vpop.f32.mrf.mxu0  ;;  %v1022_v57 = vpop.f32.mrf.mxu1  ;;  %v604_v21 = vmax.f32 %v596_v10, %v603_v6 }
 0x103   : > { %v1236_v7 = vadd.f32 %v1006_v56, %v1171_v39  ;;  %v599_v15 = vsel %vm586_vm0, %v1216_v61, -inf }
 0x104   : > { %v494_v2 = vpop.f32.mrf.mxu0  ;;  %v558_v3 = vpop.f32.mrf.mxu1  ;;  %v600_v30 = vmax.f32 %v592_v20, %v599_v15 }
 0x105   : > { %v1250_v16 = vadd.f32 %v1171_v39, %v494_v2  ;;  %v605_v25 = vsel %vm586_vm0, %v1236_v7, -inf }
 0x106   : > { %v1009_v12 = vpop.f32.mrf.mxu0  ;;  %v1025_v13 = vpop.f32.mrf.mxu1  ;;  %v606_v43 = vmax.f32 %v598_v29, %v605_v25 }
 0x107   : > { %v1253_v17 = vadd.f32 %v1009_v12, %v1171_v39  ;;  %v601_v34 = vsel %vm586_vm0, %v1250_v16, -inf  ;;  %v1304_v12 = vadd.f32 %v1022_v57, %v1171_v39  ;;  %v1314_v50 = vadd.f32 %v1025_v13, %v1171_v39 }
 0x108   : > { %v507_v22 = vpop.f32.mrf.mxu0  ;;  %v571_v23 = vpop.f32.mrf.mxu1  ;;  %v602_v6 = vmax.f32 %v594_v40, %v601_v34 }
 0x109   : > { %v611_v26 = vsel %vm586_vm0, %v1253_v17, -inf  ;;  %v1266_v27 = vadd.f32 %v1171_v39, %v507_v22  ;;  %v1311_v22 = vadd.f32 %v1171_v39, %v558_v3  ;;  %v637_v3 = vsel %vm586_vm0, %v1304_v12, -inf }
 0x10a   : > { %v612_v31 = vmax.f32 %v604_v21, %v611_v26  ;;  %v1010_v32 = vpop.f32.mrf.mxu0  ;;  %v1026_v59 = vpop.f32.mrf.mxu1  ;;  %v1328_v13 = vadd.f32 %v1171_v39, %v571_v23 }
 0x10b   : > { %v607_v35 = vsel %vm586_vm0, %v1266_v27, -inf  ;;  %v1278_v37 = vadd.f32 %v1010_v32, %v1171_v39  ;;  %v1317_v57 = vadd.f32 %v1026_v59, %v1171_v39 }
 0x10c   : > { %v620_v49 = vmax.f32 %v612_v31, %v619_v58  ;;  %v608_v53 = vmax.f32 %v600_v30, %v607_v35  ;;  %v510_v56 = vpop.f32.mrf.mxu0  ;;  %v1295_v58 = vadd.f32 %v1178_v44, %v1171_v39  ;;  %v574_v21 = vpop.f32.mrf.mxu1  ;;  %v643_v35 = vsel %vm586_vm0, %v1314_v50, -inf }
 0x10d   : > { %v613_v2 = vsel %vm586_vm0, %v1278_v37, -inf  ;;  %v1291_v4 = vadd.f32 %v1171_v39, %v510_v56  ;;  %v1331_v29 = vadd.f32 %v1171_v39, %v574_v21  ;;  %v645_v40 = vsel %vm586_vm0, %v1317_v57, -inf  ;;  %v1364_v21 = vld [vmem:[%s1349_s16 + $0x20] sm:$0xff] }
 0x10e   : > { %v616_v8 = vmax.f32 %v608_v53, %v615_v63  ;;  %v614_v10 = vmax.f32 %v606_v43, %v613_v2  ;;  %v628_v15 = vmax.f32 %v620_v49, %v627_v28  ;;  %v629_v63 = vsel %vm586_vm0, %v1282_v62, -inf }
 0x10f   : > { %v609_v14 = vsel %vm586_vm0, %v1291_v4, -inf  ;;  %v631_v28 = vsel %vm586_vm0, %v1301_v41, -inf  ;;  %v639_v39 = vsel %vm586_vm0, %v1328_v13, -inf  ;;  %v641_v49 = vsel %vm586_vm0, %v1331_v29, -inf }
 0x110   : > { %v622_v18 = vmax.f32 %v614_v10, %v621_v9  ;;  %v624_v44 = vmax.f32 %v616_v8, %v623_v38  ;;  %v610_v20 = vmax.f32 %v602_v6, %v609_v14  ;;  %v635_v9 = vsel %vm586_vm0, %v1295_v58, -inf  ;;  %v1352_v14 = vld [vmem:[%s1349_s16] sm:$0xff] }
 0x111   : > { %v636_v30 = vmax.f32 %v628_v15, %v635_v9  ;;  %v1355_v15 = vld [vmem:[%s1349_s16 + $0x8] sm:$0xff]  ;;  %v1373_v9 = vld [vmem:[%s1349_s16 + $0x38] sm:$0xff] }
 0x112   : > { %v618_v25 = vmax.f32 %v610_v20, %v617_v19  ;;  %v630_v26 = vmax.f32 %v622_v18, %v629_v63  ;;  %v632_v31 = vmax.f32 %v624_v44, %v631_v28  ;;  %v633_v19 = vsel %vm586_vm0, %v1311_v22, -inf  ;;  %v1358_v44 = vld [vmem:[%s1349_s16 + $0x10] sm:$0xff]  ;;  %v1361_v20 = vld [vmem:[%s1349_s16 + $0x18] sm:$0xff]  ;;  %v1367_v63 = vld [vmem:[%s1349_s16 + $0x28] sm:$0xff]  ;;  %1675 = vst [vmem:[#allocation4_spill] sm:$0xff] %v1373_v9 }
 0x113   : > { %v644_v53 = vmax.f32 %v636_v30, %v643_v35  ;;  %v1379_v28 = vld [vmem:[%s1349_s16 + $0x48] sm:$0xff]  ;;  %v1385_v30 = vld [vmem:[%s1349_s16 + $0x58] sm:$0xff]  ;;  %v676_v9 = vmax.f32 %v1206_v55, 0.0  ;;  %v667_v55 = vmax.f32 %v1198_v52, 0.0  ;;  %v687_v52 = vmax.f32 %v1314_v50, 0.0 }
 0x114   : > { %v638_v32 = vmax.f32 %v630_v26, %v637_v3  ;;  %v626_v34 = vmax.f32 %v618_v25, %v625_v24  ;;  %v640_v56 = vmax.f32 %v632_v31, %v639_v39  ;;  %v1370_v24 = vld [vmem:[%s1349_s16 + $0x30] sm:$0xff]  ;;  %v1376_v26 = vld [vmem:[%s1349_s16 + $0x40] sm:$0xff]  ;;  %1677 = vst [vmem:[#allocation6_spill] sm:$0xff] %v1379_v28 }
 0x115   : > { %1674 = vst [vmem:[#allocation3_spill] sm:$0xff] %v1370_v24  ;;  %1676 = vst [vmem:[#allocation5_spill] sm:$0xff] %v1376_v26  ;;  %v1382_v3 = vld [vmem:[%s1349_s16 + $0x50] sm:$0xff]  ;;  %v1388_v31 = vld [vmem:[%s1349_s16 + $0x60] sm:$0xff]  ;;  %v657_v26 = vmax.f32 %v1187_v47, 0.0  ;;  %v677_v47 = vmax.f32 %v1271_v33, 0.0 }
 0x116   : > { %v646_v23 = vmax.f32 %v638_v32, %v645_v40  ;;  %v634_v43 = vmax.f32 %v626_v34, %v633_v19  ;;  %1678 = vst [vmem:[#allocation7_spill] sm:$0xff] %v1382_v3  ;;  %1679 = vst [vmem:[#allocation8_spill] sm:$0xff] %v1388_v31  ;;  %v1391_v32 = vld [vmem:[%s1349_s16 + $0x68] sm:$0xff]  ;;  %v1396_v40 = vld [vmem:[%s1349_s16 + $0x70] sm:$0xff]  ;;  %v659_v3 = vmax.f32 %v1176_v42, 0.0  ;;  %v660_v34 = vmax.f32 %v1203_v54, 0.0 }
 0x117   : > { %1680 = vst [vmem:[#allocation9_spill] sm:$0xff] %v1391_v32  ;;  %v1444_v39 = vld [vmem:[%s1349_s16 + $0xd0] sm:$0xff]  ;;  %v1447_v19 = vld [vmem:[%s1349_s16 + $0xd8] sm:$0xff]  ;;  %v1450_v28 = vld [vmem:[%s1349_s16 + $0xe0] sm:$0xff]  ;;  %v663_v31 = vmax.f32 %v1184_v46, 0.0  ;;  %v679_v42 = vmax.f32 %v1243_v11, 0.0 }
 0x118   : > { %v642_v59 = vmax.f32 %v634_v43, %v641_v49  ;;  %v648_v2 = vmax.f32 %v644_v53, %v646_v23  ;;  %v1399_v23 = vld [vmem:[%s1349_s16 + $0x78] sm:$0xff]  ;;  %v1402_v43 = vld [vmem:[%s1349_s16 + $0x80] sm:$0xff]  ;;  %v1423_v53 = vld [vmem:[%s1349_s16 + $0xa8] sm:$0xff]  ;;  %1688 = vst [vmem:[#allocation17_spill] sm:$0xff] %v1444_v39  ;;  %v680_v54 = vmax.f32 %v1282_v62, 0.0  ;;  %v683_v46 = vmax.f32 %v1295_v58, 0.0 }
 0x119   : > { %1681 = vst [vmem:[#allocation10_spill] sm:$0xff] %v1399_v23  ;;  %1682 = vst [vmem:[#allocation11_spill] sm:$0xff] %v1402_v43  ;;  %v1426_v49 = vld [vmem:[%s1349_s16 + $0xb0] sm:$0xff]  ;;  %v1465_v32 = vld [vmem:[%s1349_s16 + $0xe8] sm:$0xff]  ;;  %v675_v43 = vmax.f32 %v1181_v45, 0.0  ;;  %v673_v23 = vmax.f32 %v1190_v48, 0.0 }
 0x11a   : > { %v647_v6 = vmax.f32 %v640_v56, %v642_v59  ;;  %v1408_v56 = vld [vmem:[%s1349_s16 + $0x88] sm:$0xff]  ;;  %v1411_v59 = vld [vmem:[%s1349_s16 + $0x90] sm:$0xff]  ;;  %1684 = vst [vmem:[#allocation13_spill] sm:$0xff] %v1426_v49  ;;  %1689 = vst [vmem:[#allocation18_spill] sm:$0xff] %v1447_v19  ;;  %v664_v45 = vmax.f32 %v1213_v60, 0.0  ;;  %v662_v48 = vmax.f32 %v1231_v5, 0.0 }
 0x11b   : > { %1690 = vst [vmem:[#allocation19_spill] sm:$0xff] %v1450_v28  ;;  %v1456_v24 = vld [vmem:[%s1349_s16 + $0xf0] sm:$0xff]  ;;  %1693 = vst [vmem:[#allocation22_spill] sm:$0xff] %v1465_v32  ;;  %v668_v11 = vmax.f32 %v1236_v7, 0.0  ;;  %v666_v33 = vmax.f32 %v1250_v16, 0.0  ;;  %v684_v60 = vmax.f32 %v1304_v12, 0.0 }
 0x11c   : > { %v649_v8 = vmax.f32 %v647_v6, %v648_v2  ;;  %v1414_v2 = vld [vmem:[%s1349_s16 + $0x98] sm:$0xff]  ;;  %1691 = vst [vmem:[#allocation20_spill] sm:$0xff] %v1456_v24  ;;  %v682_v5 = vmax.f32 %v1311_v22, 0.0  ;;  %v671_v62 = vmax.f32 %v1253_v17, 0.0  ;;  %v672_v58 = vmax.f32 %v1278_v37, 0.0 }
 0x11d   : > { %1683 = vst [vmem:[#allocation12_spill] sm:$0xff] %v1414_v2  ;;  %v1432_v6 = vld [vmem:[%s1349_s16 + $0xb8] sm:$0xff]  ;;  %v674_v2 = vmax.f32 %v1226_v1, 0.0  ;;  %v665_v1 = vmax.f32 %v1216_v61, 0.0  ;;  %v685_v61 = vmax.f32 %v1328_v13, 0.0  ;;  %v688_v7 = vmax.f32 %v1317_v57, 0.0 }
 0x11e   : > { %v650_v10 = vrot.slane %v649_v8, 4  ;;  %1685 = vst [vmem:[#allocation14_spill] sm:$0xff] %v1432_v6  ;;  %v686_v16 = vmax.f32 %v1331_v29, 0.0 }
 0x120   : > { %v651_v38 = vmax.f32 %v649_v8, %v650_v10  ;;  %v1435_v10 = vld [vmem:[%s1349_s16 + $0xc0] sm:$0xff]  ;;  %v661_v8 = vmax.f32 %v1195_v51, 0.0  ;;  %v681_v51 = vmax.f32 %v1301_v41, 0.0  ;;  %v670_v41 = vmax.f32 %v1291_v4, 0.0 }
 0x121   : > { %1686 = vst [vmem:[#allocation15_spill] sm:$0xff] %v1435_v10 }
 0x122   : > { %v652_v18 = vrot.slane %v651_v38, 2 }
 0x124   : > { %v653_v25 = vmax.f32 %v651_v38, %v652_v18  ;;  %v1420_v18 = vld [vmem:[%s1349_s16 + $0xa0] sm:$0xff] }
 0x126   : > { %v654_v35 = vrot.slane %v653_v25, 1 }
 0x128   : > { %v655_v38 = vmax.f32 %v653_v25, %v654_v35  ;;  %v1438_v25 = vld [vmem:[%s1349_s16 + $0xc8] sm:$0xff]  ;;  %v1459_v35 = vld [vmem:[%s1349_s16 + $0xf8] sm:$0xff] }
 0x129   : > { %1687 = vst [vmem:[#allocation16_spill] sm:$0xff] %v1438_v25  ;;  %1692 = vst [vmem:[#allocation21_spill] sm:$0xff] %v1459_v35 }
 0x12a   : > { %1075 = vrcp.f32 %v655_v38  ;;  %v658_v38 = vmax.f32 %v1223_v0, 0.0  ;;  %v678_v0 = vmax.f32 %v1286_v36, 0.0  ;;  %v669_v36 = vmax.f32 %v1266_v27, 0.0 }
 0x137   : > { %v1076_v35 = vpop.eup %1075 }
 0x138   : > { %v689_v12 = vmul.f32 %v1076_v35, %v657_v26  ;;  %v690_v24 = vmul.f32 %v1076_v35, %v658_v38  ;;  %v691_v22 = vmul.f32 %v1076_v35, %v659_v3  ;;  %v692_v32 = vmul.f32 %v1076_v35, %v660_v34 }
 0x139   : > { %v693_v17 = vmul.f32 %v1076_v35, %v661_v8  ;;  %v694_v28 = vmul.f32 %v1076_v35, %v662_v48  ;;  %v695_v27 = vmul.f32 %v1076_v35, %v663_v31  ;;  %v696_v19 = vmul.f32 %v1076_v35, %v664_v45 }
 0x13a   : > { %v697_v50 = vmul.f32 %v1076_v35, %v665_v1  ;;  %v698_v39 = vmul.f32 %v1076_v35, %v666_v33  ;;  %v699_v13 = vmul.f32 %v1076_v35, %v667_v55  ;;  %v700_v25 = vmul.f32 %v1076_v35, %v668_v11 }
 0x13b   : > { %v701_v10 = vmul.f32 %v1076_v35, %v669_v36  ;;  %v702_v37 = vmul.f32 %v1076_v35, %v670_v41  ;;  %v703_v4 = vmul.f32 %v1076_v35, %v671_v62  ;;  %v704_v6 = vmul.f32 %v1076_v35, %v672_v58  ;;  %v1700_v62 = vld [vmem:[#allocation3_spill] sm:$0xff] }
 0x13c   : > { %v705_v57 = vmul.f32 %v1076_v35, %v673_v23  ;;  %v706_v49 = vmul.f32 %v1076_v35, %v674_v2  ;;  %v707_v29 = vmul.f32 %v1076_v35, %v675_v43  ;;  %v708_v26 = vmul.f32 %v1076_v35, %v676_v9  ;;  %v1708_v41 = vld [vmem:[#allocation7_spill] sm:$0xff] }
 0x13d   : > { %v709_v38 = vmul.f32 %v1076_v35, %v677_v47  ;;  %v710_v3 = vmul.f32 %v1076_v35, %v678_v0  ;;  %v711_v34 = vmul.f32 %v1076_v35, %v679_v42  ;;  %v712_v8 = vmul.f32 %v1076_v35, %v680_v54 }
 0x13e   : > { %v713_v48 = vmul.f32 %v1076_v35, %v681_v51  ;;  %v714_v31 = vmul.f32 %v1076_v35, %v682_v5  ;;  %v715_v45 = vmul.f32 %v1076_v35, %v683_v46  ;;  %v716_v1 = vmul.f32 %v1076_v35, %v684_v60 }
 0x13f   : > { %v717_v55 = vmul.f32 %v1076_v35, %v685_v61  ;;  %v718_v23 = vmul.f32 %v1076_v35, %v686_v16  ;;  %v719_v43 = vmul.f32 %v1076_v35, %v687_v52  ;;  %v720_v9 = vmul.f32 %v1076_v35, %v688_v7  ;;  %v1702_v52 = vld [vmem:[#allocation4_spill] sm:$0xff] }
 0x140   : > { %v1694_v2 = vsub.f32 1.0, %v1352_v14  ;;  %v1695_v47 = vsub.f32 1.0, %v1355_v15  ;;  %v1696_v0 = vsub.f32 1.0, %v1358_v44  ;;  %v1697_v51 = vsub.f32 1.0, %v1361_v20  ;;  %v1704_v44 = vld [vmem:[#allocation5_spill] sm:$0xff] }
 0x141   : > { %v1698_v33 = vsub.f32 1.0, %v1364_v21  ;;  %v1699_v5 = vsub.f32 1.0, %v1367_v63  ;;  %v1701_v14 = vsub.f32 1.0, %v1700_v62  ;;  %v1703_v15 = vsub.f32 1.0, %v1702_v52 }
 0x142   : > { %v785_v42 = vmul.f32 %v1694_v2, %v689_v12  ;;  %v786_v54 = vmul.f32 %v1695_v47, %v690_v24  ;;  %v787_v46 = vmul.f32 %v1696_v0, %v691_v22  ;;  %v788_v11 = vmul.f32 %v1697_v51, %v692_v32  ;;  %v1706_v32 = vld [vmem:[#allocation6_spill] sm:$0xff]  ;;  %v1713_v22 = vld [vmem:[#allocation9_spill] sm:$0xff] }
 0x143   : > { %v789_v60 = vmul.f32 %v1698_v33, %v693_v17  ;;  %v790_v35 = vmul.f32 %v1699_v5, %v694_v28  ;;  %v791_v36 = vmul.f32 %v1701_v14, %v695_v27  ;;  %v792_v24 = vmul.f32 %v1703_v15, %v696_v19  ;;  %v1711_v19 = vld [vmem:[#allocation8_spill] sm:$0xff]  ;;  %v1736_v14 = vld [vmem:[#allocation18_spill] sm:$0xff] }
 0x144   : > { %v1705_v61 = vsub.f32 1.0, %v1704_v44  ;;  %v1707_v58 = vsub.f32 1.0, %v1706_v32  ;;  %v1709_v7 = vsub.f32 1.0, %v1708_v41  ;;  %v1710_v28 = vsub.f32 1.0, %v1385_v30  ;;  %817 = vst.msk [vmem:[%s1516_s20] sm:$0xff] %vm586_vm0, %v785_v42  ;;  %818 = vst.msk [vmem:[%s1516_s20 + $0x8] sm:$0xff] %vm586_vm0, %v786_v54 }
 0x145   : > { %819 = vst.msk [vmem:[%s1516_s20 + $0x10] sm:$0xff] %vm586_vm0, %v787_v46  ;;  %820 = vst.msk [vmem:[%s1516_s20 + $0x18] sm:$0xff] %vm586_vm0, %v788_v11  ;;  %v1712_v12 = vsub.f32 1.0, %v1711_v19  ;;  %v1714_v17 = vsub.f32 1.0, %v1713_v22  ;;  %v1715_v30 = vsub.f32 1.0, %v1396_v40  ;;  %v1720_v40 = vsub.f32 1.0, %v1408_v56 }
 0x146   : > { %v793_v20 = vmul.f32 %v1705_v61, %v697_v50  ;;  %v794_v21 = vmul.f32 %v1707_v58, %v698_v39  ;;  %v795_v63 = vmul.f32 %v1709_v7, %v699_v13  ;;  %v796_v16 = vmul.f32 %v1710_v28, %v700_v25  ;;  %v1716_v50 = vld [vmem:[#allocation10_spill] sm:$0xff]  ;;  %821 = vst.msk [vmem:[%s1516_s20 + $0x20] sm:$0xff] %vm586_vm0, %v789_v60  ;;  %v1722_v54 = vld [vmem:[#allocation12_spill] sm:$0xff]  ;;  %v1744_v32 = vld [vmem:[#allocation21_spill] sm:$0xff] }
 0x147   : > { %v797_v39 = vmul.f32 %v1712_v12, %v701_v10  ;;  %v798_v27 = vmul.f32 %v1714_v17, %v702_v37  ;;  %v799_v25 = vmul.f32 %v1715_v30, %v703_v4  ;;  %v1717_v13 = vsub.f32 1.0, %v1716_v50  ;;  %822 = vst.msk [vmem:[%s1516_s20 + $0x28] sm:$0xff] %vm586_vm0, %v790_v35  ;;  %823 = vst.msk [vmem:[%s1516_s20 + $0x30] sm:$0xff] %vm586_vm0, %v791_v36  ;;  %v1718_v10 = vld [vmem:[#allocation11_spill] sm:$0xff]  ;;  %v1728_v11 = vld [vmem:[#allocation14_spill] sm:$0xff] }
 0x148   : > { %824 = vst.msk [vmem:[%s1516_s20 + $0x38] sm:$0xff] %vm586_vm0, %v792_v24  ;;  %v1719_v42 = vsub.f32 1.0, %v1718_v10  ;;  %v802_v4 = vmul.f32 %v1720_v40, %v706_v49  ;;  %v1723_v0 = vsub.f32 1.0, %v1722_v54  ;;  %825 = vst.msk [vmem:[%s1516_s20 + $0x40] sm:$0xff] %vm586_vm0, %v793_v20  ;;  %v1724_v56 = vsub.f32 1.0, %v1420_v18  ;;  %v1730_v18 = vld [vmem:[#allocation15_spill] sm:$0xff] }
 0x149   : > { %v800_v2 = vmul.f32 %v1717_v13, %v704_v6  ;;  %v1721_v6 = vsub.f32 1.0, %v1411_v59  ;;  %826 = vst.msk [vmem:[%s1516_s20 + $0x48] sm:$0xff] %vm586_vm0, %v794_v21  ;;  %827 = vst.msk [vmem:[%s1516_s20 + $0x50] sm:$0xff] %vm586_vm0, %v795_v63  ;;  %v1725_v59 = vsub.f32 1.0, %v1423_v53  ;;  %v1729_v33 = vsub.f32 1.0, %v1728_v11  ;;  %v1740_v15 = vld [vmem:[#allocation22_spill] sm:$0xff] }
 0x14a   : > { %v801_v37 = vmul.f32 %v1719_v42, %v705_v57  ;;  %v804_v46 = vmul.f32 %v1723_v0, %v708_v26  ;;  %828 = vst.msk [vmem:[%s1516_s20 + $0x58] sm:$0xff] %vm586_vm0, %v796_v16  ;;  %v805_v49 = vmul.f32 %v1724_v56, %v709_v38  ;;  %829 = vst.msk [vmem:[%s1516_s20 + $0x60] sm:$0xff] %vm586_vm0, %v797_v39  ;;  %v1731_v53 = vsub.f32 1.0, %v1730_v18 }
 0x14b   : > { %v803_v47 = vmul.f32 %v1721_v6, %v707_v29  ;;  %v806_v57 = vmul.f32 %v1725_v59, %v710_v3  ;;  %v1726_v29 = vld [vmem:[#allocation13_spill] sm:$0xff]  ;;  %v808_v60 = vmul.f32 %v1729_v33, %v712_v8  ;;  %830 = vst.msk [vmem:[%s1516_s20 + $0x68] sm:$0xff] %vm586_vm0, %v798_v27  ;;  %831 = vst.msk [vmem:[%s1516_s20 + $0x70] sm:$0xff] %vm586_vm0, %v799_v25  ;;  %v1732_v3 = vld [vmem:[#allocation16_spill] sm:$0xff]  ;;  %v1737_v36 = vsub.f32 1.0, %v1736_v14 }
 0x14c   : > { %v1727_v26 = vsub.f32 1.0, %v1726_v29  ;;  %832 = vst.msk [vmem:[%s1516_s20 + $0x78] sm:$0xff] %vm586_vm0, %v800_v2  ;;  %v809_v38 = vmul.f32 %v1731_v53, %v713_v48  ;;  %v1734_v8 = vld [vmem:[#allocation17_spill] sm:$0xff]  ;;  %833 = vst.msk [vmem:[%s1516_s20 + $0x80] sm:$0xff] %vm586_vm0, %v801_v37  ;;  %v1738_v48 = vld [vmem:[#allocation19_spill] sm:$0xff]  ;;  %v1741_v24 = vsub.f32 1.0, %v1740_v15 }
 0x14d   : > { %v1735_v35 = vsub.f32 1.0, %v1734_v8  ;;  %v812_v52 = vmul.f32 %v1737_v36, %v716_v1  ;;  %834 = vst.msk [vmem:[%s1516_s20 + $0x88] sm:$0xff] %vm586_vm0, %v802_v4  ;;  %835 = vst.msk [vmem:[%s1516_s20 + $0x90] sm:$0xff] %vm586_vm0, %v803_v47  ;;  %v1742_v1 = vld [vmem:[#allocation20_spill] sm:$0xff]  ;;  %v1745_v58 = vsub.f32 1.0, %v1744_v32 }
 0x14e   : > { %v807_v51 = vmul.f32 %v1727_v26, %v711_v34  ;;  %v1733_v34 = vsub.f32 1.0, %v1732_v3  ;;  %836 = vst.msk [vmem:[%s1516_s20 + $0x98] sm:$0xff] %vm586_vm0, %v804_v46  ;;  %v814_v44 = vmul.f32 %v1741_v24, %v718_v23  ;;  %v1743_v61 = vsub.f32 1.0, %v1742_v1  ;;  %837 = vst.msk [vmem:[%s1516_s20 + $0xa0] sm:$0xff] %vm586_vm0, %v805_v49 }
 0x14f   : > { %v811_v62 = vmul.f32 %v1735_v35, %v715_v45  ;;  %v816_v21 = vmul.f32 %v1745_v58, %v720_v9  ;;  %838 = vst.msk [vmem:[%s1516_s20 + $0xa8] sm:$0xff] %vm586_vm0, %v806_v57  ;;  %840 = vst.msk [vmem:[%s1516_s20 + $0xb8] sm:$0xff] %vm586_vm0, %v808_v60 }
 0x150   : > { %v810_v5 = vmul.f32 %v1733_v34, %v714_v31  ;;  %v1739_v31 = vsub.f32 1.0, %v1738_v48  ;;  %v815_v20 = vmul.f32 %v1743_v61, %v719_v43  ;;  %839 = vst.msk [vmem:[%s1516_s20 + $0xb0] sm:$0xff] %vm586_vm0, %v807_v51  ;;  %841 = vst.msk [vmem:[%s1516_s20 + $0xc0] sm:$0xff] %vm586_vm0, %v809_v38 }
 0x151   : > { %843 = vst.msk [vmem:[%s1516_s20 + $0xd0] sm:$0xff] %vm586_vm0, %v811_v62  ;;  %844 = vst.msk [vmem:[%s1516_s20 + $0xd8] sm:$0xff] %vm586_vm0, %v812_v52 }
 0x152   : > { %v813_v45 = vmul.f32 %v1739_v31, %v717_v55  ;;  %842 = vst.msk [vmem:[%s1516_s20 + $0xc8] sm:$0xff] %vm586_vm0, %v810_v5  ;;  %846 = vst.msk [vmem:[%s1516_s20 + $0xe8] sm:$0xff] %vm586_vm0, %v814_v44 }
 0x153   : > { %847 = vst.msk [vmem:[%s1516_s20 + $0xf0] sm:$0xff] %vm586_vm0, %v815_v20  ;;  %848 = vst.msk [vmem:[%s1516_s20 + $0xf8] sm:$0xff] %vm586_vm0, %v816_v21 }
 0x154   : > { %845 = vst.msk [vmem:[%s1516_s20 + $0xe0] sm:$0xff] %vm586_vm0, %v813_v45 }
 0x155 PF: > { %s16_s17 = sadd.s32 1, %s1083_s17  }
 0x156   : > { %p13_p4 = scmp.ge.s32.totalorder %s16_s17, 4  }
 0x158   :  { %15 = sbr.rel (!%p13_p4) target bundleno = 3 (0x3), region = 69 }

</bundles_post_ra>
